<compile_context>
chip_gen: v6e
topology: v6e:2x2x1
jax: 0.10.0
libtpu: 0.0.40
codegen_flags: <defaults>
</compile_context>

<pallas_src>
import math

import jax
import jax.numpy as jnp
import numpy as np
from jax.experimental import pallas as pl
from jax.experimental.pallas import tpu as pltpu

_STD_ORDER = ("wq", "wk", "wv", "wo", "wd", "ln1g", "ln1b",
              "w1", "b1", "w2", "b2", "ln2g", "ln2b")
_ATTN_ORDER = ("wq", "wk", "wv", "wo", "ln1g", "ln1b",
               "w1", "b1", "w2", "b2", "ln2g", "ln2b")


# ----------------------------------------------------------------------------------
# Shared math — used both inside the Pallas kernel (weights as VMEM Refs) and by the
# vmapped pure-JAX reference (weights as arrays).  Weight containers only need to
# support `obj[l]` / `obj[...]`, which both Pallas Refs and jnp arrays do, so weight
# loads happen lazily right where each layer consumes them.
# ----------------------------------------------------------------------------------
def _layernorm(x, g, b):
    mu = jnp.mean(x, axis=-1, keepdims=True)
    var = jnp.mean(jnp.square(x - mu), axis=-1, keepdims=True)
    return (x - mu) * jax.lax.rsqrt(var + 1e-5) * g + b


def _encoder_block(x, key_mask, p, cond=None):
    """Post-LN transformer block.

    x        : (G*S, H)   G independent length-S sequences, rows flattened row-major
    key_mask : (G, 1, S)  1.0 = valid key token
    cond     : (G, C)     optional per-sequence conditioning vector
    """
    m, h = x.shape
    g, _, s = key_mask.shape

    # One batched MXU matmul per projection over all G*S rows.
    q = jnp.dot(x, p["wq"], preferred_element_type=jnp.float32)
    k = jnp.dot(x, p["wk"], preferred_element_type=jnp.float32)
    v = jnp.dot(x, p["wv"], preferred_element_type=jnp.float32)
    qb, kb, vb = (t.reshape(g, s, h) for t in (q, k, v))

    # q·kᵀ contracting last dims (no materialized transpose), batched over G.
    scores = jnp.einsum("gqd,gkd->gqk", qb, kb,
                        preferred_element_type=jnp.float32) * (1.0 / math.sqrt(h))
    scores = jnp.where(key_mask > 0.0, scores, jnp.float32(-1e9))
    scores = scores - jnp.max(scores, axis=-1, keepdims=True)
    e = jnp.exp(scores)
    inv = 1.0 / jnp.sum(e, axis=-1, keepdims=True)     # single reciprocal per row
    attn = e * inv

    ctx = jnp.einsum("gqk,gkd->gqd", attn, vb,
                     preferred_element_type=jnp.float32).reshape(m, h)
    ctx = jnp.dot(ctx, p["wo"], preferred_element_type=jnp.float32)

    hres = _layernorm(x + ctx, p["ln1g"], p["ln1b"])
    if cond is not None:
        hc = jnp.dot(cond, p["wd"], preferred_element_type=jnp.float32)   # (G, H)
        hres = (hres.reshape(g, s, h) + hc[:, None, :]).reshape(m, h)

    ff = jnp.maximum(jnp.dot(hres, p["w1"], preferred_element_type=jnp.float32) + p["b1"], 0.0)
    ff = jnp.dot(ff, p["w2"], preferred_element_type=jnp.float32) + p["b2"]
    return _layernorm(hres + ff, p["ln2g"], p["ln2b"])


def _forward_one_batch(ke, ds, km_keys, km_tok, dm_keys, dm_col,
                       w_in, enc_w, cross_w, dec_w, n_enc, n_cross, n_dec):
    """Full CrossAttentionKernelEncoder forward for ONE batch element.

    ke       : (max_dim, max_len, input_dim)
    ds       : (max_dim, ds_dim)
    km_keys  : (max_dim, 1, max_len)   kernel mask (key layout)
    km_tok   : (max_dim*max_len, 1)    kernel mask (token layout)
    dm_keys  : (1, 1, max_dim)         dim mask (key layout)
    dm_col   : (max_dim, 1)            dim mask (column layout)
    w_in / enc_w / cross_w / dec_w : Refs or arrays (stacked per layer kind)
    returns  : (max_dim, max_len, hidden)
    """
    max_dim, max_len, input_dim = ke.shape
    hidden = w_in.shape[-1]
    m = max_dim * max_len

    # Input projection (Linear, no bias), batched over every row of the batch element.
    x = jnp.dot(ke.reshape(m, input_dim), w_in[...], preferred_element_type=jnp.float32)

    # Encoder layers, conditioned on the per-dimension dataset encoding.
    for l in range(n_enc):
        p = {k: enc_w[k][l] for k in _STD_ORDER}
        x = _encoder_block(x, km_keys, p, cond=ds)

    # Token mask + masked mean over kernel tokens (clamp(min=0.1), as in torch).
    xm = x * km_tok
    n_k = jnp.maximum(jnp.sum(km_keys, axis=-1), 0.1)                 # (max_dim, 1)
    pooled = jnp.sum(xm.reshape(max_dim, max_len, hidden), axis=1) * (1.0 / n_k)

    # Cross-dimension attention (one sequence of length max_dim).
    cross = pooled
    for l in range(n_cross):
        p = {k: cross_w[k][l] for k in _ATTN_ORDER}
        cross = _encoder_block(cross, dm_keys, p, cond=None)
    cross = cross * dm_col

    # Decoder layers conditioned on concat(dataset encoding, cross embedding).
    combined = jnp.concatenate([ds, cross], axis=-1)                  # (max_dim, ds+H)
    y = xm
    for l in range(n_dec):
        p = {k: dec_w[k][l] for k in _STD_ORDER}
        y = _encoder_block(y, km_keys, p, cond=combined)
    y = y * km_tok
    return y.reshape(max_dim, max_len, hidden)


# ----------------------------------------------------------------------------------
# Fused Pallas kernel: one grid step == one batch element, everything VMEM resident.
# ----------------------------------------------------------------------------------
def _make_fused_kernel(n_enc, n_cross, n_dec):
    n_std, n_attn = len(_STD_ORDER), len(_ATTN_ORDER)

    def kernel(*refs):
        (ke_ref, ds_ref, km_keys_ref, km_tok_ref,
         dm_keys_ref, dm_col_ref, w_in_ref) = refs[:7]
        idx = 7
        enc_refs = refs[idx:idx + n_std]; idx += n_std
        cross_refs = refs[idx:idx + n_attn]; idx += n_attn
        dec_refs = refs[idx:idx + n_std]; idx += n_std
        o_ref = refs[idx]

        o_ref[0] = _forward_one_batch(
            ke_ref[0], ds_ref[0], km_keys_ref[0], km_tok_ref[0],
            dm_keys_ref[0], dm_col_ref[0], w_in_ref,
            dict(zip(_STD_ORDER, enc_refs)),
            dict(zip(_ATTN_ORDER, cross_refs)),
            dict(zip(_STD_ORDER, dec_refs)),
            n_enc, n_cross, n_dec)

    return kernel


def cross_attention_kernel_encoder(params, kernel_embeddings, dataset_embeddings,
                                   kernel_mask, dim_mask):
    b, max_dim, max_len, input_dim = kernel_embeddings.shape
    ds_dim = dataset_embeddings.shape[-1]
    hidden = params["w_in"].shape[1]
    m = max_dim * max_len
    n_enc, n_cross, n_dec = len(params["enc"]), len(params["cross"]), len(params["dec"])

    f32 = jnp.float32
    ke = kernel_embeddings.astype(f32)
    ds = dataset_embeddings.astype(f32)
    km = kernel_mask.astype(f32)
    dm = dim_mask.astype(f32)

    # Masks pre-laid-out host-side in both key and token form (free XLA reshapes) so the
    # kernel never performs a lane<->sublane relayout.
    km_keys = km.reshape(b, max_dim, 1, max_len)
    km_tok = km.reshape(b, m, 1)
    dm_keys = dm.reshape(b, 1, 1, max_dim)
    dm_col = dm.reshape(b, max_dim, 1)

    # Stack per-layer weights along a leading layer axis -> one operand per weight kind;
    # their block index never changes across the grid so they stay resident in VMEM.
    enc_w = [jnp.stack([p[k] for p in params["enc"]]) for k in _STD_ORDER]
    cross_w = [jnp.stack([p[k] for p in params["cross"]]) for k in _ATTN_ORDER]
    dec_w = [jnp.stack([p[k] for p in params["dec"]]) for k in _STD_ORDER]
    weights = [params["w_in"]] + enc_w + cross_w + dec_w

    def _full(a):
        nd = a.ndim
        return pl.BlockSpec(a.shape, lambda i, _nd=nd: (0,) * _nd)

    out = pl.pallas_call(
        _make_fused_kernel(n_enc, n_cross, n_dec),
        out_shape=jax.ShapeDtypeStruct((b, max_dim, max_len, hidden), f32),
        grid=(b,),
        in_specs=[
            pl.BlockSpec((1, max_dim, max_len, input_dim), lambda i: (i, 0, 0, 0)),
            pl.BlockSpec((1, max_dim, ds_dim), lambda i: (i, 0, 0)),
            pl.BlockSpec((1, max_dim, 1, max_len), lambda i: (i, 0, 0, 0)),
            pl.BlockSpec((1, m, 1), lambda i: (i, 0, 0)),
            pl.BlockSpec((1, 1, 1, max_dim), lambda i: (i, 0, 0, 0)),
            pl.BlockSpec((1, max_dim, 1), lambda i: (i, 0, 0)),
        ] + [_full(w) for w in weights],
        out_specs=pl.BlockSpec((1, max_dim, max_len, hidden), lambda i: (i, 0, 0, 0)),
        compiler_params=pltpu.CompilerParams(
            dimension_semantics=("parallel",),      # batch axis -> v7x 2-TC sharding
            vmem_limit_bytes=32 * 1024 * 1024,      # explicit budget; fits v7x's 64 MiB
        ),
    )(ke, ds, km_keys, km_tok, dm_keys, dm_col, *weights)
    return out


# ----------------------------------------------------------------------------------
# Pure-JAX reference (identical math, vmapped over batch) to validate the Pallas path.
# ----------------------------------------------------------------------------------
def ref_forward(params, kernel_embeddings, dataset_embeddings, kernel_mask, dim_mask):
    b, max_dim, max_len, _ = kernel_embeddings.shape
    m = max_dim * max_len
    f32 = jnp.float32
    ke = kernel_embeddings.astype(f32)
    ds = dataset_embeddings.astype(f32)
    km = kernel_mask.astype(f32)
    dm = dim_mask.astype(f32)

    enc_w = {k: jnp.stack([p[k] for p in params["enc"]]) for k in _STD_ORDER}
    cross_w = {k: jnp.stack([p[k] for p in params["cross"]]) for k in _ATTN_ORDER}
    dec_w = {k: jnp.stack([p[k] for p in params["dec"]]) for k in _STD_ORDER}
    n_enc, n_cross, n_dec = len(params["enc"]), len(params["cross"]), len(params["dec"])

    def one(ke_b, ds_b, kk, kt, dk, dc):
        return _forward_one_batch(ke_b, ds_b, kk, kt, dk, dc, params["w_in"],
                                  enc_w, cross_w, dec_w, n_enc, n_cross, n_dec)

    return jax.vmap(one)(ke, ds,
                         km.reshape(b, max_dim, 1, max_len),
                         km.reshape(b, m, 1),
                         dm.reshape(b, 1, 1, max_dim),
                         dm.reshape(b, max_dim, 1))


# ----------------------------------------------------------------------------------
# Deterministic synthetic parameter initialization
# ----------------------------------------------------------------------------------
def _dense(key, fan_in, fan_out):
    return (jax.random.normal(key, (fan_in, fan_out), dtype=jnp.float32)
            * (1.0 / math.sqrt(fan_in)))


def init_params(key, input_dim, hidden, ds_dim, inter, n_enc, n_cross, n_dec):
    keys = iter(jax.random.split(key, 256))
    nxt = lambda: next(keys)

    def std_layer(dsd):
        return {
            "wq": _dense(nxt(), hidden, hidden),
            "wk": _dense(nxt(), hidden, hidden),
            "wv": _dense(nxt(), hidden, hidden),
            "wo": _dense(nxt(), hidden, hidden),
            "wd": _dense(nxt(), dsd, hidden),
            "ln1g": jnp.ones((1, hidden), jnp.float32),
            "ln1b": jnp.zeros((1, hidden), jnp.float32),
            "w1": _dense(nxt(), hidden, inter),
            "b1": jnp.zeros((1, inter), jnp.float32),
            "w2": _dense(nxt(), inter, hidden),
            "b2": jnp.zeros((1, hidden), jnp.float32),
            "ln2g": jnp.ones((1, hidden), jnp.float32),
            "ln2b": jnp.zeros((1, hidden), jnp.float32),
        }

    def attn_layer():
        d = std_layer(1)
        d.pop("wd")
        return d

    return {
        "w_in": _dense(nxt(), input_dim, hidden),
        "enc": [std_layer(ds_dim) for _ in range(n_enc)],
        "cross": [attn_layer() for _ in range(n_cross)],
        "dec": [std_layer(ds_dim + hidden) for _ in range(n_dec)],
    }


# ----------------------------------------------------------------------------------
if __name__ == "__main__":
    # hidden=128 keeps activations lane-dense; max_len=8 keeps in-kernel reshapes aligned.
    B, MAX_DIM, MAX_LEN, INPUT_DIM = 2, 3, 8, 8
    HIDDEN, DS_DIM = 128, 16
    N_ENC, N_CROSS, N_DEC = 2, 1, 2

    key = jax.random.PRNGKey(0)
    k1, k2, k3 = jax.random.split(key, 3)

    kernel_embeddings = jax.random.normal(k1, (B, MAX_DIM, MAX_LEN, INPUT_DIM), jnp.float32)
    dataset_embeddings = jax.random.normal(k2, (B, MAX_DIM, DS_DIM), jnp.float32)
    lens = jnp.array([[8, 5, 3], [6, 8, 2]], jnp.int32)
    kernel_mask = (jnp.arange(MAX_LEN)[None, None, :] < lens[:, :, None]).astype(jnp.float32)
    dim_mask = jnp.array([[1.0, 1.0, 0.0], [1.0, 1.0, 1.0]], jnp.float32)

    params = init_params(k3, INPUT_DIM, HIDDEN, DS_DIM, 2 * HIDDEN, N_ENC, N_CROSS, N_DEC)

    fwd = jax.jit(cross_attention_kernel_encoder)
    out = jax.block_until_ready(fwd(params, kernel_embeddings, dataset_embeddings,
                                    kernel_mask, dim_mask))

    ref = jax.block_until_ready(
        jax.jit(ref_forward)(params, kernel_embeddings, dataset_embeddings,
                             kernel_mask, dim_mask))

    np.testing.assert_allclose(np.asarray(out), np.asarray(ref), rtol=1e-3, atol=1e-3)
    assert out.shape == (B, MAX_DIM, MAX_LEN, HIDDEN)
    print("KERNEL_OK")
</pallas_src>

<mosaic_0001>
module attributes {stable_mosaic.version = 11 : i64} {
  func.func @kernel(%arg0: i32, %arg1: memref<1x3x8x8xf32, #tpu.memory_space<vmem>>, %arg2: memref<1x3x16xf32, #tpu.memory_space<vmem>>, %arg3: memref<1x3x1x8xf32, #tpu.memory_space<vmem>>, %arg4: memref<1x24x1xf32, #tpu.memory_space<vmem>>, %arg5: memref<1x1x1x3xf32, #tpu.memory_space<vmem>>, %arg6: memref<1x3x1xf32, #tpu.memory_space<vmem>>, %arg7: memref<8x128xf32, #tpu.memory_space<vmem>>, %arg8: memref<2x128x128xf32, #tpu.memory_space<vmem>>, %arg9: memref<2x128x128xf32, #tpu.memory_space<vmem>>, %arg10: memref<2x128x128xf32, #tpu.memory_space<vmem>>, %arg11: memref<2x128x128xf32, #tpu.memory_space<vmem>>, %arg12: memref<2x16x128xf32, #tpu.memory_space<vmem>>, %arg13: memref<2x1x128xf32, #tpu.memory_space<vmem>>, %arg14: memref<2x1x128xf32, #tpu.memory_space<vmem>>, %arg15: memref<2x128x256xf32, #tpu.memory_space<vmem>>, %arg16: memref<2x1x256xf32, #tpu.memory_space<vmem>>, %arg17: memref<2x256x128xf32, #tpu.memory_space<vmem>>, %arg18: memref<2x1x128xf32, #tpu.memory_space<vmem>>, %arg19: memref<2x1x128xf32, #tpu.memory_space<vmem>>, %arg20: memref<2x1x128xf32, #tpu.memory_space<vmem>>, %arg21: memref<1x128x128xf32, #tpu.memory_space<vmem>>, %arg22: memref<1x128x128xf32, #tpu.memory_space<vmem>>, %arg23: memref<1x128x128xf32, #tpu.memory_space<vmem>>, %arg24: memref<1x128x128xf32, #tpu.memory_space<vmem>>, %arg25: memref<1x1x128xf32, #tpu.memory_space<vmem>>, %arg26: memref<1x1x128xf32, #tpu.memory_space<vmem>>, %arg27: memref<1x128x256xf32, #tpu.memory_space<vmem>>, %arg28: memref<1x1x256xf32, #tpu.memory_space<vmem>>, %arg29: memref<1x256x128xf32, #tpu.memory_space<vmem>>, %arg30: memref<1x1x128xf32, #tpu.memory_space<vmem>>, %arg31: memref<1x1x128xf32, #tpu.memory_space<vmem>>, %arg32: memref<1x1x128xf32, #tpu.memory_space<vmem>>, %arg33: memref<2x128x128xf32, #tpu.memory_space<vmem>>, %arg34: memref<2x128x128xf32, #tpu.memory_space<vmem>>, %arg35: memref<2x128x128xf32, #tpu.memory_space<vmem>>, %arg36: memref<2x128x128xf32, #tpu.memory_space<vmem>>, %arg37: memref<2x144x128xf32, #tpu.memory_space<vmem>>, %arg38: memref<2x1x128xf32, #tpu.memory_space<vmem>>, %arg39: memref<2x1x128xf32, #tpu.memory_space<vmem>>, %arg40: memref<2x128x256xf32, #tpu.memory_space<vmem>>, %arg41: memref<2x1x256xf32, #tpu.memory_space<vmem>>, %arg42: memref<2x256x128xf32, #tpu.memory_space<vmem>>, %arg43: memref<2x1x128xf32, #tpu.memory_space<vmem>>, %arg44: memref<2x1x128xf32, #tpu.memory_space<vmem>>, %arg45: memref<2x1x128xf32, #tpu.memory_space<vmem>>, %arg46: memref<1x3x8x128xf32, #tpu.memory_space<vmem>>) attributes {dimension_semantics = [#tpu.dimension_semantics<parallel>], iteration_bounds = array<i64: 2>, scalar_prefetch = 0 : i64, scratch_operands = 0 : i64, tpu.core_type = #tpu.core_type<tc>, window_params = [{transform_indices = @transform_0, window_bounds = array<i64: 1, 3, 8, 8>}, {transform_indices = @transform_1, window_bounds = array<i64: 1, 3, 16>}, {transform_indices = @transform_2, window_bounds = array<i64: 1, 3, 1, 8>}, {transform_indices = @transform_3, window_bounds = array<i64: 1, 24, 1>}, {transform_indices = @transform_4, window_bounds = array<i64: 1, 1, 1, 3>}, {transform_indices = @transform_5, window_bounds = array<i64: 1, 3, 1>}, {pipeline_mode = #tpu.pipeline_mode<synchronous>, transform_indices = @transform_6, window_bounds = array<i64: 8, 128>}, {pipeline_mode = #tpu.pipeline_mode<synchronous>, transform_indices = @transform_7, window_bounds = array<i64: 2, 128, 128>}, {pipeline_mode = #tpu.pipeline_mode<synchronous>, transform_indices = @transform_8, window_bounds = array<i64: 2, 128, 128>}, {pipeline_mode = #tpu.pipeline_mode<synchronous>, transform_indices = @transform_9, window_bounds = array<i64: 2, 128, 128>}, {pipeline_mode = #tpu.pipeline_mode<synchronous>, transform_indices = @transform_10, window_bounds = array<i64: 2, 128, 128>}, {pipeline_mode = #tpu.pipeline_mode<synchronous>, transform_indices = @transform_11, window_bounds = array<i64: 2, 16, 128>}, {pipeline_mode = #tpu.pipeline_mode<synchronous>, transform_indices = @transform_12, window_bounds = array<i64: 2, 1, 128>}, {pipeline_mode = #tpu.pipeline_mode<synchronous>, transform_indices = @transform_13, window_bounds = array<i64: 2, 1, 128>}, {pipeline_mode = #tpu.pipeline_mode<synchronous>, transform_indices = @transform_14, window_bounds = array<i64: 2, 128, 256>}, {pipeline_mode = #tpu.pipeline_mode<synchronous>, transform_indices = @transform_15, window_bounds = array<i64: 2, 1, 256>}, {pipeline_mode = #tpu.pipeline_mode<synchronous>, transform_indices = @transform_16, window_bounds = array<i64: 2, 256, 128>}, {pipeline_mode = #tpu.pipeline_mode<synchronous>, transform_indices = @transform_17, window_bounds = array<i64: 2, 1, 128>}, {pipeline_mode = #tpu.pipeline_mode<synchronous>, transform_indices = @transform_18, window_bounds = array<i64: 2, 1, 128>}, {pipeline_mode = #tpu.pipeline_mode<synchronous>, transform_indices = @transform_19, window_bounds = array<i64: 2, 1, 128>}, {pipeline_mode = #tpu.pipeline_mode<synchronous>, transform_indices = @transform_20, window_bounds = array<i64: 1, 128, 128>}, {pipeline_mode = #tpu.pipeline_mode<synchronous>, transform_indices = @transform_21, window_bounds = array<i64: 1, 128, 128>}, {pipeline_mode = #tpu.pipeline_mode<synchronous>, transform_indices = @transform_22, window_bounds = array<i64: 1, 128, 128>}, {pipeline_mode = #tpu.pipeline_mode<synchronous>, transform_indices = @transform_23, window_bounds = array<i64: 1, 128, 128>}, {pipeline_mode = #tpu.pipeline_mode<synchronous>, transform_indices = @transform_24, window_bounds = array<i64: 1, 1, 128>}, {pipeline_mode = #tpu.pipeline_mode<synchronous>, transform_indices = @transform_25, window_bounds = array<i64: 1, 1, 128>}, {pipeline_mode = #tpu.pipeline_mode<synchronous>, transform_indices = @transform_26, window_bounds = array<i64: 1, 128, 256>}, {pipeline_mode = #tpu.pipeline_mode<synchronous>, transform_indices = @transform_27, window_bounds = array<i64: 1, 1, 256>}, {pipeline_mode = #tpu.pipeline_mode<synchronous>, transform_indices = @transform_28, window_bounds = array<i64: 1, 256, 128>}, {pipeline_mode = #tpu.pipeline_mode<synchronous>, transform_indices = @transform_29, window_bounds = array<i64: 1, 1, 128>}, {pipeline_mode = #tpu.pipeline_mode<synchronous>, transform_indices = @transform_30, window_bounds = array<i64: 1, 1, 128>}, {pipeline_mode = #tpu.pipeline_mode<synchronous>, transform_indices = @transform_31, window_bounds = array<i64: 1, 1, 128>}, {pipeline_mode = #tpu.pipeline_mode<synchronous>, transform_indices = @transform_32, window_bounds = array<i64: 2, 128, 128>}, {pipeline_mode = #tpu.pipeline_mode<synchronous>, transform_indices = @transform_33, window_bounds = array<i64: 2, 128, 128>}, {pipeline_mode = #tpu.pipeline_mode<synchronous>, transform_indices = @transform_34, window_bounds = array<i64: 2, 128, 128>}, {pipeline_mode = #tpu.pipeline_mode<synchronous>, transform_indices = @transform_35, window_bounds = array<i64: 2, 128, 128>}, {pipeline_mode = #tpu.pipeline_mode<synchronous>, transform_indices = @transform_36, window_bounds = array<i64: 2, 144, 128>}, {pipeline_mode = #tpu.pipeline_mode<synchronous>, transform_indices = @transform_37, window_bounds = array<i64: 2, 1, 128>}, {pipeline_mode = #tpu.pipeline_mode<synchronous>, transform_indices = @transform_38, window_bounds = array<i64: 2, 1, 128>}, {pipeline_mode = #tpu.pipeline_mode<synchronous>, transform_indices = @transform_39, window_bounds = array<i64: 2, 128, 256>}, {pipeline_mode = #tpu.pipeline_mode<synchronous>, transform_indices = @transform_40, window_bounds = array<i64: 2, 1, 256>}, {pipeline_mode = #tpu.pipeline_mode<synchronous>, transform_indices = @transform_41, window_bounds = array<i64: 2, 256, 128>}, {pipeline_mode = #tpu.pipeline_mode<synchronous>, transform_indices = @transform_42, window_bounds = array<i64: 2, 1, 128>}, {pipeline_mode = #tpu.pipeline_mode<synchronous>, transform_indices = @transform_43, window_bounds = array<i64: 2, 1, 128>}, {pipeline_mode = #tpu.pipeline_mode<synchronous>, transform_indices = @transform_44, window_bounds = array<i64: 2, 1, 128>}, {transform_indices = @transform_45, window_bounds = array<i64: 1, 3, 8, 128>}]} {
    %c0 = arith.constant 0 : index
    %c0_0 = arith.constant 0 : index
    %c0_1 = arith.constant 0 : index
    %c0_2 = arith.constant 0 : index
    %0 = vector.load %arg1[%c0, %c0_0, %c0_1, %c0_2] : memref<1x3x8x8xf32, #tpu.memory_space<vmem>>, vector<1x3x8x8xf32>
    %1 = vector.shape_cast %0 : vector<1x3x8x8xf32> to vector<3x8x8xf32>
    %c0_3 = arith.constant 0 : index
    %c0_4 = arith.constant 0 : index
    %c0_5 = arith.constant 0 : index
    %2 = vector.load %arg2[%c0_3, %c0_4, %c0_5] : memref<1x3x16xf32, #tpu.memory_space<vmem>>, vector<1x3x16xf32>
    %3 = vector.shape_cast %2 : vector<1x3x16xf32> to vector<3x16xf32>
    %c0_6 = arith.constant 0 : index
    %c0_7 = arith.constant 0 : index
    %c0_8 = arith.constant 0 : index
    %c0_9 = arith.constant 0 : index
    %4 = vector.load %arg3[%c0_6, %c0_7, %c0_8, %c0_9] : memref<1x3x1x8xf32, #tpu.memory_space<vmem>>, vector<1x3x1x8xf32>
    %5 = vector.shape_cast %4 : vector<1x3x1x8xf32> to vector<3x1x8xf32>
    %c0_10 = arith.constant 0 : index
    %c0_11 = arith.constant 0 : index
    %c0_12 = arith.constant 0 : index
    %6 = vector.load %arg4[%c0_10, %c0_11, %c0_12] : memref<1x24x1xf32, #tpu.memory_space<vmem>>, vector<1x24x1xf32>
    %7 = vector.shape_cast %6 : vector<1x24x1xf32> to vector<24x1xf32>
    %c0_13 = arith.constant 0 : index
    %c0_14 = arith.constant 0 : index
    %c0_15 = arith.constant 0 : index
    %c0_16 = arith.constant 0 : index
    %8 = vector.load %arg5[%c0_13, %c0_14, %c0_15, %c0_16] : memref<1x1x1x3xf32, #tpu.memory_space<vmem>>, vector<1x1x1x3xf32>
    %9 = vector.shape_cast %8 : vector<1x1x1x3xf32> to vector<1x1x3xf32>
    %c0_17 = arith.constant 0 : index
    %c0_18 = arith.constant 0 : index
    %c0_19 = arith.constant 0 : index
    %10 = vector.load %arg6[%c0_17, %c0_18, %c0_19] : memref<1x3x1xf32, #tpu.memory_space<vmem>>, vector<1x3x1xf32>
    %11 = vector.shape_cast %10 : vector<1x3x1xf32> to vector<3x1xf32>
    %12 = vector.shape_cast %1 : vector<3x8x8xf32> to vector<24x8xf32>
    %c0_20 = arith.constant 0 : index
    %c0_21 = arith.constant 0 : index
    %13 = vector.load %arg7[%c0_20, %c0_21] : memref<8x128xf32, #tpu.memory_space<vmem>>, vector<8x128xf32>
    %cst = arith.constant dense<0.000000e+00> : vector<24x128xf32>
    %14 = tpu.matmul %12, %13, %cst {dimension_numbers = #tpu.dot_dimension_numbers<[1], [0], [0], [1], [0, 0, 1, 1], [], []>} : vector<24x8xf32>, vector<8x128xf32>, vector<24x128xf32> -> vector<24x128xf32>
    %c0_22 = arith.constant 0 : index
    %c0_23 = arith.constant 0 : index
    %c0_24 = arith.constant 0 : index
    %15 = vector.load %arg8[%c0_22, %c0_23, %c0_24] : memref<2x128x128xf32, #tpu.memory_space<vmem>>, vector<1x128x128xf32>
    %16 = vector.shape_cast %15 : vector<1x128x128xf32> to vector<128x128xf32>
    %c0_25 = arith.constant 0 : index
    %c0_26 = arith.constant 0 : index
    %c0_27 = arith.constant 0 : index
    %17 = vector.load %arg9[%c0_25, %c0_26, %c0_27] : memref<2x128x128xf32, #tpu.memory_space<vmem>>, vector<1x128x128xf32>
    %18 = vector.shape_cast %17 : vector<1x128x128xf32> to vector<128x128xf32>
    %c0_28 = arith.constant 0 : index
    %c0_29 = arith.constant 0 : index
    %c0_30 = arith.constant 0 : index
    %19 = vector.load %arg10[%c0_28, %c0_29, %c0_30] : memref<2x128x128xf32, #tpu.memory_space<vmem>>, vector<1x128x128xf32>
    %20 = vector.shape_cast %19 : vector<1x128x128xf32> to vector<128x128xf32>
    %c0_31 = arith.constant 0 : index
    %c0_32 = arith.constant 0 : index
    %c0_33 = arith.constant 0 : index
    %21 = vector.load %arg11[%c0_31, %c0_32, %c0_33] : memref<2x128x128xf32, #tpu.memory_space<vmem>>, vector<1x128x128xf32>
    %22 = vector.shape_cast %21 : vector<1x128x128xf32> to vector<128x128xf32>
    %c0_34 = arith.constant 0 : index
    %c0_35 = arith.constant 0 : index
    %c0_36 = arith.constant 0 : index
    %23 = vector.load %arg12[%c0_34, %c0_35, %c0_36] : memref<2x16x128xf32, #tpu.memory_space<vmem>>, vector<1x16x128xf32>
    %24 = vector.shape_cast %23 : vector<1x16x128xf32> to vector<16x128xf32>
    %c0_37 = arith.constant 0 : index
    %c0_38 = arith.constant 0 : index
    %c0_39 = arith.constant 0 : index
    %25 = vector.load %arg13[%c0_37, %c0_38, %c0_39] : memref<2x1x128xf32, #tpu.memory_space<vmem>>, vector<1x1x128xf32>
    %26 = vector.shape_cast %25 : vector<1x1x128xf32> to vector<1x128xf32>
    %c0_40 = arith.constant 0 : index
    %c0_41 = arith.constant 0 : index
    %c0_42 = arith.constant 0 : index
    %27 = vector.load %arg14[%c0_40, %c0_41, %c0_42] : memref<2x1x128xf32, #tpu.memory_space<vmem>>, vector<1x1x128xf32>
    %28 = vector.shape_cast %27 : vector<1x1x128xf32> to vector<1x128xf32>
    %c0_43 = arith.constant 0 : index
    %c0_44 = arith.constant 0 : index
    %c0_45 = arith.constant 0 : index
    %29 = vector.load %arg15[%c0_43, %c0_44, %c0_45] : memref<2x128x256xf32, #tpu.memory_space<vmem>>, vector<1x128x256xf32>
    %30 = vector.shape_cast %29 : vector<1x128x256xf32> to vector<128x256xf32>
    %c0_46 = arith.constant 0 : index
    %c0_47 = arith.constant 0 : index
    %c0_48 = arith.constant 0 : index
    %31 = vector.load %arg16[%c0_46, %c0_47, %c0_48] : memref<2x1x256xf32, #tpu.memory_space<vmem>>, vector<1x1x256xf32>
    %32 = vector.shape_cast %31 : vector<1x1x256xf32> to vector<1x256xf32>
    %c0_49 = arith.constant 0 : index
    %c0_50 = arith.constant 0 : index
    %c0_51 = arith.constant 0 : index
    %33 = vector.load %arg17[%c0_49, %c0_50, %c0_51] : memref<2x256x128xf32, #tpu.memory_space<vmem>>, vector<1x256x128xf32>
    %34 = vector.shape_cast %33 : vector<1x256x128xf32> to vector<256x128xf32>
    %c0_52 = arith.constant 0 : index
    %c0_53 = arith.constant 0 : index
    %c0_54 = arith.constant 0 : index
    %35 = vector.load %arg18[%c0_52, %c0_53, %c0_54] : memref<2x1x128xf32, #tpu.memory_space<vmem>>, vector<1x1x128xf32>
    %36 = vector.shape_cast %35 : vector<1x1x128xf32> to vector<1x128xf32>
    %c0_55 = arith.constant 0 : index
    %c0_56 = arith.constant 0 : index
    %c0_57 = arith.constant 0 : index
    %37 = vector.load %arg19[%c0_55, %c0_56, %c0_57] : memref<2x1x128xf32, #tpu.memory_space<vmem>>, vector<1x1x128xf32>
    %38 = vector.shape_cast %37 : vector<1x1x128xf32> to vector<1x128xf32>
    %c0_58 = arith.constant 0 : index
    %c0_59 = arith.constant 0 : index
    %c0_60 = arith.constant 0 : index
    %39 = vector.load %arg20[%c0_58, %c0_59, %c0_60] : memref<2x1x128xf32, #tpu.memory_space<vmem>>, vector<1x1x128xf32>
    %40 = vector.shape_cast %39 : vector<1x1x128xf32> to vector<1x128xf32>
    %cst_61 = arith.constant dense<0.000000e+00> : vector<24x128xf32>
    %41 = tpu.matmul %14, %16, %cst_61 {dimension_numbers = #tpu.dot_dimension_numbers<[1], [0], [0], [1], [0, 0, 1, 1], [], []>} : vector<24x128xf32>, vector<128x128xf32>, vector<24x128xf32> -> vector<24x128xf32>
    %cst_62 = arith.constant dense<0.000000e+00> : vector<24x128xf32>
    %42 = tpu.matmul %14, %18, %cst_62 {dimension_numbers = #tpu.dot_dimension_numbers<[1], [0], [0], [1], [0, 0, 1, 1], [], []>} : vector<24x128xf32>, vector<128x128xf32>, vector<24x128xf32> -> vector<24x128xf32>
    %cst_63 = arith.constant dense<0.000000e+00> : vector<24x128xf32>
    %43 = tpu.matmul %14, %20, %cst_63 {dimension_numbers = #tpu.dot_dimension_numbers<[1], [0], [0], [1], [0, 0, 1, 1], [], []>} : vector<24x128xf32>, vector<128x128xf32>, vector<24x128xf32> -> vector<24x128xf32>
    %44 = vector.shape_cast %41 : vector<24x128xf32> to vector<3x8x128xf32>
    %45 = vector.shape_cast %42 : vector<24x128xf32> to vector<3x8x128xf32>
    %46 = vector.shape_cast %43 : vector<24x128xf32> to vector<3x8x128xf32>
    "tpu.trace_start"() <{level = 10 : i32, message = "gqd,gkd->gqk"}> : () -> ()
    %cst_64 = arith.constant dense<0.000000e+00> : vector<3x8x8xf32>
    %47 = tpu.matmul %44, %45, %cst_64 {dimension_numbers = #tpu.dot_dimension_numbers<[2], [2], [1], [1], [0, 0, 0, 1, 1, 1], [0], [0]>} : vector<3x8x128xf32>, vector<3x8x128xf32>, vector<3x8x8xf32> -> vector<3x8x8xf32>
    "tpu.trace_stop"() : () -> ()
    %cst_65 = arith.constant 0.0883883461 : f32
    %48 = vector.broadcast %cst_65 : f32 to vector<3x8x8xf32>
    %49 = arith.mulf %47, %48 : vector<3x8x8xf32>
    %cst_66 = arith.constant 0.000000e+00 : f32
    %50 = vector.broadcast %cst_66 : f32 to vector<3x1x8xf32>
    %51 = arith.cmpf ogt, %5, %50 : vector<3x1x8xf32>
    %cst_67 = arith.constant -1.000000e+09 : f32
    %52 = vector.shape_cast %51 : vector<3x1x8xi1> to vector<3x1x8xi1>
    %53 = vector.broadcast %52 : vector<3x1x8xi1> to vector<3x8x8xi1>
    %54 = vector.broadcast %cst_67 : f32 to vector<3x8x8xf32>
    %55 = arith.select %53, %49, %54 : vector<3x8x8xi1>, vector<3x8x8xf32>
    %cst_68 = arith.constant dense<0xFF800000> : vector<3x8xf32>
    %56 = vector.multi_reduction <maximumf>, %55, %cst_68 [2] : vector<3x8x8xf32> to vector<3x8xf32>
    %57 = vector.shape_cast %56 : vector<3x8xf32> to vector<3x8x1xf32>
    %58 = vector.broadcast %57 : vector<3x8x1xf32> to vector<3x8x8xf32>
    %59 = arith.subf %55, %58 : vector<3x8x8xf32>
    %60 = math.exp %59 : vector<3x8x8xf32>
    %cst_69 = arith.constant dense<0.000000e+00> : vector<3x8xf32>
    %61 = vector.multi_reduction <add>, %60, %cst_69 [2] : vector<3x8x8xf32> to vector<3x8xf32>
    %62 = vector.shape_cast %61 : vector<3x8xf32> to vector<3x8x1xf32>
    %cst_70 = arith.constant 1.000000e+00 : f32
    %63 = vector.broadcast %cst_70 : f32 to vector<3x8x1xf32>
    %64 = arith.divf %63, %62 : vector<3x8x1xf32>
    %65 = vector.broadcast %64 : vector<3x8x1xf32> to vector<3x8x8xf32>
    %66 = arith.mulf %60, %65 : vector<3x8x8xf32>
    "tpu.trace_start"() <{level = 10 : i32, message = "gqk,gkd->gqd"}> : () -> ()
    %cst_71 = arith.constant dense<0.000000e+00> : vector<3x8x128xf32>
    %67 = tpu.matmul %66, %46, %cst_71 {dimension_numbers = #tpu.dot_dimension_numbers<[2], [1], [1], [2], [0, 0, 0, 1, 1, 2], [0], [0]>} : vector<3x8x8xf32>, vector<3x8x128xf32>, vector<3x8x128xf32> -> vector<3x8x128xf32>
    "tpu.trace_stop"() : () -> ()
    %68 = vector.shape_cast %67 : vector<3x8x128xf32> to vector<24x128xf32>
    %cst_72 = arith.constant dense<0.000000e+00> : vector<24x128xf32>
    %69 = tpu.matmul %68, %22, %cst_72 {dimension_numbers = #tpu.dot_dimension_numbers<[1], [0], [0], [1], [0, 0, 1, 1], [], []>} : vector<24x128xf32>, vector<128x128xf32>, vector<24x128xf32> -> vector<24x128xf32>
    %70 = arith.addf %14, %69 : vector<24x128xf32>
    %cst_73 = arith.constant dense<0.000000e+00> : vector<24xf32>
    %71 = vector.multi_reduction <add>, %70, %cst_73 [1] : vector<24x128xf32> to vector<24xf32>
    %72 = vector.shape_cast %71 : vector<24xf32> to vector<24x1xf32>
    %cst_74 = arith.constant 1.280000e+02 : f32
    %73 = vector.broadcast %cst_74 : f32 to vector<24x1xf32>
    %74 = arith.divf %72, %73 : vector<24x1xf32>
    %75 = vector.broadcast %74 : vector<24x1xf32> to vector<24x128xf32>
    %76 = arith.subf %70, %75 : vector<24x128xf32>
    %77 = arith.mulf %76, %76 : vector<24x128xf32>
    %cst_75 = arith.constant dense<0.000000e+00> : vector<24xf32>
    %78 = vector.multi_reduction <add>, %77, %cst_75 [1] : vector<24x128xf32> to vector<24xf32>
    %79 = vector.shape_cast %78 : vector<24xf32> to vector<24x1xf32>
    %cst_76 = arith.constant 1.280000e+02 : f32
    %80 = vector.broadcast %cst_76 : f32 to vector<24x1xf32>
    %81 = arith.divf %79, %80 : vector<24x1xf32>
    %82 = vector.broadcast %74 : vector<24x1xf32> to vector<24x128xf32>
    %83 = arith.subf %70, %82 : vector<24x128xf32>
    %cst_77 = arith.constant 9.99999974E-6 : f32
    %84 = vector.broadcast %cst_77 : f32 to vector<24x1xf32>
    %85 = arith.addf %81, %84 : vector<24x1xf32>
    %86 = math.rsqrt %85 : vector<24x1xf32>
    %87 = vector.broadcast %86 : vector<24x1xf32> to vector<24x128xf32>
    %88 = arith.mulf %83, %87 : vector<24x128xf32>
    %89 = vector.broadcast %26 : vector<1x128xf32> to vector<24x128xf32>
    %90 = arith.mulf %88, %89 : vector<24x128xf32>
    %91 = vector.broadcast %28 : vector<1x128xf32> to vector<24x128xf32>
    %92 = arith.addf %90, %91 : vector<24x128xf32>
    %cst_78 = arith.constant dense<0.000000e+00> : vector<3x128xf32>
    %93 = tpu.matmul %3, %24, %cst_78 {dimension_numbers = #tpu.dot_dimension_numbers<[1], [0], [0], [1], [0, 0, 1, 1], [], []>} : vector<3x16xf32>, vector<16x128xf32>, vector<3x128xf32> -> vector<3x128xf32>
    %94 = vector.shape_cast %92 : vector<24x128xf32> to vector<3x8x128xf32>
    %95 = vector.shape_cast %93 : vector<3x128xf32> to vector<3x1x128xf32>
    %96 = vector.broadcast %95 : vector<3x1x128xf32> to vector<3x8x128xf32>
    %97 = arith.addf %94, %96 : vector<3x8x128xf32>
    %98 = vector.shape_cast %97 : vector<3x8x128xf32> to vector<24x128xf32>
    %cst_79 = arith.constant dense<0.000000e+00> : vector<24x256xf32>
    %99 = tpu.matmul %98, %30, %cst_79 {dimension_numbers = #tpu.dot_dimension_numbers<[1], [0], [0], [1], [0, 0, 1, 1], [], []>} : vector<24x128xf32>, vector<128x256xf32>, vector<24x256xf32> -> vector<24x256xf32>
    %100 = vector.broadcast %32 : vector<1x256xf32> to vector<24x256xf32>
    %101 = arith.addf %99, %100 : vector<24x256xf32>
    %cst_80 = arith.constant 0.000000e+00 : f32
    %102 = vector.broadcast %cst_80 : f32 to vector<24x256xf32>
    %103 = arith.maximumf %101, %102 : vector<24x256xf32>
    %cst_81 = arith.constant dense<0.000000e+00> : vector<24x128xf32>
    %104 = tpu.matmul %103, %34, %cst_81 {dimension_numbers = #tpu.dot_dimension_numbers<[1], [0], [0], [1], [0, 0, 1, 1], [], []>} : vector<24x256xf32>, vector<256x128xf32>, vector<24x128xf32> -> vector<24x128xf32>
    %105 = vector.broadcast %36 : vector<1x128xf32> to vector<24x128xf32>
    %106 = arith.addf %104, %105 : vector<24x128xf32>
    %107 = arith.addf %98, %106 : vector<24x128xf32>
    %cst_82 = arith.constant dense<0.000000e+00> : vector<24xf32>
    %108 = vector.multi_reduction <add>, %107, %cst_82 [1] : vector<24x128xf32> to vector<24xf32>
    %109 = vector.shape_cast %108 : vector<24xf32> to vector<24x1xf32>
    %cst_83 = arith.constant 1.280000e+02 : f32
    %110 = vector.broadcast %cst_83 : f32 to vector<24x1xf32>
    %111 = arith.divf %109, %110 : vector<24x1xf32>
    %112 = vector.broadcast %111 : vector<24x1xf32> to vector<24x128xf32>
    %113 = arith.subf %107, %112 : vector<24x128xf32>
    %114 = arith.mulf %113, %113 : vector<24x128xf32>
    %cst_84 = arith.constant dense<0.000000e+00> : vector<24xf32>
    %115 = vector.multi_reduction <add>, %114, %cst_84 [1] : vector<24x128xf32> to vector<24xf32>
    %116 = vector.shape_cast %115 : vector<24xf32> to vector<24x1xf32>
    %cst_85 = arith.constant 1.280000e+02 : f32
    %117 = vector.broadcast %cst_85 : f32 to vector<24x1xf32>
    %118 = arith.divf %116, %117 : vector<24x1xf32>
    %119 = vector.broadcast %111 : vector<24x1xf32> to vector<24x128xf32>
    %120 = arith.subf %107, %119 : vector<24x128xf32>
    %cst_86 = arith.constant 9.99999974E-6 : f32
    %121 = vector.broadcast %cst_86 : f32 to vector<24x1xf32>
    %122 = arith.addf %118, %121 : vector<24x1xf32>
    %123 = math.rsqrt %122 : vector<24x1xf32>
    %124 = vector.broadcast %123 : vector<24x1xf32> to vector<24x128xf32>
    %125 = arith.mulf %120, %124 : vector<24x128xf32>
    %126 = vector.broadcast %38 : vector<1x128xf32> to vector<24x128xf32>
    %127 = arith.mulf %125, %126 : vector<24x128xf32>
    %128 = vector.broadcast %40 : vector<1x128xf32> to vector<24x128xf32>
    %129 = arith.addf %127, %128 : vector<24x128xf32>
    %c1 = arith.constant 1 : index
    %c0_87 = arith.constant 0 : index
    %c0_88 = arith.constant 0 : index
    %130 = vector.load %arg8[%c1, %c0_87, %c0_88] : memref<2x128x128xf32, #tpu.memory_space<vmem>>, vector<1x128x128xf32>
    %131 = vector.shape_cast %130 : vector<1x128x128xf32> to vector<128x128xf32>
    %c1_89 = arith.constant 1 : index
    %c0_90 = arith.constant 0 : index
    %c0_91 = arith.constant 0 : index
    %132 = vector.load %arg9[%c1_89, %c0_90, %c0_91] : memref<2x128x128xf32, #tpu.memory_space<vmem>>, vector<1x128x128xf32>
    %133 = vector.shape_cast %132 : vector<1x128x128xf32> to vector<128x128xf32>
    %c1_92 = arith.constant 1 : index
    %c0_93 = arith.constant 0 : index
    %c0_94 = arith.constant 0 : index
    %134 = vector.load %arg10[%c1_92, %c0_93, %c0_94] : memref<2x128x128xf32, #tpu.memory_space<vmem>>, vector<1x128x128xf32>
    %135 = vector.shape_cast %134 : vector<1x128x128xf32> to vector<128x128xf32>
    %c1_95 = arith.constant 1 : index
    %c0_96 = arith.constant 0 : index
    %c0_97 = arith.constant 0 : index
    %136 = vector.load %arg11[%c1_95, %c0_96, %c0_97] : memref<2x128x128xf32, #tpu.memory_space<vmem>>, vector<1x128x128xf32>
    %137 = vector.shape_cast %136 : vector<1x128x128xf32> to vector<128x128xf32>
    %c1_98 = arith.constant 1 : index
    %c0_99 = arith.constant 0 : index
    %c0_100 = arith.constant 0 : index
    %138 = vector.load %arg12[%c1_98, %c0_99, %c0_100] : memref<2x16x128xf32, #tpu.memory_space<vmem>>, vector<1x16x128xf32>
    %139 = vector.shape_cast %138 : vector<1x16x128xf32> to vector<16x128xf32>
    %c1_101 = arith.constant 1 : index
    %c0_102 = arith.constant 0 : index
    %c0_103 = arith.constant 0 : index
    %140 = vector.load %arg13[%c1_101, %c0_102, %c0_103] : memref<2x1x128xf32, #tpu.memory_space<vmem>>, vector<1x1x128xf32>
    %141 = vector.shape_cast %140 : vector<1x1x128xf32> to vector<1x128xf32>
    %c1_104 = arith.constant 1 : index
    %c0_105 = arith.constant 0 : index
    %c0_106 = arith.constant 0 : index
    %142 = vector.load %arg14[%c1_104, %c0_105, %c0_106] : memref<2x1x128xf32, #tpu.memory_space<vmem>>, vector<1x1x128xf32>
    %143 = vector.shape_cast %142 : vector<1x1x128xf32> to vector<1x128xf32>
    %c1_107 = arith.constant 1 : index
    %c0_108 = arith.constant 0 : index
    %c0_109 = arith.constant 0 : index
    %144 = vector.load %arg15[%c1_107, %c0_108, %c0_109] : memref<2x128x256xf32, #tpu.memory_space<vmem>>, vector<1x128x256xf32>
    %145 = vector.shape_cast %144 : vector<1x128x256xf32> to vector<128x256xf32>
    %c1_110 = arith.constant 1 : index
    %c0_111 = arith.constant 0 : index
    %c0_112 = arith.constant 0 : index
    %146 = vector.load %arg16[%c1_110, %c0_111, %c0_112] : memref<2x1x256xf32, #tpu.memory_space<vmem>>, vector<1x1x256xf32>
    %147 = vector.shape_cast %146 : vector<1x1x256xf32> to vector<1x256xf32>
    %c1_113 = arith.constant 1 : index
    %c0_114 = arith.constant 0 : index
    %c0_115 = arith.constant 0 : index
    %148 = vector.load %arg17[%c1_113, %c0_114, %c0_115] : memref<2x256x128xf32, #tpu.memory_space<vmem>>, vector<1x256x128xf32>
    %149 = vector.shape_cast %148 : vector<1x256x128xf32> to vector<256x128xf32>
    %c1_116 = arith.constant 1 : index
    %c0_117 = arith.constant 0 : index
    %c0_118 = arith.constant 0 : index
    %150 = vector.load %arg18[%c1_116, %c0_117, %c0_118] : memref<2x1x128xf32, #tpu.memory_space<vmem>>, vector<1x1x128xf32>
    %151 = vector.shape_cast %150 : vector<1x1x128xf32> to vector<1x128xf32>
    %c1_119 = arith.constant 1 : index
    %c0_120 = arith.constant 0 : index
    %c0_121 = arith.constant 0 : index
    %152 = vector.load %arg19[%c1_119, %c0_120, %c0_121] : memref<2x1x128xf32, #tpu.memory_space<vmem>>, vector<1x1x128xf32>
    %153 = vector.shape_cast %152 : vector<1x1x128xf32> to vector<1x128xf32>
    %c1_122 = arith.constant 1 : index
    %c0_123 = arith.constant 0 : index
    %c0_124 = arith.constant 0 : index
    %154 = vector.load %arg20[%c1_122, %c0_123, %c0_124] : memref<2x1x128xf32, #tpu.memory_space<vmem>>, vector<1x1x128xf32>
    %155 = vector.shape_cast %154 : vector<1x1x128xf32> to vector<1x128xf32>
    %cst_125 = arith.constant dense<0.000000e+00> : vector<24x128xf32>
    %156 = tpu.matmul %129, %131, %cst_125 {dimension_numbers = #tpu.dot_dimension_numbers<[1], [0], [0], [1], [0, 0, 1, 1], [], []>} : vector<24x128xf32>, vector<128x128xf32>, vector<24x128xf32> -> vector<24x128xf32>
    %cst_126 = arith.constant dense<0.000000e+00> : vector<24x128xf32>
    %157 = tpu.matmul %129, %133, %cst_126 {dimension_numbers = #tpu.dot_dimension_numbers<[1], [0], [0], [1], [0, 0, 1, 1], [], []>} : vector<24x128xf32>, vector<128x128xf32>, vector<24x128xf32> -> vector<24x128xf32>
    %cst_127 = arith.constant dense<0.000000e+00> : vector<24x128xf32>
    %158 = tpu.matmul %129, %135, %cst_127 {dimension_numbers = #tpu.dot_dimension_numbers<[1], [0], [0], [1], [0, 0, 1, 1], [], []>} : vector<24x128xf32>, vector<128x128xf32>, vector<24x128xf32> -> vector<24x128xf32>
    %159 = vector.shape_cast %156 : vector<24x128xf32> to vector<3x8x128xf32>
    %160 = vector.shape_cast %157 : vector<24x128xf32> to vector<3x8x128xf32>
    %161 = vector.shape_cast %158 : vector<24x128xf32> to vector<3x8x128xf32>
    "tpu.trace_start"() <{level = 10 : i32, message = "gqd,gkd->gqk"}> : () -> ()
    %cst_128 = arith.constant dense<0.000000e+00> : vector<3x8x8xf32>
    %162 = tpu.matmul %159, %160, %cst_128 {dimension_numbers = #tpu.dot_dimension_numbers<[2], [2], [1], [1], [0, 0, 0, 1, 1, 1], [0], [0]>} : vector<3x8x128xf32>, vector<3x8x128xf32>, vector<3x8x8xf32> -> vector<3x8x8xf32>
    "tpu.trace_stop"() : () -> ()
    %cst_129 = arith.constant 0.0883883461 : f32
    %163 = vector.broadcast %cst_129 : f32 to vector<3x8x8xf32>
    %164 = arith.mulf %162, %163 : vector<3x8x8xf32>
    %cst_130 = arith.constant 0.000000e+00 : f32
    %165 = vector.broadcast %cst_130 : f32 to vector<3x1x8xf32>
    %166 = arith.cmpf ogt, %5, %165 : vector<3x1x8xf32>
    %cst_131 = arith.constant -1.000000e+09 : f32
    %167 = vector.shape_cast %166 : vector<3x1x8xi1> to vector<3x1x8xi1>
    %168 = vector.broadcast %167 : vector<3x1x8xi1> to vector<3x8x8xi1>
    %169 = vector.broadcast %cst_131 : f32 to vector<3x8x8xf32>
    %170 = arith.select %168, %164, %169 : vector<3x8x8xi1>, vector<3x8x8xf32>
    %cst_132 = arith.constant dense<0xFF800000> : vector<3x8xf32>
    %171 = vector.multi_reduction <maximumf>, %170, %cst_132 [2] : vector<3x8x8xf32> to vector<3x8xf32>
    %172 = vector.shape_cast %171 : vector<3x8xf32> to vector<3x8x1xf32>
    %173 = vector.broadcast %172 : vector<3x8x1xf32> to vector<3x8x8xf32>
    %174 = arith.subf %170, %173 : vector<3x8x8xf32>
    %175 = math.exp %174 : vector<3x8x8xf32>
    %cst_133 = arith.constant dense<0.000000e+00> : vector<3x8xf32>
    %176 = vector.multi_reduction <add>, %175, %cst_133 [2] : vector<3x8x8xf32> to vector<3x8xf32>
    %177 = vector.shape_cast %176 : vector<3x8xf32> to vector<3x8x1xf32>
    %cst_134 = arith.constant 1.000000e+00 : f32
    %178 = vector.broadcast %cst_134 : f32 to vector<3x8x1xf32>
    %179 = arith.divf %178, %177 : vector<3x8x1xf32>
    %180 = vector.broadcast %179 : vector<3x8x1xf32> to vector<3x8x8xf32>
    %181 = arith.mulf %175, %180 : vector<3x8x8xf32>
    "tpu.trace_start"() <{level = 10 : i32, message = "gqk,gkd->gqd"}> : () -> ()
    %cst_135 = arith.constant dense<0.000000e+00> : vector<3x8x128xf32>
    %182 = tpu.matmul %181, %161, %cst_135 {dimension_numbers = #tpu.dot_dimension_numbers<[2], [1], [1], [2], [0, 0, 0, 1, 1, 2], [0], [0]>} : vector<3x8x8xf32>, vector<3x8x128xf32>, vector<3x8x128xf32> -> vector<3x8x128xf32>
    "tpu.trace_stop"() : () -> ()
    %183 = vector.shape_cast %182 : vector<3x8x128xf32> to vector<24x128xf32>
    %cst_136 = arith.constant dense<0.000000e+00> : vector<24x128xf32>
    %184 = tpu.matmul %183, %137, %cst_136 {dimension_numbers = #tpu.dot_dimension_numbers<[1], [0], [0], [1], [0, 0, 1, 1], [], []>} : vector<24x128xf32>, vector<128x128xf32>, vector<24x128xf32> -> vector<24x128xf32>
    %185 = arith.addf %129, %184 : vector<24x128xf32>
    %cst_137 = arith.constant dense<0.000000e+00> : vector<24xf32>
    %186 = vector.multi_reduction <add>, %185, %cst_137 [1] : vector<24x128xf32> to vector<24xf32>
    %187 = vector.shape_cast %186 : vector<24xf32> to vector<24x1xf32>
    %cst_138 = arith.constant 1.280000e+02 : f32
    %188 = vector.broadcast %cst_138 : f32 to vector<24x1xf32>
    %189 = arith.divf %187, %188 : vector<24x1xf32>
    %190 = vector.broadcast %189 : vector<24x1xf32> to vector<24x128xf32>
    %191 = arith.subf %185, %190 : vector<24x128xf32>
    %192 = arith.mulf %191, %191 : vector<24x128xf32>
    %cst_139 = arith.constant dense<0.000000e+00> : vector<24xf32>
    %193 = vector.multi_reduction <add>, %192, %cst_139 [1] : vector<24x128xf32> to vector<24xf32>
    %194 = vector.shape_cast %193 : vector<24xf32> to vector<24x1xf32>
    %cst_140 = arith.constant 1.280000e+02 : f32
    %195 = vector.broadcast %cst_140 : f32 to vector<24x1xf32>
    %196 = arith.divf %194, %195 : vector<24x1xf32>
    %197 = vector.broadcast %189 : vector<24x1xf32> to vector<24x128xf32>
    %198 = arith.subf %185, %197 : vector<24x128xf32>
    %cst_141 = arith.constant 9.99999974E-6 : f32
    %199 = vector.broadcast %cst_141 : f32 to vector<24x1xf32>
    %200 = arith.addf %196, %199 : vector<24x1xf32>
    %201 = math.rsqrt %200 : vector<24x1xf32>
    %202 = vector.broadcast %201 : vector<24x1xf32> to vector<24x128xf32>
    %203 = arith.mulf %198, %202 : vector<24x128xf32>
    %204 = vector.broadcast %141 : vector<1x128xf32> to vector<24x128xf32>
    %205 = arith.mulf %203, %204 : vector<24x128xf32>
    %206 = vector.broadcast %143 : vector<1x128xf32> to vector<24x128xf32>
    %207 = arith.addf %205, %206 : vector<24x128xf32>
    %cst_142 = arith.constant dense<0.000000e+00> : vector<3x128xf32>
    %208 = tpu.matmul %3, %139, %cst_142 {dimension_numbers = #tpu.dot_dimension_numbers<[1], [0], [0], [1], [0, 0, 1, 1], [], []>} : vector<3x16xf32>, vector<16x128xf32>, vector<3x128xf32> -> vector<3x128xf32>
    %209 = vector.shape_cast %207 : vector<24x128xf32> to vector<3x8x128xf32>
    %210 = vector.shape_cast %208 : vector<3x128xf32> to vector<3x1x128xf32>
    %211 = vector.broadcast %210 : vector<3x1x128xf32> to vector<3x8x128xf32>
    %212 = arith.addf %209, %211 : vector<3x8x128xf32>
    %213 = vector.shape_cast %212 : vector<3x8x128xf32> to vector<24x128xf32>
    %cst_143 = arith.constant dense<0.000000e+00> : vector<24x256xf32>
    %214 = tpu.matmul %213, %145, %cst_143 {dimension_numbers = #tpu.dot_dimension_numbers<[1], [0], [0], [1], [0, 0, 1, 1], [], []>} : vector<24x128xf32>, vector<128x256xf32>, vector<24x256xf32> -> vector<24x256xf32>
    %215 = vector.broadcast %147 : vector<1x256xf32> to vector<24x256xf32>
    %216 = arith.addf %214, %215 : vector<24x256xf32>
    %cst_144 = arith.constant 0.000000e+00 : f32
    %217 = vector.broadcast %cst_144 : f32 to vector<24x256xf32>
    %218 = arith.maximumf %216, %217 : vector<24x256xf32>
    %cst_145 = arith.constant dense<0.000000e+00> : vector<24x128xf32>
    %219 = tpu.matmul %218, %149, %cst_145 {dimension_numbers = #tpu.dot_dimension_numbers<[1], [0], [0], [1], [0, 0, 1, 1], [], []>} : vector<24x256xf32>, vector<256x128xf32>, vector<24x128xf32> -> vector<24x128xf32>
    %220 = vector.broadcast %151 : vector<1x128xf32> to vector<24x128xf32>
    %221 = arith.addf %219, %220 : vector<24x128xf32>
    %222 = arith.addf %213, %221 : vector<24x128xf32>
    %cst_146 = arith.constant dense<0.000000e+00> : vector<24xf32>
    %223 = vector.multi_reduction <add>, %222, %cst_146 [1] : vector<24x128xf32> to vector<24xf32>
    %224 = vector.shape_cast %223 : vector<24xf32> to vector<24x1xf32>
    %cst_147 = arith.constant 1.280000e+02 : f32
    %225 = vector.broadcast %cst_147 : f32 to vector<24x1xf32>
    %226 = arith.divf %224, %225 : vector<24x1xf32>
    %227 = vector.broadcast %226 : vector<24x1xf32> to vector<24x128xf32>
    %228 = arith.subf %222, %227 : vector<24x128xf32>
    %229 = arith.mulf %228, %228 : vector<24x128xf32>
    %cst_148 = arith.constant dense<0.000000e+00> : vector<24xf32>
    %230 = vector.multi_reduction <add>, %229, %cst_148 [1] : vector<24x128xf32> to vector<24xf32>
    %231 = vector.shape_cast %230 : vector<24xf32> to vector<24x1xf32>
    %cst_149 = arith.constant 1.280000e+02 : f32
    %232 = vector.broadcast %cst_149 : f32 to vector<24x1xf32>
    %233 = arith.divf %231, %232 : vector<24x1xf32>
    %234 = vector.broadcast %226 : vector<24x1xf32> to vector<24x128xf32>
    %235 = arith.subf %222, %234 : vector<24x128xf32>
    %cst_150 = arith.constant 9.99999974E-6 : f32
    %236 = vector.broadcast %cst_150 : f32 to vector<24x1xf32>
    %237 = arith.addf %233, %236 : vector<24x1xf32>
    %238 = math.rsqrt %237 : vector<24x1xf32>
    %239 = vector.broadcast %238 : vector<24x1xf32> to vector<24x128xf32>
    %240 = arith.mulf %235, %239 : vector<24x128xf32>
    %241 = vector.broadcast %153 : vector<1x128xf32> to vector<24x128xf32>
    %242 = arith.mulf %240, %241 : vector<24x128xf32>
    %243 = vector.broadcast %155 : vector<1x128xf32> to vector<24x128xf32>
    %244 = arith.addf %242, %243 : vector<24x128xf32>
    %245 = vector.broadcast %7 : vector<24x1xf32> to vector<24x128xf32>
    %246 = arith.mulf %244, %245 : vector<24x128xf32>
    %cst_151 = arith.constant dense<0.000000e+00> : vector<3x1xf32>
    %247 = vector.multi_reduction <add>, %5, %cst_151 [2] : vector<3x1x8xf32> to vector<3x1xf32>
    %cst_152 = arith.constant 1.000000e-01 : f32
    %248 = vector.broadcast %cst_152 : f32 to vector<3x1xf32>
    %249 = arith.maximumf %247, %248 : vector<3x1xf32>
    %250 = vector.shape_cast %246 : vector<24x128xf32> to vector<3x8x128xf32>
    %cst_153 = arith.constant dense<0.000000e+00> : vector<3x128xf32>
    %251 = vector.multi_reduction <add>, %250, %cst_153 [1] : vector<3x8x128xf32> to vector<3x128xf32>
    %cst_154 = arith.constant 1.000000e+00 : f32
    %252 = vector.broadcast %cst_154 : f32 to vector<3x1xf32>
    %253 = arith.divf %252, %249 : vector<3x1xf32>
    %254 = vector.broadcast %253 : vector<3x1xf32> to vector<3x128xf32>
    %255 = arith.mulf %251, %254 : vector<3x128xf32>
    %c0_155 = arith.constant 0 : index
    %c0_156 = arith.constant 0 : index
    %c0_157 = arith.constant 0 : index
    %256 = vector.load %arg21[%c0_155, %c0_156, %c0_157] : memref<1x128x128xf32, #tpu.memory_space<vmem>>, vector<1x128x128xf32>
    %257 = vector.shape_cast %256 : vector<1x128x128xf32> to vector<128x128xf32>
    %c0_158 = arith.constant 0 : index
    %c0_159 = arith.constant 0 : index
    %c0_160 = arith.constant 0 : index
    %258 = vector.load %arg22[%c0_158, %c0_159, %c0_160] : memref<1x128x128xf32, #tpu.memory_space<vmem>>, vector<1x128x128xf32>
    %259 = vector.shape_cast %258 : vector<1x128x128xf32> to vector<128x128xf32>
    %c0_161 = arith.constant 0 : index
    %c0_162 = arith.constant 0 : index
    %c0_163 = arith.constant 0 : index
    %260 = vector.load %arg23[%c0_161, %c0_162, %c0_163] : memref<1x128x128xf32, #tpu.memory_space<vmem>>, vector<1x128x128xf32>
    %261 = vector.shape_cast %260 : vector<1x128x128xf32> to vector<128x128xf32>
    %c0_164 = arith.constant 0 : index
    %c0_165 = arith.constant 0 : index
    %c0_166 = arith.constant 0 : index
    %262 = vector.load %arg24[%c0_164, %c0_165, %c0_166] : memref<1x128x128xf32, #tpu.memory_space<vmem>>, vector<1x128x128xf32>
    %263 = vector.shape_cast %262 : vector<1x128x128xf32> to vector<128x128xf32>
    %c0_167 = arith.constant 0 : index
    %c0_168 = arith.constant 0 : index
    %c0_169 = arith.constant 0 : index
    %264 = vector.load %arg25[%c0_167, %c0_168, %c0_169] : memref<1x1x128xf32, #tpu.memory_space<vmem>>, vector<1x1x128xf32>
    %265 = vector.shape_cast %264 : vector<1x1x128xf32> to vector<1x128xf32>
    %c0_170 = arith.constant 0 : index
    %c0_171 = arith.constant 0 : index
    %c0_172 = arith.constant 0 : index
    %266 = vector.load %arg26[%c0_170, %c0_171, %c0_172] : memref<1x1x128xf32, #tpu.memory_space<vmem>>, vector<1x1x128xf32>
    %267 = vector.shape_cast %266 : vector<1x1x128xf32> to vector<1x128xf32>
    %c0_173 = arith.constant 0 : index
    %c0_174 = arith.constant 0 : index
    %c0_175 = arith.constant 0 : index
    %268 = vector.load %arg27[%c0_173, %c0_174, %c0_175] : memref<1x128x256xf32, #tpu.memory_space<vmem>>, vector<1x128x256xf32>
    %269 = vector.shape_cast %268 : vector<1x128x256xf32> to vector<128x256xf32>
    %c0_176 = arith.constant 0 : index
    %c0_177 = arith.constant 0 : index
    %c0_178 = arith.constant 0 : index
    %270 = vector.load %arg28[%c0_176, %c0_177, %c0_178] : memref<1x1x256xf32, #tpu.memory_space<vmem>>, vector<1x1x256xf32>
    %271 = vector.shape_cast %270 : vector<1x1x256xf32> to vector<1x256xf32>
    %c0_179 = arith.constant 0 : index
    %c0_180 = arith.constant 0 : index
    %c0_181 = arith.constant 0 : index
    %272 = vector.load %arg29[%c0_179, %c0_180, %c0_181] : memref<1x256x128xf32, #tpu.memory_space<vmem>>, vector<1x256x128xf32>
    %273 = vector.shape_cast %272 : vector<1x256x128xf32> to vector<256x128xf32>
    %c0_182 = arith.constant 0 : index
    %c0_183 = arith.constant 0 : index
    %c0_184 = arith.constant 0 : index
    %274 = vector.load %arg30[%c0_182, %c0_183, %c0_184] : memref<1x1x128xf32, #tpu.memory_space<vmem>>, vector<1x1x128xf32>
    %275 = vector.shape_cast %274 : vector<1x1x128xf32> to vector<1x128xf32>
    %c0_185 = arith.constant 0 : index
    %c0_186 = arith.constant 0 : index
    %c0_187 = arith.constant 0 : index
    %276 = vector.load %arg31[%c0_185, %c0_186, %c0_187] : memref<1x1x128xf32, #tpu.memory_space<vmem>>, vector<1x1x128xf32>
    %277 = vector.shape_cast %276 : vector<1x1x128xf32> to vector<1x128xf32>
    %c0_188 = arith.constant 0 : index
    %c0_189 = arith.constant 0 : index
    %c0_190 = arith.constant 0 : index
    %278 = vector.load %arg32[%c0_188, %c0_189, %c0_190] : memref<1x1x128xf32, #tpu.memory_space<vmem>>, vector<1x1x128xf32>
    %279 = vector.shape_cast %278 : vector<1x1x128xf32> to vector<1x128xf32>
    %cst_191 = arith.constant dense<0.000000e+00> : vector<3x128xf32>
    %280 = tpu.matmul %255, %257, %cst_191 {dimension_numbers = #tpu.dot_dimension_numbers<[1], [0], [0], [1], [0, 0, 1, 1], [], []>} : vector<3x128xf32>, vector<128x128xf32>, vector<3x128xf32> -> vector<3x128xf32>
    %cst_192 = arith.constant dense<0.000000e+00> : vector<3x128xf32>
    %281 = tpu.matmul %255, %259, %cst_192 {dimension_numbers = #tpu.dot_dimension_numbers<[1], [0], [0], [1], [0, 0, 1, 1], [], []>} : vector<3x128xf32>, vector<128x128xf32>, vector<3x128xf32> -> vector<3x128xf32>
    %cst_193 = arith.constant dense<0.000000e+00> : vector<3x128xf32>
    %282 = tpu.matmul %255, %261, %cst_193 {dimension_numbers = #tpu.dot_dimension_numbers<[1], [0], [0], [1], [0, 0, 1, 1], [], []>} : vector<3x128xf32>, vector<128x128xf32>, vector<3x128xf32> -> vector<3x128xf32>
    %283 = vector.shape_cast %280 : vector<3x128xf32> to vector<1x3x128xf32>
    %284 = vector.shape_cast %281 : vector<3x128xf32> to vector<1x3x128xf32>
    %285 = vector.shape_cast %282 : vector<3x128xf32> to vector<1x3x128xf32>
    "tpu.trace_start"() <{level = 10 : i32, message = "gqd,gkd->gqk"}> : () -> ()
    %cst_194 = arith.constant dense<0.000000e+00> : vector<1x3x3xf32>
    %286 = tpu.matmul %283, %284, %cst_194 {dimension_numbers = #tpu.dot_dimension_numbers<[2], [2], [1], [1], [0, 0, 0, 1, 1, 1], [0], [0]>} : vector<1x3x128xf32>, vector<1x3x128xf32>, vector<1x3x3xf32> -> vector<1x3x3xf32>
    "tpu.trace_stop"() : () -> ()
    %cst_195 = arith.constant 0.0883883461 : f32
    %287 = vector.broadcast %cst_195 : f32 to vector<1x3x3xf32>
    %288 = arith.mulf %286, %287 : vector<1x3x3xf32>
    %cst_196 = arith.constant 0.000000e+00 : f32
    %289 = vector.broadcast %cst_196 : f32 to vector<1x1x3xf32>
    %290 = arith.cmpf ogt, %9, %289 : vector<1x1x3xf32>
    %cst_197 = arith.constant -1.000000e+09 : f32
    %291 = vector.shape_cast %290 : vector<1x1x3xi1> to vector<1x1x3xi1>
    %292 = vector.broadcast %291 : vector<1x1x3xi1> to vector<1x3x3xi1>
    %293 = vector.broadcast %cst_197 : f32 to vector<1x3x3xf32>
    %294 = arith.select %292, %288, %293 : vector<1x3x3xi1>, vector<1x3x3xf32>
    %cst_198 = arith.constant dense<0xFF800000> : vector<1x3xf32>
    %295 = vector.multi_reduction <maximumf>, %294, %cst_198 [2] : vector<1x3x3xf32> to vector<1x3xf32>
    %296 = vector.shape_cast %295 : vector<1x3xf32> to vector<1x3x1xf32>
    %297 = vector.broadcast %296 : vector<1x3x1xf32> to vector<1x3x3xf32>
    %298 = arith.subf %294, %297 : vector<1x3x3xf32>
    %299 = math.exp %298 : vector<1x3x3xf32>
    %cst_199 = arith.constant dense<0.000000e+00> : vector<1x3xf32>
    %300 = vector.multi_reduction <add>, %299, %cst_199 [2] : vector<1x3x3xf32> to vector<1x3xf32>
    %301 = vector.shape_cast %300 : vector<1x3xf32> to vector<1x3x1xf32>
    %cst_200 = arith.constant 1.000000e+00 : f32
    %302 = vector.broadcast %cst_200 : f32 to vector<1x3x1xf32>
    %303 = arith.divf %302, %301 : vector<1x3x1xf32>
    %304 = vector.broadcast %303 : vector<1x3x1xf32> to vector<1x3x3xf32>
    %305 = arith.mulf %299, %304 : vector<1x3x3xf32>
    "tpu.trace_start"() <{level = 10 : i32, message = "gqk,gkd->gqd"}> : () -> ()
    %cst_201 = arith.constant dense<0.000000e+00> : vector<1x3x128xf32>
    %306 = tpu.matmul %305, %285, %cst_201 {dimension_numbers = #tpu.dot_dimension_numbers<[2], [1], [1], [2], [0, 0, 0, 1, 1, 2], [0], [0]>} : vector<1x3x3xf32>, vector<1x3x128xf32>, vector<1x3x128xf32> -> vector<1x3x128xf32>
    "tpu.trace_stop"() : () -> ()
    %307 = vector.shape_cast %306 : vector<1x3x128xf32> to vector<3x128xf32>
    %cst_202 = arith.constant dense<0.000000e+00> : vector<3x128xf32>
    %308 = tpu.matmul %307, %263, %cst_202 {dimension_numbers = #tpu.dot_dimension_numbers<[1], [0], [0], [1], [0, 0, 1, 1], [], []>} : vector<3x128xf32>, vector<128x128xf32>, vector<3x128xf32> -> vector<3x128xf32>
    %309 = arith.addf %255, %308 : vector<3x128xf32>
    %cst_203 = arith.constant dense<0.000000e+00> : vector<3xf32>
    %310 = vector.multi_reduction <add>, %309, %cst_203 [1] : vector<3x128xf32> to vector<3xf32>
    %311 = vector.shape_cast %310 : vector<3xf32> to vector<3x1xf32>
    %cst_204 = arith.constant 1.280000e+02 : f32
    %312 = vector.broadcast %cst_204 : f32 to vector<3x1xf32>
    %313 = arith.divf %311, %312 : vector<3x1xf32>
    %314 = vector.broadcast %313 : vector<3x1xf32> to vector<3x128xf32>
    %315 = arith.subf %309, %314 : vector<3x128xf32>
    %316 = arith.mulf %315, %315 : vector<3x128xf32>
    %cst_205 = arith.constant dense<0.000000e+00> : vector<3xf32>
    %317 = vector.multi_reduction <add>, %316, %cst_205 [1] : vector<3x128xf32> to vector<3xf32>
    %318 = vector.shape_cast %317 : vector<3xf32> to vector<3x1xf32>
    %cst_206 = arith.constant 1.280000e+02 : f32
    %319 = vector.broadcast %cst_206 : f32 to vector<3x1xf32>
    %320 = arith.divf %318, %319 : vector<3x1xf32>
    %321 = vector.broadcast %313 : vector<3x1xf32> to vector<3x128xf32>
    %322 = arith.subf %309, %321 : vector<3x128xf32>
    %cst_207 = arith.constant 9.99999974E-6 : f32
    %323 = vector.broadcast %cst_207 : f32 to vector<3x1xf32>
    %324 = arith.addf %320, %323 : vector<3x1xf32>
    %325 = math.rsqrt %324 : vector<3x1xf32>
    %326 = vector.broadcast %325 : vector<3x1xf32> to vector<3x128xf32>
    %327 = arith.mulf %322, %326 : vector<3x128xf32>
    %328 = vector.broadcast %265 : vector<1x128xf32> to vector<3x128xf32>
    %329 = arith.mulf %327, %328 : vector<3x128xf32>
    %330 = vector.broadcast %267 : vector<1x128xf32> to vector<3x128xf32>
    %331 = arith.addf %329, %330 : vector<3x128xf32>
    %cst_208 = arith.constant dense<0.000000e+00> : vector<3x256xf32>
    %332 = tpu.matmul %331, %269, %cst_208 {dimension_numbers = #tpu.dot_dimension_numbers<[1], [0], [0], [1], [0, 0, 1, 1], [], []>} : vector<3x128xf32>, vector<128x256xf32>, vector<3x256xf32> -> vector<3x256xf32>
    %333 = vector.broadcast %271 : vector<1x256xf32> to vector<3x256xf32>
    %334 = arith.addf %332, %333 : vector<3x256xf32>
    %cst_209 = arith.constant 0.000000e+00 : f32
    %335 = vector.broadcast %cst_209 : f32 to vector<3x256xf32>
    %336 = arith.maximumf %334, %335 : vector<3x256xf32>
    %cst_210 = arith.constant dense<0.000000e+00> : vector<3x128xf32>
    %337 = tpu.matmul %336, %273, %cst_210 {dimension_numbers = #tpu.dot_dimension_numbers<[1], [0], [0], [1], [0, 0, 1, 1], [], []>} : vector<3x256xf32>, vector<256x128xf32>, vector<3x128xf32> -> vector<3x128xf32>
    %338 = vector.broadcast %275 : vector<1x128xf32> to vector<3x128xf32>
    %339 = arith.addf %337, %338 : vector<3x128xf32>
    %340 = arith.addf %331, %339 : vector<3x128xf32>
    %cst_211 = arith.constant dense<0.000000e+00> : vector<3xf32>
    %341 = vector.multi_reduction <add>, %340, %cst_211 [1] : vector<3x128xf32> to vector<3xf32>
    %342 = vector.shape_cast %341 : vector<3xf32> to vector<3x1xf32>
    %cst_212 = arith.constant 1.280000e+02 : f32
    %343 = vector.broadcast %cst_212 : f32 to vector<3x1xf32>
    %344 = arith.divf %342, %343 : vector<3x1xf32>
    %345 = vector.broadcast %344 : vector<3x1xf32> to vector<3x128xf32>
    %346 = arith.subf %340, %345 : vector<3x128xf32>
    %347 = arith.mulf %346, %346 : vector<3x128xf32>
    %cst_213 = arith.constant dense<0.000000e+00> : vector<3xf32>
    %348 = vector.multi_reduction <add>, %347, %cst_213 [1] : vector<3x128xf32> to vector<3xf32>
    %349 = vector.shape_cast %348 : vector<3xf32> to vector<3x1xf32>
    %cst_214 = arith.constant 1.280000e+02 : f32
    %350 = vector.broadcast %cst_214 : f32 to vector<3x1xf32>
    %351 = arith.divf %349, %350 : vector<3x1xf32>
    %352 = vector.broadcast %344 : vector<3x1xf32> to vector<3x128xf32>
    %353 = arith.subf %340, %352 : vector<3x128xf32>
    %cst_215 = arith.constant 9.99999974E-6 : f32
    %354 = vector.broadcast %cst_215 : f32 to vector<3x1xf32>
    %355 = arith.addf %351, %354 : vector<3x1xf32>
    %356 = math.rsqrt %355 : vector<3x1xf32>
    %357 = vector.broadcast %356 : vector<3x1xf32> to vector<3x128xf32>
    %358 = arith.mulf %353, %357 : vector<3x128xf32>
    %359 = vector.broadcast %277 : vector<1x128xf32> to vector<3x128xf32>
    %360 = arith.mulf %358, %359 : vector<3x128xf32>
    %361 = vector.broadcast %279 : vector<1x128xf32> to vector<3x128xf32>
    %362 = arith.addf %360, %361 : vector<3x128xf32>
    %363 = vector.broadcast %11 : vector<3x1xf32> to vector<3x128xf32>
    %364 = arith.mulf %362, %363 : vector<3x128xf32>
    %365 = tpu.concatenate %3, %364 in 1 : vector<3x16xf32>, vector<3x128xf32> -> vector<3x144xf32>
    %c0_216 = arith.constant 0 : index
    %c0_217 = arith.constant 0 : index
    %c0_218 = arith.constant 0 : index
    %366 = vector.load %arg33[%c0_216, %c0_217, %c0_218] : memref<2x128x128xf32, #tpu.memory_space<vmem>>, vector<1x128x128xf32>
    %367 = vector.shape_cast %366 : vector<1x128x128xf32> to vector<128x128xf32>
    %c0_219 = arith.constant 0 : index
    %c0_220 = arith.constant 0 : index
    %c0_221 = arith.constant 0 : index
    %368 = vector.load %arg34[%c0_219, %c0_220, %c0_221] : memref<2x128x128xf32, #tpu.memory_space<vmem>>, vector<1x128x128xf32>
    %369 = vector.shape_cast %368 : vector<1x128x128xf32> to vector<128x128xf32>
    %c0_222 = arith.constant 0 : index
    %c0_223 = arith.constant 0 : index
    %c0_224 = arith.constant 0 : index
    %370 = vector.load %arg35[%c0_222, %c0_223, %c0_224] : memref<2x128x128xf32, #tpu.memory_space<vmem>>, vector<1x128x128xf32>
    %371 = vector.shape_cast %370 : vector<1x128x128xf32> to vector<128x128xf32>
    %c0_225 = arith.constant 0 : index
    %c0_226 = arith.constant 0 : index
    %c0_227 = arith.constant 0 : index
    %372 = vector.load %arg36[%c0_225, %c0_226, %c0_227] : memref<2x128x128xf32, #tpu.memory_space<vmem>>, vector<1x128x128xf32>
    %373 = vector.shape_cast %372 : vector<1x128x128xf32> to vector<128x128xf32>
    %c0_228 = arith.constant 0 : index
    %c0_229 = arith.constant 0 : index
    %c0_230 = arith.constant 0 : index
    %374 = vector.load %arg37[%c0_228, %c0_229, %c0_230] : memref<2x144x128xf32, #tpu.memory_space<vmem>>, vector<1x144x128xf32>
    %375 = vector.shape_cast %374 : vector<1x144x128xf32> to vector<144x128xf32>
    %c0_231 = arith.constant 0 : index
    %c0_232 = arith.constant 0 : index
    %c0_233 = arith.constant 0 : index
    %376 = vector.load %arg38[%c0_231, %c0_232, %c0_233] : memref<2x1x128xf32, #tpu.memory_space<vmem>>, vector<1x1x128xf32>
    %377 = vector.shape_cast %376 : vector<1x1x128xf32> to vector<1x128xf32>
    %c0_234 = arith.constant 0 : index
    %c0_235 = arith.constant 0 : index
    %c0_236 = arith.constant 0 : index
    %378 = vector.load %arg39[%c0_234, %c0_235, %c0_236] : memref<2x1x128xf32, #tpu.memory_space<vmem>>, vector<1x1x128xf32>
    %379 = vector.shape_cast %378 : vector<1x1x128xf32> to vector<1x128xf32>
    %c0_237 = arith.constant 0 : index
    %c0_238 = arith.constant 0 : index
    %c0_239 = arith.constant 0 : index
    %380 = vector.load %arg40[%c0_237, %c0_238, %c0_239] : memref<2x128x256xf32, #tpu.memory_space<vmem>>, vector<1x128x256xf32>
    %381 = vector.shape_cast %380 : vector<1x128x256xf32> to vector<128x256xf32>
    %c0_240 = arith.constant 0 : index
    %c0_241 = arith.constant 0 : index
    %c0_242 = arith.constant 0 : index
    %382 = vector.load %arg41[%c0_240, %c0_241, %c0_242] : memref<2x1x256xf32, #tpu.memory_space<vmem>>, vector<1x1x256xf32>
    %383 = vector.shape_cast %382 : vector<1x1x256xf32> to vector<1x256xf32>
    %c0_243 = arith.constant 0 : index
    %c0_244 = arith.constant 0 : index
    %c0_245 = arith.constant 0 : index
    %384 = vector.load %arg42[%c0_243, %c0_244, %c0_245] : memref<2x256x128xf32, #tpu.memory_space<vmem>>, vector<1x256x128xf32>
    %385 = vector.shape_cast %384 : vector<1x256x128xf32> to vector<256x128xf32>
    %c0_246 = arith.constant 0 : index
    %c0_247 = arith.constant 0 : index
    %c0_248 = arith.constant 0 : index
    %386 = vector.load %arg43[%c0_246, %c0_247, %c0_248] : memref<2x1x128xf32, #tpu.memory_space<vmem>>, vector<1x1x128xf32>
    %387 = vector.shape_cast %386 : vector<1x1x128xf32> to vector<1x128xf32>
    %c0_249 = arith.constant 0 : index
    %c0_250 = arith.constant 0 : index
    %c0_251 = arith.constant 0 : index
    %388 = vector.load %arg44[%c0_249, %c0_250, %c0_251] : memref<2x1x128xf32, #tpu.memory_space<vmem>>, vector<1x1x128xf32>
    %389 = vector.shape_cast %388 : vector<1x1x128xf32> to vector<1x128xf32>
    %c0_252 = arith.constant 0 : index
    %c0_253 = arith.constant 0 : index
    %c0_254 = arith.constant 0 : index
    %390 = vector.load %arg45[%c0_252, %c0_253, %c0_254] : memref<2x1x128xf32, #tpu.memory_space<vmem>>, vector<1x1x128xf32>
    %391 = vector.shape_cast %390 : vector<1x1x128xf32> to vector<1x128xf32>
    %cst_255 = arith.constant dense<0.000000e+00> : vector<24x128xf32>
    %392 = tpu.matmul %246, %367, %cst_255 {dimension_numbers = #tpu.dot_dimension_numbers<[1], [0], [0], [1], [0, 0, 1, 1], [], []>} : vector<24x128xf32>, vector<128x128xf32>, vector<24x128xf32> -> vector<24x128xf32>
    %cst_256 = arith.constant dense<0.000000e+00> : vector<24x128xf32>
    %393 = tpu.matmul %246, %369, %cst_256 {dimension_numbers = #tpu.dot_dimension_numbers<[1], [0], [0], [1], [0, 0, 1, 1], [], []>} : vector<24x128xf32>, vector<128x128xf32>, vector<24x128xf32> -> vector<24x128xf32>
    %cst_257 = arith.constant dense<0.000000e+00> : vector<24x128xf32>
    %394 = tpu.matmul %246, %371, %cst_257 {dimension_numbers = #tpu.dot_dimension_numbers<[1], [0], [0], [1], [0, 0, 1, 1], [], []>} : vector<24x128xf32>, vector<128x128xf32>, vector<24x128xf32> -> vector<24x128xf32>
    %395 = vector.shape_cast %392 : vector<24x128xf32> to vector<3x8x128xf32>
    %396 = vector.shape_cast %393 : vector<24x128xf32> to vector<3x8x128xf32>
    %397 = vector.shape_cast %394 : vector<24x128xf32> to vector<3x8x128xf32>
    "tpu.trace_start"() <{level = 10 : i32, message = "gqd,gkd->gqk"}> : () -> ()
    %cst_258 = arith.constant dense<0.000000e+00> : vector<3x8x8xf32>
    %398 = tpu.matmul %395, %396, %cst_258 {dimension_numbers = #tpu.dot_dimension_numbers<[2], [2], [1], [1], [0, 0, 0, 1, 1, 1], [0], [0]>} : vector<3x8x128xf32>, vector<3x8x128xf32>, vector<3x8x8xf32> -> vector<3x8x8xf32>
    "tpu.trace_stop"() : () -> ()
    %cst_259 = arith.constant 0.0883883461 : f32
    %399 = vector.broadcast %cst_259 : f32 to vector<3x8x8xf32>
    %400 = arith.mulf %398, %399 : vector<3x8x8xf32>
    %cst_260 = arith.constant 0.000000e+00 : f32
    %401 = vector.broadcast %cst_260 : f32 to vector<3x1x8xf32>
    %402 = arith.cmpf ogt, %5, %401 : vector<3x1x8xf32>
    %cst_261 = arith.constant -1.000000e+09 : f32
    %403 = vector.shape_cast %402 : vector<3x1x8xi1> to vector<3x1x8xi1>
    %404 = vector.broadcast %403 : vector<3x1x8xi1> to vector<3x8x8xi1>
    %405 = vector.broadcast %cst_261 : f32 to vector<3x8x8xf32>
    %406 = arith.select %404, %400, %405 : vector<3x8x8xi1>, vector<3x8x8xf32>
    %cst_262 = arith.constant dense<0xFF800000> : vector<3x8xf32>
    %407 = vector.multi_reduction <maximumf>, %406, %cst_262 [2] : vector<3x8x8xf32> to vector<3x8xf32>
    %408 = vector.shape_cast %407 : vector<3x8xf32> to vector<3x8x1xf32>
    %409 = vector.broadcast %408 : vector<3x8x1xf32> to vector<3x8x8xf32>
    %410 = arith.subf %406, %409 : vector<3x8x8xf32>
    %411 = math.exp %410 : vector<3x8x8xf32>
    %cst_263 = arith.constant dense<0.000000e+00> : vector<3x8xf32>
    %412 = vector.multi_reduction <add>, %411, %cst_263 [2] : vector<3x8x8xf32> to vector<3x8xf32>
    %413 = vector.shape_cast %412 : vector<3x8xf32> to vector<3x8x1xf32>
    %cst_264 = arith.constant 1.000000e+00 : f32
    %414 = vector.broadcast %cst_264 : f32 to vector<3x8x1xf32>
    %415 = arith.divf %414, %413 : vector<3x8x1xf32>
    %416 = vector.broadcast %415 : vector<3x8x1xf32> to vector<3x8x8xf32>
    %417 = arith.mulf %411, %416 : vector<3x8x8xf32>
    "tpu.trace_start"() <{level = 10 : i32, message = "gqk,gkd->gqd"}> : () -> ()
    %cst_265 = arith.constant dense<0.000000e+00> : vector<3x8x128xf32>
    %418 = tpu.matmul %417, %397, %cst_265 {dimension_numbers = #tpu.dot_dimension_numbers<[2], [1], [1], [2], [0, 0, 0, 1, 1, 2], [0], [0]>} : vector<3x8x8xf32>, vector<3x8x128xf32>, vector<3x8x128xf32> -> vector<3x8x128xf32>
    "tpu.trace_stop"() : () -> ()
    %419 = vector.shape_cast %418 : vector<3x8x128xf32> to vector<24x128xf32>
    %cst_266 = arith.constant dense<0.000000e+00> : vector<24x128xf32>
    %420 = tpu.matmul %419, %373, %cst_266 {dimension_numbers = #tpu.dot_dimension_numbers<[1], [0], [0], [1], [0, 0, 1, 1], [], []>} : vector<24x128xf32>, vector<128x128xf32>, vector<24x128xf32> -> vector<24x128xf32>
    %421 = arith.addf %246, %420 : vector<24x128xf32>
    %cst_267 = arith.constant dense<0.000000e+00> : vector<24xf32>
    %422 = vector.multi_reduction <add>, %421, %cst_267 [1] : vector<24x128xf32> to vector<24xf32>
    %423 = vector.shape_cast %422 : vector<24xf32> to vector<24x1xf32>
    %cst_268 = arith.constant 1.280000e+02 : f32
    %424 = vector.broadcast %cst_268 : f32 to vector<24x1xf32>
    %425 = arith.divf %423, %424 : vector<24x1xf32>
    %426 = vector.broadcast %425 : vector<24x1xf32> to vector<24x128xf32>
    %427 = arith.subf %421, %426 : vector<24x128xf32>
    %428 = arith.mulf %427, %427 : vector<24x128xf32>
    %cst_269 = arith.constant dense<0.000000e+00> : vector<24xf32>
    %429 = vector.multi_reduction <add>, %428, %cst_269 [1] : vector<24x128xf32> to vector<24xf32>
    %430 = vector.shape_cast %429 : vector<24xf32> to vector<24x1xf32>
    %cst_270 = arith.constant 1.280000e+02 : f32
    %431 = vector.broadcast %cst_270 : f32 to vector<24x1xf32>
    %432 = arith.divf %430, %431 : vector<24x1xf32>
    %433 = vector.broadcast %425 : vector<24x1xf32> to vector<24x128xf32>
    %434 = arith.subf %421, %433 : vector<24x128xf32>
    %cst_271 = arith.constant 9.99999974E-6 : f32
    %435 = vector.broadcast %cst_271 : f32 to vector<24x1xf32>
    %436 = arith.addf %432, %435 : vector<24x1xf32>
    %437 = math.rsqrt %436 : vector<24x1xf32>
    %438 = vector.broadcast %437 : vector<24x1xf32> to vector<24x128xf32>
    %439 = arith.mulf %434, %438 : vector<24x128xf32>
    %440 = vector.broadcast %377 : vector<1x128xf32> to vector<24x128xf32>
    %441 = arith.mulf %439, %440 : vector<24x128xf32>
    %442 = vector.broadcast %379 : vector<1x128xf32> to vector<24x128xf32>
    %443 = arith.addf %441, %442 : vector<24x128xf32>
    %cst_272 = arith.constant dense<0.000000e+00> : vector<3x128xf32>
    %444 = tpu.matmul %365, %375, %cst_272 {dimension_numbers = #tpu.dot_dimension_numbers<[1], [0], [0], [1], [0, 0, 1, 1], [], []>} : vector<3x144xf32>, vector<144x128xf32>, vector<3x128xf32> -> vector<3x128xf32>
    %445 = vector.shape_cast %443 : vector<24x128xf32> to vector<3x8x128xf32>
    %446 = vector.shape_cast %444 : vector<3x128xf32> to vector<3x1x128xf32>
    %447 = vector.broadcast %446 : vector<3x1x128xf32> to vector<3x8x128xf32>
    %448 = arith.addf %445, %447 : vector<3x8x128xf32>
    %449 = vector.shape_cast %448 : vector<3x8x128xf32> to vector<24x128xf32>
    %cst_273 = arith.constant dense<0.000000e+00> : vector<24x256xf32>
    %450 = tpu.matmul %449, %381, %cst_273 {dimension_numbers = #tpu.dot_dimension_numbers<[1], [0], [0], [1], [0, 0, 1, 1], [], []>} : vector<24x128xf32>, vector<128x256xf32>, vector<24x256xf32> -> vector<24x256xf32>
    %451 = vector.broadcast %383 : vector<1x256xf32> to vector<24x256xf32>
    %452 = arith.addf %450, %451 : vector<24x256xf32>
    %cst_274 = arith.constant 0.000000e+00 : f32
    %453 = vector.broadcast %cst_274 : f32 to vector<24x256xf32>
    %454 = arith.maximumf %452, %453 : vector<24x256xf32>
    %cst_275 = arith.constant dense<0.000000e+00> : vector<24x128xf32>
    %455 = tpu.matmul %454, %385, %cst_275 {dimension_numbers = #tpu.dot_dimension_numbers<[1], [0], [0], [1], [0, 0, 1, 1], [], []>} : vector<24x256xf32>, vector<256x128xf32>, vector<24x128xf32> -> vector<24x128xf32>
    %456 = vector.broadcast %387 : vector<1x128xf32> to vector<24x128xf32>
    %457 = arith.addf %455, %456 : vector<24x128xf32>
    %458 = arith.addf %449, %457 : vector<24x128xf32>
    %cst_276 = arith.constant dense<0.000000e+00> : vector<24xf32>
    %459 = vector.multi_reduction <add>, %458, %cst_276 [1] : vector<24x128xf32> to vector<24xf32>
    %460 = vector.shape_cast %459 : vector<24xf32> to vector<24x1xf32>
    %cst_277 = arith.constant 1.280000e+02 : f32
    %461 = vector.broadcast %cst_277 : f32 to vector<24x1xf32>
    %462 = arith.divf %460, %461 : vector<24x1xf32>
    %463 = vector.broadcast %462 : vector<24x1xf32> to vector<24x128xf32>
    %464 = arith.subf %458, %463 : vector<24x128xf32>
    %465 = arith.mulf %464, %464 : vector<24x128xf32>
    %cst_278 = arith.constant dense<0.000000e+00> : vector<24xf32>
    %466 = vector.multi_reduction <add>, %465, %cst_278 [1] : vector<24x128xf32> to vector<24xf32>
    %467 = vector.shape_cast %466 : vector<24xf32> to vector<24x1xf32>
    %cst_279 = arith.constant 1.280000e+02 : f32
    %468 = vector.broadcast %cst_279 : f32 to vector<24x1xf32>
    %469 = arith.divf %467, %468 : vector<24x1xf32>
    %470 = vector.broadcast %462 : vector<24x1xf32> to vector<24x128xf32>
    %471 = arith.subf %458, %470 : vector<24x128xf32>
    %cst_280 = arith.constant 9.99999974E-6 : f32
    %472 = vector.broadcast %cst_280 : f32 to vector<24x1xf32>
    %473 = arith.addf %469, %472 : vector<24x1xf32>
    %474 = math.rsqrt %473 : vector<24x1xf32>
    %475 = vector.broadcast %474 : vector<24x1xf32> to vector<24x128xf32>
    %476 = arith.mulf %471, %475 : vector<24x128xf32>
    %477 = vector.broadcast %389 : vector<1x128xf32> to vector<24x128xf32>
    %478 = arith.mulf %476, %477 : vector<24x128xf32>
    %479 = vector.broadcast %391 : vector<1x128xf32> to vector<24x128xf32>
    %480 = arith.addf %478, %479 : vector<24x128xf32>
    %c1_281 = arith.constant 1 : index
    %c0_282 = arith.constant 0 : index
    %c0_283 = arith.constant 0 : index
    %481 = vector.load %arg33[%c1_281, %c0_282, %c0_283] : memref<2x128x128xf32, #tpu.memory_space<vmem>>, vector<1x128x128xf32>
    %482 = vector.shape_cast %481 : vector<1x128x128xf32> to vector<128x128xf32>
    %c1_284 = arith.constant 1 : index
    %c0_285 = arith.constant 0 : index
    %c0_286 = arith.constant 0 : index
    %483 = vector.load %arg34[%c1_284, %c0_285, %c0_286] : memref<2x128x128xf32, #tpu.memory_space<vmem>>, vector<1x128x128xf32>
    %484 = vector.shape_cast %483 : vector<1x128x128xf32> to vector<128x128xf32>
    %c1_287 = arith.constant 1 : index
    %c0_288 = arith.constant 0 : index
    %c0_289 = arith.constant 0 : index
    %485 = vector.load %arg35[%c1_287, %c0_288, %c0_289] : memref<2x128x128xf32, #tpu.memory_space<vmem>>, vector<1x128x128xf32>
    %486 = vector.shape_cast %485 : vector<1x128x128xf32> to vector<128x128xf32>
    %c1_290 = arith.constant 1 : index
    %c0_291 = arith.constant 0 : index
    %c0_292 = arith.constant 0 : index
    %487 = vector.load %arg36[%c1_290, %c0_291, %c0_292] : memref<2x128x128xf32, #tpu.memory_space<vmem>>, vector<1x128x128xf32>
    %488 = vector.shape_cast %487 : vector<1x128x128xf32> to vector<128x128xf32>
    %c1_293 = arith.constant 1 : index
    %c0_294 = arith.constant 0 : index
    %c0_295 = arith.constant 0 : index
    %489 = vector.load %arg37[%c1_293, %c0_294, %c0_295] : memref<2x144x128xf32, #tpu.memory_space<vmem>>, vector<1x144x128xf32>
    %490 = vector.shape_cast %489 : vector<1x144x128xf32> to vector<144x128xf32>
    %c1_296 = arith.constant 1 : index
    %c0_297 = arith.constant 0 : index
    %c0_298 = arith.constant 0 : index
    %491 = vector.load %arg38[%c1_296, %c0_297, %c0_298] : memref<2x1x128xf32, #tpu.memory_space<vmem>>, vector<1x1x128xf32>
    %492 = vector.shape_cast %491 : vector<1x1x128xf32> to vector<1x128xf32>
    %c1_299 = arith.constant 1 : index
    %c0_300 = arith.constant 0 : index
    %c0_301 = arith.constant 0 : index
    %493 = vector.load %arg39[%c1_299, %c0_300, %c0_301] : memref<2x1x128xf32, #tpu.memory_space<vmem>>, vector<1x1x128xf32>
    %494 = vector.shape_cast %493 : vector<1x1x128xf32> to vector<1x128xf32>
    %c1_302 = arith.constant 1 : index
    %c0_303 = arith.constant 0 : index
    %c0_304 = arith.constant 0 : index
    %495 = vector.load %arg40[%c1_302, %c0_303, %c0_304] : memref<2x128x256xf32, #tpu.memory_space<vmem>>, vector<1x128x256xf32>
    %496 = vector.shape_cast %495 : vector<1x128x256xf32> to vector<128x256xf32>
    %c1_305 = arith.constant 1 : index
    %c0_306 = arith.constant 0 : index
    %c0_307 = arith.constant 0 : index
    %497 = vector.load %arg41[%c1_305, %c0_306, %c0_307] : memref<2x1x256xf32, #tpu.memory_space<vmem>>, vector<1x1x256xf32>
    %498 = vector.shape_cast %497 : vector<1x1x256xf32> to vector<1x256xf32>
    %c1_308 = arith.constant 1 : index
    %c0_309 = arith.constant 0 : index
    %c0_310 = arith.constant 0 : index
    %499 = vector.load %arg42[%c1_308, %c0_309, %c0_310] : memref<2x256x128xf32, #tpu.memory_space<vmem>>, vector<1x256x128xf32>
    %500 = vector.shape_cast %499 : vector<1x256x128xf32> to vector<256x128xf32>
    %c1_311 = arith.constant 1 : index
    %c0_312 = arith.constant 0 : index
    %c0_313 = arith.constant 0 : index
    %501 = vector.load %arg43[%c1_311, %c0_312, %c0_313] : memref<2x1x128xf32, #tpu.memory_space<vmem>>, vector<1x1x128xf32>
    %502 = vector.shape_cast %501 : vector<1x1x128xf32> to vector<1x128xf32>
    %c1_314 = arith.constant 1 : index
    %c0_315 = arith.constant 0 : index
    %c0_316 = arith.constant 0 : index
    %503 = vector.load %arg44[%c1_314, %c0_315, %c0_316] : memref<2x1x128xf32, #tpu.memory_space<vmem>>, vector<1x1x128xf32>
    %504 = vector.shape_cast %503 : vector<1x1x128xf32> to vector<1x128xf32>
    %c1_317 = arith.constant 1 : index
    %c0_318 = arith.constant 0 : index
    %c0_319 = arith.constant 0 : index
    %505 = vector.load %arg45[%c1_317, %c0_318, %c0_319] : memref<2x1x128xf32, #tpu.memory_space<vmem>>, vector<1x1x128xf32>
    %506 = vector.shape_cast %505 : vector<1x1x128xf32> to vector<1x128xf32>
    %cst_320 = arith.constant dense<0.000000e+00> : vector<24x128xf32>
    %507 = tpu.matmul %480, %482, %cst_320 {dimension_numbers = #tpu.dot_dimension_numbers<[1], [0], [0], [1], [0, 0, 1, 1], [], []>} : vector<24x128xf32>, vector<128x128xf32>, vector<24x128xf32> -> vector<24x128xf32>
    %cst_321 = arith.constant dense<0.000000e+00> : vector<24x128xf32>
    %508 = tpu.matmul %480, %484, %cst_321 {dimension_numbers = #tpu.dot_dimension_numbers<[1], [0], [0], [1], [0, 0, 1, 1], [], []>} : vector<24x128xf32>, vector<128x128xf32>, vector<24x128xf32> -> vector<24x128xf32>
    %cst_322 = arith.constant dense<0.000000e+00> : vector<24x128xf32>
    %509 = tpu.matmul %480, %486, %cst_322 {dimension_numbers = #tpu.dot_dimension_numbers<[1], [0], [0], [1], [0, 0, 1, 1], [], []>} : vector<24x128xf32>, vector<128x128xf32>, vector<24x128xf32> -> vector<24x128xf32>
    %510 = vector.shape_cast %507 : vector<24x128xf32> to vector<3x8x128xf32>
    %511 = vector.shape_cast %508 : vector<24x128xf32> to vector<3x8x128xf32>
    %512 = vector.shape_cast %509 : vector<24x128xf32> to vector<3x8x128xf32>
    "tpu.trace_start"() <{level = 10 : i32, message = "gqd,gkd->gqk"}> : () -> ()
    %cst_323 = arith.constant dense<0.000000e+00> : vector<3x8x8xf32>
    %513 = tpu.matmul %510, %511, %cst_323 {dimension_numbers = #tpu.dot_dimension_numbers<[2], [2], [1], [1], [0, 0, 0, 1, 1, 1], [0], [0]>} : vector<3x8x128xf32>, vector<3x8x128xf32>, vector<3x8x8xf32> -> vector<3x8x8xf32>
    "tpu.trace_stop"() : () -> ()
    %cst_324 = arith.constant 0.0883883461 : f32
    %514 = vector.broadcast %cst_324 : f32 to vector<3x8x8xf32>
    %515 = arith.mulf %513, %514 : vector<3x8x8xf32>
    %cst_325 = arith.constant 0.000000e+00 : f32
    %516 = vector.broadcast %cst_325 : f32 to vector<3x1x8xf32>
    %517 = arith.cmpf ogt, %5, %516 : vector<3x1x8xf32>
    %cst_326 = arith.constant -1.000000e+09 : f32
    %518 = vector.shape_cast %517 : vector<3x1x8xi1> to vector<3x1x8xi1>
    %519 = vector.broadcast %518 : vector<3x1x8xi1> to vector<3x8x8xi1>
    %520 = vector.broadcast %cst_326 : f32 to vector<3x8x8xf32>
    %521 = arith.select %519, %515, %520 : vector<3x8x8xi1>, vector<3x8x8xf32>
    %cst_327 = arith.constant dense<0xFF800000> : vector<3x8xf32>
    %522 = vector.multi_reduction <maximumf>, %521, %cst_327 [2] : vector<3x8x8xf32> to vector<3x8xf32>
    %523 = vector.shape_cast %522 : vector<3x8xf32> to vector<3x8x1xf32>
    %524 = vector.broadcast %523 : vector<3x8x1xf32> to vector<3x8x8xf32>
    %525 = arith.subf %521, %524 : vector<3x8x8xf32>
    %526 = math.exp %525 : vector<3x8x8xf32>
    %cst_328 = arith.constant dense<0.000000e+00> : vector<3x8xf32>
    %527 = vector.multi_reduction <add>, %526, %cst_328 [2] : vector<3x8x8xf32> to vector<3x8xf32>
    %528 = vector.shape_cast %527 : vector<3x8xf32> to vector<3x8x1xf32>
    %cst_329 = arith.constant 1.000000e+00 : f32
    %529 = vector.broadcast %cst_329 : f32 to vector<3x8x1xf32>
    %530 = arith.divf %529, %528 : vector<3x8x1xf32>
    %531 = vector.broadcast %530 : vector<3x8x1xf32> to vector<3x8x8xf32>
    %532 = arith.mulf %526, %531 : vector<3x8x8xf32>
    "tpu.trace_start"() <{level = 10 : i32, message = "gqk,gkd->gqd"}> : () -> ()
    %cst_330 = arith.constant dense<0.000000e+00> : vector<3x8x128xf32>
    %533 = tpu.matmul %532, %512, %cst_330 {dimension_numbers = #tpu.dot_dimension_numbers<[2], [1], [1], [2], [0, 0, 0, 1, 1, 2], [0], [0]>} : vector<3x8x8xf32>, vector<3x8x128xf32>, vector<3x8x128xf32> -> vector<3x8x128xf32>
    "tpu.trace_stop"() : () -> ()
    %534 = vector.shape_cast %533 : vector<3x8x128xf32> to vector<24x128xf32>
    %cst_331 = arith.constant dense<0.000000e+00> : vector<24x128xf32>
    %535 = tpu.matmul %534, %488, %cst_331 {dimension_numbers = #tpu.dot_dimension_numbers<[1], [0], [0], [1], [0, 0, 1, 1], [], []>} : vector<24x128xf32>, vector<128x128xf32>, vector<24x128xf32> -> vector<24x128xf32>
    %536 = arith.addf %480, %535 : vector<24x128xf32>
    %cst_332 = arith.constant dense<0.000000e+00> : vector<24xf32>
    %537 = vector.multi_reduction <add>, %536, %cst_332 [1] : vector<24x128xf32> to vector<24xf32>
    %538 = vector.shape_cast %537 : vector<24xf32> to vector<24x1xf32>
    %cst_333 = arith.constant 1.280000e+02 : f32
    %539 = vector.broadcast %cst_333 : f32 to vector<24x1xf32>
    %540 = arith.divf %538, %539 : vector<24x1xf32>
    %541 = vector.broadcast %540 : vector<24x1xf32> to vector<24x128xf32>
    %542 = arith.subf %536, %541 : vector<24x128xf32>
    %543 = arith.mulf %542, %542 : vector<24x128xf32>
    %cst_334 = arith.constant dense<0.000000e+00> : vector<24xf32>
    %544 = vector.multi_reduction <add>, %543, %cst_334 [1] : vector<24x128xf32> to vector<24xf32>
    %545 = vector.shape_cast %544 : vector<24xf32> to vector<24x1xf32>
    %cst_335 = arith.constant 1.280000e+02 : f32
    %546 = vector.broadcast %cst_335 : f32 to vector<24x1xf32>
    %547 = arith.divf %545, %546 : vector<24x1xf32>
    %548 = vector.broadcast %540 : vector<24x1xf32> to vector<24x128xf32>
    %549 = arith.subf %536, %548 : vector<24x128xf32>
    %cst_336 = arith.constant 9.99999974E-6 : f32
    %550 = vector.broadcast %cst_336 : f32 to vector<24x1xf32>
    %551 = arith.addf %547, %550 : vector<24x1xf32>
    %552 = math.rsqrt %551 : vector<24x1xf32>
    %553 = vector.broadcast %552 : vector<24x1xf32> to vector<24x128xf32>
    %554 = arith.mulf %549, %553 : vector<24x128xf32>
    %555 = vector.broadcast %492 : vector<1x128xf32> to vector<24x128xf32>
    %556 = arith.mulf %554, %555 : vector<24x128xf32>
    %557 = vector.broadcast %494 : vector<1x128xf32> to vector<24x128xf32>
    %558 = arith.addf %556, %557 : vector<24x128xf32>
    %cst_337 = arith.constant dense<0.000000e+00> : vector<3x128xf32>
    %559 = tpu.matmul %365, %490, %cst_337 {dimension_numbers = #tpu.dot_dimension_numbers<[1], [0], [0], [1], [0, 0, 1, 1], [], []>} : vector<3x144xf32>, vector<144x128xf32>, vector<3x128xf32> -> vector<3x128xf32>
    %560 = vector.shape_cast %558 : vector<24x128xf32> to vector<3x8x128xf32>
    %561 = vector.shape_cast %559 : vector<3x128xf32> to vector<3x1x128xf32>
    %562 = vector.broadcast %561 : vector<3x1x128xf32> to vector<3x8x128xf32>
    %563 = arith.addf %560, %562 : vector<3x8x128xf32>
    %564 = vector.shape_cast %563 : vector<3x8x128xf32> to vector<24x128xf32>
    %cst_338 = arith.constant dense<0.000000e+00> : vector<24x256xf32>
    %565 = tpu.matmul %564, %496, %cst_338 {dimension_numbers = #tpu.dot_dimension_numbers<[1], [0], [0], [1], [0, 0, 1, 1], [], []>} : vector<24x128xf32>, vector<128x256xf32>, vector<24x256xf32> -> vector<24x256xf32>
    %566 = vector.broadcast %498 : vector<1x256xf32> to vector<24x256xf32>
    %567 = arith.addf %565, %566 : vector<24x256xf32>
    %cst_339 = arith.constant 0.000000e+00 : f32
    %568 = vector.broadcast %cst_339 : f32 to vector<24x256xf32>
    %569 = arith.maximumf %567, %568 : vector<24x256xf32>
    %cst_340 = arith.constant dense<0.000000e+00> : vector<24x128xf32>
    %570 = tpu.matmul %569, %500, %cst_340 {dimension_numbers = #tpu.dot_dimension_numbers<[1], [0], [0], [1], [0, 0, 1, 1], [], []>} : vector<24x256xf32>, vector<256x128xf32>, vector<24x128xf32> -> vector<24x128xf32>
    %571 = vector.broadcast %502 : vector<1x128xf32> to vector<24x128xf32>
    %572 = arith.addf %570, %571 : vector<24x128xf32>
    %573 = arith.addf %564, %572 : vector<24x128xf32>
    %cst_341 = arith.constant dense<0.000000e+00> : vector<24xf32>
    %574 = vector.multi_reduction <add>, %573, %cst_341 [1] : vector<24x128xf32> to vector<24xf32>
    %575 = vector.shape_cast %574 : vector<24xf32> to vector<24x1xf32>
    %cst_342 = arith.constant 1.280000e+02 : f32
    %576 = vector.broadcast %cst_342 : f32 to vector<24x1xf32>
    %577 = arith.divf %575, %576 : vector<24x1xf32>
    %578 = vector.broadcast %577 : vector<24x1xf32> to vector<24x128xf32>
    %579 = arith.subf %573, %578 : vector<24x128xf32>
    %580 = arith.mulf %579, %579 : vector<24x128xf32>
    %cst_343 = arith.constant dense<0.000000e+00> : vector<24xf32>
    %581 = vector.multi_reduction <add>, %580, %cst_343 [1] : vector<24x128xf32> to vector<24xf32>
    %582 = vector.shape_cast %581 : vector<24xf32> to vector<24x1xf32>
    %cst_344 = arith.constant 1.280000e+02 : f32
    %583 = vector.broadcast %cst_344 : f32 to vector<24x1xf32>
    %584 = arith.divf %582, %583 : vector<24x1xf32>
    %585 = vector.broadcast %577 : vector<24x1xf32> to vector<24x128xf32>
    %586 = arith.subf %573, %585 : vector<24x128xf32>
    %cst_345 = arith.constant 9.99999974E-6 : f32
    %587 = vector.broadcast %cst_345 : f32 to vector<24x1xf32>
    %588 = arith.addf %584, %587 : vector<24x1xf32>
    %589 = math.rsqrt %588 : vector<24x1xf32>
    %590 = vector.broadcast %589 : vector<24x1xf32> to vector<24x128xf32>
    %591 = arith.mulf %586, %590 : vector<24x128xf32>
    %592 = vector.broadcast %504 : vector<1x128xf32> to vector<24x128xf32>
    %593 = arith.mulf %591, %592 : vector<24x128xf32>
    %594 = vector.broadcast %506 : vector<1x128xf32> to vector<24x128xf32>
    %595 = arith.addf %593, %594 : vector<24x128xf32>
    %596 = vector.broadcast %7 : vector<24x1xf32> to vector<24x128xf32>
    %597 = arith.mulf %595, %596 : vector<24x128xf32>
    %598 = vector.shape_cast %597 : vector<24x128xf32> to vector<3x8x128xf32>
    %c0_346 = arith.constant 0 : index
    %c0_347 = arith.constant 0 : index
    %c0_348 = arith.constant 0 : index
    %c0_349 = arith.constant 0 : index
    %599 = vector.load %arg46[%c0_346, %c0_347, %c0_348, %c0_349] : memref<1x3x8x128xf32, #tpu.memory_space<vmem>>, vector<1x3x8x128xf32>
    %600 = vector.shape_cast %599 : vector<1x3x8x128xf32> to vector<3x8x128xf32>
    %601 = vector.shape_cast %598 : vector<3x8x128xf32> to vector<1x3x8x128xf32>
    tpu.vector_store %arg46[%c0_346, %c0_347, %c0_348, %c0_349], %601 {strides = array<i32>} : memref<1x3x8x128xf32, #tpu.memory_space<vmem>>, vector<1x3x8x128xf32>,
    return
  }
  func.func @transform_0(%arg0: i32) -> (i32, i32, i32, i32) {
    %c0_i32 = arith.constant 0 : i32
    %c0_i32_0 = arith.constant 0 : i32
    %c0_i32_1 = arith.constant 0 : i32
    %c0_i32_2 = arith.constant 0 : i32
    return %arg0, %c0_i32, %c0_i32_0, %c0_i32_1 : i32, i32, i32, i32
  }
  func.func @transform_1(%arg0: i32) -> (i32, i32, i32) {
    %c0_i32 = arith.constant 0 : i32
    %c0_i32_0 = arith.constant 0 : i32
    %c0_i32_1 = arith.constant 0 : i32
    return %arg0, %c0_i32, %c0_i32_0 : i32, i32, i32
  }
  func.func @transform_2(%arg0: i32) -> (i32, i32, i32, i32) {
    %c0_i32 = arith.constant 0 : i32
    %c0_i32_0 = arith.constant 0 : i32
    %c0_i32_1 = arith.constant 0 : i32
    %c0_i32_2 = arith.constant 0 : i32
    return %arg0, %c0_i32, %c0_i32_0, %c0_i32_1 : i32, i32, i32, i32
  }
  func.func @transform_3(%arg0: i32) -> (i32, i32, i32) {
    %c0_i32 = arith.constant 0 : i32
    %c0_i32_0 = arith.constant 0 : i32
    %c0_i32_1 = arith.constant 0 : i32
    return %arg0, %c0_i32, %c0_i32_0 : i32, i32, i32
  }
  func.func @transform_4(%arg0: i32) -> (i32, i32, i32, i32) {
    %c0_i32 = arith.constant 0 : i32
    %c0_i32_0 = arith.constant 0 : i32
    %c0_i32_1 = arith.constant 0 : i32
    %c0_i32_2 = arith.constant 0 : i32
    return %arg0, %c0_i32, %c0_i32_0, %c0_i32_1 : i32, i32, i32, i32
  }
  func.func @transform_5(%arg0: i32) -> (i32, i32, i32) {
    %c0_i32 = arith.constant 0 : i32
    %c0_i32_0 = arith.constant 0 : i32
    %c0_i32_1 = arith.constant 0 : i32
    return %arg0, %c0_i32, %c0_i32_0 : i32, i32, i32
  }
  func.func @transform_6(%arg0: i32) -> (i32, i32) {
    %c0_i32 = arith.constant 0 : i32
    %c0_i32_0 = arith.constant 0 : i32
    %c0_i32_1 = arith.constant 0 : i32
    return %c0_i32, %c0_i32_0 : i32, i32
  }
  func.func @transform_7(%arg0: i32) -> (i32, i32, i32) {
    %c0_i32 = arith.constant 0 : i32
    %c0_i32_0 = arith.constant 0 : i32
    %c0_i32_1 = arith.constant 0 : i32
    %c0_i32_2 = arith.constant 0 : i32
    return %c0_i32, %c0_i32_0, %c0_i32_1 : i32, i32, i32
  }
  func.func @transform_8(%arg0: i32) -> (i32, i32, i32) {
    %c0_i32 = arith.constant 0 : i32
    %c0_i32_0 = arith.constant 0 : i32
    %c0_i32_1 = arith.constant 0 : i32
    %c0_i32_2 = arith.constant 0 : i32
    return %c0_i32, %c0_i32_0, %c0_i32_1 : i32, i32, i32
  }
  func.func @transform_9(%arg0: i32) -> (i32, i32, i32) {
    %c0_i32 = arith.constant 0 : i32
    %c0_i32_0 = arith.constant 0 : i32
    %c0_i32_1 = arith.constant 0 : i32
    %c0_i32_2 = arith.constant 0 : i32
    return %c0_i32, %c0_i32_0, %c0_i32_1 : i32, i32, i32
  }
  func.func @transform_10(%arg0: i32) -> (i32, i32, i32) {
    %c0_i32 = arith.constant 0 : i32
    %c0_i32_0 = arith.constant 0 : i32
    %c0_i32_1 = arith.constant 0 : i32
    %c0_i32_2 = arith.constant 0 : i32
    return %c0_i32, %c0_i32_0, %c0_i32_1 : i32, i32, i32
  }
  func.func @transform_11(%arg0: i32) -> (i32, i32, i32) {
    %c0_i32 = arith.constant 0 : i32
    %c0_i32_0 = arith.constant 0 : i32
    %c0_i32_1 = arith.constant 0 : i32
    %c0_i32_2 = arith.constant 0 : i32
    return %c0_i32, %c0_i32_0, %c0_i32_1 : i32, i32, i32
  }
  func.func @transform_12(%arg0: i32) -> (i32, i32, i32) {
    %c0_i32 = arith.constant 0 : i32
    %c0_i32_0 = arith.constant 0 : i32
    %c0_i32_1 = arith.constant 0 : i32
    %c0_i32_2 = arith.constant 0 : i32
    return %c0_i32, %c0_i32_0, %c0_i32_1 : i32, i32, i32
  }
  func.func @transform_13(%arg0: i32) -> (i32, i32, i32) {
    %c0_i32 = arith.constant 0 : i32
    %c0_i32_0 = arith.constant 0 : i32
    %c0_i32_1 = arith.constant 0 : i32
    %c0_i32_2 = arith.constant 0 : i32
    return %c0_i32, %c0_i32_0, %c0_i32_1 : i32, i32, i32
  }
  func.func @transform_14(%arg0: i32) -> (i32, i32, i32) {
    %c0_i32 = arith.constant 0 : i32
    %c0_i32_0 = arith.constant 0 : i32
    %c0_i32_1 = arith.constant 0 : i32
    %c0_i32_2 = arith.constant 0 : i32
    return %c0_i32, %c0_i32_0, %c0_i32_1 : i32, i32, i32
  }
  func.func @transform_15(%arg0: i32) -> (i32, i32, i32) {
    %c0_i32 = arith.constant 0 : i32
    %c0_i32_0 = arith.constant 0 : i32
    %c0_i32_1 = arith.constant 0 : i32
    %c0_i32_2 = arith.constant 0 : i32
    return %c0_i32, %c0_i32_0, %c0_i32_1 : i32, i32, i32
  }
  func.func @transform_16(%arg0: i32) -> (i32, i32, i32) {
    %c0_i32 = arith.constant 0 : i32
    %c0_i32_0 = arith.constant 0 : i32
    %c0_i32_1 = arith.constant 0 : i32
    %c0_i32_2 = arith.constant 0 : i32
    return %c0_i32, %c0_i32_0, %c0_i32_1 : i32, i32, i32
  }
  func.func @transform_17(%arg0: i32) -> (i32, i32, i32) {
    %c0_i32 = arith.constant 0 : i32
    %c0_i32_0 = arith.constant 0 : i32
    %c0_i32_1 = arith.constant 0 : i32
    %c0_i32_2 = arith.constant 0 : i32
    return %c0_i32, %c0_i32_0, %c0_i32_1 : i32, i32, i32
  }
  func.func @transform_18(%arg0: i32) -> (i32, i32, i32) {
    %c0_i32 = arith.constant 0 : i32
    %c0_i32_0 = arith.constant 0 : i32
    %c0_i32_1 = arith.constant 0 : i32
    %c0_i32_2 = arith.constant 0 : i32
    return %c0_i32, %c0_i32_0, %c0_i32_1 : i32, i32, i32
  }
  func.func @transform_19(%arg0: i32) -> (i32, i32, i32) {
    %c0_i32 = arith.constant 0 : i32
    %c0_i32_0 = arith.constant 0 : i32
    %c0_i32_1 = arith.constant 0 : i32
    %c0_i32_2 = arith.constant 0 : i32
    return %c0_i32, %c0_i32_0, %c0_i32_1 : i32, i32, i32
  }
  func.func @transform_20(%arg0: i32) -> (i32, i32, i32) {
    %c0_i32 = arith.constant 0 : i32
    %c0_i32_0 = arith.constant 0 : i32
    %c0_i32_1 = arith.constant 0 : i32
    %c0_i32_2 = arith.constant 0 : i32
    return %c0_i32, %c0_i32_0, %c0_i32_1 : i32, i32, i32
  }
  func.func @transform_21(%arg0: i32) -> (i32, i32, i32) {
    %c0_i32 = arith.constant 0 : i32
    %c0_i32_0 = arith.constant 0 : i32
    %c0_i32_1 = arith.constant 0 : i32
    %c0_i32_2 = arith.constant 0 : i32
    return %c0_i32, %c0_i32_0, %c0_i32_1 : i32, i32, i32
  }
  func.func @transform_22(%arg0: i32) -> (i32, i32, i32) {
    %c0_i32 = arith.constant 0 : i32
    %c0_i32_0 = arith.constant 0 : i32
    %c0_i32_1 = arith.constant 0 : i32
    %c0_i32_2 = arith.constant 0 : i32
    return %c0_i32, %c0_i32_0, %c0_i32_1 : i32, i32, i32
  }
  func.func @transform_23(%arg0: i32) -> (i32, i32, i32) {
    %c0_i32 = arith.constant 0 : i32
    %c0_i32_0 = arith.constant 0 : i32
    %c0_i32_1 = arith.constant 0 : i32
    %c0_i32_2 = arith.constant 0 : i32
    return %c0_i32, %c0_i32_0, %c0_i32_1 : i32, i32, i32
  }
  func.func @transform_24(%arg0: i32) -> (i32, i32, i32) {
    %c0_i32 = arith.constant 0 : i32
    %c0_i32_0 = arith.constant 0 : i32
    %c0_i32_1 = arith.constant 0 : i32
    %c0_i32_2 = arith.constant 0 : i32
    return %c0_i32, %c0_i32_0, %c0_i32_1 : i32, i32, i32
  }
  func.func @transform_25(%arg0: i32) -> (i32, i32, i32) {
    %c0_i32 = arith.constant 0 : i32
    %c0_i32_0 = arith.constant 0 : i32
    %c0_i32_1 = arith.constant 0 : i32
    %c0_i32_2 = arith.constant 0 : i32
    return %c0_i32, %c0_i32_0, %c0_i32_1 : i32, i32, i32
  }
  func.func @transform_26(%arg0: i32) -> (i32, i32, i32) {
    %c0_i32 = arith.constant 0 : i32
    %c0_i32_0 = arith.constant 0 : i32
    %c0_i32_1 = arith.constant 0 : i32
    %c0_i32_2 = arith.constant 0 : i32
    return %c0_i32, %c0_i32_0, %c0_i32_1 : i32, i32, i32
  }
  func.func @transform_27(%arg0: i32) -> (i32, i32, i32) {
    %c0_i32 = arith.constant 0 : i32
    %c0_i32_0 = arith.constant 0 : i32
    %c0_i32_1 = arith.constant 0 : i32
    %c0_i32_2 = arith.constant 0 : i32
    return %c0_i32, %c0_i32_0, %c0_i32_1 : i32, i32, i32
  }
  func.func @transform_28(%arg0: i32) -> (i32, i32, i32) {
    %c0_i32 = arith.constant 0 : i32
    %c0_i32_0 = arith.constant 0 : i32
    %c0_i32_1 = arith.constant 0 : i32
    %c0_i32_2 = arith.constant 0 : i32
    return %c0_i32, %c0_i32_0, %c0_i32_1 : i32, i32, i32
  }
  func.func @transform_29(%arg0: i32) -> (i32, i32, i32) {
    %c0_i32 = arith.constant 0 : i32
    %c0_i32_0 = arith.constant 0 : i32
    %c0_i32_1 = arith.constant 0 : i32
    %c0_i32_2 = arith.constant 0 : i32
    return %c0_i32, %c0_i32_0, %c0_i32_1 : i32, i32, i32
  }
  func.func @transform_30(%arg0: i32) -> (i32, i32, i32) {
    %c0_i32 = arith.constant 0 : i32
    %c0_i32_0 = arith.constant 0 : i32
    %c0_i32_1 = arith.constant 0 : i32
    %c0_i32_2 = arith.constant 0 : i32
    return %c0_i32, %c0_i32_0, %c0_i32_1 : i32, i32, i32
  }
  func.func @transform_31(%arg0: i32) -> (i32, i32, i32) {
    %c0_i32 = arith.constant 0 : i32
    %c0_i32_0 = arith.constant 0 : i32
    %c0_i32_1 = arith.constant 0 : i32
    %c0_i32_2 = arith.constant 0 : i32
    return %c0_i32, %c0_i32_0, %c0_i32_1 : i32, i32, i32
  }
  func.func @transform_32(%arg0: i32) -> (i32, i32, i32) {
    %c0_i32 = arith.constant 0 : i32
    %c0_i32_0 = arith.constant 0 : i32
    %c0_i32_1 = arith.constant 0 : i32
    %c0_i32_2 = arith.constant 0 : i32
    return %c0_i32, %c0_i32_0, %c0_i32_1 : i32, i32, i32
  }
  func.func @transform_33(%arg0: i32) -> (i32, i32, i32) {
    %c0_i32 = arith.constant 0 : i32
    %c0_i32_0 = arith.constant 0 : i32
    %c0_i32_1 = arith.constant 0 : i32
    %c0_i32_2 = arith.constant 0 : i32
    return %c0_i32, %c0_i32_0, %c0_i32_1 : i32, i32, i32
  }
  func.func @transform_34(%arg0: i32) -> (i32, i32, i32) {
    %c0_i32 = arith.constant 0 : i32
    %c0_i32_0 = arith.constant 0 : i32
    %c0_i32_1 = arith.constant 0 : i32
    %c0_i32_2 = arith.constant 0 : i32
    return %c0_i32, %c0_i32_0, %c0_i32_1 : i32, i32, i32
  }
  func.func @transform_35(%arg0: i32) -> (i32, i32, i32) {
    %c0_i32 = arith.constant 0 : i32
    %c0_i32_0 = arith.constant 0 : i32
    %c0_i32_1 = arith.constant 0 : i32
    %c0_i32_2 = arith.constant 0 : i32
    return %c0_i32, %c0_i32_0, %c0_i32_1 : i32, i32, i32
  }
  func.func @transform_36(%arg0: i32) -> (i32, i32, i32) {
    %c0_i32 = arith.constant 0 : i32
    %c0_i32_0 = arith.constant 0 : i32
    %c0_i32_1 = arith.constant 0 : i32
    %c0_i32_2 = arith.constant 0 : i32
    return %c0_i32, %c0_i32_0, %c0_i32_1 : i32, i32, i32
  }
  func.func @transform_37(%arg0: i32) -> (i32, i32, i32) {
    %c0_i32 = arith.constant 0 : i32
    %c0_i32_0 = arith.constant 0 : i32
    %c0_i32_1 = arith.constant 0 : i32
    %c0_i32_2 = arith.constant 0 : i32
    return %c0_i32, %c0_i32_0, %c0_i32_1 : i32, i32, i32
  }
  func.func @transform_38(%arg0: i32) -> (i32, i32, i32) {
    %c0_i32 = arith.constant 0 : i32
    %c0_i32_0 = arith.constant 0 : i32
    %c0_i32_1 = arith.constant 0 : i32
    %c0_i32_2 = arith.constant 0 : i32
    return %c0_i32, %c0_i32_0, %c0_i32_1 : i32, i32, i32
  }
  func.func @transform_39(%arg0: i32) -> (i32, i32, i32) {
    %c0_i32 = arith.constant 0 : i32
    %c0_i32_0 = arith.constant 0 : i32
    %c0_i32_1 = arith.constant 0 : i32
    %c0_i32_2 = arith.constant 0 : i32
    return %c0_i32, %c0_i32_0, %c0_i32_1 : i32, i32, i32
  }
  func.func @transform_40(%arg0: i32) -> (i32, i32, i32) {
    %c0_i32 = arith.constant 0 : i32
    %c0_i32_0 = arith.constant 0 : i32
    %c0_i32_1 = arith.constant 0 : i32
    %c0_i32_2 = arith.constant 0 : i32
    return %c0_i32, %c0_i32_0, %c0_i32_1 : i32, i32, i32
  }
  func.func @transform_41(%arg0: i32) -> (i32, i32, i32) {
    %c0_i32 = arith.constant 0 : i32
    %c0_i32_0 = arith.constant 0 : i32
    %c0_i32_1 = arith.constant 0 : i32
    %c0_i32_2 = arith.constant 0 : i32
    return %c0_i32, %c0_i32_0, %c0_i32_1 : i32, i32, i32
  }
  func.func @transform_42(%arg0: i32) -> (i32, i32, i32) {
    %c0_i32 = arith.constant 0 : i32
    %c0_i32_0 = arith.constant 0 : i32
    %c0_i32_1 = arith.constant 0 : i32
    %c0_i32_2 = arith.constant 0 : i32
    return %c0_i32, %c0_i32_0, %c0_i32_1 : i32, i32, i32
  }
  func.func @transform_43(%arg0: i32) -> (i32, i32, i32) {
    %c0_i32 = arith.constant 0 : i32
    %c0_i32_0 = arith.constant 0 : i32
    %c0_i32_1 = arith.constant 0 : i32
    %c0_i32_2 = arith.constant 0 : i32
    return %c0_i32, %c0_i32_0, %c0_i32_1 : i32, i32, i32
  }
  func.func @transform_44(%arg0: i32) -> (i32, i32, i32) {
    %c0_i32 = arith.constant 0 : i32
    %c0_i32_0 = arith.constant 0 : i32
    %c0_i32_1 = arith.constant 0 : i32
    %c0_i32_2 = arith.constant 0 : i32
    return %c0_i32, %c0_i32_0, %c0_i32_1 : i32, i32, i32
  }
  func.func @transform_45(%arg0: i32) -> (i32, i32, i32, i32) {
    %c0_i32 = arith.constant 0 : i32
    %c0_i32_0 = arith.constant 0 : i32
    %c0_i32_1 = arith.constant 0 : i32
    %c0_i32_2 = arith.constant 0 : i32
    return %arg0, %c0_i32, %c0_i32_0, %c0_i32_1 : i32, i32, i32, i32
  }
}

</mosaic_0001>

<bundles_post_ra>
// kernel: cross_attention_kernel_encoder.1
= control target key start
LH: loop header
LB: loop body
LE: loop exit
PB: predicated region body
PF: predicated region fallthrough
CT: control target
= control target key end

     0   :  { %s10343_s6 = smov 1   ;;  %s10344_s10 = smov 2   ;;  %s12536_s0 = inlined_call_operand.smem [shape: u32[46], index: -1, kind: input, shape index: {}] }
   0x1   :  { %s10404_s5 = sld [smem:[%s12536_s0]]   ;;  %s10345_s14 = smov 3  }
   0x2   :  { %s10409_s9 = sld [smem:[%s12536_s0 + %s10343_s6]]   ;;  %s10346_s18 = smov 4  }
   0x3   :  { %s10414_s13 = sld [smem:[%s12536_s0 + %s10344_s10]]   ;;  %s10347_s22 = smov 5  }
   0x4   :  { %s10419_s17 = sld [smem:[%s12536_s0 + %s10345_s14]]   ;;  %s10348_s26 = smov 6  }
   0x5   :  { %s10424_s21 = sld [smem:[%s12536_s0 + %s10346_s18]]   ;;  %s10349_s30 = smov 7  }
   0x6   :  { %s10429_s25 = sld [smem:[%s12536_s0 + %s10347_s22]]   ;;  %s10350_s4 = smov 8  }
   0x7   :  { %12578 = sst [smem:[#allocation5_spill]] %s10404_s5  ;;  %s10351_s10 = smov 9  }
   0x8   :  { %12579 = sst [smem:[#allocation6_spill]] %s10409_s9  ;;  %s10352_s15 = smov 10  }
   0x9   :  { %12580 = sst [smem:[#allocation7_spill]] %s10414_s13  ;;  %s10353_s20 = smov 11  }
   0xa   :  { %12581 = sst [smem:[#allocation8_spill]] %s10419_s17  ;;  %s10355_s1 = smov 13  }
   0xb   :  { %12582 = sst [smem:[#allocation9_spill]] %s10424_s21  ;;  %s10356_s7 = smov 14  }
   0xc   :  { %12583 = sst [smem:[#allocation10_spill]] %s10429_s25  ;;  %s10358_s22 = smov 16  }
   0xd   :  { %s10434_s29 = sld [smem:[%s12536_s0 + %s10348_s26]]   ;;  %s10354_s26 = smov 12  }
   0xe   :  { %s10439_s3 = sld [smem:[%s12536_s0 + %s10349_s30]]   ;;  %s10359_s28 = smov 17  }
   0xf   :  { %s10444_s8 = sld [smem:[%s12536_s0 + %s10350_s4]]  }
  0x10   :  { %s10449_s14 = sld [smem:[%s12536_s0 + %s10351_s10]]  }
  0x11   :  { %s10454_s19 = sld [smem:[%s12536_s0 + %s10352_s15]]   ;;  %s10357_s15 = smov 15  }
  0x12   :  { %s10459_s24 = sld [smem:[%s12536_s0 + %s10353_s20]]  }
  0x13   :  { %s10464_s30 = sld [smem:[%s12536_s0 + %s10354_s26]]  }
  0x14   :  { %12584 = sst [smem:[#allocation11_spill]] %s10439_s3 }
  0x15   :  { %12585 = sst [smem:[#allocation12_spill]] %s10444_s8 }
  0x16   :  { %12586 = sst [smem:[#allocation13_spill]] %s10449_s14 }
  0x17   :  { %s10469_s6 = sld [smem:[%s12536_s0 + %s10355_s1]]  }
  0x18   :  { %s10474_s12 = sld [smem:[%s12536_s0 + %s10356_s7]]   ;;  %s10360_s7 = smov 18  }
  0x19   :  { %s10479_s20 = sld [smem:[%s12536_s0 + %s10357_s15]]   ;;  %s10361_s15 = smov 19  }
  0x1a   :  { %s10484_s27 = sld [smem:[%s12536_s0 + %s10358_s22]]   ;;  %s10362_s22 = smov 20  }
  0x1b   :  { %s10489_s4 = sld [smem:[%s12536_s0 + %s10359_s28]]   ;;  %s10363_s28 = smov 21  }
  0x1c   :  { %s10494_s25 = sld [smem:[%s12536_s0 + %s10360_s7]]   ;;  %s10364_s7 = smov 22  }
  0x1d   :  { %12587 = sst [smem:[#allocation14_spill]] %s10469_s6 }
  0x1e   :  { %12588 = sst [smem:[#allocation15_spill]] %s10474_s12 }
  0x1f   :  { %s10499_s21 = sld [smem:[%s12536_s0 + %s10361_s15]]   ;;  %s10365_s15 = smov 23  }
  0x20   :  { %s10504_s17 = sld [smem:[%s12536_s0 + %s10362_s22]]   ;;  %s10366_s22 = smov 24  }
  0x21   :  { %12589 = sst [smem:[#allocation16_spill]] %s10489_s4 }
  0x22   :  { %12590 = sst [smem:[#allocation17_spill]] %s10494_s25 }
  0x23   :  { %s10509_s4 = sld [smem:[%s12536_s0 + %s10363_s28]]   ;;  %s10367_s28 = smov 25  }
  0x24   :  { %s10514_s25 = sld [smem:[%s12536_s0 + %s10364_s7]]   ;;  %s10368_s7 = smov 26  }
  0x25   :  { %12591 = sst [smem:[#allocation18_spill]] %s10499_s21 }
  0x26   :  { %12592 = sst [smem:[#allocation19_spill]] %s10504_s17 }
  0x27   :  { %s10519_s21 = sld [smem:[%s12536_s0 + %s10365_s15]]   ;;  %s10369_s15 = smov 27  }
  0x28   :  { %s10524_s17 = sld [smem:[%s12536_s0 + %s10366_s22]]   ;;  %s10370_s22 = smov 28  }
  0x29   :  { %12593 = sst [smem:[#allocation20_spill]] %s10509_s4 }
  0x2a   :  { %12594 = sst [smem:[#allocation21_spill]] %s10514_s25 }
  0x2b   :  { %s10529_s4 = sld [smem:[%s12536_s0 + %s10367_s28]]   ;;  %s10371_s28 = smov 29  }
  0x2c   :  { %s10534_s25 = sld [smem:[%s12536_s0 + %s10368_s7]]   ;;  %s10372_s7 = smov 30  }
  0x2d   :  { %12595 = sst [smem:[#allocation22_spill]] %s10519_s21 }
  0x2e   :  { %12596 = sst [smem:[#allocation23_spill]] %s10524_s17 }
  0x2f   :  { %s10539_s21 = sld [smem:[%s12536_s0 + %s10369_s15]]   ;;  %s10373_s15 = smov 31  }
  0x30   :  { %s10544_s17 = sld [smem:[%s12536_s0 + %s10370_s22]]   ;;  %s10374_s22 = smov 32  }
  0x31   :  { %12597 = sst [smem:[#allocation24_spill]] %s10529_s4 }
  0x32   :  { %12598 = sst [smem:[#allocation25_spill]] %s10534_s25 }
  0x33   :  { %s10549_s4 = sld [smem:[%s12536_s0 + %s10371_s28]]   ;;  %s10375_s28 = smov 33  }
  0x34   :  { %s10554_s25 = sld [smem:[%s12536_s0 + %s10372_s7]]   ;;  %s10376_s7 = smov 34  }
  0x35   :  { %12599 = sst [smem:[#allocation26_spill]] %s10539_s21 }
  0x36   :  { %12600 = sst [smem:[#allocation27_spill]] %s10544_s17 }
  0x37   :  { %s10559_s21 = sld [smem:[%s12536_s0 + %s10373_s15]]   ;;  %s10377_s15 = smov 35  }
  0x38   :  { %s10564_s17 = sld [smem:[%s12536_s0 + %s10374_s22]]   ;;  %s10378_s22 = smov 36  }
  0x39   :  { %12601 = sst [smem:[#allocation28_spill]] %s10549_s4 }
  0x3a   :  { %12602 = sst [smem:[#allocation29_spill]] %s10554_s25 }
  0x3b   :  { %s10569_s4 = sld [smem:[%s12536_s0 + %s10375_s28]]   ;;  %s10379_s28 = smov 37  }
  0x3c   :  { %s10574_s25 = sld [smem:[%s12536_s0 + %s10376_s7]]   ;;  %s10380_s7 = smov 38  }
  0x3d   :  { %12603 = sst [smem:[#allocation30_spill]] %s10559_s21 }
  0x3e   :  { %12604 = sst [smem:[#allocation31_spill]] %s10564_s17 }
  0x3f   :  { %s10579_s21 = sld [smem:[%s12536_s0 + %s10377_s15]]   ;;  %s10381_s15 = smov 39  }
  0x40   :  { %s10584_s17 = sld [smem:[%s12536_s0 + %s10378_s22]]   ;;  %s10382_s22 = smov 40  }
  0x41   :  { %12605 = sst [smem:[#allocation32_spill]] %s10569_s4 }
  0x42   :  { %12606 = sst [smem:[#allocation33_spill]] %s10574_s25 }
  0x43   :  { %s10589_s4 = sld [smem:[%s12536_s0 + %s10379_s28]]   ;;  %s10383_s28 = smov 41  }
  0x44   :  { %s10594_s25 = sld [smem:[%s12536_s0 + %s10380_s7]]   ;;  %s10384_s7 = smov 42  }
  0x45   :  { %12607 = sst [smem:[#allocation34_spill]] %s10579_s21 }
  0x46   :  { %12608 = sst [smem:[#allocation35_spill]] %s10584_s17 }
  0x47   :  { %s10599_s21 = sld [smem:[%s12536_s0 + %s10381_s15]]   ;;  %s10385_s15 = smov 43  }
  0x48   :  { %s10604_s17 = sld [smem:[%s12536_s0 + %s10382_s22]]   ;;  %s10386_s22 = smov 44  }
  0x49   :  { %12609 = sst [smem:[#allocation36_spill]] %s10589_s4 }
  0x4a   :  { %12610 = sst [smem:[#allocation37_spill]] %s10594_s25 }
  0x4b   :  { %s10609_s4 = sld [smem:[%s12536_s0 + %s10383_s28]]   ;;  %s10387_s28 = smov 45  }
  0x4c   :  { %s10614_s25 = sld [smem:[%s12536_s0 + %s10384_s7]]  }
  0x4d   :  { %12611 = sst [smem:[#allocation38_spill]] %s10599_s21 }
  0x4e   :  { %12612 = sst [smem:[#allocation39_spill]] %s10604_s17 }
  0x4f   :  { %s10619_s21 = sld [smem:[%s12536_s0 + %s10385_s15]]  }
  0x50   :  { %s10624_s17 = sld [smem:[%s12536_s0 + %s10386_s22]]  }
  0x51   :  { %12613 = sst [smem:[#allocation40_spill]] %s10609_s4 }
  0x52   :  { %s10629_s4 = sld [smem:[%s12536_s0 + %s10387_s28]]  }
  0x53   :  { %96 = vsyncpa [#allocation3], 0 }
  0x54   :  { %98 = vsyncpa [#allocation3 + $0x1], 0  ;;  %s10631_s7 = smov 0   ;;  %s10633_s10 = smov 0  }
  0x55   :  { %s10635_s11 = smov 0   ;;  %s10637_s15 = smov 0  }
  0x56 LB: > { %s12614_s14 = sld [smem:[#allocation13_spill]]  ;;  %s10652_s0 = sadd.s32 4294967295, %s10341_s15   ;;  %s10329_s7 = sphi %s10631_s7, %s12660_s7   ;;  %s10341_s15 = sphi %s10637_s15, %s12663_s15   ;;  %s10337_s11 = sphi %s10635_s11, %s12662_s11   ;;  %s10333_s10 = sphi %s10633_s10, %s12661_s10  }
  0x57   : > { %s12615_s12 = sld [smem:[#allocation15_spill]]  ;;  %s8140_s16 = sadd.s32 4294967294, %s10341_s15  }
  0x58   : > { %s12616_s8 = sld [smem:[#allocation12_spill]]  ;;  %s10656_s18 = sadd.s32 1, %s10341_s15  }
  0x59   : > { %s12617_s6 = sld [smem:[#allocation14_spill]]  ;;  %s1086_s22 = sadd.s32 1, %s10337_s11 }
  0x5a   : > { %s12618_s3 = sld [smem:[#allocation11_spill]]  ;;  %s1083_s23 = ssub.s32 %s10341_s15, %s10656_s18 }
  0x5b   : > { %p1096_p0 = scmp.ne.s32.totalorder %s10337_s11, %s10333_s10  ;;  %p1084_p1 = scmp.eq.s32.totalorder %s1083_s23, 0 }
  0x5c   : > { %p1097_p2 = scmp.eq.s32.totalorder %s10652_s0, 1  ;;  %p1102_p3 = scmp.ne.s32.totalorder %s10333_s10, %s10329_s7 }
  0x5d   : > { %p1103_p4 = scmp.eq.s32.totalorder %s8140_s16, 1  ;;  %p8143_p7 = scmp.ge.s32.totalorder %s10341_s15, 1 }
  0x5e   : > { %s10667_s26 = scalar_select %p1084_p1, %s10337_s11, %s1086_s22  }
  0x5f   : > { %p10669_p5 = por %p1097_p2, %p1096_p0  ;;  %p10673_p6 = por %p1103_p4, %p1102_p3 }
  0x60   : > { %p1281_p8 = scmp.lt.s32.totalorder %s10341_s15, 3 }
  0x62   : > { %p1282_p9 = pnand %p8143_p7, %p1281_p8 }
  0x63   : > { %p1409_p10 = scmp.lt.s32.totalorder (!%p1282_p9), %s10652_s0, 1  ;;  %s12621_s5 = sld [smem:[#allocation5_spill]] (!%p1282_p9) }
  0x64   : > { %1285 = sbr.rel (%p1282_p9) target bundleno = 10434 (0x28c2), region = 200  ;;  %s12622_s13 = sld [smem:[#allocation7_spill]] (!%p1282_p9) }
  0x65   : > { %s12629_s9 = sld [smem:[#allocation6_spill]] (!%p1282_p9) }
  0x69   : > { %v1446_v0 = vld [vmem:[%s10434_s29] sm:$0xff]  ;;  %v1552_v1 = vld [vmem:[%s12618_s3 + $0x78] sm:$0xff]  ;;  %v10388_v2 = vmov 0.0   ;;  %vm10389_vm0 = vmmov 0   ;;  %s10686_s2 = scalar_select %p1409_p10, %s10652_s0, 1  ;;  %v1551_v3 = vld [vmem:[%s12618_s3 + $0x70] sm:$0xff] }
  0x6a   : > { %9118 = vmatprep.subr.mxu0 %v10388_v2  ;;  %9120 = vmatprep.mubr.msk.f32.mxu0 %vm10389_vm0, %v10388_v2  ;;  %v1550_v4 = vld [vmem:[%s12618_s3 + $0x68] sm:$0xff]  ;;  %vm1447_vm1 = vcmask 64512   ;;  %v1568_v5 = vld [vmem:[%s12616_s8 + $0x78] sm:$0xff]  ;;  %v1549_v7 = vld [vmem:[%s12618_s3 + $0x60] sm:$0xff]  ;;  %vm2540_vm8 = vcmask 130048   ;;  %vm4260_vm9 = vcmask 57344  }
  0x6b   : > { %9119 = vmatpush3.msra.mxu0 %v1446_v0  ;;  %9129 = vmatprep.subr.mxu1 %v10388_v2  ;;  %s12556_s16 = smul.u32 24, %s10686_s2  ;;  %v1567_v8 = vld [vmem:[%s12616_s8 + $0x70] sm:$0xff]  ;;  %v1566_v10 = vld [vmem:[%s12616_s8 + $0x68] sm:$0xff]  ;;  %v1548_v11 = vld [vmem:[%s12618_s3 + $0x58] sm:$0xff]  ;;  %vm4449_vm10 = vcmask 1041409   ;;  %vm4451_vm11 = vcmask 1042434  }
  0x6c   : > { %9130 = vmatpush3.msra.mxu1 %v1552_v1  ;;  %9170 = vmatprep.subr.mxu0 %v10388_v2  ;;  %v1565_v12 = vld [vmem:[%s12616_s8 + $0x60] sm:$0xff]  ;;  %v1564_v14 = vld [vmem:[%s12616_s8 + $0x58] sm:$0xff]  ;;  %v1547_v15 = vld [vmem:[%s12618_s3 + $0x50] sm:$0xff]  ;;  %s10071_s23 = smul.u32 3, %s10686_s2  ;;  %vm4760_vm12 = vcmask 1042432   ;;  %vm4743_vm15 = vcmask 18432  }
  0x6d   : > { %9131 = vmatprep.subr.mxu1 %v10388_v2  ;;  %9161 = vmatprep.mubr.msk.f32.mxu1 %vm10389_vm0, %v10388_v2  ;;  %s1413_s22 = scalar_lea.vmem %s12621_s5, %s12556_s16  ;;  %v1563_v16 = vld [vmem:[%s12616_s8 + $0x50] sm:$0xff]  ;;  %v1546_v17 = vld [vmem:[%s12618_s3 + $0x48] sm:$0xff]  ;;  %v1545_v19 = vld [vmem:[%s12618_s3 + $0x40] sm:$0xff]  ;;  %s12631_s5 = sld [smem:[#allocation17_spill]] }
  0x6e   : > { %9132 = vmatpush3.msra.mxu1 %v1551_v3  ;;  %v1434_v6 = vld [vmem:[%s1413_s22] sm:$0xff]  ;;  %v1435_v9 = vld [vmem:[%s1413_s22 + $0x8] sm:$0xff]  ;;  %v1436_v13 = vld [vmem:[%s1413_s22 + $0x10] sm:$0xff]  ;;  %s10851_s22 = scalar_lea.vmem %s12622_s13, %s10071_s23  ;;  %s12557_s23 = sshll.u32 %s10686_s2, 2 }
  0x6f   : > { %9133 = vmatprep.subr.mxu1 %v10388_v2  ;;  %9121 = vmatmul.mubr.msk.f32.vlgmr.msra.gmra.mxu0 %vm1447_vm1, %v1434_v6  ;;  %v1562_v18 = vld [vmem:[%s12616_s8 + $0x48] sm:$0xff]  ;;  %v1561_v20 = vld [vmem:[%s12616_s8 + $0x40] sm:$0xff]  ;;  %v1544_v21 = vld [vmem:[%s12618_s3 + $0x38] sm:$0xff]  ;;  %s10953_s16 = scalar_lea.vmem %s12629_s9, %s12557_s23  ;;  %s12630_s23 = sld [smem:[#allocation16_spill]] }
  0x70   : > { %9134 = vmatpush3.msra.mxu1 %v1550_v4  ;;  %9123 = vmatprep.mubr.msk.f32.mxu0 %vm10389_vm0, %v10388_v2  ;;  %v1560_v22 = vld [vmem:[%s12616_s8 + $0x38] sm:$0xff]  ;;  %v1543_v23 = vld [vmem:[%s12618_s3 + $0x30] sm:$0xff]  ;;  %v1542_v25 = vld [vmem:[%s12618_s3 + $0x28] sm:$0xff]  ;;  %s12632_s9 = sld [smem:[#allocation18_spill]] }
  0x71   : > { %9135 = vmatprep.subr.mxu1 %v10388_v2  ;;  %9171 = vmatpush3.msra.mxu0 %v1568_v5  ;;  %v1559_v24 = vld [vmem:[%s12616_s8 + $0x30] sm:$0xff]  ;;  %v1558_v26 = vld [vmem:[%s12616_s8 + $0x28] sm:$0xff]  ;;  %v1541_v27 = vld [vmem:[%s12618_s3 + $0x20] sm:$0xff]  ;;  %s12636_s13 = sld [smem:[#allocation20_spill]] }
  0x72   : > { %9172 = vmatprep.subr.mxu0 %v10388_v2  ;;  %9136 = vmatpush3.msra.mxu1 %v1549_v7  ;;  %v1557_v28 = vld [vmem:[%s12616_s8 + $0x20] sm:$0xff]  ;;  %v1540_v29 = vld [vmem:[%s12618_s3 + $0x18] sm:$0xff]  ;;  %v1539_v31 = vld [vmem:[%s12618_s3 + $0x10] sm:$0xff] }
  0x73   : > { %9173 = vmatpush3.msra.mxu0 %v1567_v8  ;;  %9137 = vmatprep.subr.mxu1 %v10388_v2  ;;  %v1556_v30 = vld [vmem:[%s12616_s8 + $0x18] sm:$0xff]  ;;  %v1555_v32 = vld [vmem:[%s12616_s8 + $0x10] sm:$0xff]  ;;  %v1538_v33 = vld [vmem:[%s12618_s3 + $0x8] sm:$0xff] }
  0x74   : > { %9124 = vmatmul.mubr.msk.f32.gmra.mxu0 %vm1447_vm1, %v1435_v9  ;;  %9174 = vmatprep.subr.mxu0 %v10388_v2  ;;  %v1554_v34 = vld [vmem:[%s12616_s8 + $0x8] sm:$0xff]  ;;  %v1537_v35 = vld [vmem:[%s12618_s3] sm:$0xff]  ;;  %v1584_v37 = vld [vmem:[%s12614_s14 + $0x78] sm:$0xff] }
  0x75   : > { %9126 = vmatprep.mubr.msk.f32.mxu0 %vm10389_vm0, %v10388_v2  ;;  %9175 = vmatpush3.msra.mxu0 %v1566_v10  ;;  %v1553_v36 = vld [vmem:[%s12616_s8] sm:$0xff]  ;;  %v1583_v39 = vld [vmem:[%s12614_s14 + $0x70] sm:$0xff]  ;;  %v1582_v41 = vld [vmem:[%s12614_s14 + $0x68] sm:$0xff] }
  0x76   : > { %9176 = vmatprep.subr.mxu0 %v10388_v2  ;;  %9138 = vmatpush3.msra.mxu1 %v1548_v11  ;;  %v1581_v43 = vld [vmem:[%s12614_s14 + $0x60] sm:$0xff]  ;;  %v1580_v45 = vld [vmem:[%s12614_s14 + $0x58] sm:$0xff]  ;;  %v1579_v47 = vld [vmem:[%s12614_s14 + $0x50] sm:$0xff] }
  0x77   : > { %9177 = vmatpush3.msra.mxu0 %v1565_v12  ;;  %9139 = vmatprep.subr.mxu1 %v10388_v2  ;;  %v1578_v49 = vld [vmem:[%s12614_s14 + $0x48] sm:$0xff]  ;;  %v1577_v50 = vld [vmem:[%s12614_s14 + $0x40] sm:$0xff]  ;;  %v1576_v51 = vld [vmem:[%s12614_s14 + $0x38] sm:$0xff] }
  0x78   : > { %9127 = vmatmul.mubr.msk.f32.gmra.mxu0 %vm1447_vm1, %v1436_v13  ;;  %9178 = vmatprep.subr.mxu0 %v10388_v2  ;;  %v1575_v52 = vld [vmem:[%s12614_s14 + $0x30] sm:$0xff]  ;;  %v1574_v53 = vld [vmem:[%s12614_s14 + $0x28] sm:$0xff]  ;;  %v1573_v54 = vld [vmem:[%s12614_s14 + $0x20] sm:$0xff] }
  0x79   : > { %9179 = vmatpush3.msra.mxu0 %v1564_v14  ;;  %9140 = vmatpush3.msra.mxu1 %v1547_v15  ;;  %v1572_v55 = vld [vmem:[%s12614_s14 + $0x18] sm:$0xff]  ;;  %v1571_v56 = vld [vmem:[%s12614_s14 + $0x10] sm:$0xff]  ;;  %v1570_v57 = vld [vmem:[%s12614_s14 + $0x8] sm:$0xff]  ;;  %v10390_v14 = vmov 0   ;;  %v2132_v15 = vlaneseq }
  0x7a   : > { %9180 = vmatprep.subr.mxu0 %v10388_v2  ;;  %9141 = vmatprep.subr.mxu1 %v10388_v2  ;;  %v1569_v58 = vld [vmem:[%s12614_s14] sm:$0xff] }
  0x7b   : > { %9181 = vmatpush3.msra.mxu0 %v1563_v16  ;;  %9142 = vmatpush3.msra.mxu1 %v1546_v17  ;;  %v1438_v16 = vld [vmem:[%s10851_s22] sm:$0x1]  ;;  %v10854_v17 = vshrl.u32 %v2132_v15, 7  ;;  %v1588_v15 = vld [vmem:[%s10454_s19 + $0x18] sm:$0xff] }
  0x7c   : > { %9182 = vmatprep.subr.mxu0 %v10388_v2  ;;  %9143 = vmatprep.subr.mxu1 %v10388_v2  ;;  %vm2126_vm2 = vcmp.gt.f32.partialorder %v1438_v16, 0.0  ;;  %v1587_v16 = vld [vmem:[%s10454_s19 + $0x10] sm:$0xff] }
  0x7d   : > { %9183 = vmatpush3.msra.mxu0 %v1562_v18  ;;  %9144 = vmatpush3.msra.mxu1 %v1545_v19  ;;  %v10857_v18 = vsub.s32 0, %v10854_v17  ;;  %v1439_v19 = vld [vmem:[%s10851_s22 + $0x1] sm:$0x1] }
  0x7e   : > { %9184 = vmatprep.subr.mxu0 %v10388_v2  ;;  %9145 = vmatprep.subr.mxu1 %v10388_v2  ;;  %vm2127_vm3 = vcmp.gt.f32.partialorder %v1439_v19, 0.0  ;;  %v1586_v19 = vld [vmem:[%s10454_s19 + $0x8] sm:$0xff] }
  0x7f   : > { %9185 = vmatpush3.msra.mxu0 %v1561_v20  ;;  %9146 = vmatpush3.msra.mxu1 %v1544_v21  ;;  %v2129_v20 = vsel %vm2126_vm2, 1, %v10390_v14  ;;  %vm4756_vm2 = vcmask 23552  }
  0x80   : > { %9186 = vmatprep.subr.mxu0 %v10388_v2  ;;  %9147 = vmatprep.subr.mxu1 %v10388_v2  ;;  %v2135_v21 = vrot.slane %v2129_v20, %v10857_v18 }
  0x81   : > { %9187 = vmatpush3.msra.mxu0 %v1560_v22  ;;  %9148 = vmatpush3.msra.mxu1 %v1543_v23  ;;  %v1440_v22 = vld [vmem:[%s10851_s22 + $0x2] sm:$0x1]  ;;  %v2130_v23 = vsel %vm2127_vm3, 1, %v10390_v14 }
  0x82   : > { %9188 = vmatprep.subr.mxu0 %v10388_v2  ;;  %9149 = vmatprep.subr.mxu1 %v10388_v2  ;;  %vm2128_vm4 = vcmp.gt.f32.partialorder %v1440_v22, 0.0  ;;  %vm10864_vm5 = vcmp.eq.s32.totalorder %v2135_v21, 1 }
  0x83   : > { %9189 = vmatpush3.msra.mxu0 %v1559_v24  ;;  %9150 = vmatpush3.msra.mxu1 %v1542_v25 }
  0x84   : > { %9190 = vmatprep.subr.mxu0 %v10388_v2  ;;  %9151 = vmatprep.subr.mxu1 %v10388_v2 }
  0x85   : > { %9191 = vmatpush3.msra.mxu0 %v1558_v26  ;;  %9152 = vmatpush3.msra.mxu1 %v1541_v27  ;;  %v2139_v27 = vrot.slane %v2130_v23, %v10857_v18 }
  0x86   : > { %9192 = vmatprep.subr.mxu0 %v10388_v2  ;;  %9153 = vmatprep.subr.mxu1 %v10388_v2 }
  0x87   : > { %9193 = vmatpush3.msra.mxu0 %v1557_v28  ;;  %9154 = vmatpush3.msra.mxu1 %v1540_v29  ;;  %v2131_v29 = vsel %vm2128_vm4, 1, %v10390_v14  ;;  %vm10873_vm6 = vcmp.eq.s32.totalorder %v2139_v27, 1 }
  0x88   : > { %9194 = vmatprep.subr.mxu0 %v10388_v2  ;;  %9155 = vmatprep.subr.mxu1 %v10388_v2 }
  0x89   : > { %9195 = vmatpush3.msra.mxu0 %v1556_v30  ;;  %9156 = vmatpush3.msra.mxu1 %v1539_v31 }
  0x8a   : > { %9196 = vmatprep.subr.mxu0 %v10388_v2  ;;  %9157 = vmatprep.subr.mxu1 %v10388_v2 }
  0x8b   : > { %9197 = vmatpush3.msra.mxu0 %v1555_v32  ;;  %9158 = vmatpush3.msra.mxu1 %v1538_v33 }
  0x8c   : > { %9198 = vmatprep.subr.mxu0 %v10388_v2  ;;  %9159 = vmatprep.subr.mxu1 %v10388_v2 }
  0x8d   : > { %9199 = vmatpush3.msra.mxu0 %v1554_v34  ;;  %9160 = vmatpush3.msra.mxu1 %v1537_v35  ;;  %v2143_v34 = vrot.slane %v2131_v29, %v10857_v18 }
  0x8e   : > { %9200 = vmatprep.subr.mxu0 %v10388_v2  ;;  %9202 = vmatprep.mubr.msk.f32.mxu0 %vm10389_vm0, %v10388_v2 }
  0x8f   : > { %9211 = vmatprep.subr.mxu1 %v10388_v2  ;;  %9201 = vmatpush3.msra.mxu0 %v1553_v36  ;;  %vm10881_vm7 = vcmp.eq.s32.totalorder %v2143_v34, 1 }
  0x90   : > { %9252 = vmatprep.subr.mxu0 %v10388_v2  ;;  %10164 = vset.pattern.permute.xlu1 %v10390_v14 }
  0x91   : > { %10165 = vset.pattern.permute.xlu0 %v10390_v14 }
 0x12f   : > { %v10769_v38 = vpop.f32.mrf.mxu0 }
 0x130   : > { %9162 = vmatmul.mubr.f32.vlgmr.msra.gmra.mxu1 %v10769_v38  ;;  %9203 = vmatmul.mubr.f32.vlgmr.msra.gmra.mxu0 %v10769_v38 }
 0x131   : > { %9212 = vmatpush3.msra.mxu1 %v1584_v37  ;;  %v9122_v40 = vpop.f32.mrf.mxu0  ;;  %9164 = vmatprep.mubr.msk.f32.mxu1 %vm10389_vm0, %v10388_v2 }
 0x132   : > { %9213 = vmatprep.subr.mxu1 %v10388_v2  ;;  %9205 = vmatprep.mubr.msk.f32.mxu0 %vm10389_vm0, %v10388_v2 }
 0x133   : > { %9214 = vmatpush3.msra.mxu1 %v1583_v39 }
 0x134   : > { %v10780_v42 = vpop.f32.mrf.mxu0  ;;  %9215 = vmatprep.subr.mxu1 %v10388_v2 }
 0x135   : > { %9165 = vmatmul.mubr.f32.gmra.mxu1 %v10780_v42  ;;  %9206 = vmatmul.mubr.f32.gmra.mxu0 %v10780_v42 }
 0x136   : > { %9216 = vmatpush3.msra.mxu1 %v1582_v41  ;;  %v9125_v44 = vpop.f32.mrf.mxu0  ;;  %9167 = vmatprep.mubr.msk.f32.mxu1 %vm10389_vm0, %v10388_v2 }
 0x137   : > { %9217 = vmatprep.subr.mxu1 %v10388_v2  ;;  %9208 = vmatprep.mubr.msk.f32.mxu0 %vm10389_vm0, %v10388_v2 }
 0x138   : > { %9218 = vmatpush3.msra.mxu1 %v1581_v43  ;;  %v10790_v46 = vpop.f32.mrf.mxu0 }
 0x139   : > { %9219 = vmatprep.subr.mxu1 %v10388_v2  ;;  %9168 = vmatmul.mubr.f32.gmra.mxu1 %v10790_v46 }
 0x13a   : > { %9209 = vmatmul.mubr.f32.gmra.mxu0 %v10790_v46  ;;  %9220 = vmatpush3.msra.mxu1 %v1580_v45  ;;  %v9128_v48 = vpop.f32.mrf.mxu0 }
 0x13b   : > { %9221 = vmatprep.subr.mxu1 %v10388_v2  ;;  %9243 = vmatprep.mubr.msk.f32.mxu1 %vm10389_vm0, %v10388_v2 }
 0x13c   : > { %9222 = vmatpush3.msra.mxu1 %v1579_v47  ;;  %9254 = vmatprep.mubr.msk.f32.mxu0 %vm10389_vm0, %v10388_v2 }
 0x13d   : > { %9223 = vmatprep.subr.mxu1 %v10388_v2 }
 0x13e   : > { %9224 = vmatpush3.msra.mxu1 %v1578_v49 }
 0x13f   : > { %9225 = vmatprep.subr.mxu1 %v10388_v2 }
 0x140   : > { %9226 = vmatpush3.msra.mxu1 %v1577_v50 }
 0x141   : > { %9227 = vmatprep.subr.mxu1 %v10388_v2 }
 0x142   : > { %9228 = vmatpush3.msra.mxu1 %v1576_v51 }
 0x143   : > { %9229 = vmatprep.subr.mxu1 %v10388_v2 }
 0x144   : > { %9230 = vmatpush3.msra.mxu1 %v1575_v52 }
 0x145   : > { %9231 = vmatprep.subr.mxu1 %v10388_v2 }
 0x146   : > { %9232 = vmatpush3.msra.mxu1 %v1574_v53 }
 0x147   : > { %9233 = vmatprep.subr.mxu1 %v10388_v2 }
 0x148   : > { %9234 = vmatpush3.msra.mxu1 %v1573_v54 }
 0x149   : > { %9235 = vmatprep.subr.mxu1 %v10388_v2 }
 0x14a   : > { %9236 = vmatpush3.msra.mxu1 %v1572_v55 }
 0x14b   : > { %9237 = vmatprep.subr.mxu1 %v10388_v2 }
 0x14c   : > { %9238 = vmatpush3.msra.mxu1 %v1571_v56 }
 0x14d   : > { %9239 = vmatprep.subr.mxu1 %v10388_v2 }
 0x14e   : > { %9240 = vmatpush3.msra.mxu1 %v1570_v57 }
 0x14f   : > { %9241 = vmatprep.subr.mxu1 %v10388_v2 }
 0x150   : > { %9242 = vmatpush3.msra.mxu1 %v1569_v58 }
 0x151   : > { %9244 = vmatmul.mubr.f32.vlgmr.msra.gmra.mxu1 %v10769_v38  ;;  %9282 = vmatprep.subr.mxu1 %v10388_v2 }
 0x152   : > { %9246 = vmatprep.mubr.msk.f32.mxu1 %vm10389_vm0, %v10388_v2 }
 0x155   : > { %9247 = vmatmul.mubr.f32.gmra.mxu1 %v10780_v42 }
 0x156   : > { %9249 = vmatprep.mubr.msk.f32.mxu1 %vm10389_vm0, %v10388_v2 }
 0x159   : > { %9250 = vmatmul.mubr.f32.gmra.mxu1 %v10790_v46 }
 0x15a   : > { %9314 = vmatprep.mubr.msk.f32.mxu1 %vm10389_vm0, %v10388_v2 }
 0x1f0   : > { %v1739_v59 = vpop.f32.mrf.mxu1  ;;  %v1819_v60 = vpop.f32.mrf.mxu0 }
 0x1f1   : > { %9253 = vmatpush3.xpose.msra.mxu0 %v1819_v60 }
 0x1f2   : > { %v9163_v61 = vpop.f32.mrf.mxu1  ;;  %v9204_v62 = vpop.f32.mrf.mxu0  ;;  %9257 = vmatprep.subr.mxu0 %v10388_v2 }
 0x1f4   : > { %9255 = vmatmul.mubr.f32.vlgmr.msra.gmra.mxu0 %v1739_v59 }
 0x1f5   : > { %v1744_v63 = vpop.f32.mrf.mxu1  ;;  %v1824_v0 = vpop.f32.mrf.mxu0  ;;  %9259 = vmatprep.mubr.msk.f32.mxu0 %vm10389_vm0, %v10388_v2 }
 0x1f6   : > { %9258 = vmatpush3.xpose.msra.mxu0 %v1824_v0  ;;  %v1599_v0 = vld [vmem:[%s10454_s19 + $0x70] sm:$0xff] }
 0x1f7   : > { %v9166_v1 = vpop.f32.mrf.mxu1  ;;  %v9207_v3 = vpop.f32.mrf.mxu0  ;;  %9262 = vmatprep.subr.mxu0 %v10388_v2 }
 0x1f8   : > { %v1598_v1 = vld [vmem:[%s10454_s19 + $0x68] sm:$0xff]  ;;  %v1597_v3 = vld [vmem:[%s10454_s19 + $0x60] sm:$0xff] }
 0x1f9   : > { %v1749_v4 = vpop.f32.mrf.mxu1  ;;  %9260 = vmatmul.mubr.f32.vlgmr.msra.gmra.mxu0 %v1744_v63  ;;  %v1600_v63 = vld [vmem:[%s10454_s19 + $0x78] sm:$0xff] }
 0x1fa   : > { %v1829_v5 = vpop.f32.mrf.mxu0  ;;  %9264 = vmatprep.mubr.msk.f32.mxu0 %vm10389_vm0, %v10388_v2  ;;  %9283 = vmatpush3.msra.mxu1 %v1600_v63 }
 0x1fb   : > { %9263 = vmatpush3.xpose.msra.mxu0 %v1829_v5  ;;  %v9169_v6 = vpop.f32.mrf.mxu1  ;;  %9284 = vmatprep.subr.mxu1 %v10388_v2  ;;  %v1595_v5 = vld [vmem:[%s10454_s19 + $0x50] sm:$0xff] }
 0x1fc   : > { %v9210_v7 = vpop.f32.mrf.mxu0  ;;  %9267 = vmatprep.subr.mxu0 %v10388_v2  ;;  %9285 = vmatpush3.msra.mxu1 %v1599_v0  ;;  %v1594_v6 = vld [vmem:[%s10454_s19 + $0x48] sm:$0xff] }
 0x1fd   : > { %9286 = vmatprep.subr.mxu1 %v10388_v2  ;;  %v1593_v7 = vld [vmem:[%s10454_s19 + $0x40] sm:$0xff] }
 0x1fe   : > { %9265 = vmatmul.mubr.f32.vlgmr.msra.gmra.mxu0 %v1749_v4  ;;  %9287 = vmatpush3.msra.mxu1 %v1598_v1  ;;  %v1596_v4 = vld [vmem:[%s10454_s19 + $0x58] sm:$0xff] }
 0x1ff   : > { %9269 = vmatprep.mubr.msk.f32.mxu0 %vm10389_vm0, %v10388_v2  ;;  %9288 = vmatprep.subr.mxu1 %v10388_v2 }
 0x200   : > { %9289 = vmatpush3.msra.mxu1 %v1597_v3 }
 0x201   : > { %9290 = vmatprep.subr.mxu1 %v10388_v2 }
 0x202   : > { %9291 = vmatpush3.msra.mxu1 %v1596_v4  ;;  %v1630_v4 = vld [vmem:[%s12615_s12 + $0xc8] sm:$0xff] }
 0x203   : > { %9292 = vmatprep.subr.mxu1 %v10388_v2 }
 0x204   : > { %9293 = vmatpush3.msra.mxu1 %v1595_v5  ;;  %v1629_v5 = vld [vmem:[%s12615_s12 + $0xc0] sm:$0xff] }
 0x205   : > { %9294 = vmatprep.subr.mxu1 %v10388_v2 }
 0x206   : > { %9295 = vmatpush3.msra.mxu1 %v1594_v6  ;;  %v1628_v6 = vld [vmem:[%s12615_s12 + $0xb8] sm:$0xff] }
 0x207   : > { %9296 = vmatprep.subr.mxu1 %v10388_v2 }
 0x208   : > { %9297 = vmatpush3.msra.mxu1 %v1593_v7  ;;  %v1627_v7 = vld [vmem:[%s12615_s12 + $0xb0] sm:$0xff] }
 0x209   : > { %9298 = vmatprep.subr.mxu1 %v10388_v2 }
 0x211   : > { %v1899_v8 = vpop.f32.mrf.mxu1 }
 0x212   : > { %9268 = vmatpush3.msra.mxu0 %v1899_v8  ;;  %v1592_v8 = vld [vmem:[%s10454_s19 + $0x38] sm:$0xff] }
 0x213   : > { %v9245_v9 = vpop.f32.mrf.mxu1  ;;  %9272 = vmatprep.subr.mxu0 %v10388_v2  ;;  %9299 = vmatpush3.msra.mxu1 %v1592_v8  ;;  %v1626_v8 = vld [vmem:[%s12615_s12 + $0xa8] sm:$0xff] }
 0x214   : > { %v1591_v9 = vld [vmem:[%s10454_s19 + $0x30] sm:$0xff]  ;;  %9300 = vmatprep.subr.mxu1 %v10388_v2 }
 0x215   : > { %v10843_v10 = vpop.f32.mrf.mxu1  ;;  %9301 = vmatpush3.msra.mxu1 %v1591_v9  ;;  %v1625_v9 = vld [vmem:[%s12615_s12 + $0xa0] sm:$0xff] }
 0x216   : > { %9302 = vmatprep.subr.mxu1 %v10388_v2 }
 0x217   : > { %v9248_v11 = vpop.f32.mrf.mxu1 }
 0x218   : > { %v1590_v11 = vld [vmem:[%s10454_s19 + $0x28] sm:$0xff] }
 0x219   : > { %v10845_v12 = vpop.f32.mrf.mxu1  ;;  %9303 = vmatpush3.msra.mxu1 %v1590_v11  ;;  %v1624_v11 = vld [vmem:[%s12615_s12 + $0x98] sm:$0xff] }
 0x21a   : > { %9304 = vmatprep.subr.mxu1 %v10388_v2 }
 0x21b   : > { %v9251_v13 = vpop.f32.mrf.mxu1 }
 0x21c   : > { %v1589_v13 = vld [vmem:[%s10454_s19 + $0x20] sm:$0xff] }
 0x21d   : > { %9305 = vmatpush3.msra.mxu1 %v1589_v13  ;;  %v1623_v13 = vld [vmem:[%s12615_s12 + $0x90] sm:$0xff] }
 0x21e   : > { %9306 = vmatprep.subr.mxu1 %v10388_v2 }
 0x21f   : > { %9307 = vmatpush3.msra.mxu1 %v1588_v15  ;;  %v1622_v15 = vld [vmem:[%s12615_s12 + $0x88] sm:$0xff] }
 0x220   : > { %9308 = vmatprep.subr.mxu1 %v10388_v2 }
 0x221   : > { %9309 = vmatpush3.msra.mxu1 %v1587_v16  ;;  %v1621_v16 = vld [vmem:[%s12615_s12 + $0x80] sm:$0xff] }
 0x222   : > { %9310 = vmatprep.subr.mxu1 %v10388_v2 }
 0x223   : > { %9311 = vmatpush3.msra.mxu1 %v1586_v19  ;;  %v1620_v19 = vld [vmem:[%s12615_s12 + $0x78] sm:$0xff] }
 0x224   : > { %9312 = vmatprep.subr.mxu1 %v10388_v2 }
 0x2b4   : > { %v1979_v24 = vpop.f32.mrf.mxu0 }
 0x2b5   : > { %v2123_v26 = vmul.f32 0.088388346, %v1979_v24 }
 0x2b6   : > { %v9256_v28 = vpop.f32.mrf.mxu0 }
 0x2b7   : > { %v2147_v30 = vsel %vm10864_vm5, %v2123_v26, -1e+09 }
 0x2b8   : > { %v2150_v31 = vsel %vm1447_vm1, %v2147_v30, -inf }
 0x2b9   : > { %v2049_v32 = vpop.f32.mrf.mxu0  ;;  %2151 = vmax.xlane.f32.xlu0 %v2150_v31 }
 0x2ba   : > { %v2124_v35 = vmul.f32 0.088388346, %v2049_v32 }
 0x2bb   : > { %v9261_v36 = vpop.f32.mrf.mxu0 }
 0x2bc   : > { %v2148_v37 = vsel %vm10873_vm6, %v2124_v35, -1e+09  ;;  %v1602_v36 = vld [vmem:[%s10459_s24 + $0x8] sm:$0xff] }
 0x2bd   : > { %v2153_v40 = vsel %vm1447_vm1, %v2148_v37, -inf }
 0x2be   : > { %v2119_v39 = vpop.f32.mrf.mxu0  ;;  %2154 = vmax.xlane.f32.xlu0 %v2153_v40 }
 0x2bf   : > { %v2125_v43 = vmul.f32 0.088388346, %v2119_v39  ;;  %v1437_v39 = vld [vmem:[%s10953_s16] sm:$0x7] }
 0x2c0   : > { %v9266_v44 = vpop.f32.mrf.mxu0 }
 0x2c1   : > { %v2149_v45 = vsel %vm10881_vm7, %v2125_v43, -1e+09 }
 0x2c2   : > { %v2156_v47 = vsel %vm1447_vm1, %v2149_v45, -inf }
 0x2c3   : > { %2157 = vmax.xlane.f32.xlu1 %v2156_v47 }
 0x342   : > { %v2152_v48 = vpop.xlane.xlu0 %2151 }
 0x343   : > { %v2159_v49 = vsub.f32 %v2147_v30, %v2152_v48 }
 0x345   : > { %v2162_v50 = vmul.f32 1.442695, %v2159_v49 }
 0x347   : > { %10166 = vpow2.f32 %v2162_v50  ;;  %v2155_v51 = vpop.xlane.xlu0 %2154 }
 0x348   : > { %v2160_v52 = vsub.f32 %v2148_v37, %v2155_v51  ;;  %v1601_v37 = vld [vmem:[%s10459_s24] sm:$0xff] }
 0x34a   : > { %v2164_v53 = vmul.f32 1.442695, %v2160_v52  ;;  %v1636_v52 = vld [vmem:[%s12615_s12 + $0xf8] sm:$0xff] }
 0x34c   : > { %v2158_v54 = vpop.xlane.xlu1 %2157  ;;  %10168 = vpow2.f32 %v2164_v53  ;;  %v1635_v53 = vld [vmem:[%s12615_s12 + $0xf0] sm:$0xff] }
 0x34d   : > { %v2161_v55 = vsub.f32 %v2149_v45, %v2158_v54  ;;  %v1634_v54 = vld [vmem:[%s12615_s12 + $0xe8] sm:$0xff] }
 0x34f   : > { %v2166_v56 = vmul.f32 1.442695, %v2161_v55  ;;  %v1633_v55 = vld [vmem:[%s12615_s12 + $0xe0] sm:$0xff] }
 0x351   : > { %10170 = vpow2.f32 %v2166_v56  ;;  %v1631_v56 = vld [vmem:[%s12615_s12 + $0xd0] sm:$0xff] }
 0x354   : > { %v10167_v57 = vpop.eup %10166 }
 0x355   : > { %v2168_v58 = vsel %vm1447_vm1, %v10167_v57, 0.0 }
 0x356   : > { %2169 = vadd.xlane.f32.xlu1 %v2168_v58 }
 0x359   : > { %v10889_v59 = vpop.eup %10168 }
 0x35a   : > { %v2171_v60 = vsel %vm1447_vm1, %v10889_v59, 0.0 }
 0x35b   : > { %2172 = vadd.xlane.f32.xlu0 %v2171_v60 }
 0x35e   : > { %v10893_v61 = vpop.eup %10170 }
 0x35f   : > { %v2174_v62 = vsel %vm1447_vm1, %v10893_v61, 0.0 }
 0x360   : > { %2175 = vadd.xlane.f32.xlu1 %v2174_v62 }
 0x3df   : > { %v2170_v20 = vpop.xlane.xlu1 %2169 }
 0x3e0   : > { %10172 = vrcp.f32 %v2170_v20  ;;  %v1619_v20 = vld [vmem:[%s12615_s12 + $0x70] sm:$0xff] }
 0x3e4   : > { %v2173_v21 = vpop.xlane.xlu0 %2172 }
 0x3e5   : > { %10174 = vrcp.f32 %v2173_v21  ;;  %v1618_v21 = vld [vmem:[%s12615_s12 + $0x68] sm:$0xff] }
 0x3e9   : > { %v2176_v22 = vpop.xlane.xlu1 %2175 }
 0x3ea   : > { %10176 = vrcp.f32 %v2176_v22  ;;  %v1617_v22 = vld [vmem:[%s12615_s12 + $0x60] sm:$0xff] }
 0x3ed   : > { %v10173_v23 = vpop.eup %10172 }
 0x3ee   : > { %v2183_v24 = vmul.f32 %v10173_v23, %v10167_v57  ;;  %v1616_v23 = vld [vmem:[%s12615_s12 + $0x58] sm:$0xff] }
 0x3f0   : > { %9270 = vmatmul.mubr.msk.f32.vlgmr.msra.gmra.mxu0 %vm1447_vm1, %v2183_v24  ;;  %v1615_v24 = vld [vmem:[%s12615_s12 + $0x50] sm:$0xff] }
 0x3f1   : > { %9273 = vmatpush3.msra.mxu0 %v10843_v10  ;;  %9274 = vmatprep.mubr.msk.f32.mxu0 %vm10389_vm0, %v10388_v2  ;;  %v1585_v10 = vld [vmem:[%s10454_s19] sm:$0xff] }
 0x3f2   : > { %v10175_v26 = vpop.eup %10174  ;;  %9277 = vmatprep.subr.mxu0 %v10388_v2  ;;  %9313 = vmatpush3.msra.mxu1 %v1585_v10  ;;  %v1612_v10 = vld [vmem:[%s12615_s12 + $0x38] sm:$0xff] }
 0x3f3   : > { %v2184_v27 = vmul.f32 %v10175_v26, %v10889_v59 }
 0x3f5   : > { %9275 = vmatmul.mubr.msk.f32.vlgmr.msra.gmra.mxu0 %vm1447_vm1, %v2184_v27  ;;  %v1614_v27 = vld [vmem:[%s12615_s12 + $0x48] sm:$0xff] }
 0x3f6   : > { %9278 = vmatpush3.msra.mxu0 %v10845_v12  ;;  %9279 = vmatprep.mubr.msk.f32.mxu0 %vm10389_vm0, %v10388_v2 }
 0x3f7   : > { %v10177_v28 = vpop.eup %10176  ;;  %9323 = vmatprep.subr.mxu0 %v10388_v2 }
 0x3f8   : > { %v2185_v29 = vmul.f32 %v10177_v28, %v10893_v61  ;;  %v1613_v28 = vld [vmem:[%s12615_s12 + $0x40] sm:$0xff] }
 0x3fa   : > { %9280 = vmatmul.mubr.msk.f32.vlgmr.msra.gmra.mxu0 %vm1447_vm1, %v2185_v29 }
 0x3fb   : > { %9327 = vmatprep.mubr.msk.f32.mxu0 %vm10389_vm0, %v10388_v2  ;;  %9324 = vmatpush3.msra.mxu0 %v1602_v36  ;;  %v1605_v36 = vld [vmem:[%s12615_s12] sm:$0xff] }
 0x3fc   : > { %9325 = vmatprep.subr.mxu0 %v10388_v2 }
 0x3fd   : > { %9326 = vmatpush3.msra.mxu0 %v1601_v37  ;;  %v1669_v37 = vld [vmem:[%s10484_s27 + $0xf8] sm:$0xff] }
 0x3fe   : > { %9328 = vmatmul.mubr.msk.f32.vlgmr.msra.gmra.mxu0 %vm2540_vm8, %v1437_v39  ;;  %2667 = vmatprep.subr.mxu0 %v1636_v52  ;;  %v1653_v39 = vld [vmem:[%s10484_s27 + $0x78] sm:$0xff]  ;;  %v1648_v52 = vld [vmem:[%s10484_s27 + $0x50] sm:$0xff] }
 0x3ff   : > { %2731 = vmatprep.mubr.f32.mxu0 %v10388_v2  ;;  %2668 = vmatpush1.msra.mxu0 %v1635_v53  ;;  %v1663_v53 = vld [vmem:[%s10484_s27 + $0xc8] sm:$0xff] }
 0x400   : > { %2669 = vmatprep.subr.mxu0 %v1634_v54  ;;  %8580 = vmatprep.subr.mxu1 %v1669_v37  ;;  %v1647_v54 = vld [vmem:[%s10484_s27 + $0x48] sm:$0xff] }
 0x401   : > { %2670 = vmatpush1.msra.mxu0 %v1633_v55  ;;  %v1662_v55 = vld [vmem:[%s10484_s27 + $0xc0] sm:$0xff] }
 0x4b0   : > { %v2255_v12 = vpop.f32.mrf.mxu0 }
 0x4b1   : > { %9315 = vmatmul.mubr.f32.vlgmr.msra.gmra.mxu1 %v2255_v12  ;;  %v1611_v12 = vld [vmem:[%s12615_s12 + $0x30] sm:$0xff] }
 0x4b2   : > { %v9271_v30 = vpop.f32.mrf.mxu0  ;;  %9317 = vmatprep.mubr.msk.f32.mxu1 %vm10389_vm0, %v10388_v2  ;;  %8581 = vmatpush3.msra.mxu1 %v1653_v39 }
 0x4b3   : > { %v1610_v30 = vld [vmem:[%s12615_s12 + $0x28] sm:$0xff] }
 0x4b5   : > { %v2328_v31 = vpop.f32.mrf.mxu0 }
 0x4b6   : > { %9318 = vmatmul.mubr.f32.gmra.mxu1 %v2328_v31  ;;  %v1609_v31 = vld [vmem:[%s12615_s12 + $0x20] sm:$0xff] }
 0x4b7   : > { %v9276_v32 = vpop.f32.mrf.mxu0  ;;  %9320 = vmatprep.mubr.msk.f32.mxu1 %vm10389_vm0, %v10388_v2 }
 0x4b8   : > { %v1608_v32 = vld [vmem:[%s12615_s12 + $0x18] sm:$0xff] }
 0x4ba   : > { %v2401_v34 = vpop.f32.mrf.mxu0 }
 0x4bb   : > { %9321 = vmatmul.mubr.f32.gmra.mxu1 %v2401_v34  ;;  %v1607_v34 = vld [vmem:[%s12615_s12 + $0x10] sm:$0xff] }
 0x4bc   : > { %v9281_v35 = vpop.f32.mrf.mxu0 }
 0x4bd   : > { %v1606_v35 = vld [vmem:[%s12615_s12 + $0x8] sm:$0xff] }
 0x4be   : > { %v10996_v26 = vpop.f32.mrf.mxu0 }
 0x4c0   : > { %v9329_v29 = vpop.f32.mrf.mxu0 }
 0x571   : > { %v2471_v40 = vpop.f32.mrf.mxu1 }
 0x572   : > { %v2485_v43 = vadd.f32 %v2471_v40, %v10769_v38  ;;  %v1632_v38 = vld [vmem:[%s12615_s12 + $0xd8] sm:$0xff]  ;;  %v1668_v40 = vld [vmem:[%s10484_s27 + $0xf0] sm:$0xff] }
 0x573   : > { %v9316_v44 = vpop.f32.mrf.mxu1  ;;  %2671 = vmatprep.subr.mxu0 %v1632_v38  ;;  %8582 = vmatprep.subr.mxu1 %v1668_v40  ;;  %v1646_v38 = vld [vmem:[%s10484_s27 + $0x40] sm:$0xff] }
 0x574   : > { %2488 = vadd.xlane.f32.xlu0 %v2485_v43  ;;  %2672 = vmatpush1.msra.mxu0 %v1631_v56  ;;  %v1667_v44 = vld [vmem:[%s10484_s27 + $0xe8] sm:$0xff]  ;;  %v1661_v56 = vld [vmem:[%s10484_s27 + $0xb8] sm:$0xff] }
 0x575   : > { %2673 = vmatprep.subr.mxu0 %v1630_v4  ;;  %v10391_v4 = vmov 1966171168  }
 0x576   : > { %v2476_v45 = vpop.f32.mrf.mxu1  ;;  %2674 = vmatpush1.msra.mxu0 %v1629_v5  ;;  %v2616_v5 = vunpack.c.l.s4 %v10391_v4 }
 0x577   : > { %v2486_v47 = vadd.f32 %v2476_v45, %v10780_v42  ;;  %2675 = vmatprep.subr.mxu0 %v1628_v6  ;;  %v1651_v45 = vld [vmem:[%s10484_s27 + $0x68] sm:$0xff] }
 0x578   : > { %v9319_v48 = vpop.f32.mrf.mxu1  ;;  %2676 = vmatpush1.msra.mxu0 %v1627_v7 }
 0x579   : > { %2490 = vadd.xlane.f32.xlu1 %v2486_v47  ;;  %2677 = vmatprep.subr.mxu0 %v1626_v8  ;;  %v1650_v48 = vld [vmem:[%s10484_s27 + $0x60] sm:$0xff]  ;;  %v2617_v8 = vunpack.c.0.s8 %v2616_v5 }
 0x57a   : > { %2678 = vmatpush1.msra.mxu0 %v1625_v9 }
 0x57b   : > { %v2481_v49 = vpop.f32.mrf.mxu1  ;;  %2679 = vmatprep.subr.mxu0 %v1624_v11 }
 0x57c   : > { %v2487_v50 = vadd.f32 %v2481_v49, %v10790_v46  ;;  %2680 = vmatpush1.msra.mxu0 %v1623_v13  ;;  %v1665_v49 = vld [vmem:[%s10484_s27 + $0xd8] sm:$0xff] }
 0x57d   : > { %v9322_v51 = vpop.f32.mrf.mxu1  ;;  %2681 = vmatprep.subr.mxu0 %v1622_v15  ;;  %v11034_v15 = vsub.s32 %v2617_v8, %v10854_v17 }
 0x57e   : > { %2492 = vadd.xlane.f32.xlu0 %v2487_v50  ;;  %2682 = vmatpush1.msra.mxu0 %v1621_v16  ;;  %v1664_v51 = vld [vmem:[%s10484_s27 + $0xd0] sm:$0xff] }
 0x57f   : > { %2683 = vmatprep.subr.mxu0 %v1620_v19 }
 0x580   : > { %2684 = vmatpush1.msra.mxu0 %v1619_v20  ;;  %v2621_v20 = vrot.slane %v10996_v26, %v11034_v15 }
 0x581   : > { %2685 = vmatprep.subr.mxu0 %v1618_v21 }
 0x582   : > { %2686 = vmatpush1.msra.mxu0 %v1617_v22  ;;  %v2629_v21 = vrot.slane %v2621_v20, %v11034_v15 }
 0x583   : > { %2687 = vmatprep.subr.mxu0 %v1616_v23  ;;  %v8154_v23 = vld [vmem:[%s10464_s30] ss:$0 sm:$0xff] }
 0x584   : > { %2688 = vmatpush1.msra.mxu0 %v1615_v24 }
 0x585   : > { %2689 = vmatprep.subr.mxu0 %v1614_v27  ;;  %v8155_v27 = vld [vmem:[%s12617_s6] ss:$0 sm:$0xff] }
 0x586   : > { %2690 = vmatpush1.msra.mxu0 %v1613_v28  ;;  %v2622_v28 = vcombine.high %v2621_v20, %v2621_v20 }
 0x587   : > { %2691 = vmatprep.subr.mxu0 %v1612_v10  ;;  %v2641_v10 = vrot.slane %v2629_v21, %v10857_v18 }
 0x588   : > { %2692 = vmatpush1.msra.mxu0 %v1611_v12 }
 0x589   : > { %2693 = vmatprep.subr.mxu0 %v1610_v30 }
 0x58a   : > { %2694 = vmatpush1.msra.mxu0 %v1609_v31  ;;  %v2636_v31 = vrot.slane %v2622_v28, %v11034_v15 }
 0x58b   : > { %2695 = vmatprep.subr.mxu0 %v1608_v32 }
 0x58c   : > { %2696 = vmatpush1.msra.mxu0 %v1607_v34  ;;  %v2645_v37 = vrot.slane %v2636_v31, %v10857_v18 }
 0x58d   : > { %2697 = vmatprep.subr.mxu0 %v1606_v35 }
 0x58e   : > { %2698 = vmatpush1.msra.mxu0 %v1605_v36  ;;  %v2637_v36 = vcombine.high %v2629_v21, %v2629_v21 }
 0x58f   : > { %9330 = vmatprep.subr.mxu0 %v10388_v2 }
 0x5fd   : > { %v2489_v42 = vpop.xlane.xlu0 %2488 }
 0x5fe   : > { %v2495_v57 = vmul.f32 0.0078125, %v2489_v42  ;;  %v1645_v42 = vld [vmem:[%s10484_s27 + $0x38] sm:$0xff] }
 0x600   : > { %v10968_v58 = vsub.f32 %v2485_v43, %v2495_v57  ;;  %v1652_v43 = vld [vmem:[%s10484_s27 + $0x70] sm:$0xff] }
 0x601   : > { %8583 = vmatpush3.msra.mxu1 %v1652_v43  ;;  %v1660_v57 = vld [vmem:[%s10484_s27 + $0xb0] sm:$0xff] }
 0x602   : > { %v2491_v46 = vpop.xlane.xlu1 %2490  ;;  %v2501_v59 = vmul.f32 %v10968_v58, %v10968_v58  ;;  %8584 = vmatprep.subr.mxu1 %v1667_v44  ;;  %v2649_v44 = vrot.slane %v2637_v36, %v10857_v18  ;;  %v8174_v36 = vld [vmem:[%s12618_s3 + $0xf0] sm:$0xff] }
 0x603   : > { %v2496_v60 = vmul.f32 0.0078125, %v2491_v46  ;;  %8585 = vmatpush3.msra.mxu1 %v1651_v45  ;;  %v1644_v46 = vld [vmem:[%s10484_s27 + $0x30] sm:$0xff] }
 0x604   : > { %2504 = vadd.xlane.f32.xlu1 %v2501_v59  ;;  %v1659_v59 = vld [vmem:[%s10484_s27 + $0xa8] sm:$0xff] }
 0x605   : > { %v10972_v61 = vsub.f32 %v2486_v47, %v2496_v60  ;;  %v1666_v47 = vld [vmem:[%s10484_s27 + $0xe0] sm:$0xff]  ;;  %v1643_v60 = vld [vmem:[%s10484_s27 + $0x28] sm:$0xff] }
 0x606   : > { %8586 = vmatprep.subr.mxu1 %v1666_v47  ;;  %v1641_v47 = vld [vmem:[%s10484_s27 + $0x18] sm:$0xff] }
 0x607   : > { %v2493_v62 = vpop.xlane.xlu0 %2492  ;;  %v2502_v0 = vmul.f32 %v10972_v61, %v10972_v61  ;;  %8587 = vmatpush3.msra.mxu1 %v1650_v48  ;;  %v1656_v48 = vld [vmem:[%s10484_s27 + $0x90] sm:$0xff] }
 0x608   : > { %v2497_v63 = vmul.f32 0.0078125, %v2493_v62  ;;  %8588 = vmatprep.subr.mxu1 %v1665_v49  ;;  %v1658_v62 = vld [vmem:[%s10484_s27 + $0xa0] sm:$0xff]  ;;  %v1640_v49 = vld [vmem:[%s10484_s27 + $0x10] sm:$0xff] }
 0x609   : > { %2506 = vadd.xlane.f32.xlu0 %v2502_v0 }
 0x60a   : > { %v10976_v1 = vsub.f32 %v2487_v50, %v2497_v63  ;;  %v1649_v50 = vld [vmem:[%s10484_s27 + $0x58] sm:$0xff]  ;;  %v1642_v63 = vld [vmem:[%s10484_s27 + $0x20] sm:$0xff] }
 0x60b   : > { %8589 = vmatpush3.msra.mxu1 %v1649_v50  ;;  %v1655_v50 = vld [vmem:[%s10484_s27 + $0x88] sm:$0xff] }
 0x60c   : > { %v2503_v3 = vmul.f32 %v10976_v1, %v10976_v1  ;;  %8590 = vmatprep.subr.mxu1 %v1664_v51  ;;  %v1639_v51 = vld [vmem:[%s10484_s27 + $0x8] sm:$0xff] }
 0x60d   : > { %8591 = vmatpush3.msra.mxu1 %v1648_v52  ;;  %v1654_v52 = vld [vmem:[%s10484_s27 + $0x80] sm:$0xff] }
 0x60e   : > { %2508 = vadd.xlane.f32.xlu1 %v2503_v3  ;;  %8592 = vmatprep.subr.mxu1 %v1663_v53  ;;  %v1638_v53 = vld [vmem:[%s10484_s27] sm:$0xff] }
 0x60f   : > { %8593 = vmatpush3.msra.mxu1 %v1647_v54  ;;  %v1637_v54 = vld [vmem:[%s10479_s20] sm:$0x3] }
 0x610   : > { %8594 = vmatprep.subr.mxu1 %v1662_v55  ;;  %v11072_v55 = vsub.s32 1, %v10854_v17 }
 0x611   : > { %8595 = vmatpush3.msra.mxu1 %v1646_v38  ;;  %v2660_v38 = vrot.slane %v1637_v54, %v10857_v18 }
 0x612   : > { %8596 = vmatprep.subr.mxu1 %v1661_v56  ;;  %v2664_v56 = vrot.slane %v1637_v54, %v11072_v55 }
 0x613   : > { %8597 = vmatpush3.msra.mxu1 %v1645_v42 }
 0x614   : > { %8598 = vmatprep.subr.mxu1 %v1660_v57 }
 0x615   : > { %8599 = vmatpush3.msra.mxu1 %v1644_v46 }
 0x616   : > { %8600 = vmatprep.subr.mxu1 %v1659_v59 }
 0x617   : > { %8601 = vmatpush3.msra.mxu1 %v1643_v60 }
 0x618   : > { %8602 = vmatprep.subr.mxu1 %v1658_v62 }
 0x619   : > { %8603 = vmatpush3.msra.mxu1 %v1642_v63 }
 0x68d   : > { %v2505_v0 = vpop.xlane.xlu1 %2504 }
 0x68e   : > { %v2510_v3 = vmul.f32 0.0078125, %v2505_v0 }
 0x690   : > { %v2513_v6 = vadd.f32 1e-05, %v2510_v3 }
 0x692   : > { %10178 = vrsqrt.f32 %v2513_v6  ;;  %v2507_v7 = vpop.xlane.xlu0 %2506 }
 0x693   : > { %v2511_v9 = vmul.f32 0.0078125, %v2507_v7 }
 0x695   : > { %v2514_v11 = vadd.f32 1e-05, %v2511_v9 }
 0x697   : > { %v2509_v13 = vpop.xlane.xlu1 %2508  ;;  %10180 = vrsqrt.f32 %v2514_v11 }
 0x698   : > { %v2512_v16 = vmul.f32 0.0078125, %v2509_v13 }
 0x69a   : > { %v2515_v19 = vadd.f32 1e-05, %v2512_v16 }
 0x69c   : > { %10182 = vrsqrt.f32 %v2515_v19  ;;  %v8157_v19 = vld [vmem:[%s12630_s23] ss:$0 sm:$0xff] }
 0x69f   : > { %v10179_v22 = vpop.eup %10178 }
 0x6a0   : > { %v2519_v24 = vmul.f32 %v10179_v22, %v10968_v58 }
 0x6a2   : > { %v2528_v29 = vmul.f32 %v8154_v23, %v2519_v24 }
 0x6a4   : > { %v10181_v12 = vpop.eup %10180  ;;  %v2537_v30 = vadd.f32 %v8155_v27, %v2528_v29 }
 0x6a5   : > { %v2520_v32 = vmul.f32 %v10181_v12, %v10972_v61 }
 0x6a6   : > { %v11045_v34 = vadd.f32 %v2641_v10, %v2537_v30 }
 0x6a7   : > { %v2529_v26 = vmul.f32 %v8154_v23, %v2520_v32 }
 0x6a8   : > { %2732 = vmatmul.mubr.f32.vlgmr.msra.gmra.mxu0 %v11045_v34 }
 0x6a9   : > { %v10183_v35 = vpop.eup %10182  ;;  %2737 = vmatprep.mubr.f32.mxu0 %v10388_v2  ;;  %v2538_v58 = vadd.f32 %v8155_v27, %v2529_v26 }
 0x6aa   : > { %v2521_v39 = vmul.f32 %v10183_v35, %v10976_v1  ;;  %v1657_v1 = vld [vmem:[%s10484_s27 + $0x98] sm:$0xff] }
 0x6ab   : > { %v11051_v40 = vadd.f32 %v2645_v37, %v2538_v58  ;;  %8604 = vmatprep.subr.mxu1 %v1657_v1  ;;  %v8175_v35 = vld [vmem:[%s12618_s3 + $0xf8] sm:$0xff]  ;;  %v8190_v58 = vld [vmem:[%s12616_s8 + $0xf0] sm:$0xff]  ;;  %v8173_v37 = vld [vmem:[%s12618_s3 + $0xe8] sm:$0xff] }
 0x6ac   : > { %v2530_v61 = vmul.f32 %v8154_v23, %v2521_v39  ;;  %8605 = vmatpush3.msra.mxu1 %v1641_v47  ;;  %9331 = vmatpush3.msra.mxu0 %v8175_v35  ;;  %v8189_v39 = vld [vmem:[%s12616_s8 + $0xe8] sm:$0xff]  ;;  %v8159_v35 = vld [vmem:[%s12632_s9] ss:$0 sm:$0xff] }
 0x6ad   : > { %2738 = vmatmul.mubr.f32.gmra.mxu0 %v11051_v40  ;;  %8606 = vmatprep.subr.mxu1 %v1656_v48 }
 0x6ae   : > { %v2539_v43 = vadd.f32 %v8155_v27, %v2530_v61  ;;  %2743 = vmatprep.mubr.f32.mxu0 %v10388_v2  ;;  %8607 = vmatpush3.msra.mxu1 %v1640_v49  ;;  %v8188_v61 = vld [vmem:[%s12616_s8 + $0xe0] sm:$0xff] }
 0x6af   : > { %8608 = vmatprep.subr.mxu1 %v1655_v50  ;;  %9332 = vmatprep.subr.mxu0 %v10388_v2 }
 0x6b0   : > { %v11056_v45 = vadd.f32 %v2649_v44, %v2539_v43  ;;  %8609 = vmatpush3.msra.mxu1 %v1639_v51  ;;  %9333 = vmatpush3.msra.mxu0 %v8174_v36 }
 0x6b1   : > { %8610 = vmatprep.subr.mxu1 %v1654_v52  ;;  %9334 = vmatprep.subr.mxu0 %v10388_v2 }
 0x6b2   : > { %2744 = vmatmul.mubr.f32.gmra.mxu0 %v11056_v45  ;;  %8611 = vmatpush3.msra.mxu1 %v1638_v53 }
 0x6b3   : > { %9362 = vmatprep.mubr.msk.f32.mxu0 %vm10389_vm0, %v10388_v2  ;;  %9371 = vmatprep.subr.mxu1 %v10388_v2 }
 0x6b4   : > { %9335 = vmatpush3.msra.mxu0 %v8173_v37  ;;  %v8207_v37 = vld [vmem:[%s12614_s14 + $0xf8] sm:$0xff] }
 0x6b5   : > { %9336 = vmatprep.subr.mxu0 %v10388_v2 }
 0x768   : > { %v2733_v42 = vpop.f32.mrf.mxu0 }
 0x769   : > { %v2734_v57 = vadd.f32 %v2733_v42, %v2660_v38  ;;  %v8170_v42 = vld [vmem:[%s12618_s3 + $0xd0] sm:$0xff] }
 0x76a   : > { %v2735_v46 = vpop.f32.mrf.mxu0 }
 0x76b   : > { %v2736_v59 = vadd.f32 %v2735_v46, %v2664_v56  ;;  %v2750_v63 = vmax.f32 %v2734_v57, 0.0  ;;  %v8186_v57 = vld [vmem:[%s12616_s8 + $0xd0] sm:$0xff]  ;;  %v8169_v46 = vld [vmem:[%s12618_s3 + $0xc8] sm:$0xff] }
 0x76d   : > { %v2751_v60 = vmax.f32 %v2736_v59, 0.0  ;;  %v2739_v62 = vpop.f32.mrf.mxu0  ;;  %v8185_v59 = vld [vmem:[%s12616_s8 + $0xc8] sm:$0xff] }
 0x76e   : > { %v2740_v0 = vadd.f32 %v2739_v62, %v2660_v38  ;;  %v8184_v62 = vld [vmem:[%s12616_s8 + $0xc0] sm:$0xff] }
 0x76f   : > { %v2741_v3 = vpop.f32.mrf.mxu0  ;;  %2826 = vmatprep.mubr.f32.mxu1 %v2751_v60  ;;  %v8168_v60 = vld [vmem:[%s12618_s3 + $0xc0] sm:$0xff] }
 0x770   : > { %v2742_v4 = vadd.f32 %v2741_v3, %v2664_v56  ;;  %2827 = vmatmul.mubr.f32.vlgmr.msra.gmra.mxu1 %v2750_v63  ;;  %v2752_v6 = vmax.f32 %v2740_v0, 0.0  ;;  %v8167_v63 = vld [vmem:[%s12618_s3 + $0xb8] sm:$0xff]  ;;  %v8166_v3 = vld [vmem:[%s12618_s3 + $0xb0] sm:$0xff] }
 0x771   : > { %v8183_v0 = vld [vmem:[%s12616_s8 + $0xb8] sm:$0xff] }
 0x772   : > { %v2745_v5 = vpop.f32.mrf.mxu0  ;;  %v2753_v17 = vmax.f32 %v2742_v4, 0.0  ;;  %v8182_v4 = vld [vmem:[%s12616_s8 + $0xb0] sm:$0xff] }
 0x773   : > { %v2746_v7 = vadd.f32 %v2745_v5, %v2660_v38  ;;  %v8171_v38 = vld [vmem:[%s12618_s3 + $0xd8] sm:$0xff]  ;;  %v8165_v5 = vld [vmem:[%s12618_s3 + $0xa8] sm:$0xff] }
 0x774   : > { %v2747_v8 = vpop.f32.mrf.mxu0  ;;  %2831 = vmatprep.mubr.f32.mxu1 %v2753_v17  ;;  %v8181_v17 = vld [vmem:[%s12616_s8 + $0xa8] sm:$0xff] }
 0x775   : > { %v2748_v9 = vadd.f32 %v2747_v8, %v2664_v56  ;;  %2832 = vmatmul.mubr.f32.gmra.mxu1 %v2752_v6  ;;  %v2754_v13 = vmax.f32 %v2746_v7, 0.0  ;;  %v8187_v56 = vld [vmem:[%s12616_s8 + $0xd8] sm:$0xff]  ;;  %v8164_v6 = vld [vmem:[%s12618_s3 + $0xa0] sm:$0xff] }
 0x776   : > { %v8180_v7 = vld [vmem:[%s12616_s8 + $0xa0] sm:$0xff]  ;;  %v8163_v8 = vld [vmem:[%s12618_s3 + $0x98] sm:$0xff] }
 0x777   : > { %v2755_v11 = vmax.f32 %v2748_v9, 0.0  ;;  %v8179_v9 = vld [vmem:[%s12616_s8 + $0x98] sm:$0xff] }
 0x779   : > { %2836 = vmatprep.mubr.f32.mxu1 %v2755_v11  ;;  %v8162_v11 = vld [vmem:[%s12618_s3 + $0x90] sm:$0xff] }
 0x77a   : > { %2837 = vmatmul.mubr.f32.gmra.mxu1 %v2754_v13  ;;  %v8178_v13 = vld [vmem:[%s12616_s8 + $0x90] sm:$0xff] }
 0x77b   : > { %9403 = vmatprep.mubr.msk.f32.mxu1 %vm10389_vm0, %v10388_v2 }
 0x830   : > { %v8612_v16 = vpop.f32.mrf.mxu1 }
 0x832   : > { %v8613_v20 = vpop.f32.mrf.mxu1 }
 0x833   : > { %v8614_v21 = vadd.f32 %v8613_v20, %v8612_v16  ;;  %v8161_v16 = vld [vmem:[%s12618_s3 + $0x88] sm:$0xff]  ;;  %v8160_v20 = vld [vmem:[%s12618_s3 + $0x80] sm:$0xff] }
 0x835   : > { %v2829_v22 = vadd.f32 %v8614_v21, %v8157_v19  ;;  %v8615_v23 = vpop.f32.mrf.mxu1  ;;  %v8176_v21 = vld [vmem:[%s12616_s8 + $0x80] sm:$0xff] }
 0x837   : > { %v8616_v24 = vpop.f32.mrf.mxu1  ;;  %v2842_v27 = vadd.f32 %v2829_v22, %v11045_v34  ;;  %v8191_v34 = vld [vmem:[%s12616_s8 + $0xf8] sm:$0xff] }
 0x838   : > { %v8617_v28 = vadd.f32 %v8616_v24, %v8615_v23  ;;  %9372 = vmatpush3.msra.mxu1 %v8191_v34 }
 0x839   : > { %2845 = vadd.xlane.f32.xlu0 %v2842_v27  ;;  %9373 = vmatprep.subr.mxu1 %v10388_v2 }
 0x83a   : > { %v8618_v29 = vpop.f32.mrf.mxu1  ;;  %v2834_v10 = vadd.f32 %v8617_v28, %v8157_v19  ;;  %9374 = vmatpush3.msra.mxu1 %v8190_v58 }
 0x83b   : > { %9375 = vmatprep.subr.mxu1 %v10388_v2 }
 0x83c   : > { %v8619_v12 = vpop.f32.mrf.mxu1  ;;  %v2843_v31 = vadd.f32 %v2834_v10, %v11051_v40  ;;  %v8172_v40 = vld [vmem:[%s12618_s3 + $0xe0] sm:$0xff]  ;;  %9376 = vmatpush3.msra.mxu1 %v8189_v39  ;;  %s12633_s3 = sld [smem:[#allocation8_spill]] }
 0x83d   : > { %v8620_v30 = vadd.f32 %v8619_v12, %v8618_v29  ;;  %9377 = vmatprep.subr.mxu1 %v10388_v2  ;;  %9337 = vmatpush3.msra.mxu0 %v8172_v40  ;;  %v8206_v40 = vld [vmem:[%s12614_s14 + $0xf0] sm:$0xff] }
 0x83e   : > { %2847 = vadd.xlane.f32.xlu1 %v2843_v31  ;;  %9378 = vmatpush3.msra.mxu1 %v8188_v61 }
 0x83f   : > { %v2839_v32 = vadd.f32 %v8620_v30, %v8157_v19  ;;  %9338 = vmatprep.subr.mxu0 %v10388_v2  ;;  %9379 = vmatprep.subr.mxu1 %v10388_v2  ;;  %v8177_v19 = vld [vmem:[%s12616_s8 + $0x88] sm:$0xff] }
 0x840   : > { %9339 = vmatpush3.msra.mxu0 %v8171_v38  ;;  %9380 = vmatpush3.msra.mxu1 %v8187_v56  ;;  %v8198_v38 = vld [vmem:[%s12614_s14 + $0xb0] sm:$0xff]  ;;  %v8197_v56 = vld [vmem:[%s12614_s14 + $0xa8] sm:$0xff] }
 0x841   : > { %v2844_v26 = vadd.f32 %v2839_v32, %v11056_v45  ;;  %9340 = vmatprep.subr.mxu0 %v10388_v2  ;;  %9381 = vmatprep.subr.mxu1 %v10388_v2  ;;  %v8158_v32 = vld [vmem:[%s12631_s5] ss:$0 sm:$0xff] }
 0x842   : > { %9341 = vmatpush3.msra.mxu0 %v8170_v42  ;;  %9382 = vmatpush3.msra.mxu1 %v8186_v57  ;;  %v8196_v42 = vld [vmem:[%s12614_s14 + $0xa0] sm:$0xff]  ;;  %v8195_v57 = vld [vmem:[%s12614_s14 + $0x98] sm:$0xff] }
 0x843   : > { %2849 = vadd.xlane.f32.xlu0 %v2844_v26  ;;  %9342 = vmatprep.subr.mxu0 %v10388_v2 }
 0x844   : > { %9343 = vmatpush3.msra.mxu0 %v8169_v46  ;;  %9383 = vmatprep.subr.mxu1 %v10388_v2  ;;  %v8194_v46 = vld [vmem:[%s12614_s14 + $0x90] sm:$0xff] }
 0x845   : > { %9344 = vmatprep.subr.mxu0 %v10388_v2  ;;  %9384 = vmatpush3.msra.mxu1 %v8185_v59  ;;  %v8193_v59 = vld [vmem:[%s12614_s14 + $0x88] sm:$0xff] }
 0x846   : > { %9345 = vmatpush3.msra.mxu0 %v8168_v60  ;;  %9385 = vmatprep.subr.mxu1 %v10388_v2  ;;  %v8192_v60 = vld [vmem:[%s12614_s14 + $0x80] sm:$0xff] }
 0x847   : > { %9346 = vmatprep.subr.mxu0 %v10388_v2  ;;  %9386 = vmatpush3.msra.mxu1 %v8184_v62 }
 0x848   : > { %9347 = vmatpush3.msra.mxu0 %v8167_v63  ;;  %9387 = vmatprep.subr.mxu1 %v10388_v2 }
 0x849   : > { %9348 = vmatprep.subr.mxu0 %v10388_v2  ;;  %9388 = vmatpush3.msra.mxu1 %v8183_v0 }
 0x84a   : > { %9349 = vmatpush3.msra.mxu0 %v8166_v3  ;;  %9389 = vmatprep.subr.mxu1 %v10388_v2 }
 0x84b   : > { %9350 = vmatprep.subr.mxu0 %v10388_v2  ;;  %9390 = vmatpush3.msra.mxu1 %v8182_v4 }
 0x84c   : > { %9351 = vmatpush3.msra.mxu0 %v8165_v5  ;;  %9391 = vmatprep.subr.mxu1 %v10388_v2 }
 0x84d   : > { %9352 = vmatprep.subr.mxu0 %v10388_v2  ;;  %9392 = vmatpush3.msra.mxu1 %v8181_v17 }
 0x84e   : > { %9353 = vmatpush3.msra.mxu0 %v8164_v6  ;;  %9393 = vmatprep.subr.mxu1 %v10388_v2 }
 0x84f   : > { %9354 = vmatprep.subr.mxu0 %v10388_v2  ;;  %9394 = vmatpush3.msra.mxu1 %v8180_v7 }
 0x850   : > { %9355 = vmatpush3.msra.mxu0 %v8163_v8  ;;  %9395 = vmatprep.subr.mxu1 %v10388_v2 }
 0x851   : > { %9356 = vmatprep.subr.mxu0 %v10388_v2  ;;  %9396 = vmatpush3.msra.mxu1 %v8179_v9 }
 0x852   : > { %9357 = vmatpush3.msra.mxu0 %v8162_v11  ;;  %9397 = vmatprep.subr.mxu1 %v10388_v2 }
 0x853   : > { %9358 = vmatprep.subr.mxu0 %v10388_v2  ;;  %9398 = vmatpush3.msra.mxu1 %v8178_v13 }
 0x854   : > { %9359 = vmatpush3.msra.mxu0 %v8161_v16  ;;  %9399 = vmatprep.subr.mxu1 %v10388_v2 }
 0x855   : > { %9360 = vmatprep.subr.mxu0 %v10388_v2  ;;  %9400 = vmatpush3.msra.mxu1 %v8177_v19 }
 0x856   : > { %9361 = vmatpush3.msra.mxu0 %v8160_v20  ;;  %9401 = vmatprep.subr.mxu1 %v10388_v2 }
 0x857   : > { %9402 = vmatpush3.msra.mxu1 %v8176_v21  ;;  %9412 = vmatprep.subr.mxu0 %v10388_v2 }
 0x858   : > { %9453 = vmatprep.subr.mxu1 %v10388_v2 }
 0x8c2   : > { %v2846_v43 = vpop.xlane.xlu0 %2845 }
 0x8c3   : > { %v2851_v44 = vmul.f32 0.0078125, %v2846_v43 }
 0x8c5   : > { %v11098_v45 = vsub.f32 %v2842_v27, %v2851_v44 }
 0x8c7   : > { %v2848_v1 = vpop.xlane.xlu1 %2847  ;;  %v2857_v47 = vmul.f32 %v11098_v45, %v11098_v45 }
 0x8c8   : > { %v2852_v48 = vmul.f32 0.0078125, %v2848_v1 }
 0x8c9   : > { %2860 = vadd.xlane.f32.xlu1 %v2857_v47  ;;  %v8204_v47 = vld [vmem:[%s12614_s14 + $0xe0] sm:$0xff] }
 0x8ca   : > { %v11102_v49 = vsub.f32 %v2843_v31, %v2852_v48 }
 0x8cc   : > { %v2850_v50 = vpop.xlane.xlu0 %2849  ;;  %v2858_v52 = vmul.f32 %v11102_v49, %v11102_v49 }
 0x8cd   : > { %v2853_v51 = vmul.f32 0.0078125, %v2850_v50  ;;  %v8203_v50 = vld [vmem:[%s12614_s14 + $0xd8] sm:$0xff] }
 0x8ce   : > { %2862 = vadd.xlane.f32.xlu0 %v2858_v52  ;;  %v8201_v52 = vld [vmem:[%s12614_s14 + $0xc8] sm:$0xff] }
 0x8cf   : > { %v11106_v53 = vsub.f32 %v2844_v26, %v2853_v51  ;;  %v8202_v51 = vld [vmem:[%s12614_s14 + $0xd0] sm:$0xff] }
 0x8d1   : > { %v2859_v54 = vmul.f32 %v11106_v53, %v11106_v53 }
 0x8d3   : > { %2864 = vadd.xlane.f32.xlu1 %v2859_v54  ;;  %v8199_v54 = vld [vmem:[%s12614_s14 + $0xb8] sm:$0xff] }
 0x952   : > { %v2861_v22 = vpop.xlane.xlu1 %2860 }
 0x953   : > { %v2866_v23 = vmul.f32 0.0078125, %v2861_v22 }
 0x955   : > { %v2869_v24 = vadd.f32 1e-05, %v2866_v23 }
 0x957   : > { %10184 = vrsqrt.f32 %v2869_v24  ;;  %v2863_v27 = vpop.xlane.xlu0 %2862 }
 0x958   : > { %v2867_v28 = vmul.f32 0.0078125, %v2863_v27 }
 0x95a   : > { %v2870_v29 = vadd.f32 1e-05, %v2867_v28 }
 0x95c   : > { %v2865_v10 = vpop.xlane.xlu1 %2864  ;;  %10186 = vrsqrt.f32 %v2870_v29 }
 0x95d   : > { %v2868_v12 = vmul.f32 0.0078125, %v2865_v10 }
 0x95f   : > { %v2871_v30 = vadd.f32 1e-05, %v2868_v12 }
 0x961   : > { %10188 = vrsqrt.f32 %v2871_v30 }
 0x964   : > { %v10185_v31 = vpop.eup %10184 }
 0x965   : > { %v2875_v26 = vmul.f32 %v10185_v31, %v11098_v45  ;;  %v8205_v45 = vld [vmem:[%s12614_s14 + $0xe8] sm:$0xff] }
 0x967   : > { %v2884_v34 = vmul.f32 %v8158_v32, %v2875_v26 }
 0x969   : > { %v10187_v36 = vpop.eup %10186  ;;  %v11161_v58 = vadd.f32 %v8159_v35, %v2884_v34 }
 0x96a   : > { %v2876_v39 = vmul.f32 %v10187_v36, %v11102_v49 }
 0x96b   : > { %9363 = vmatmul.mubr.f32.vlgmr.msra.gmra.mxu0 %v11161_v58  ;;  %9404 = vmatmul.mubr.f32.vlgmr.msra.gmra.mxu1 %v11161_v58 }
 0x96c   : > { %9413 = vmatpush3.msra.mxu0 %v8207_v37  ;;  %9365 = vmatprep.mubr.msk.f32.mxu0 %vm10389_vm0, %v10388_v2  ;;  %v2885_v61 = vmul.f32 %v8158_v32, %v2876_v39 }
 0x96d   : > { %9414 = vmatprep.subr.mxu0 %v10388_v2  ;;  %9406 = vmatprep.mubr.msk.f32.mxu1 %vm10389_vm0, %v10388_v2 }
 0x96e   : > { %v10189_v43 = vpop.eup %10188  ;;  %9415 = vmatpush3.msra.mxu0 %v8206_v40  ;;  %v11173_v44 = vadd.f32 %v8159_v35, %v2885_v61 }
 0x96f   : > { %v2877_v1 = vmul.f32 %v10189_v43, %v11106_v53  ;;  %9416 = vmatprep.subr.mxu0 %v10388_v2  ;;  %v8200_v53 = vld [vmem:[%s12614_s14 + $0xc0] sm:$0xff]  ;;  %s12659_s14 = sld [smem:[#allocation39_spill]] }
 0x970   : > { %9366 = vmatmul.mubr.f32.gmra.mxu0 %v11173_v44  ;;  %9407 = vmatmul.mubr.f32.gmra.mxu1 %v11173_v44 }
 0x971   : > { %v2886_v48 = vmul.f32 %v8158_v32, %v2877_v1  ;;  %9417 = vmatpush3.msra.mxu0 %v8205_v45  ;;  %9368 = vmatprep.mubr.msk.f32.mxu0 %vm10389_vm0, %v10388_v2 }
 0x972   : > { %9418 = vmatprep.subr.mxu0 %v10388_v2  ;;  %9409 = vmatprep.mubr.msk.f32.mxu1 %vm10389_vm0, %v10388_v2 }
 0x973   : > { %v11186_v49 = vadd.f32 %v8159_v35, %v2886_v48  ;;  %9419 = vmatpush3.msra.mxu0 %v8204_v47 }
 0x974   : > { %9420 = vmatprep.subr.mxu0 %v10388_v2 }
 0x975   : > { %9369 = vmatmul.mubr.f32.gmra.mxu0 %v11186_v49  ;;  %9410 = vmatmul.mubr.f32.gmra.mxu1 %v11186_v49 }
 0x976   : > { %9421 = vmatpush3.msra.mxu0 %v8203_v50  ;;  %9444 = vmatprep.mubr.msk.f32.mxu0 %vm10389_vm0, %v10388_v2 }
 0x977   : > { %9422 = vmatprep.subr.mxu0 %v10388_v2  ;;  %9455 = vmatprep.mubr.msk.f32.mxu1 %vm10389_vm0, %v10388_v2 }
 0x978   : > { %9423 = vmatpush3.msra.mxu0 %v8202_v51 }
 0x979   : > { %9424 = vmatprep.subr.mxu0 %v10388_v2 }
 0x97a   : > { %9425 = vmatpush3.msra.mxu0 %v8201_v52 }
 0x97b   : > { %9426 = vmatprep.subr.mxu0 %v10388_v2 }
 0x97c   : > { %9427 = vmatpush3.msra.mxu0 %v8200_v53 }
 0x97d   : > { %9428 = vmatprep.subr.mxu0 %v10388_v2 }
 0x97e   : > { %9429 = vmatpush3.msra.mxu0 %v8199_v54 }
 0x97f   : > { %9430 = vmatprep.subr.mxu0 %v10388_v2 }
 0x980   : > { %9431 = vmatpush3.msra.mxu0 %v8198_v38 }
 0x981   : > { %9432 = vmatprep.subr.mxu0 %v10388_v2 }
 0x982   : > { %9433 = vmatpush3.msra.mxu0 %v8197_v56 }
 0x983   : > { %9434 = vmatprep.subr.mxu0 %v10388_v2 }
 0x984   : > { %9435 = vmatpush3.msra.mxu0 %v8196_v42 }
 0x985   : > { %9436 = vmatprep.subr.mxu0 %v10388_v2 }
 0x986   : > { %9437 = vmatpush3.msra.mxu0 %v8195_v57 }
 0x987   : > { %9438 = vmatprep.subr.mxu0 %v10388_v2 }
 0x988   : > { %9439 = vmatpush3.msra.mxu0 %v8194_v46 }
 0x989   : > { %9440 = vmatprep.subr.mxu0 %v10388_v2 }
 0x98a   : > { %9441 = vmatpush3.msra.mxu0 %v8193_v59 }
 0x98b   : > { %9442 = vmatprep.subr.mxu0 %v10388_v2 }
 0x98c   : > { %9443 = vmatpush3.msra.mxu0 %v8192_v60 }
 0x98d   : > { %9445 = vmatmul.mubr.f32.vlgmr.msra.gmra.mxu0 %v11161_v58  ;;  %9473 = vmatprep.subr.mxu0 %v10388_v2 }
 0x98e   : > { %9447 = vmatprep.mubr.msk.f32.mxu0 %vm10389_vm0, %v10388_v2 }
 0x991   : > { %9448 = vmatmul.mubr.f32.gmra.mxu0 %v11173_v44 }
 0x992   : > { %9450 = vmatprep.mubr.msk.f32.mxu0 %vm10389_vm0, %v10388_v2 }
 0x995   : > { %9451 = vmatmul.mubr.f32.gmra.mxu0 %v11186_v49 }
 0x996   : > { %9475 = vmatprep.mubr.msk.f32.mxu0 %vm10389_vm0, %v10388_v2 }
 0xa2b   : > { %v3111_v62 = vpop.f32.mrf.mxu0  ;;  %v3191_v63 = vpop.f32.mrf.mxu1 }
 0xa2c   : > { %9454 = vmatpush3.xpose.msra.mxu1 %v3191_v63 }
 0xa2d   : > { %v9364_v0 = vpop.f32.mrf.mxu0  ;;  %v9405_v3 = vpop.f32.mrf.mxu1  ;;  %9458 = vmatprep.subr.mxu1 %v10388_v2 }
 0xa2e   : > { %v8223_v0 = vld [vmem:[%s10454_s19 + $0xf8] sm:$0xff]  ;;  %v8222_v3 = vld [vmem:[%s10454_s19 + $0xf0] sm:$0xff] }
 0xa2f   : > { %9456 = vmatmul.mubr.f32.vlgmr.msra.gmra.mxu1 %v3111_v62 }
 0xa30   : > { %v3116_v4 = vpop.f32.mrf.mxu0  ;;  %v3196_v5 = vpop.f32.mrf.mxu1  ;;  %9460 = vmatprep.mubr.msk.f32.mxu1 %vm10389_vm0, %v10388_v2 }
 0xa31   : > { %9459 = vmatpush3.xpose.msra.mxu1 %v3196_v5  ;;  %v8221_v5 = vld [vmem:[%s10454_s19 + $0xe8] sm:$0xff] }
 0xa32   : > { %v9367_v17 = vpop.f32.mrf.mxu0  ;;  %v9408_v6 = vpop.f32.mrf.mxu1  ;;  %9463 = vmatprep.subr.mxu1 %v10388_v2 }
 0xa33   : > { %v8220_v6 = vld [vmem:[%s10454_s19 + $0xe0] sm:$0xff] }
 0xa34   : > { %9461 = vmatmul.mubr.f32.vlgmr.msra.gmra.mxu1 %v3116_v4 }
 0xa35   : > { %v3121_v7 = vpop.f32.mrf.mxu0  ;;  %v3201_v8 = vpop.f32.mrf.mxu1  ;;  %9465 = vmatprep.mubr.msk.f32.mxu1 %vm10389_vm0, %v10388_v2 }
 0xa36   : > { %9464 = vmatpush3.xpose.msra.mxu1 %v3201_v8  ;;  %v8218_v8 = vld [vmem:[%s10454_s19 + $0xd0] sm:$0xff] }
 0xa37   : > { %v9370_v9 = vpop.f32.mrf.mxu0  ;;  %v9411_v11 = vpop.f32.mrf.mxu1  ;;  %9468 = vmatprep.subr.mxu1 %v10388_v2 }
 0xa38   : > { %v8217_v9 = vld [vmem:[%s10454_s19 + $0xc8] sm:$0xff]  ;;  %v8216_v11 = vld [vmem:[%s10454_s19 + $0xc0] sm:$0xff] }
 0xa39   : > { %9466 = vmatmul.mubr.f32.vlgmr.msra.gmra.mxu1 %v3121_v7  ;;  %v8219_v7 = vld [vmem:[%s10454_s19 + $0xd8] sm:$0xff] }
 0xa3a   : > { %9470 = vmatprep.mubr.msk.f32.mxu1 %vm10389_vm0, %v10388_v2 }
 0xa4d   : > { %v3271_v13 = vpop.f32.mrf.mxu0 }
 0xa4e   : > { %9469 = vmatpush3.msra.mxu1 %v3271_v13  ;;  %v8215_v13 = vld [vmem:[%s10454_s19 + $0xb8] sm:$0xff] }
 0xa4f   : > { %v9446_v16 = vpop.f32.mrf.mxu0  ;;  %9478 = vmatprep.subr.mxu1 %v10388_v2 }
 0xa50   : > { %v8214_v16 = vld [vmem:[%s10454_s19 + $0xb0] sm:$0xff] }
 0xa51   : > { %v3276_v19 = vpop.f32.mrf.mxu0 }
 0xa52   : > { %9474 = vmatpush3.msra.mxu0 %v3276_v19  ;;  %v8213_v19 = vld [vmem:[%s10454_s19 + $0xa8] sm:$0xff] }
 0xa53   : > { %v9449_v20 = vpop.f32.mrf.mxu0  ;;  %9483 = vmatprep.subr.mxu0 %v10388_v2 }
 0xa54   : > { %v8212_v20 = vld [vmem:[%s10454_s19 + $0xa0] sm:$0xff] }
 0xa55   : > { %v3281_v21 = vpop.f32.mrf.mxu0 }
 0xa57   : > { %v9452_v22 = vpop.f32.mrf.mxu0 }
 0xa58   : > { %v8210_v22 = vld [vmem:[%s10454_s19 + $0x90] sm:$0xff] }
 0xaef   : > { %v3351_v23 = vpop.f32.mrf.mxu1 }
 0xaf0   : > { %v3495_v24 = vmul.f32 0.088388346, %v3351_v23  ;;  %v8209_v23 = vld [vmem:[%s10454_s19 + $0x88] sm:$0xff] }
 0xaf1   : > { %v9457_v27 = vpop.f32.mrf.mxu1 }
 0xaf2   : > { %v3498_v28 = vsel %vm10864_vm5, %v3495_v24, -1e+09  ;;  %v8208_v24 = vld [vmem:[%s10454_s19 + $0x80] sm:$0xff] }
 0xaf3   : > { %v3501_v29 = vsel %vm1447_vm1, %v3498_v28, -inf }
 0xaf4   : > { %v3421_v10 = vpop.f32.mrf.mxu1  ;;  %3502 = vmax.xlane.f32.xlu0 %v3501_v29 }
 0xaf5   : > { %v3496_v12 = vmul.f32 0.088388346, %v3421_v10 }
 0xaf6   : > { %v9462_v30 = vpop.f32.mrf.mxu1 }
 0xaf7   : > { %v3499_v31 = vsel %vm10873_vm6, %v3496_v12, -1e+09 }
 0xaf8   : > { %v3504_v32 = vsel %vm1447_vm1, %v3499_v31, -inf }
 0xaf9   : > { %v3491_v26 = vpop.f32.mrf.mxu1  ;;  %3505 = vmax.xlane.f32.xlu1 %v3504_v32  ;;  %v8224_v32 = vld [vmem:[%s10459_s24 + $0x10] sm:$0xff] }
 0xafa   : > { %v3497_v35 = vmul.f32 0.088388346, %v3491_v26  ;;  %v10276_v26 = vld [vmem:[%s10953_s16] sm:$0x7] }
 0xafb   : > { %v9467_v34 = vpop.f32.mrf.mxu1 }
 0xafc   : > { %v3500_v36 = vsel %vm10881_vm7, %v3497_v35, -1e+09 }
 0xafd   : > { %v3507_v37 = vsel %vm1447_vm1, %v3500_v36, -inf }
 0xafe   : > { %3508 = vmax.xlane.f32.xlu0 %v3507_v37 }
 0xb7d   : > { %v3503_v39 = vpop.xlane.xlu0 %3502 }
 0xb7e   : > { %v3510_v40 = vsub.f32 %v3498_v28, %v3503_v39 }
 0xb80   : > { %v3513_v61 = vmul.f32 1.442695, %v3510_v40 }
 0xb82   : > { %10190 = vpow2.f32 %v3513_v61  ;;  %v3506_v43 = vpop.xlane.xlu1 %3505 }
 0xb83   : > { %v3511_v45 = vsub.f32 %v3499_v31, %v3506_v43  ;;  %v8225_v31 = vld [vmem:[%s10459_s24 + $0x18] sm:$0xff] }
 0xb85   : > { %v3515_v1 = vmul.f32 1.442695, %v3511_v45 }
 0xb87   : > { %10192 = vpow2.f32 %v3515_v1  ;;  %v3509_v47 = vpop.xlane.xlu0 %3508  ;;  %v8259_v1 = vld [vmem:[%s12615_s12 + $0x1f8] sm:$0xff] }
 0xb88   : > { %v3512_v48 = vsub.f32 %v3500_v36, %v3509_v47  ;;  %v8258_v47 = vld [vmem:[%s12615_s12 + $0x1f0] sm:$0xff] }
 0xb8a   : > { %v3517_v50 = vmul.f32 1.442695, %v3512_v48  ;;  %v8257_v48 = vld [vmem:[%s12615_s12 + $0x1e8] sm:$0xff] }
 0xb8c   : > { %10194 = vpow2.f32 %v3517_v50  ;;  %v8256_v50 = vld [vmem:[%s12615_s12 + $0x1e0] sm:$0xff] }
 0xb8f   : > { %v10191_v51 = vpop.eup %10190 }
 0xb90   : > { %v3519_v52 = vsel %vm1447_vm1, %v10191_v51, 0.0 }
 0xb91   : > { %3520 = vadd.xlane.f32.xlu1 %v3519_v52 }
 0xb94   : > { %v10193_v53 = vpop.eup %10192 }
 0xb95   : > { %v3522_v54 = vsel %vm1447_vm1, %v10193_v53, 0.0 }
 0xb96   : > { %3523 = vadd.xlane.f32.xlu0 %v3522_v54 }
 0xb99   : > { %v10195_v38 = vpop.eup %10194 }
 0xb9a   : > { %v3525_v56 = vsel %vm1447_vm1, %v10195_v38, 0.0 }
 0xb9b   : > { %3526 = vadd.xlane.f32.xlu1 %v3525_v56 }
 0xc1a   : > { %v3521_v42 = vpop.xlane.xlu1 %3520 }
 0xc1b   : > { %10196 = vrcp.f32 %v3521_v42 }
 0xc1f   : > { %v3524_v57 = vpop.xlane.xlu0 %3523 }
 0xc20   : > { %10198 = vrcp.f32 %v3524_v57 }
 0xc24   : > { %v3527_v46 = vpop.xlane.xlu1 %3526 }
 0xc25   : > { %10200 = vrcp.f32 %v3527_v46 }
 0xc28   : > { %v10197_v59 = vpop.eup %10196 }
 0xc29   : > { %v3534_v60 = vmul.f32 %v10197_v59, %v10191_v51  ;;  %v8254_v51 = vld [vmem:[%s12615_s12 + $0x1d0] sm:$0xff] }
 0xc2b   : > { %9471 = vmatmul.mubr.msk.f32.vlgmr.msra.gmra.mxu1 %vm1447_vm1, %v3534_v60 }
 0xc2c   : > { %9479 = vmatpush3.msra.mxu1 %v3281_v21  ;;  %9480 = vmatprep.mubr.msk.f32.mxu1 %vm10389_vm0, %v10388_v2  ;;  %v8211_v21 = vld [vmem:[%s10454_s19 + $0x98] sm:$0xff] }
 0xc2d   : > { %v10199_v62 = vpop.eup %10198  ;;  %9524 = vmatprep.subr.mxu1 %v10388_v2 }
 0xc2e   : > { %v3535_v63 = vmul.f32 %v10199_v62, %v10193_v53  ;;  %v8253_v62 = vld [vmem:[%s12615_s12 + $0x1c8] sm:$0xff] }
 0xc30   : > { %9476 = vmatmul.mubr.msk.f32.vlgmr.msra.gmra.mxu0 %vm1447_vm1, %v3535_v63  ;;  %v8252_v63 = vld [vmem:[%s12615_s12 + $0x1c0] sm:$0xff] }
 0xc31   : > { %9484 = vmatpush3.msra.mxu0 %v8223_v0  ;;  %9515 = vmatprep.mubr.msk.f32.mxu0 %vm10389_vm0, %v10388_v2  ;;  %v8251_v0 = vld [vmem:[%s12615_s12 + $0x1b8] sm:$0xff] }
 0xc32   : > { %v10201_v4 = vpop.eup %10200  ;;  %9485 = vmatprep.subr.mxu0 %v10388_v2 }
 0xc33   : > { %v3536_v17 = vmul.f32 %v10201_v4, %v10195_v38  ;;  %9486 = vmatpush3.msra.mxu0 %v8222_v3  ;;  %v8250_v3 = vld [vmem:[%s12615_s12 + $0x1b0] sm:$0xff]  ;;  %v8249_v4 = vld [vmem:[%s12615_s12 + $0x1a8] sm:$0xff] }
 0xc34   : > { %9487 = vmatprep.subr.mxu0 %v10388_v2 }
 0xc35   : > { %9481 = vmatmul.mubr.msk.f32.vlgmr.msra.gmra.mxu1 %vm1447_vm1, %v3536_v17  ;;  %9488 = vmatpush3.msra.mxu0 %v8221_v5  ;;  %v8248_v5 = vld [vmem:[%s12615_s12 + $0x1a0] sm:$0xff]  ;;  %v8247_v17 = vld [vmem:[%s12615_s12 + $0x198] sm:$0xff] }
 0xc36   : > { %9489 = vmatprep.subr.mxu0 %v10388_v2  ;;  %9528 = vmatprep.mubr.msk.f32.mxu1 %vm10389_vm0, %v10388_v2 }
 0xc37   : > { %9490 = vmatpush3.msra.mxu0 %v8220_v6  ;;  %9525 = vmatpush3.msra.mxu1 %v8225_v31  ;;  %v8246_v6 = vld [vmem:[%s12615_s12 + $0x190] sm:$0xff]  ;;  %v8229_v31 = vld [vmem:[%s12615_s12 + $0x108] sm:$0xff] }
 0xc38   : > { %9491 = vmatprep.subr.mxu0 %v10388_v2  ;;  %9526 = vmatprep.subr.mxu1 %v10388_v2 }
 0xc39   : > { %9492 = vmatpush3.msra.mxu0 %v8219_v7  ;;  %9527 = vmatpush3.msra.mxu1 %v8224_v32  ;;  %v8245_v7 = vld [vmem:[%s12615_s12 + $0x188] sm:$0xff]  ;;  %v8228_v32 = vld [vmem:[%s12615_s12 + $0x100] sm:$0xff] }
 0xc3a   : > { %9493 = vmatprep.subr.mxu0 %v10388_v2  ;;  %9529 = vmatmul.mubr.msk.f32.vlgmr.msra.gmra.mxu1 %vm2540_vm8, %v10276_v26  ;;  %v8292_v26 = vld [vmem:[%s10484_s27 + $0x1f8] sm:$0xff] }
 0xc3b   : > { %9494 = vmatpush3.msra.mxu0 %v8218_v8  ;;  %4077 = vmatprep.mubr.f32.mxu1 %v10388_v2  ;;  %v8244_v8 = vld [vmem:[%s12615_s12 + $0x180] sm:$0xff] }
 0xc3c   : > { %9495 = vmatprep.subr.mxu0 %v10388_v2  ;;  %4013 = vmatprep.subr.mxu1 %v8259_v1  ;;  %v8287_v1 = vld [vmem:[%s10484_s27 + $0x1d0] sm:$0xff] }
 0xc3d   : > { %9496 = vmatpush3.msra.mxu0 %v8217_v9  ;;  %4014 = vmatpush1.msra.mxu1 %v8258_v47  ;;  %v8243_v9 = vld [vmem:[%s12615_s12 + $0x178] sm:$0xff]  ;;  %v8271_v47 = vld [vmem:[%s10484_s27 + $0x150] sm:$0xff] }
 0xc3e   : > { %9497 = vmatprep.subr.mxu0 %v10388_v2  ;;  %4015 = vmatprep.subr.mxu1 %v8257_v48  ;;  %v8286_v48 = vld [vmem:[%s10484_s27 + $0x1c8] sm:$0xff] }
 0xc3f   : > { %9498 = vmatpush3.msra.mxu0 %v8216_v11  ;;  %4016 = vmatpush1.msra.mxu1 %v8256_v50  ;;  %v8242_v11 = vld [vmem:[%s12615_s12 + $0x170] sm:$0xff]  ;;  %v8270_v50 = vld [vmem:[%s10484_s27 + $0x148] sm:$0xff] }
 0xc40   : > { %9499 = vmatprep.subr.mxu0 %v10388_v2 }
 0xc41   : > { %9500 = vmatpush3.msra.mxu0 %v8215_v13  ;;  %v8241_v13 = vld [vmem:[%s12615_s12 + $0x168] sm:$0xff] }
 0xc42   : > { %9501 = vmatprep.subr.mxu0 %v10388_v2 }
 0xc43   : > { %9502 = vmatpush3.msra.mxu0 %v8214_v16  ;;  %v8240_v16 = vld [vmem:[%s12615_s12 + $0x160] sm:$0xff] }
 0xc44   : > { %9503 = vmatprep.subr.mxu0 %v10388_v2 }
 0xc45   : > { %9504 = vmatpush3.msra.mxu0 %v8213_v19  ;;  %v8239_v19 = vld [vmem:[%s12615_s12 + $0x158] sm:$0xff] }
 0xc46   : > { %9505 = vmatprep.subr.mxu0 %v10388_v2 }
 0xc47   : > { %9506 = vmatpush3.msra.mxu0 %v8212_v20  ;;  %v8238_v20 = vld [vmem:[%s12615_s12 + $0x150] sm:$0xff] }
 0xc48   : > { %9507 = vmatprep.subr.mxu0 %v10388_v2 }
 0xc49   : > { %9508 = vmatpush3.msra.mxu0 %v8211_v21 }
 0xc4a   : > { %9509 = vmatprep.subr.mxu0 %v10388_v2 }
 0xc4b   : > { %9510 = vmatpush3.msra.mxu0 %v8210_v22  ;;  %v8237_v22 = vld [vmem:[%s12615_s12 + $0x148] sm:$0xff] }
 0xc4c   : > { %9511 = vmatprep.subr.mxu0 %v10388_v2 }
 0xc4d   : > { %9512 = vmatpush3.msra.mxu0 %v8209_v23  ;;  %v8236_v23 = vld [vmem:[%s12615_s12 + $0x140] sm:$0xff] }
 0xc4e   : > { %9513 = vmatprep.subr.mxu0 %v10388_v2 }
 0xc4f   : > { %9514 = vmatpush3.msra.mxu0 %v8208_v24 }
 0xc50   : > { %8712 = vmatprep.subr.mxu0 %v8292_v26 }
 0xceb   : > { %v3606_v27 = vpop.f32.mrf.mxu1 }
 0xcec   : > { %9516 = vmatmul.mubr.f32.vlgmr.msra.gmra.mxu0 %v3606_v27  ;;  %v8235_v27 = vld [vmem:[%s12615_s12 + $0x138] sm:$0xff] }
 0xced   : > { %v9472_v28 = vpop.f32.mrf.mxu1  ;;  %9518 = vmatprep.mubr.msk.f32.mxu0 %vm10389_vm0, %v10388_v2 }
 0xcee   : > { %v8234_v28 = vld [vmem:[%s12615_s12 + $0x130] sm:$0xff] }
 0xcf0   : > { %v3679_v29 = vpop.f32.mrf.mxu0 }
 0xcf1   : > { %9519 = vmatmul.mubr.f32.gmra.mxu0 %v3679_v29  ;;  %v8233_v29 = vld [vmem:[%s12615_s12 + $0x128] sm:$0xff] }
 0xcf2   : > { %v9477_v10 = vpop.f32.mrf.mxu0  ;;  %9521 = vmatprep.mubr.msk.f32.mxu0 %vm10389_vm0, %v10388_v2 }
 0xcf3   : > { %v8232_v10 = vld [vmem:[%s12615_s12 + $0x120] sm:$0xff] }
 0xcf5   : > { %v3752_v12 = vpop.f32.mrf.mxu1 }
 0xcf6   : > { %9522 = vmatmul.mubr.f32.gmra.mxu0 %v3752_v12  ;;  %v8231_v12 = vld [vmem:[%s12615_s12 + $0x118] sm:$0xff] }
 0xcf7   : > { %v9482_v30 = vpop.f32.mrf.mxu1 }
 0xcf8   : > { %v8230_v30 = vld [vmem:[%s12615_s12 + $0x110] sm:$0xff] }
 0xcfa   : > { %v11339_v21 = vpop.f32.mrf.mxu1 }
 0xcfc   : > { %v9530_v24 = vpop.f32.mrf.mxu1 }
 0xdac   : > { %v3822_v35 = vpop.f32.mrf.mxu0 }
 0xdad   : > { %v3836_v34 = vadd.f32 %v3822_v35, %v11161_v58  ;;  %v8255_v58 = vld [vmem:[%s12615_s12 + $0x1d8] sm:$0xff]  ;;  %s12635_s12 = sld [smem:[#allocation19_spill]] }
 0xdae   : > { %v9517_v36 = vpop.f32.mrf.mxu0  ;;  %4017 = vmatprep.subr.mxu1 %v8255_v58  ;;  %v8276_v35 = vld [vmem:[%s10484_s27 + $0x178] sm:$0xff]  ;;  %v8285_v58 = vld [vmem:[%s10484_s27 + $0x1c0] sm:$0xff] }
 0xdaf   : > { %3839 = vadd.xlane.f32.xlu0 %v3836_v34  ;;  %4018 = vmatpush1.msra.mxu1 %v8254_v51  ;;  %v8275_v36 = vld [vmem:[%s10484_s27 + $0x170] sm:$0xff]  ;;  %v8269_v51 = vld [vmem:[%s10484_s27 + $0x140] sm:$0xff] }
 0xdb0   : > { %4019 = vmatprep.subr.mxu1 %v8253_v62  ;;  %8713 = vmatpush3.msra.mxu0 %v8276_v35 }
 0xdb1   : > { %v3827_v37 = vpop.f32.mrf.mxu0  ;;  %4020 = vmatpush1.msra.mxu1 %v8252_v63 }
 0xdb2   : > { %v3837_v39 = vadd.f32 %v3827_v37, %v11173_v44  ;;  %4021 = vmatprep.subr.mxu1 %v8251_v0  ;;  %v8290_v37 = vld [vmem:[%s10484_s27 + $0x1e8] sm:$0xff] }
 0xdb3   : > { %v9520_v40 = vpop.f32.mrf.mxu0  ;;  %4022 = vmatpush1.msra.mxu1 %v8250_v3 }
 0xdb4   : > { %3841 = vadd.xlane.f32.xlu1 %v3837_v39  ;;  %4023 = vmatprep.subr.mxu1 %v8249_v4  ;;  %v8289_v40 = vld [vmem:[%s10484_s27 + $0x1e0] sm:$0xff] }
 0xdb5   : > { %4024 = vmatpush1.msra.mxu1 %v8248_v5 }
 0xdb6   : > { %v3832_v61 = vpop.f32.mrf.mxu0  ;;  %4025 = vmatprep.subr.mxu1 %v8247_v17 }
 0xdb7   : > { %v3838_v43 = vadd.f32 %v3832_v61, %v11186_v49  ;;  %4026 = vmatpush1.msra.mxu1 %v8246_v6  ;;  %v8273_v61 = vld [vmem:[%s10484_s27 + $0x160] sm:$0xff] }
 0xdb8   : > { %v9523_v45 = vpop.f32.mrf.mxu0  ;;  %4027 = vmatprep.subr.mxu1 %v8245_v7  ;;  %v3967_v7 = vrot.slane %v11339_v21, %v11034_v15 }
 0xdb9   : > { %3843 = vadd.xlane.f32.xlu0 %v3838_v43  ;;  %4028 = vmatpush1.msra.mxu1 %v8244_v8  ;;  %v8272_v45 = vld [vmem:[%s10484_s27 + $0x158] sm:$0xff] }
 0xdba   : > { %4029 = vmatprep.subr.mxu1 %v8243_v9  ;;  %v3975_v8 = vrot.slane %v3967_v7, %v11034_v15 }
 0xdbb   : > { %4030 = vmatpush1.msra.mxu1 %v8242_v11  ;;  %v8299_v11 = vld [vmem:[%s10464_s30 + $0x1] ss:$0 sm:$0xff] }
 0xdbc   : > { %4031 = vmatprep.subr.mxu1 %v8241_v13 }
 0xdbd   : > { %4032 = vmatpush1.msra.mxu1 %v8240_v16  ;;  %v8300_v16 = vld [vmem:[%s12617_s6 + $0x1] ss:$0 sm:$0xff]  ;;  %s12634_s6 = smul.u32 24, %s10686_s2 }
 0xdbe   : > { %4033 = vmatprep.subr.mxu1 %v8239_v19  ;;  %v3968_v19 = vcombine.high %v3967_v7, %v3967_v7 }
 0xdbf   : > { %4034 = vmatpush1.msra.mxu1 %v8238_v20  ;;  %s1426_s8 = scalar_lea.vmem %s12633_s3, %s12634_s6  ;;  %s12637_s3 = sld [smem:[#allocation21_spill]] }
 0xdc0   : > { %4035 = vmatprep.subr.mxu1 %v8237_v22  ;;  %v3987_v22 = vrot.slane %v3975_v8, %v10857_v18 }
 0xdc1   : > { %4036 = vmatpush1.msra.mxu1 %v8236_v23 }
 0xdc2   : > { %4037 = vmatprep.subr.mxu1 %v8235_v27  ;;  %v3982_v27 = vrot.slane %v3968_v19, %v11034_v15 }
 0xdc3   : > { %4038 = vmatpush1.msra.mxu1 %v8234_v28 }
 0xdc4   : > { %4039 = vmatprep.subr.mxu1 %v8233_v29 }
 0xdc5   : > { %4040 = vmatpush1.msra.mxu1 %v8232_v10 }
 0xdc6   : > { %4041 = vmatprep.subr.mxu1 %v8231_v12  ;;  %v3991_v12 = vrot.slane %v3982_v27, %v10857_v18 }
 0xdc7   : > { %4042 = vmatpush1.msra.mxu1 %v8230_v30  ;;  %v3983_v30 = vcombine.high %v3975_v8, %v3975_v8 }
 0xdc8   : > { %4043 = vmatprep.subr.mxu1 %v8229_v31 }
 0xdc9   : > { %4044 = vmatpush1.msra.mxu1 %v8228_v32  ;;  %v3995_v35 = vrot.slane %v3983_v30, %v10857_v18  ;;  %v10279_v30 = vld [vmem:[%s10851_s22 + $0x2] sm:$0x1] }
 0xdca   : > { %9531 = vmatprep.subr.mxu1 %v10388_v2 }
 0xe38   : > { %v3840_v44 = vpop.xlane.xlu0 %3839 }
 0xe39   : > { %v3845_v52 = vmul.f32 0.0078125, %v3840_v44  ;;  %v8284_v44 = vld [vmem:[%s10484_s27 + $0x1b8] sm:$0xff] }
 0xe3b   : > { %v11311_v53 = vsub.f32 %v3836_v34, %v3845_v52  ;;  %v8291_v34 = vld [vmem:[%s10484_s27 + $0x1f0] sm:$0xff]  ;;  %v8268_v52 = vld [vmem:[%s10484_s27 + $0x138] sm:$0xff] }
 0xe3c   : > { %8714 = vmatprep.subr.mxu0 %v8291_v34 }
 0xe3d   : > { %v3842_v49 = vpop.xlane.xlu1 %3841  ;;  %v3851_v54 = vmul.f32 %v11311_v53, %v11311_v53  ;;  %8715 = vmatpush3.msra.mxu0 %v8275_v36  ;;  %v8264_v36 = vld [vmem:[%s10484_s27 + $0x118] sm:$0xff] }
 0xe3e   : > { %v3846_v38 = vmul.f32 0.0078125, %v3842_v49  ;;  %8716 = vmatprep.subr.mxu0 %v8290_v37  ;;  %v8283_v49 = vld [vmem:[%s10484_s27 + $0x1b0] sm:$0xff] }
 0xe3f   : > { %3854 = vadd.xlane.f32.xlu1 %v3851_v54  ;;  %v8267_v54 = vld [vmem:[%s10484_s27 + $0x130] sm:$0xff] }
 0xe40   : > { %v11315_v56 = vsub.f32 %v3837_v39, %v3846_v38  ;;  %v8274_v39 = vld [vmem:[%s10484_s27 + $0x168] sm:$0xff]  ;;  %v8279_v37 = vld [vmem:[%s10484_s27 + $0x190] sm:$0xff] }
 0xe41   : > { %8717 = vmatpush3.msra.mxu0 %v8274_v39  ;;  %v8282_v38 = vld [vmem:[%s10484_s27 + $0x1a8] sm:$0xff]  ;;  %v8263_v39 = vld [vmem:[%s10484_s27 + $0x110] sm:$0xff] }
 0xe42   : > { %v3844_v42 = vpop.xlane.xlu0 %3843  ;;  %v3852_v57 = vmul.f32 %v11315_v56, %v11315_v56  ;;  %8718 = vmatprep.subr.mxu0 %v8289_v40  ;;  %v8278_v40 = vld [vmem:[%s10484_s27 + $0x188] sm:$0xff] }
 0xe43   : > { %v3847_v46 = vmul.f32 0.0078125, %v3844_v42  ;;  %8719 = vmatpush3.msra.mxu0 %v8273_v61  ;;  %v8266_v42 = vld [vmem:[%s10484_s27 + $0x128] sm:$0xff] }
 0xe44   : > { %3856 = vadd.xlane.f32.xlu0 %v3852_v57  ;;  %v8281_v57 = vld [vmem:[%s10484_s27 + $0x1a0] sm:$0xff]  ;;  %v8262_v61 = vld [vmem:[%s10484_s27 + $0x108] sm:$0xff] }
 0xe45   : > { %v11319_v59 = vsub.f32 %v3838_v43, %v3847_v46  ;;  %v8288_v43 = vld [vmem:[%s10484_s27 + $0x1d8] sm:$0xff]  ;;  %v8265_v46 = vld [vmem:[%s10484_s27 + $0x120] sm:$0xff] }
 0xe46   : > { %8720 = vmatprep.subr.mxu0 %v8288_v43  ;;  %v8277_v43 = vld [vmem:[%s10484_s27 + $0x180] sm:$0xff] }
 0xe47   : > { %v3853_v60 = vmul.f32 %v11319_v59, %v11319_v59  ;;  %8721 = vmatpush3.msra.mxu0 %v8272_v45  ;;  %v8261_v45 = vld [vmem:[%s10484_s27 + $0x100] sm:$0xff] }
 0xe48   : > { %8722 = vmatprep.subr.mxu0 %v8287_v1  ;;  %v8260_v1 = vld [vmem:[%s10479_s20 + $0x2] sm:$0x3] }
 0xe49   : > { %3858 = vadd.xlane.f32.xlu1 %v3853_v60  ;;  %8723 = vmatpush3.msra.mxu0 %v8271_v47  ;;  %v4006_v47 = vrot.slane %v8260_v1, %v10857_v18 }
 0xe4a   : > { %8724 = vmatprep.subr.mxu0 %v8286_v48  ;;  %v4010_v48 = vrot.slane %v8260_v1, %v11072_v55  ;;  %v1443_v1 = vld [vmem:[%s1426_s8 + $0x10] sm:$0xff] }
 0xe4b   : > { %8725 = vmatpush3.msra.mxu0 %v8270_v50 }
 0xe4c   : > { %8726 = vmatprep.subr.mxu0 %v8285_v58 }
 0xe4d   : > { %8727 = vmatpush3.msra.mxu0 %v8269_v51 }
 0xe4e   : > { %8728 = vmatprep.subr.mxu0 %v8284_v44 }
 0xe4f   : > { %8729 = vmatpush3.msra.mxu0 %v8268_v52 }
 0xe50   : > { %8730 = vmatprep.subr.mxu0 %v8283_v49 }
 0xe51   : > { %8731 = vmatpush3.msra.mxu0 %v8267_v54 }
 0xe52   : > { %8732 = vmatprep.subr.mxu0 %v8282_v38 }
 0xe53   : > { %8733 = vmatpush3.msra.mxu0 %v8266_v42 }
 0xe54   : > { %8734 = vmatprep.subr.mxu0 %v8281_v57 }
 0xe55   : > { %8735 = vmatpush3.msra.mxu0 %v8265_v46 }
 0xec8   : > { %v3855_v60 = vpop.xlane.xlu1 %3854 }
 0xec9   : > { %v3860_v62 = vmul.f32 0.0078125, %v3855_v60 }
 0xecb   : > { %v3863_v63 = vadd.f32 1e-05, %v3860_v62 }
 0xecd   : > { %10202 = vrsqrt.f32 %v3863_v63  ;;  %v3857_v0 = vpop.xlane.xlu0 %3856 }
 0xece   : > { %v3861_v3 = vmul.f32 0.0078125, %v3857_v0 }
 0xed0   : > { %v3864_v4 = vadd.f32 1e-05, %v3861_v3 }
 0xed2   : > { %10204 = vrsqrt.f32 %v3864_v4  ;;  %v3859_v5 = vpop.xlane.xlu1 %3858 }
 0xed3   : > { %v3862_v17 = vmul.f32 0.0078125, %v3859_v5 }
 0xed5   : > { %v3865_v6 = vadd.f32 1e-05, %v3862_v17 }
 0xed7   : > { %10206 = vrsqrt.f32 %v3865_v6  ;;  %v8302_v6 = vld [vmem:[%s12630_s23 + $0x1] ss:$0 sm:$0xff] }
 0xeda   : > { %v10203_v9 = vpop.eup %10202 }
 0xedb   : > { %v3869_v13 = vmul.f32 %v10203_v9, %v11311_v53 }
 0xedd   : > { %v3878_v20 = vmul.f32 %v8299_v11, %v3869_v13 }
 0xedf   : > { %v10205_v23 = vpop.eup %10204  ;;  %v3887_v24 = vadd.f32 %v8300_v16, %v3878_v20 }
 0xee0   : > { %v3870_v28 = vmul.f32 %v10205_v23, %v11315_v56 }
 0xee1   : > { %v11385_v29 = vadd.f32 %v3987_v22, %v3887_v24 }
 0xee2   : > { %v3879_v21 = vmul.f32 %v8299_v11, %v3870_v28 }
 0xee3   : > { %4078 = vmatmul.mubr.f32.vlgmr.msra.gmra.mxu1 %v11385_v29 }
 0xee4   : > { %v10207_v10 = vpop.eup %10206  ;;  %4083 = vmatprep.mubr.f32.mxu1 %v10388_v2  ;;  %v3888_v53 = vadd.f32 %v8300_v16, %v3879_v21  ;;  %v10277_v21 = vld [vmem:[%s10851_s22 + $0x1] sm:$0x1] }
 0xee5   : > { %v3871_v31 = vmul.f32 %v10207_v10, %v11319_v59  ;;  %v8280_v59 = vld [vmem:[%s10484_s27 + $0x198] sm:$0xff]  ;;  %v4264_v10 = vsel %vm4260_vm9, %v10277_v21, 0.0 }
 0xee6   : > { %v11391_v32 = vadd.f32 %v3991_v12, %v3888_v53  ;;  %8736 = vmatprep.subr.mxu0 %v8280_v59 }
 0xee7   : > { %v3880_v56 = vmul.f32 %v8299_v11, %v3871_v31  ;;  %8737 = vmatpush3.msra.mxu0 %v8264_v36  ;;  %v4267_v31 = vsel %vm4260_vm9, %v10279_v30, 0.0 }
 0xee8   : > { %4084 = vmatmul.mubr.f32.gmra.mxu1 %v11391_v32  ;;  %8738 = vmatprep.subr.mxu0 %v8279_v37 }
 0xee9   : > { %4089 = vmatprep.mubr.f32.mxu1 %v10388_v2  ;;  %v3889_v26 = vadd.f32 %v8300_v16, %v3880_v56  ;;  %8739 = vmatpush3.msra.mxu0 %v8263_v39 }
 0xeea   : > { %8740 = vmatprep.subr.mxu0 %v8278_v40 }
 0xeeb   : > { %v11396_v34 = vadd.f32 %v3995_v35, %v3889_v26  ;;  %8741 = vmatpush3.msra.mxu0 %v8262_v61 }
 0xeec   : > { %8742 = vmatprep.subr.mxu0 %v8277_v43 }
 0xeed   : > { %4090 = vmatmul.mubr.f32.gmra.mxu1 %v11396_v34  ;;  %8743 = vmatpush3.msra.mxu0 %v8261_v45 }
 0xeee   : > { %9563 = vmatprep.mubr.msk.f32.mxu1 %vm10389_vm0, %v10388_v2  ;;  %9566 = vmatprep.subr.mxu0 %v10388_v2 }
 0xfa3   : > { %v4079_v50 = vpop.f32.mrf.mxu1 }
 0xfa4   : > { %v4080_v58 = vadd.f32 %v4079_v50, %v4006_v47  ;;  %v4343_v50 = vld [vmem:[%s12636_s13 + $0x78] sm:$0xff] }
 0xfa5   : > { %v4081_v51 = vpop.f32.mrf.mxu1 }
 0xfa6   : > { %v4082_v44 = vadd.f32 %v4081_v51, %v4010_v48  ;;  %v4096_v54 = vmax.f32 %v4080_v58, 0.0  ;;  %v4326_v58 = vld [vmem:[%s12635_s12 + $0x70] sm:$0xff] }
 0xfa7   : > { %v4342_v51 = vld [vmem:[%s12636_s13 + $0x70] sm:$0xff] }
 0xfa8   : > { %v4097_v52 = vmax.f32 %v4082_v44, 0.0  ;;  %v4085_v49 = vpop.f32.mrf.mxu1  ;;  %v4325_v44 = vld [vmem:[%s12635_s12 + $0x68] sm:$0xff] }
 0xfa9   : > { %v4086_v38 = vadd.f32 %v4085_v49, %v4006_v47  ;;  %v4324_v49 = vld [vmem:[%s12635_s12 + $0x60] sm:$0xff] }
 0xfaa   : > { %v4087_v42 = vpop.f32.mrf.mxu1  ;;  %4172 = vmatprep.mubr.f32.mxu0 %v4097_v52  ;;  %v4341_v52 = vld [vmem:[%s12636_s13 + $0x68] sm:$0xff] }
 0xfab   : > { %v4088_v57 = vadd.f32 %v4087_v42, %v4010_v48  ;;  %4173 = vmatmul.mubr.f32.vlgmr.msra.gmra.mxu0 %v4096_v54  ;;  %v4098_v62 = vmax.f32 %v4086_v38, 0.0  ;;  %v4340_v54 = vld [vmem:[%s12636_s13 + $0x60] sm:$0xff]  ;;  %v4323_v38 = vld [vmem:[%s12635_s12 + $0x58] sm:$0xff] }
 0xfac   : > { %9567 = vmatpush3.msra.mxu0 %v4343_v50  ;;  %v4339_v42 = vld [vmem:[%s12636_s13 + $0x58] sm:$0xff] }
 0xfad   : > { %v4099_v46 = vmax.f32 %v4088_v57, 0.0  ;;  %v4091_v60 = vpop.f32.mrf.mxu1  ;;  %9568 = vmatprep.subr.mxu0 %v10388_v2  ;;  %v4322_v57 = vld [vmem:[%s12635_s12 + $0x50] sm:$0xff] }
 0xfae   : > { %v4092_v63 = vadd.f32 %v4091_v60, %v4006_v47  ;;  %v1442_v47 = vld [vmem:[%s1426_s8 + $0x8] sm:$0xff]  ;;  %9569 = vmatpush3.msra.mxu0 %v4342_v51 }
 0xfaf   : > { %v4093_v0 = vpop.f32.mrf.mxu1  ;;  %4177 = vmatprep.mubr.f32.mxu0 %v4099_v46  ;;  %9570 = vmatprep.subr.mxu0 %v10388_v2  ;;  %v4338_v46 = vld [vmem:[%s12636_s13 + $0x50] sm:$0xff]  ;;  %v4321_v60 = vld [vmem:[%s12635_s12 + $0x48] sm:$0xff] }
 0xfb0   : > { %v4094_v3 = vadd.f32 %v4093_v0, %v4010_v48  ;;  %4178 = vmatmul.mubr.f32.gmra.mxu0 %v4098_v62  ;;  %v4100_v5 = vmax.f32 %v4092_v63, 0.0  ;;  %v4327_v48 = vld [vmem:[%s12635_s12 + $0x78] sm:$0xff]  ;;  %v4337_v62 = vld [vmem:[%s12636_s13 + $0x48] sm:$0xff]  ;;  %v4320_v63 = vld [vmem:[%s12635_s12 + $0x40] sm:$0xff] }
 0xfb1   : > { %9532 = vmatpush3.msra.mxu1 %v4327_v48  ;;  %9571 = vmatpush3.msra.mxu0 %v4341_v52  ;;  %v4336_v0 = vld [vmem:[%s12636_s13 + $0x40] sm:$0xff] }
 0xfb2   : > { %v4101_v4 = vmax.f32 %v4094_v3, 0.0  ;;  %9533 = vmatprep.subr.mxu1 %v10388_v2  ;;  %9572 = vmatprep.subr.mxu0 %v10388_v2  ;;  %v4319_v3 = vld [vmem:[%s12635_s12 + $0x38] sm:$0xff] }
 0xfb3   : > { %9534 = vmatpush3.msra.mxu1 %v4326_v58  ;;  %9573 = vmatpush3.msra.mxu0 %v4340_v54 }
 0xfb4   : > { %4182 = vmatprep.mubr.f32.mxu0 %v4101_v4  ;;  %9535 = vmatprep.subr.mxu1 %v10388_v2  ;;  %v4335_v4 = vld [vmem:[%s12636_s13 + $0x38] sm:$0xff] }
 0xfb5   : > { %4183 = vmatmul.mubr.f32.gmra.mxu0 %v4100_v5  ;;  %9536 = vmatpush3.msra.mxu1 %v4325_v44  ;;  %v4318_v5 = vld [vmem:[%s12635_s12 + $0x30] sm:$0xff] }
 0xfb6   : > { %9598 = vmatprep.mubr.msk.f32.mxu0 %vm10389_vm0, %v10388_v2  ;;  %9537 = vmatprep.subr.mxu1 %v10388_v2 }
 0xfb7   : > { %9538 = vmatpush3.msra.mxu1 %v4324_v49  ;;  %9574 = vmatprep.subr.mxu0 %v10388_v2 }
 0xfb8   : > { %9539 = vmatprep.subr.mxu1 %v10388_v2  ;;  %9575 = vmatpush3.msra.mxu0 %v4339_v42 }
 0xfb9   : > { %9540 = vmatpush3.msra.mxu1 %v4323_v38  ;;  %9576 = vmatprep.subr.mxu0 %v10388_v2 }
 0xfba   : > { %9541 = vmatprep.subr.mxu1 %v10388_v2  ;;  %9577 = vmatpush3.msra.mxu0 %v4338_v46 }
 0xfbb   : > { %9542 = vmatpush3.msra.mxu1 %v4322_v57  ;;  %9578 = vmatprep.subr.mxu0 %v10388_v2 }
 0xfbc   : > { %9543 = vmatprep.subr.mxu1 %v10388_v2  ;;  %9579 = vmatpush3.msra.mxu0 %v4337_v62 }
 0xfbd   : > { %9544 = vmatpush3.msra.mxu1 %v4321_v60  ;;  %9580 = vmatprep.subr.mxu0 %v10388_v2 }
 0xfbe   : > { %9545 = vmatprep.subr.mxu1 %v10388_v2  ;;  %9581 = vmatpush3.msra.mxu0 %v4336_v0 }
 0xfbf   : > { %9546 = vmatpush3.msra.mxu1 %v4320_v63  ;;  %9582 = vmatprep.subr.mxu0 %v10388_v2 }
 0xfc0   : > { %9547 = vmatprep.subr.mxu1 %v10388_v2  ;;  %9583 = vmatpush3.msra.mxu0 %v4335_v4 }
 0xfc1   : > { %9548 = vmatpush3.msra.mxu1 %v4319_v3  ;;  %9584 = vmatprep.subr.mxu0 %v10388_v2 }
 0xfc2   : > { %9549 = vmatprep.subr.mxu1 %v10388_v2 }
 0xfc3   : > { %9550 = vmatpush3.msra.mxu1 %v4318_v5 }
 0xfc4   : > { %9551 = vmatprep.subr.mxu1 %v10388_v2 }
0x106b   : > { %v8744_v17 = vpop.f32.mrf.mxu0 }
0x106d   : > { %v8745_v7 = vpop.f32.mrf.mxu0 }
0x106e   : > { %v8746_v8 = vadd.f32 %v8745_v7, %v8744_v17  ;;  %v4334_v17 = vld [vmem:[%s12636_s13 + $0x30] sm:$0xff]  ;;  %v4333_v7 = vld [vmem:[%s12636_s13 + $0x28] sm:$0xff] }
0x106f   : > { %9585 = vmatpush3.msra.mxu0 %v4334_v17 }
0x1070   : > { %v4175_v9 = vadd.f32 %v8746_v8, %v8302_v6  ;;  %v8747_v11 = vpop.f32.mrf.mxu0  ;;  %v4316_v8 = vld [vmem:[%s12635_s12 + $0x20] sm:$0xff]  ;;  %9586 = vmatprep.subr.mxu0 %v10388_v2 }
0x1071   : > { %9587 = vmatpush3.msra.mxu0 %v4333_v7 }
0x1072   : > { %v8748_v13 = vpop.f32.mrf.mxu0  ;;  %v4188_v16 = vadd.f32 %v4175_v9, %v11385_v29  ;;  %v10278_v29 = vld [vmem:[%s10851_s22] sm:$0x1]  ;;  %9588 = vmatprep.subr.mxu0 %v10388_v2  ;;  %s12639_s22 = sld [smem:[#allocation22_spill]] }
0x1073   : > { %v8749_v19 = vadd.f32 %v8748_v13, %v8747_v11  ;;  %v4261_v12 = vsel %vm4260_vm9, %v10278_v29, 0.0  ;;  %v4332_v9 = vld [vmem:[%s12636_s13 + $0x20] sm:$0xff]  ;;  %v4315_v11 = vld [vmem:[%s12635_s12 + $0x18] sm:$0xff] }
0x1074   : > { %4191 = vadd.xlane.f32.xlu0 %v4188_v16  ;;  %v4331_v13 = vld [vmem:[%s12636_s13 + $0x18] sm:$0xff]  ;;  %9589 = vmatpush3.msra.mxu0 %v4332_v9 }
0x1075   : > { %v4180_v20 = vadd.f32 %v8749_v19, %v8302_v6  ;;  %v8750_v22 = vpop.f32.mrf.mxu0  ;;  %9590 = vmatprep.subr.mxu0 %v10388_v2  ;;  %v4330_v19 = vld [vmem:[%s12636_s13 + $0x10] sm:$0xff] }
0x1076   : > { %9591 = vmatpush3.msra.mxu0 %v4331_v13 }
0x1077   : > { %v8751_v23 = vpop.f32.mrf.mxu0  ;;  %v4189_v24 = vadd.f32 %v4180_v20, %v11391_v32  ;;  %v1441_v32 = vld [vmem:[%s1426_s8] sm:$0xff]  ;;  %v4313_v20 = vld [vmem:[%s12635_s12 + $0x8] sm:$0xff]  ;;  %9592 = vmatprep.subr.mxu0 %v10388_v2  ;;  %s12638_s8 = sld [smem:[#allocation9_spill]] }
0x1078   : > { %v8752_v27 = vadd.f32 %v8751_v23, %v8750_v22  ;;  %v4329_v22 = vld [vmem:[%s12636_s13 + $0x8] sm:$0xff]  ;;  %9593 = vmatpush3.msra.mxu0 %v4330_v19  ;;  %v4312_v23 = vld [vmem:[%s12635_s12] sm:$0xff] }
0x1079   : > { %4193 = vadd.xlane.f32.xlu1 %v4189_v24  ;;  %9594 = vmatprep.subr.mxu0 %v10388_v2 }
0x107a   : > { %v4185_v28 = vadd.f32 %v8752_v27, %v8302_v6  ;;  %v4317_v6 = vld [vmem:[%s12635_s12 + $0x28] sm:$0xff]  ;;  %9595 = vmatpush3.msra.mxu0 %v4329_v22 }
0x107b   : > { %9552 = vmatpush3.msra.mxu1 %v4317_v6  ;;  %9596 = vmatprep.subr.mxu0 %v10388_v2 }
0x107c   : > { %v4190_v53 = vadd.f32 %v4185_v28, %v11396_v34  ;;  %9553 = vmatprep.subr.mxu1 %v10388_v2 }
0x107d   : > { %4265 = vadd.xlane.f32.xlu1 %v4264_v10  ;;  %9554 = vmatpush3.msra.mxu1 %v4316_v8  ;;  %s1429_s6 = scalar_lea.vmem %s12638_s8, %s10686_s2  ;;  %s12640_s8 = sld [smem:[#allocation25_spill]] }
0x107e   : > { %4195 = vadd.xlane.f32.xlu0 %v4190_v53  ;;  %9555 = vmatprep.subr.mxu1 %v10388_v2 }
0x107f   : > { %9556 = vmatpush3.msra.mxu1 %v4315_v11 }
0x1080   : > { %9557 = vmatprep.subr.mxu1 %v10388_v2 }
0x1082   : > { %4262 = vadd.xlane.f32.xlu0 %v4261_v12 }
0x1086   : > { %4268 = vadd.xlane.f32.xlu0 %v4267_v31 }
0x108e   : > { %4244 = vperm.xlu1 %10164, %v1441_v32  }
0x10fd   : > { %v4192_v56 = vpop.xlane.xlu0 %4191 }
0x10fe   : > { %v4197_v26 = vmul.f32 0.0078125, %v4192_v56 }
0x1100   : > { %v11425_v35 = vsub.f32 %v4188_v16, %v4197_v26  ;;  %v4314_v16 = vld [vmem:[%s12635_s12 + $0x10] sm:$0xff] }
0x1101   : > { %9558 = vmatpush3.msra.mxu1 %v4314_v16 }
0x1102   : > { %v4194_v59 = vpop.xlane.xlu1 %4193  ;;  %v4203_v34 = vmul.f32 %v11425_v35, %v11425_v35  ;;  %9559 = vmatprep.subr.mxu1 %v10388_v2 }
0x1103   : > { %v4198_v36 = vmul.f32 0.0078125, %v4194_v59  ;;  %9560 = vmatpush3.msra.mxu1 %v4313_v20 }
0x1104   : > { %4206 = vadd.xlane.f32.xlu1 %v4203_v34  ;;  %9561 = vmatprep.subr.mxu1 %v10388_v2 }
0x1105   : > { %v11429_v37 = vsub.f32 %v4189_v24, %v4198_v36  ;;  %v4328_v24 = vld [vmem:[%s12636_s13] sm:$0xff]  ;;  %9562 = vmatpush3.msra.mxu1 %v4312_v23  ;;  %s12658_s13 = sld [smem:[#allocation37_spill]] }
0x1106   : > { %9597 = vmatpush3.msra.mxu0 %v4328_v24  ;;  %9601 = vmatprep.subr.mxu1 %v10388_v2  ;;  %v4266_v27 = vpop.xlane.xlu1 %4265  ;;  %v8303_v36 = vld [vmem:[%s12631_s5 + $0x1] ss:$0 sm:$0xff]  ;;  %s12643_s5 = sld [smem:[#allocation24_spill]] }
0x1107   : > { %v4196_v39 = vpop.xlane.xlu0 %4195  ;;  %v4204_v40 = vmul.f32 %v11429_v37, %v11429_v37  ;;  %9636 = vmatprep.subr.mxu0 %v10388_v2 }
0x1108   : > { %v4199_v61 = vmul.f32 0.0078125, %v4196_v39 }
0x1109   : > { %4208 = vadd.xlane.f32.xlu0 %v4204_v40  ;;  %v8304_v40 = vld [vmem:[%s12632_s9 + $0x1] ss:$0 sm:$0xff]  ;;  %s12647_s9 = sld [smem:[#allocation32_spill]] }
0x110a   : > { %v11433_v43 = vsub.f32 %v4190_v53, %v4199_v61  ;;  %v11501_v21 = vpop.permute.xlu1 %4244 }
0x110b   : > { %v4263_v28 = vpop.xlane.xlu0 %4262 }
0x110c   : > { %v4205_v45 = vmul.f32 %v11433_v43, %v11433_v43  ;;  %v4270_v58 = vmax.f32 %v4263_v28, 0.1 }
0x110e   : > { %4210 = vadd.xlane.f32.xlu1 %v4205_v45 }
0x110f   : > { %v4269_v10 = vpop.xlane.xlu0 %4268 }
0x1110   : > { %v4272_v44 = vmax.f32 %v4269_v10, 0.1 }
0x111f   : > { %4254 = vperm.xlu1 %10164, %v1443_v1   ;;  %4249 = vperm.xlu0 %10165, %v1442_v47   ;;  %v4271_v47 = vmax.f32 %v4266_v27, 0.1 }
0x118d   : > { %v4207_v53 = vpop.xlane.xlu1 %4206 }
0x118e   : > { %v4212_v29 = vmul.f32 0.0078125, %v4207_v53 }
0x1190   : > { %v4215_v12 = vadd.f32 1e-05, %v4212_v29 }
0x1192   : > { %10208 = vrsqrt.f32 %v4215_v12  ;;  %v4209_v30 = vpop.xlane.xlu0 %4208 }
0x1193   : > { %v4213_v31 = vmul.f32 0.0078125, %v4209_v30 }
0x1195   : > { %v4216_v32 = vadd.f32 1e-05, %v4213_v31  ;;  %v4359_v31 = vld [vmem:[%s12637_s3 + $0x78] sm:$0xff] }
0x1197   : > { %10210 = vrsqrt.f32 %v4216_v32  ;;  %v4211_v56 = vpop.xlane.xlu1 %4210 }
0x1198   : > { %v4214_v26 = vmul.f32 0.0078125, %v4211_v56  ;;  %v4358_v56 = vld [vmem:[%s12637_s3 + $0x70] sm:$0xff] }
0x119a   : > { %v4217_v59 = vadd.f32 1e-05, %v4214_v26  ;;  %v11510_v52 = vpop.permute.xlu0 %4249  ;;  %v4357_v26 = vld [vmem:[%s12637_s3 + $0x68] sm:$0xff] }
0x119b   : > { %v11519_v63 = vpop.permute.xlu1 %4254 }
0x119c   : > { %10212 = vrsqrt.f32 %v4217_v59  ;;  %v4356_v59 = vld [vmem:[%s12637_s3 + $0x60] sm:$0xff] }
0x119d   : > { %10214 = vrcp.f32 %v4271_v47  ;;  %v4348_v47 = vld [vmem:[%s12637_s3 + $0x20] sm:$0xff] }
0x119e   : > { %10216 = vrcp.f32 %v4270_v58  ;;  %v4346_v58 = vld [vmem:[%s12637_s3 + $0x10] sm:$0xff] }
0x119f   : > { %v10209_v34 = vpop.eup %10208  ;;  %10218 = vrcp.f32 %v4272_v44  ;;  %v4344_v44 = vld [vmem:[%s12637_s3] sm:$0xff] }
0x11a0   : > { %v4221_v39 = vmul.f32 %v10209_v34, %v11425_v35  ;;  %v4355_v34 = vld [vmem:[%s12637_s3 + $0x58] sm:$0xff] }
0x11a2   : > { %v4230_v61 = vmul.f32 %v8303_v36, %v4221_v39  ;;  %v4353_v39 = vld [vmem:[%s12637_s3 + $0x48] sm:$0xff] }
0x11a4   : > { %v10211_v45 = vpop.eup %10210  ;;  %v4239_v1 = vadd.f32 %v8304_v40, %v4230_v61  ;;  %v4351_v61 = vld [vmem:[%s12637_s3 + $0x38] sm:$0xff] }
0x11a5   : > { %v4222_v48 = vmul.f32 %v10211_v45, %v11429_v37  ;;  %v4350_v45 = vld [vmem:[%s12637_s3 + $0x30] sm:$0xff] }
0x11a6   : > { %v11508_v50 = vmul.f32 %v11501_v21, %v4239_v1  ;;  %v4349_v1 = vld [vmem:[%s12637_s3 + $0x28] sm:$0xff] }
0x11a7   : > { %v4231_v51 = vmul.f32 %v8303_v36, %v4222_v48  ;;  %v4347_v48 = vld [vmem:[%s12637_s3 + $0x18] sm:$0xff] }
0x11a8   : > { %v4273_v49 = vrot.slane %v11508_v50, 4 }
0x11a9   : > { %v10213_v54 = vpop.eup %10212  ;;  %v4240_v35 = vadd.f32 %v8304_v40, %v4231_v51  ;;  %v4345_v51 = vld [vmem:[%s12637_s3 + $0x8] sm:$0xff] }
0x11aa   : > { %v4223_v38 = vmul.f32 %v10213_v54, %v11433_v43  ;;  %v4274_v42 = vadd.f32 %v4273_v49, %v11508_v50  ;;  %v10215_v9 = vpop.eup %10214 }
0x11ab   : > { %v11516_v37 = vmul.f32 %v11510_v52, %v4240_v35  ;;  %v10217_v16 = vpop.eup %10216  ;;  %v4304_v23 = vrot.slane %v10215_v9, %v10857_v18 }
0x11ac   : > { %v4232_v57 = vmul.f32 %v8303_v36, %v4223_v38  ;;  %v4275_v60 = vrot.slane %v4274_v42, 2  ;;  %v10219_v20 = vpop.eup %10218  ;;  %v4300_v27 = vrot.slane %v10217_v16, %v10857_v18  ;;  %v4354_v36 = vld [vmem:[%s12637_s3 + $0x50] sm:$0xff]  ;;  %v4373_v16 = vld [vmem:[%s12639_s22 + $0x68] sm:$0xff] }
0x11ad   : > { %v4279_v46 = vrot.slane %v11516_v37, 4  ;;  %v4308_v53 = vrot.slane %v10219_v20, %v10857_v18  ;;  %v4371_v20 = vld [vmem:[%s12639_s22 + $0x58] sm:$0xff] }
0x11ae   : > { %v4241_v62 = vadd.f32 %v8304_v40, %v4232_v57  ;;  %v4276_v43 = vadd.f32 %v4275_v60, %v4274_v42  ;;  %v4352_v40 = vld [vmem:[%s12637_s3 + $0x40] sm:$0xff]  ;;  %s12642_s3 = sld [smem:[#allocation23_spill]] }
0x11af   : > { %v4280_v0 = vadd.f32 %v4279_v46, %v11516_v37  ;;  %v1444_v46 = vld [vmem:[%s1429_s6] sm:$0x1]  ;;  %s12641_s6 = sld [smem:[#allocation27_spill]] }
0x11b0   : > { %v11523_v3 = vmul.f32 %v11519_v63, %v4241_v62  ;;  %v4277_v7 = vrot.slane %v4276_v43, 1  ;;  %vm4735_vm13 = vcmp.gt.f32.partialorder %v1444_v46, 0.0  ;;  %v4407_v46 = vld [vmem:[%s12640_s8 + $0xe8] sm:$0xff] }
0x11b1   : > { %v4281_v4 = vrot.slane %v4280_v0, 2  ;;  %v4736_v60 = vsel %vm4735_vm13, 1, %v10390_v14 }
0x11b2   : > { %v4285_v5 = vrot.slane %v11523_v3, 4  ;;  %v4278_v22 = vadd.f32 %v4277_v7, %v4276_v43  ;;  %v4740_v62 = vrot.slane %v4736_v60, %v10857_v18 }
0x11b3   : > { %v4282_v17 = vadd.f32 %v4281_v4, %v4280_v0 }
0x11b4   : > { %v4286_v6 = vadd.f32 %v4285_v5, %v11523_v3  ;;  %v11532_v29 = vmul.f32 %v4300_v27, %v4278_v22  ;;  %vm4741_vm14 = vcmp.eq.s32.totalorder %v4740_v62, 1  ;;  %v4370_v22 = vld [vmem:[%s12639_s22 + $0x50] sm:$0xff]  ;;  %v4367_v27 = vld [vmem:[%s12639_s22 + $0x38] sm:$0xff] }
0x11b5   : > { %v4283_v8 = vrot.slane %v4282_v17, 1 }
0x11b6   : > { %v4287_v11 = vrot.slane %v4286_v6, 2 }
0x11b7   : > { %v4284_v13 = vadd.f32 %v4283_v8, %v4282_v17 }
0x11b8   : > { %v4288_v19 = vadd.f32 %v4287_v11, %v4286_v6  ;;  %v4375_v11 = vld [vmem:[%s12639_s22 + $0x78] sm:$0xff] }
0x11b9   : > { %v11529_v28 = vmul.f32 %v4304_v23, %v4284_v13  ;;  %v4374_v13 = vld [vmem:[%s12639_s22 + $0x70] sm:$0xff]  ;;  %v4369_v23 = vld [vmem:[%s12639_s22 + $0x48] sm:$0xff] }
0x11ba   : > { %v4289_v24 = vrot.slane %v4288_v19, 1 }
0x11bb   : > { %v4450_v30 = vsel %vm4449_vm10, %v11529_v28, %v11532_v29 }
0x11bc   : > { %v4290_v10 = vadd.f32 %v4289_v24, %v4288_v19  ;;  %v4372_v19 = vld [vmem:[%s12639_s22 + $0x60] sm:$0xff] }
0x11bd   : > { %v4368_v24 = vld [vmem:[%s12639_s22 + $0x40] sm:$0xff] }
0x11be   : > { %v11534_v12 = vmul.f32 %v4308_v53, %v4290_v10  ;;  %v4366_v10 = vld [vmem:[%s12639_s22 + $0x30] sm:$0xff]  ;;  %v4365_v53 = vld [vmem:[%s12639_s22 + $0x28] sm:$0xff] }
0x11c0   : > { %v4452_v32 = vsel %vm4451_vm11, %v11534_v12, %v4450_v30  ;;  %v4364_v30 = vld [vmem:[%s12639_s22 + $0x20] sm:$0xff] }
0x11c1   : > { %9564 = vmatmul.mubr.f32.vlgmr.msra.gmra.mxu1 %v4452_v32  ;;  %9599 = vmatmul.mubr.f32.vlgmr.msra.gmra.mxu0 %v4452_v32 }
0x11c2   : > { %9602 = vmatpush3.msra.mxu1 %v4359_v31  ;;  %9633 = vmatprep.mubr.msk.f32.mxu1 %vm10389_vm0, %v10388_v2  ;;  %v4363_v31 = vld [vmem:[%s12639_s22 + $0x18] sm:$0xff] }
0x11c3   : > { %9603 = vmatprep.subr.mxu1 %v10388_v2  ;;  %9638 = vmatprep.mubr.msk.f32.mxu0 %vm10389_vm0, %v10388_v2 }
0x11c4   : > { %9604 = vmatpush3.msra.mxu1 %v4358_v56  ;;  %v4361_v56 = vld [vmem:[%s12639_s22 + $0x8] sm:$0xff] }
0x11c5   : > { %9605 = vmatprep.subr.mxu1 %v10388_v2 }
0x11c6   : > { %9606 = vmatpush3.msra.mxu1 %v4357_v26 }
0x11c7   : > { %9607 = vmatprep.subr.mxu1 %v10388_v2 }
0x11c8   : > { %9608 = vmatpush3.msra.mxu1 %v4356_v59 }
0x11c9   : > { %9609 = vmatprep.subr.mxu1 %v10388_v2 }
0x11ca   : > { %9610 = vmatpush3.msra.mxu1 %v4355_v34 }
0x11cb   : > { %9611 = vmatprep.subr.mxu1 %v10388_v2 }
0x11cc   : > { %9612 = vmatpush3.msra.mxu1 %v4354_v36  ;;  %v4360_v36 = vld [vmem:[%s12639_s22] sm:$0xff] }
0x11cd   : > { %9613 = vmatprep.subr.mxu1 %v10388_v2 }
0x11ce   : > { %9614 = vmatpush3.msra.mxu1 %v4353_v39 }
0x11cf   : > { %9615 = vmatprep.subr.mxu1 %v10388_v2 }
0x11d0   : > { %9616 = vmatpush3.msra.mxu1 %v4352_v40 }
0x11d1   : > { %9617 = vmatprep.subr.mxu1 %v10388_v2 }
0x11d2   : > { %9618 = vmatpush3.msra.mxu1 %v4351_v61 }
0x11d3   : > { %9619 = vmatprep.subr.mxu1 %v10388_v2 }
0x11d4   : > { %9620 = vmatpush3.msra.mxu1 %v4350_v45 }
0x11d5   : > { %9621 = vmatprep.subr.mxu1 %v10388_v2 }
0x11d6   : > { %9622 = vmatpush3.msra.mxu1 %v4349_v1 }
0x11d7   : > { %9623 = vmatprep.subr.mxu1 %v10388_v2 }
0x11d8   : > { %9624 = vmatpush3.msra.mxu1 %v4348_v47 }
0x11d9   : > { %9625 = vmatprep.subr.mxu1 %v10388_v2 }
0x11da   : > { %9626 = vmatpush3.msra.mxu1 %v4347_v48 }
0x11db   : > { %9627 = vmatprep.subr.mxu1 %v10388_v2 }
0x11dc   : > { %9628 = vmatpush3.msra.mxu1 %v4346_v58 }
0x11dd   : > { %9629 = vmatprep.subr.mxu1 %v10388_v2 }
0x11de   : > { %9630 = vmatpush3.msra.mxu1 %v4345_v51 }
0x11df   : > { %9631 = vmatprep.subr.mxu1 %v10388_v2 }
0x11e0   : > { %9632 = vmatpush3.msra.mxu1 %v4344_v44 }
0x11e1   : > { %9634 = vmatmul.mubr.f32.vlgmr.msra.gmra.mxu1 %v4452_v32  ;;  %9646 = vmatprep.subr.mxu1 %v10388_v2  ;;  %v4362_v32 = vld [vmem:[%s12639_s22 + $0x10] sm:$0xff] }
0x11e2   : > { %9678 = vmatprep.mubr.msk.f32.mxu1 %vm10389_vm0, %v10388_v2  ;;  %9647 = vmatpush3.msra.mxu1 %v4375_v11  ;;  %v4406_v11 = vld [vmem:[%s12640_s8 + $0xe0] sm:$0xff] }
0x11e3   : > { %9648 = vmatprep.subr.mxu1 %v10388_v2 }
0x11e4   : > { %9649 = vmatpush3.msra.mxu1 %v4374_v13  ;;  %v4405_v13 = vld [vmem:[%s12640_s8 + $0xd8] sm:$0xff] }
0x11e5   : > { %9650 = vmatprep.subr.mxu1 %v10388_v2 }
0x11e6   : > { %9651 = vmatpush3.msra.mxu1 %v4373_v16  ;;  %v4404_v16 = vld [vmem:[%s12640_s8 + $0xd0] sm:$0xff] }
0x11e7   : > { %9652 = vmatprep.subr.mxu1 %v10388_v2 }
0x11e8   : > { %9653 = vmatpush3.msra.mxu1 %v4372_v19  ;;  %v4403_v19 = vld [vmem:[%s12640_s8 + $0xc8] sm:$0xff] }
0x11e9   : > { %9654 = vmatprep.subr.mxu1 %v10388_v2 }
0x11ea   : > { %9655 = vmatpush3.msra.mxu1 %v4371_v20  ;;  %v4402_v20 = vld [vmem:[%s12640_s8 + $0xc0] sm:$0xff] }
0x11eb   : > { %9656 = vmatprep.subr.mxu1 %v10388_v2 }
0x11ec   : > { %9657 = vmatpush3.msra.mxu1 %v4370_v22  ;;  %v4401_v22 = vld [vmem:[%s12640_s8 + $0xb8] sm:$0xff] }
0x11ed   : > { %9658 = vmatprep.subr.mxu1 %v10388_v2 }
0x11ee   : > { %9659 = vmatpush3.msra.mxu1 %v4369_v23  ;;  %v4400_v23 = vld [vmem:[%s12640_s8 + $0xb0] sm:$0xff] }
0x11ef   : > { %9660 = vmatprep.subr.mxu1 %v10388_v2 }
0x11f0   : > { %9661 = vmatpush3.msra.mxu1 %v4368_v24  ;;  %v4399_v24 = vld [vmem:[%s12640_s8 + $0xa8] sm:$0xff] }
0x11f1   : > { %9662 = vmatprep.subr.mxu1 %v10388_v2 }
0x11f2   : > { %9663 = vmatpush3.msra.mxu1 %v4367_v27  ;;  %v4398_v27 = vld [vmem:[%s12640_s8 + $0xa0] sm:$0xff] }
0x11f3   : > { %9664 = vmatprep.subr.mxu1 %v10388_v2 }
0x11f4   : > { %9665 = vmatpush3.msra.mxu1 %v4366_v10  ;;  %v4397_v10 = vld [vmem:[%s12640_s8 + $0x98] sm:$0xff] }
0x11f5   : > { %9666 = vmatprep.subr.mxu1 %v10388_v2 }
0x11f6   : > { %9667 = vmatpush3.msra.mxu1 %v4365_v53  ;;  %v4396_v53 = vld [vmem:[%s12640_s8 + $0x90] sm:$0xff] }
0x11f7   : > { %9668 = vmatprep.subr.mxu1 %v10388_v2 }
0x11f8   : > { %9669 = vmatpush3.msra.mxu1 %v4364_v30  ;;  %v4395_v30 = vld [vmem:[%s12640_s8 + $0x88] sm:$0xff] }
0x11f9   : > { %9670 = vmatprep.subr.mxu1 %v10388_v2 }
0x11fa   : > { %9671 = vmatpush3.msra.mxu1 %v4363_v31  ;;  %v4394_v31 = vld [vmem:[%s12640_s8 + $0x80] sm:$0xff] }
0x11fb   : > { %9672 = vmatprep.subr.mxu1 %v10388_v2 }
0x11fc   : > { %9673 = vmatpush3.msra.mxu1 %v4362_v32  ;;  %v4393_v32 = vld [vmem:[%s12640_s8 + $0x78] sm:$0xff] }
0x11fd   : > { %9674 = vmatprep.subr.mxu1 %v10388_v2 }
0x11fe   : > { %9675 = vmatpush3.msra.mxu1 %v4361_v56  ;;  %v4392_v56 = vld [vmem:[%s12640_s8 + $0x70] sm:$0xff] }
0x11ff   : > { %9676 = vmatprep.subr.mxu1 %v10388_v2 }
0x1200   : > { %9677 = vmatpush3.msra.mxu1 %v4360_v36  ;;  %v4388_v36 = vld [vmem:[%s12640_s8 + $0x50] sm:$0xff] }
0x1281   : > { %v4520_v49 = vpop.f32.mrf.mxu1  ;;  %v4590_v54 = vpop.f32.mrf.mxu0 }
0x1282   : > { %9637 = vmatpush3.xpose.msra.mxu0 %v4590_v54 }
0x1283   : > { %v9565_v35 = vpop.f32.mrf.mxu1  ;;  %v9600_v38 = vpop.f32.mrf.mxu0  ;;  %9641 = vmatprep.subr.mxu0 %v10388_v2 }
0x1285   : > { %9639 = vmatmul.mubr.f32.vlgmr.msra.gmra.mxu0 %v4520_v49 }
0x1286   : > { %9643 = vmatprep.mubr.msk.f32.mxu0 %vm10389_vm0, %v10388_v2 }
0x12a1   : > { %v4660_v42 = vpop.f32.mrf.mxu1 }
0x12a2   : > { %9642 = vmatpush3.msk.msra.mxu0 %vm4760_vm12, %v4660_v42  ;;  %v4409_v42 = vld [vmem:[%s12640_s8 + $0xf8] sm:$0xff] }
0x12a3   : > { %v9635_v57 = vpop.f32.mrf.mxu1  ;;  %4997 = vmatprep.subr.mxu0 %v4409_v42  ;;  %v4440_v42 = vld [vmem:[%s12641_s6 + $0xe8] sm:$0xff] }
0x12a4   : > { %v4408_v57 = vld [vmem:[%s12640_s8 + $0xf0] sm:$0xff] }
0x1345   : > { %v4730_v0 = vpop.f32.mrf.mxu0 }
0x1346   : > { %v4734_v43 = vmul.f32 0.088388346, %v4730_v0 }
0x1347   : > { %v9640_v4 = vpop.f32.mrf.mxu0 }
0x1348   : > { %v4742_v5 = vsel %vm4741_vm14, %v4734_v43, -1e+09 }
0x1349   : > { %v4744_v17 = vsel %vm4743_vm15, %v4742_v5, -inf }
0x134a   : > { %4745 = vmax.xlane.f32.xlu1 %v4744_v17 }
0x13d3   : > { %v4746_v6 = vpop.xlane.xlu1 %4745 }
0x13d4   : > { %v4747_v7 = vsub.f32 %v4742_v5, %v4746_v6 }
0x13d6   : > { %v4748_v8 = vmul.f32 1.442695, %v4747_v7 }
0x13d8   : > { %10220 = vpow2.f32 %v4748_v8 }
0x13e5   : > { %v10221_v14 = vpop.eup %10220 }
0x13e6   : > { %v4750_v9 = vsel %vm4743_vm15, %v10221_v14, 0.0 }
0x13e7   : > { %4751 = vadd.xlane.f32.xlu0 %v4750_v9 }
0x1470   : > { %v4752_v26 = vpop.xlane.xlu0 %4751 }
0x1471   : > { %10222 = vrcp.f32 %v4752_v26  ;;  %v4391_v26 = vld [vmem:[%s12640_s8 + $0x68] sm:$0xff] }
0x147e   : > { %v10223_v59 = vpop.eup %10222 }
0x147f   : > { %v4755_v34 = vmul.f32 %v10223_v59, %v10221_v14  ;;  %v4390_v59 = vld [vmem:[%s12640_s8 + $0x60] sm:$0xff] }
0x1481   : > { %9644 = vmatmul.mubr.msk.f32.vlgmr.msra.gmra.mxu0 %vm4756_vm2, %v4755_v34  ;;  %v4389_v34 = vld [vmem:[%s12640_s8 + $0x58] sm:$0xff] }
0x1482   : > { %5061 = vmatprep.mubr.f32.mxu0 %v10388_v2  ;;  %4998 = vmatpush1.msra.mxu0 %v4408_v57  ;;  %v4424_v57 = vld [vmem:[%s12641_s6 + $0x68] sm:$0xff] }
0x1483   : > { %4999 = vmatprep.subr.mxu0 %v4407_v46  ;;  %v4439_v46 = vld [vmem:[%s12641_s6 + $0xe0] sm:$0xff] }
0x1484   : > { %5000 = vmatpush1.msra.mxu0 %v4406_v11  ;;  %v4417_v11 = vld [vmem:[%s12641_s6 + $0x30] sm:$0xff] }
0x1485   : > { %5001 = vmatprep.subr.mxu0 %v4405_v13  ;;  %v4432_v13 = vld [vmem:[%s12641_s6 + $0xa8] sm:$0xff] }
0x1486   : > { %5002 = vmatpush1.msra.mxu0 %v4404_v16  ;;  %v4416_v16 = vld [vmem:[%s12641_s6 + $0x28] sm:$0xff] }
0x1487   : > { %5003 = vmatprep.subr.mxu0 %v4403_v19  ;;  %v4431_v19 = vld [vmem:[%s12641_s6 + $0xa0] sm:$0xff] }
0x1488   : > { %5004 = vmatpush1.msra.mxu0 %v4402_v20  ;;  %v4415_v20 = vld [vmem:[%s12641_s6 + $0x20] sm:$0xff] }
0x1489   : > { %5005 = vmatprep.subr.mxu0 %v4401_v22  ;;  %v4430_v22 = vld [vmem:[%s12641_s6 + $0x98] sm:$0xff] }
0x148a   : > { %5006 = vmatpush1.msra.mxu0 %v4400_v23 }
0x148b   : > { %5007 = vmatprep.subr.mxu0 %v4399_v24 }
0x148c   : > { %5008 = vmatpush1.msra.mxu0 %v4398_v27 }
0x148d   : > { %5009 = vmatprep.subr.mxu0 %v4397_v10 }
0x148e   : > { %5010 = vmatpush1.msra.mxu0 %v4396_v53 }
0x148f   : > { %5011 = vmatprep.subr.mxu0 %v4395_v30 }
0x1490   : > { %5012 = vmatpush1.msra.mxu0 %v4394_v31 }
0x1491   : > { %5013 = vmatprep.subr.mxu0 %v4393_v32  ;;  %v8307_v32 = vld [vmem:[%s12642_s3] ss:$0 sm:$0xff]  ;;  %s12646_s3 = sld [smem:[#allocation26_spill]] }
0x1492   : > { %5014 = vmatpush1.msra.mxu0 %v4392_v56 }
0x1493   : > { %5015 = vmatprep.subr.mxu0 %v4391_v26 }
0x1494   : > { %5016 = vmatpush1.msra.mxu0 %v4390_v59 }
0x1495   : > { %5017 = vmatprep.subr.mxu0 %v4389_v34 }
0x1496   : > { %5018 = vmatpush1.msra.mxu0 %v4388_v36 }
0x1541   : > { %v4830_v39 = vpop.f32.mrf.mxu0 }
0x1542   : > { %9679 = vmatmul.mubr.f32.vlgmr.msra.gmra.mxu1 %v4830_v39  ;;  %v4387_v39 = vld [vmem:[%s12640_s8 + $0x48] sm:$0xff] }
0x1543   : > { %v9645_v40 = vpop.f32.mrf.mxu0  ;;  %5019 = vmatprep.subr.mxu0 %v4387_v39  ;;  %v8308_v39 = vld [vmem:[%s12643_s5] ss:$0 sm:$0xff]  ;;  %s12645_s5 = sld [smem:[#allocation33_spill]] }
0x1544   : > { %v4386_v40 = vld [vmem:[%s12640_s8 + $0x40] sm:$0xff] }
0x1545   : > { %5020 = vmatpush1.msra.mxu0 %v4386_v40 }
0x1602   : > { %v4900_v61 = vpop.f32.mrf.mxu1 }
0x1603   : > { %v4905_v45 = vrot.slane %v4900_v61, 1  ;;  %v4906_v1 = vrot.slane %v4900_v61, 2  ;;  %v4910_v51 = vadd.f32 %v4900_v61, %v11532_v29  ;;  %v4385_v61 = vld [vmem:[%s12640_s8 + $0x38] sm:$0xff] }
0x1604   : > { %v9680_v47 = vpop.f32.mrf.mxu1  ;;  %5021 = vmatprep.subr.mxu0 %v4385_v61 }
0x1605   : > { %v4911_v48 = vadd.f32 %v4905_v45, %v11529_v28  ;;  %v4912_v58 = vadd.f32 %v4906_v1, %v11534_v12  ;;  %v4384_v45 = vld [vmem:[%s12640_s8 + $0x30] sm:$0xff]  ;;  %v4383_v1 = vld [vmem:[%s12640_s8 + $0x28] sm:$0xff]  ;;  %v4382_v47 = vld [vmem:[%s12640_s8 + $0x20] sm:$0xff] }
0x1606   : > { %5022 = vmatpush1.msra.mxu0 %v4384_v45 }
0x1607   : > { %v4916_v44 = vrot.slane %v4911_v48, 7  ;;  %v4918_v49 = vrot.slane %v4912_v58, 6  ;;  %5023 = vmatprep.subr.mxu0 %v4383_v1 }
0x1608   : > { %5024 = vmatpush1.msra.mxu0 %v4382_v47 }
0x1609   : > { %v4917_v54 = vsel %vm4449_vm10, %v4916_v44, %v4910_v51  ;;  %v4378_v44 = vld [vmem:[%s12640_s8] sm:$0xff] }
0x160a   : > { %v4919_v35 = vsel %vm4451_vm11, %v4918_v49, %v4917_v54  ;;  %v4442_v49 = vld [vmem:[%s12641_s6 + $0xf8] sm:$0xff] }
0x160b   : > { %v4921_v38 = vsel %vm4760_vm12, %v4919_v35, 0.0  ;;  %v4426_v54 = vld [vmem:[%s12641_s6 + $0x78] sm:$0xff]  ;;  %v4441_v35 = vld [vmem:[%s12641_s6 + $0xf0] sm:$0xff]  ;;  %8825 = vmatprep.subr.mxu1 %v4442_v49 }
0x160c   : > { %4922 = vadd.xlane.f32.xlu1 %v4921_v38  ;;  %v4425_v38 = vld [vmem:[%s12641_s6 + $0x70] sm:$0xff]  ;;  %8826 = vmatpush3.msra.mxu1 %v4426_v54 }
0x160d   : > { %8827 = vmatprep.subr.mxu1 %v4441_v35 }
0x160e   : > { %8828 = vmatpush3.msra.mxu1 %v4425_v38 }
0x160f   : > { %8829 = vmatprep.subr.mxu1 %v4440_v42 }
0x1610   : > { %8830 = vmatpush3.msra.mxu1 %v4424_v57 }
0x1611   : > { %8831 = vmatprep.subr.mxu1 %v4439_v46 }
0x1695   : > { %v4923_v28 = vpop.xlane.xlu1 %4922 }
0x1696   : > { %v4924_v12 = vmul.f32 0.0078125, %v4923_v28  ;;  %v4423_v28 = vld [vmem:[%s12641_s6 + $0x60] sm:$0xff] }
0x1697   : > { %8832 = vmatpush3.msra.mxu1 %v4423_v28 }
0x1698   : > { %v4926_v60 = vrot.slane %v4924_v12, 1  ;;  %v4927_v29 = vrot.slane %v4924_v12, 2  ;;  %v11628_v62 = vsub.f32 %v4910_v51, %v4924_v12  ;;  %v4379_v51 = vld [vmem:[%s12640_s8 + $0x8] sm:$0xff]  ;;  %v4438_v12 = vld [vmem:[%s12641_s6 + $0xd8] sm:$0xff] }
0x1699   : > { %8833 = vmatprep.subr.mxu1 %v4438_v12 }
0x169a   : > { %v11630_v0 = vsub.f32 %v4911_v48, %v4926_v60  ;;  %v11632_v43 = vsub.f32 %v4912_v58, %v4927_v29  ;;  %v4934_v17 = vmul.f32 %v11628_v62, %v11628_v62  ;;  %v4381_v48 = vld [vmem:[%s12640_s8 + $0x18] sm:$0xff]  ;;  %v4380_v58 = vld [vmem:[%s12640_s8 + $0x10] sm:$0xff]  ;;  %s12644_s8 = sld [smem:[#allocation31_spill]] }
0x169b   : > { %5025 = vmatprep.subr.mxu0 %v4381_v48  ;;  %v4422_v60 = vld [vmem:[%s12641_s6 + $0x58] sm:$0xff]  ;;  %v4437_v29 = vld [vmem:[%s12641_s6 + $0xd0] sm:$0xff] }
0x169c   : > { %v4935_v4 = vmul.f32 %v11630_v0, %v11630_v0  ;;  %v4936_v5 = vmul.f32 %v11632_v43, %v11632_v43  ;;  %5026 = vmatpush1.msra.mxu0 %v4380_v58  ;;  %8834 = vmatpush3.msra.mxu1 %v4422_v60 }
0x169d   : > { %5027 = vmatprep.subr.mxu0 %v4379_v51  ;;  %8835 = vmatprep.subr.mxu1 %v4437_v29 }
0x169e   : > { %v4940_v6 = vrot.slane %v4935_v4, 7  ;;  %v4942_v7 = vrot.slane %v4936_v5, 6  ;;  %5028 = vmatpush1.msra.mxu0 %v4378_v44  ;;  %v4421_v4 = vld [vmem:[%s12641_s6 + $0x50] sm:$0xff]  ;;  %v4436_v5 = vld [vmem:[%s12641_s6 + $0xc8] sm:$0xff] }
0x169f   : > { %9681 = vmatprep.subr.mxu0 %v10388_v2  ;;  %8836 = vmatpush3.msra.mxu1 %v4421_v4  ;;  %v5290_v4 = vld [vmem:[%s12645_s5 + $0x78] sm:$0xff] }
0x16a0   : > { %v4941_v8 = vsel %vm4449_vm10, %v4940_v6, %v4934_v17  ;;  %v4420_v17 = vld [vmem:[%s12641_s6 + $0x48] sm:$0xff]  ;;  %v4435_v6 = vld [vmem:[%s12641_s6 + $0xc0] sm:$0xff]  ;;  %8837 = vmatprep.subr.mxu1 %v4436_v5  ;;  %v5257_v48 = vld [vmem:[%s12644_s8 + $0x70] sm:$0xff] }
0x16a1   : > { %v4943_v14 = vsel %vm4451_vm11, %v4942_v7, %v4941_v8  ;;  %v4419_v7 = vld [vmem:[%s12641_s6 + $0x40] sm:$0xff]  ;;  %8838 = vmatpush3.msra.mxu1 %v4420_v17  ;;  %v4434_v8 = vld [vmem:[%s12641_s6 + $0xb8] sm:$0xff]  ;;  %v5256_v58 = vld [vmem:[%s12644_s8 + $0x68] sm:$0xff] }
0x16a2   : > { %v4945_v9 = vsel %vm4760_vm12, %v4943_v14, 0.0  ;;  %8839 = vmatprep.subr.mxu1 %v4435_v6  ;;  %v4418_v14 = vld [vmem:[%s12641_s6 + $0x38] sm:$0xff]  ;;  %v5255_v51 = vld [vmem:[%s12644_s8 + $0x60] sm:$0xff]  ;;  %v5253_v49 = vld [vmem:[%s12644_s8 + $0x50] sm:$0xff] }
0x16a3   : > { %4946 = vadd.xlane.f32.xlu1 %v4945_v9  ;;  %8840 = vmatpush3.msra.mxu1 %v4419_v7  ;;  %v4433_v9 = vld [vmem:[%s12641_s6 + $0xb0] sm:$0xff]  ;;  %v5254_v44 = vld [vmem:[%s12644_s8 + $0x58] sm:$0xff]  ;;  %v5252_v54 = vld [vmem:[%s12644_s8 + $0x48] sm:$0xff] }
0x16a4   : > { %8841 = vmatprep.subr.mxu1 %v4434_v8  ;;  %v5251_v35 = vld [vmem:[%s12644_s8 + $0x40] sm:$0xff]  ;;  %v5250_v38 = vld [vmem:[%s12644_s8 + $0x38] sm:$0xff]  ;;  %v5249_v42 = vld [vmem:[%s12644_s8 + $0x30] sm:$0xff] }
0x16a5   : > { %8842 = vmatpush3.msra.mxu1 %v4418_v14  ;;  %v5248_v57 = vld [vmem:[%s12644_s8 + $0x28] sm:$0xff]  ;;  %v5247_v46 = vld [vmem:[%s12644_s8 + $0x20] sm:$0xff]  ;;  %v5246_v28 = vld [vmem:[%s12644_s8 + $0x18] sm:$0xff] }
0x16a6   : > { %8843 = vmatprep.subr.mxu1 %v4433_v9  ;;  %v5245_v12 = vld [vmem:[%s12644_s8 + $0x10] sm:$0xff]  ;;  %v5244_v60 = vld [vmem:[%s12644_s8 + $0x8] sm:$0xff]  ;;  %v5243_v29 = vld [vmem:[%s12644_s8] sm:$0xff] }
0x16a7   : > { %8844 = vmatpush3.msra.mxu1 %v4417_v11  ;;  %v5289_v5 = vld [vmem:[%s12645_s5 + $0x70] sm:$0xff]  ;;  %v5288_v17 = vld [vmem:[%s12645_s5 + $0x68] sm:$0xff]  ;;  %v5287_v6 = vld [vmem:[%s12645_s5 + $0x60] sm:$0xff] }
0x16a8   : > { %8845 = vmatprep.subr.mxu1 %v4432_v13  ;;  %v5286_v7 = vld [vmem:[%s12645_s5 + $0x58] sm:$0xff]  ;;  %v5285_v8 = vld [vmem:[%s12645_s5 + $0x50] sm:$0xff]  ;;  %v5284_v14 = vld [vmem:[%s12645_s5 + $0x48] sm:$0xff] }
0x16a9   : > { %8846 = vmatpush3.msra.mxu1 %v4416_v16  ;;  %v5283_v9 = vld [vmem:[%s12645_s5 + $0x40] sm:$0xff]  ;;  %v5282_v11 = vld [vmem:[%s12645_s5 + $0x38] sm:$0xff]  ;;  %v5281_v13 = vld [vmem:[%s12645_s5 + $0x30] sm:$0xff] }
0x16aa   : > { %8847 = vmatprep.subr.mxu1 %v4431_v19  ;;  %v5280_v16 = vld [vmem:[%s12645_s5 + $0x28] sm:$0xff]  ;;  %v5279_v19 = vld [vmem:[%s12645_s5 + $0x20] sm:$0xff] }
0x16ab   : > { %8848 = vmatpush3.msra.mxu1 %v4415_v20  ;;  %v5278_v20 = vld [vmem:[%s12645_s5 + $0x18] sm:$0xff] }
0x16ac   : > { %8849 = vmatprep.subr.mxu1 %v4430_v22  ;;  %v5277_v22 = vld [vmem:[%s12645_s5 + $0x10] sm:$0xff] }
0x172c   : > { %v4947_v23 = vpop.xlane.xlu1 %4946 }
0x172d   : > { %v4948_v24 = vmul.f32 0.0078125, %v4947_v23  ;;  %v5276_v23 = vld [vmem:[%s12645_s5 + $0x8] sm:$0xff] }
0x172f   : > { %v4949_v27 = vadd.f32 1e-05, %v4948_v24  ;;  %v5275_v24 = vld [vmem:[%s12645_s5] sm:$0xff] }
0x1731   : > { %10224 = vrsqrt.f32 %v4949_v27  ;;  %v4414_v27 = vld [vmem:[%s12641_s6 + $0x18] sm:$0xff] }
0x1732   : > { %8850 = vmatpush3.msra.mxu1 %v4414_v27 }
0x173e   : > { %v10225_v10 = vpop.eup %10224 }
0x173f   : > { %v4952_v53 = vrot.slane %v10225_v10, 1  ;;  %v4953_v30 = vrot.slane %v10225_v10, 2  ;;  %v4957_v31 = vmul.f32 %v10225_v10, %v11628_v62  ;;  %v4429_v10 = vld [vmem:[%s12641_s6 + $0x90] sm:$0xff] }
0x1740   : > { %8851 = vmatprep.subr.mxu1 %v4429_v10 }
0x1741   : > { %v4958_v56 = vmul.f32 %v4952_v53, %v11630_v0  ;;  %v4959_v26 = vmul.f32 %v4953_v30, %v11632_v43  ;;  %v4966_v59 = vmul.f32 %v8307_v32, %v4957_v31  ;;  %v5258_v43 = vld [vmem:[%s12644_s8 + $0x78] sm:$0xff]  ;;  %v4413_v53 = vld [vmem:[%s12641_s6 + $0x10] sm:$0xff]  ;;  %v4428_v30 = vld [vmem:[%s12641_s6 + $0x88] sm:$0xff] }
0x1742   : > { %8852 = vmatpush3.msra.mxu1 %v4413_v53  ;;  %v4412_v31 = vld [vmem:[%s12641_s6 + $0x8] sm:$0xff] }
0x1743   : > { %v4967_v34 = vmul.f32 %v8307_v32, %v4958_v56  ;;  %v4968_v36 = vmul.f32 %v8307_v32, %v4959_v26  ;;  %v11707_v45 = vadd.f32 %v8308_v39, %v4966_v59  ;;  %8853 = vmatprep.subr.mxu1 %v4428_v30  ;;  %v4427_v32 = vld [vmem:[%s12641_s6 + $0x80] sm:$0xff] }
0x1744   : > { %8854 = vmatpush3.msra.mxu1 %v4412_v31  ;;  %v4411_v56 = vld [vmem:[%s12641_s6] sm:$0xff]  ;;  %s12650_s6 = sshll.u32 %s10686_s2, 2  ;;  %s12652_s2 = sld [smem:[#allocation35_spill]] }
0x1745   : > { %v11703_v40 = vadd.f32 %v8308_v39, %v4967_v34  ;;  %v11705_v61 = vadd.f32 %v8308_v39, %v4968_v36  ;;  %8855 = vmatprep.subr.mxu1 %v4427_v32  ;;  %v4410_v26 = vld [vmem:[%s12646_s3] sm:$0x3]  ;;  %s12648_s3 = sld [smem:[#allocation28_spill]] }
0x1746   : > { %8856 = vmatpush3.msra.mxu1 %v4411_v56  ;;  %v4982_v59 = vrot.slane %v4410_v26, %v10857_v18  ;;  %v4986_v34 = vrot.slane %v4410_v26, %v11072_v55 }
0x1747   : > { %v4992_v62 = vrot.slane %v11703_v40, 7  ;;  %v4994_v1 = vrot.slane %v11705_v61, 6  ;;  %9722 = vmatprep.subr.mxu1 %v10388_v2 }
0x1749   : > { %v4993_v0 = vsel %vm4449_vm10, %v4992_v62, %v11707_v45 }
0x174a   : > { %v4995_v47 = vsel %vm4451_vm11, %v4994_v1, %v4993_v0 }
0x174b   : > { %5062 = vmatmul.mubr.f32.vlgmr.msra.gmra.mxu0 %v4995_v47  ;;  %v5274_v47 = vld [vmem:[%s12647_s9 + $0x78] sm:$0xff] }
0x174c   : > { %9682 = vmatpush3.msra.mxu0 %v5258_v43  ;;  %9713 = vmatprep.mubr.msk.f32.mxu0 %vm10389_vm0, %v10388_v2 }
0x174d   : > { %9683 = vmatprep.subr.mxu0 %v10388_v2 }
0x174e   : > { %9684 = vmatpush3.msra.mxu0 %v5257_v48  ;;  %v5273_v48 = vld [vmem:[%s12647_s9 + $0x70] sm:$0xff] }
0x174f   : > { %9685 = vmatprep.subr.mxu0 %v10388_v2 }
0x1750   : > { %9686 = vmatpush3.msra.mxu0 %v5256_v58  ;;  %v5272_v58 = vld [vmem:[%s12647_s9 + $0x68] sm:$0xff] }
0x1751   : > { %9687 = vmatprep.subr.mxu0 %v10388_v2 }
0x1752   : > { %9688 = vmatpush3.msra.mxu0 %v5255_v51  ;;  %v5271_v51 = vld [vmem:[%s12647_s9 + $0x60] sm:$0xff] }
0x1753   : > { %9689 = vmatprep.subr.mxu0 %v10388_v2 }
0x1754   : > { %9690 = vmatpush3.msra.mxu0 %v5254_v44  ;;  %v5270_v44 = vld [vmem:[%s12647_s9 + $0x58] sm:$0xff] }
0x1755   : > { %9691 = vmatprep.subr.mxu0 %v10388_v2 }
0x1756   : > { %9692 = vmatpush3.msra.mxu0 %v5253_v49  ;;  %v5269_v49 = vld [vmem:[%s12647_s9 + $0x50] sm:$0xff] }
0x1757   : > { %9693 = vmatprep.subr.mxu0 %v10388_v2 }
0x1758   : > { %9694 = vmatpush3.msra.mxu0 %v5252_v54  ;;  %v5268_v54 = vld [vmem:[%s12647_s9 + $0x48] sm:$0xff] }
0x1759   : > { %9695 = vmatprep.subr.mxu0 %v10388_v2 }
0x175a   : > { %9696 = vmatpush3.msra.mxu0 %v5251_v35  ;;  %v5267_v35 = vld [vmem:[%s12647_s9 + $0x40] sm:$0xff] }
0x175b   : > { %9697 = vmatprep.subr.mxu0 %v10388_v2 }
0x175c   : > { %9698 = vmatpush3.msra.mxu0 %v5250_v38  ;;  %v5266_v38 = vld [vmem:[%s12647_s9 + $0x38] sm:$0xff] }
0x175d   : > { %9699 = vmatprep.subr.mxu0 %v10388_v2 }
0x175e   : > { %9700 = vmatpush3.msra.mxu0 %v5249_v42  ;;  %v5265_v42 = vld [vmem:[%s12647_s9 + $0x30] sm:$0xff] }
0x175f   : > { %9701 = vmatprep.subr.mxu0 %v10388_v2 }
0x1760   : > { %9702 = vmatpush3.msra.mxu0 %v5248_v57  ;;  %v5264_v57 = vld [vmem:[%s12647_s9 + $0x28] sm:$0xff] }
0x1761   : > { %9703 = vmatprep.subr.mxu0 %v10388_v2 }
0x1762   : > { %9704 = vmatpush3.msra.mxu0 %v5247_v46  ;;  %v5263_v46 = vld [vmem:[%s12647_s9 + $0x20] sm:$0xff] }
0x1763   : > { %9705 = vmatprep.subr.mxu0 %v10388_v2 }
0x1764   : > { %9706 = vmatpush3.msra.mxu0 %v5246_v28  ;;  %v5262_v28 = vld [vmem:[%s12647_s9 + $0x18] sm:$0xff] }
0x1765   : > { %9707 = vmatprep.subr.mxu0 %v10388_v2 }
0x1766   : > { %9708 = vmatpush3.msra.mxu0 %v5245_v12 }
0x1767   : > { %9709 = vmatprep.subr.mxu0 %v10388_v2 }
0x1768   : > { %9710 = vmatpush3.msra.mxu0 %v5244_v60  ;;  %v5261_v60 = vld [vmem:[%s12647_s9 + $0x10] sm:$0xff] }
0x1769   : > { %9711 = vmatprep.subr.mxu0 %v10388_v2 }
0x176a   : > { %9712 = vmatpush3.msra.mxu0 %v5243_v29 }
0x176b   : > { %9714 = vmatmul.mubr.f32.vlgmr.msra.gmra.mxu0 %v11508_v50  ;;  %9763 = vmatprep.subr.mxu0 %v10388_v2 }
0x176c   : > { %9764 = vmatpush3.msra.mxu0 %v5290_v4  ;;  %9716 = vmatprep.mubr.msk.f32.mxu0 %vm10389_vm0, %v10388_v2  ;;  %v5260_v4 = vld [vmem:[%s12647_s9 + $0x8] sm:$0xff] }
0x176d   : > { %9765 = vmatprep.subr.mxu0 %v10388_v2 }
0x176e   : > { %9766 = vmatpush3.msra.mxu0 %v5289_v5 }
0x176f   : > { %9717 = vmatmul.mubr.f32.gmra.mxu0 %v11516_v37  ;;  %9767 = vmatprep.subr.mxu0 %v10388_v2 }
0x1770   : > { %9768 = vmatpush3.msra.mxu0 %v5288_v17  ;;  %9719 = vmatprep.mubr.msk.f32.mxu0 %vm10389_vm0, %v10388_v2  ;;  %v5259_v17 = vld [vmem:[%s12647_s9] sm:$0xff] }
0x1771   : > { %9769 = vmatprep.subr.mxu0 %v10388_v2 }
0x1772   : > { %9770 = vmatpush3.msra.mxu0 %v5287_v6 }
0x1773   : > { %9720 = vmatmul.mubr.f32.gmra.mxu0 %v11523_v3  ;;  %9771 = vmatprep.subr.mxu0 %v10388_v2 }
0x1774   : > { %9772 = vmatpush3.msra.mxu0 %v5286_v7  ;;  %9795 = vmatprep.mubr.msk.f32.mxu0 %vm10389_vm0, %v10388_v2 }
0x1775   : > { %9773 = vmatprep.subr.mxu0 %v10388_v2 }
0x1776   : > { %9774 = vmatpush3.msra.mxu0 %v5285_v8 }
0x1777   : > { %9775 = vmatprep.subr.mxu0 %v10388_v2 }
0x1778   : > { %9776 = vmatpush3.msra.mxu0 %v5284_v14 }
0x1779   : > { %9777 = vmatprep.subr.mxu0 %v10388_v2 }
0x177a   : > { %9778 = vmatpush3.msra.mxu0 %v5283_v9 }
0x177b   : > { %9779 = vmatprep.subr.mxu0 %v10388_v2 }
0x177c   : > { %9780 = vmatpush3.msra.mxu0 %v5282_v11 }
0x177d   : > { %9781 = vmatprep.subr.mxu0 %v10388_v2 }
0x177e   : > { %9782 = vmatpush3.msra.mxu0 %v5281_v13 }
0x177f   : > { %9783 = vmatprep.subr.mxu0 %v10388_v2 }
0x1780   : > { %9784 = vmatpush3.msra.mxu0 %v5280_v16 }
0x1781   : > { %9785 = vmatprep.subr.mxu0 %v10388_v2 }
0x1782   : > { %9786 = vmatpush3.msra.mxu0 %v5279_v19 }
0x1783   : > { %9787 = vmatprep.subr.mxu0 %v10388_v2 }
0x1784   : > { %9788 = vmatpush3.msra.mxu0 %v5278_v20 }
0x1785   : > { %9789 = vmatprep.subr.mxu0 %v10388_v2 }
0x1786   : > { %9790 = vmatpush3.msra.mxu0 %v5277_v22 }
0x1787   : > { %9791 = vmatprep.subr.mxu0 %v10388_v2 }
0x1788   : > { %9792 = vmatpush3.msra.mxu0 %v5276_v23 }
0x1789   : > { %9793 = vmatprep.subr.mxu0 %v10388_v2 }
0x178a   : > { %9794 = vmatpush3.msra.mxu0 %v5275_v24 }
0x178b   : > { %9796 = vmatmul.mubr.f32.vlgmr.msra.gmra.mxu0 %v11508_v50  ;;  %9809 = vmatprep.subr.mxu0 %v10388_v2 }
0x178c   : > { %9798 = vmatprep.mubr.msk.f32.mxu0 %vm10389_vm0, %v10388_v2 }
0x178f   : > { %9799 = vmatmul.mubr.f32.gmra.mxu0 %v11516_v37 }
0x1790   : > { %9801 = vmatprep.mubr.msk.f32.mxu0 %vm10389_vm0, %v10388_v2 }
0x1793   : > { %9802 = vmatmul.mubr.f32.gmra.mxu0 %v11523_v3 }
0x1794   : > { %9811 = vmatprep.mubr.msk.f32.mxu0 %vm10389_vm0, %v10388_v2 }
0x180b   : > { %v5063_v36 = vpop.f32.mrf.mxu0 }
0x180c   : > { %v5064_v39 = vadd.f32 %v5063_v36, %v4982_v59 }
0x180d   : > { %v5065_v62 = vpop.f32.mrf.mxu0 }
0x180e   : > { %v5066_v1 = vadd.f32 %v5065_v62, %v4986_v34  ;;  %v5068_v43 = vmax.f32 %v5064_v39, 0.0 }
0x1810   : > { %v5069_v0 = vmax.f32 %v5066_v1, 0.0 }
0x1812   : > { %5140 = vmatprep.mubr.f32.mxu1 %v5069_v0 }
0x1813   : > { %5141 = vmatmul.mubr.f32.vlgmr.msra.gmra.mxu1 %v5068_v43 }
0x1814   : > { %9723 = vmatpush3.msra.mxu1 %v5274_v47  ;;  %9754 = vmatprep.mubr.msk.f32.mxu1 %vm10389_vm0, %v10388_v2 }
0x1815   : > { %9724 = vmatprep.subr.mxu1 %v10388_v2 }
0x1816   : > { %9725 = vmatpush3.msra.mxu1 %v5273_v48 }
0x1817   : > { %9726 = vmatprep.subr.mxu1 %v10388_v2 }
0x1818   : > { %9727 = vmatpush3.msra.mxu1 %v5272_v58 }
0x1819   : > { %9728 = vmatprep.subr.mxu1 %v10388_v2 }
0x181a   : > { %9729 = vmatpush3.msra.mxu1 %v5271_v51 }
0x181b   : > { %9730 = vmatprep.subr.mxu1 %v10388_v2 }
0x181c   : > { %9731 = vmatpush3.msra.mxu1 %v5270_v44 }
0x181d   : > { %9732 = vmatprep.subr.mxu1 %v10388_v2 }
0x181e   : > { %9733 = vmatpush3.msra.mxu1 %v5269_v49 }
0x181f   : > { %9734 = vmatprep.subr.mxu1 %v10388_v2 }
0x1820   : > { %9735 = vmatpush3.msra.mxu1 %v5268_v54  ;;  %v8309_v54 = vld [vmem:[%s12648_s3] ss:$0 sm:$0xff]  ;;  %s12649_s3 = sld [smem:[#allocation10_spill]] }
0x1821   : > { %9736 = vmatprep.subr.mxu1 %v10388_v2 }
0x1822   : > { %9737 = vmatpush3.msra.mxu1 %v5267_v35 }
0x1823   : > { %9738 = vmatprep.subr.mxu1 %v10388_v2 }
0x1824   : > { %9739 = vmatpush3.msra.mxu1 %v5266_v38 }
0x1825   : > { %9740 = vmatprep.subr.mxu1 %v10388_v2 }
0x1826   : > { %9741 = vmatpush3.msra.mxu1 %v5265_v42  ;;  %s1433_s12 = scalar_lea.vmem %s12649_s3, %s12650_s6  ;;  %s12653_s6 = sld [smem:[#allocation29_spill]] }
0x1827   : > { %9742 = vmatprep.subr.mxu1 %v10388_v2  ;;  %s12654_s3 = sld [smem:[#allocation30_spill]] }
0x1828   : > { %9743 = vmatpush3.msra.mxu1 %v5264_v57 }
0x1829   : > { %9744 = vmatprep.subr.mxu1 %v10388_v2 }
0x182a   : > { %9745 = vmatpush3.msra.mxu1 %v5263_v46 }
0x182b   : > { %v5461_v12 = vpop.f32.mrf.mxu0  ;;  %9746 = vmatprep.subr.mxu1 %v10388_v2 }
0x182c   : > { %9747 = vmatpush3.msra.mxu1 %v5262_v28 }
0x182d   : > { %v9715_v29 = vpop.f32.mrf.mxu0  ;;  %9748 = vmatprep.subr.mxu1 %v10388_v2 }
0x182e   : > { %9749 = vmatpush3.msra.mxu1 %v5261_v60 }
0x182f   : > { %v5466_v5 = vpop.f32.mrf.mxu0  ;;  %9750 = vmatprep.subr.mxu1 %v10388_v2 }
0x1830   : > { %9751 = vmatpush3.msra.mxu1 %v5260_v4 }
0x1831   : > { %v9718_v6 = vpop.f32.mrf.mxu0  ;;  %9752 = vmatprep.subr.mxu1 %v10388_v2 }
0x1832   : > { %9753 = vmatpush3.msra.mxu1 %v5259_v17 }
0x1833   : > { %v5471_v7 = vpop.f32.mrf.mxu0  ;;  %9755 = vmatmul.mubr.f32.vlgmr.msra.gmra.mxu1 %v11508_v50  ;;  %9804 = vmatprep.subr.mxu1 %v10388_v2 }
0x1834   : > { %9757 = vmatprep.mubr.msk.f32.mxu1 %vm10389_vm0, %v10388_v2 }
0x1835   : > { %v9721_v8 = vpop.f32.mrf.mxu0 }
0x1837   : > { %9758 = vmatmul.mubr.f32.gmra.mxu1 %v11516_v37 }
0x1838   : > { %9760 = vmatprep.mubr.msk.f32.mxu1 %vm10389_vm0, %v10388_v2 }
0x183b   : > { %9761 = vmatmul.mubr.f32.gmra.mxu1 %v11523_v3 }
0x183c   : > { %9806 = vmatprep.mubr.msk.f32.mxu1 %vm10389_vm0, %v10388_v2 }
0x184b   : > { %v5621_v14 = vpop.f32.mrf.mxu0 }
0x184d   : > { %v9797_v9 = vpop.f32.mrf.mxu0 }
0x184f   : > { %v5626_v11 = vpop.f32.mrf.mxu0 }
0x1851   : > { %v9800_v13 = vpop.f32.mrf.mxu0 }
0x1853   : > { %v11852_v16 = vpop.f32.mrf.mxu0 }
0x1855   : > { %v9803_v19 = vpop.f32.mrf.mxu0 }
0x18d3   : > { %v8857_v20 = vpop.f32.mrf.mxu1 }
0x18d5   : > { %v8858_v22 = vpop.f32.mrf.mxu1 }
0x18d6   : > { %v8859_v23 = vadd.f32 %v8858_v22, %v8857_v20 }
0x18d8   : > { %v5143_v42 = vadd.f32 %v8859_v23, %v8309_v54 }
0x18da   : > { %v5148_v4 = vrot.slane %v5143_v42, 2  ;;  %v5152_v8 = vadd.f32 %v5143_v42, %v11707_v45  ;;  %v1445_v45 = vld [vmem:[%s1433_s12] sm:$0x7]  ;;  %s12651_s12 = sld [smem:[#allocation34_spill]] }
0x18dc   : > { %v5154_v17 = vadd.f32 %v5148_v4, %v11705_v61 }
0x18de   : > { %v5160_v9 = vrot.slane %v5154_v17, 6 }
0x18e0   : > { %v5305_v54 = vld [vmem:[%s12651_s12 + $0x70] sm:$0xff]  ;;  %v5295_v4 = vld [vmem:[%s12651_s12 + $0x20] sm:$0xff] }
0x18f3   : > { %v5541_v24 = vpop.f32.mrf.mxu1 }
0x18f4   : > { %9805 = vmatpush3.xpose.msra.mxu1 %v5541_v24 }
0x18f5   : > { %v9756_v27 = vpop.f32.mrf.mxu1  ;;  %9814 = vmatprep.subr.mxu1 %v10388_v2 }
0x18f7   : > { %v5546_v10 = vpop.f32.mrf.mxu1  ;;  %9807 = vmatmul.mubr.f32.vlgmr.msra.gmra.mxu1 %v5461_v12  ;;  %v5147_v12 = vrot.slane %v5143_v42, 1  ;;  %v5302_v42 = vld [vmem:[%s12651_s12 + $0x58] sm:$0xff] }
0x18f8   : > { %9810 = vmatpush3.xpose.msra.mxu0 %v5546_v10  ;;  %9816 = vmatprep.mubr.msk.f32.mxu1 %vm10389_vm0, %v10388_v2 }
0x18f9   : > { %v9759_v53 = vpop.f32.mrf.mxu1  ;;  %9819 = vmatprep.subr.mxu0 %v10388_v2 }
0x18fb   : > { %v5551_v30 = vpop.f32.mrf.mxu1  ;;  %9812 = vmatmul.mubr.f32.vlgmr.msra.gmra.mxu0 %v5466_v5  ;;  %v5153_v5 = vadd.f32 %v5147_v12, %v11703_v40  ;;  %v5298_v12 = vld [vmem:[%s12651_s12 + $0x38] sm:$0xff] }
0x18fc   : > { %9815 = vmatpush3.xpose.msra.mxu1 %v5551_v30  ;;  %9820 = vmatpush3.msra.mxu0 %v5621_v14 }
0x18fd   : > { %v9762_v31 = vpop.f32.mrf.mxu1  ;;  %9824 = vmatprep.subr.mxu1 %v10388_v2  ;;  %9821 = vmatprep.mubr.msk.f32.mxu0 %vm10389_vm0, %v10388_v2  ;;  %v5158_v6 = vrot.slane %v5153_v5, 7 }
0x18fe   : > { %9829 = vmatprep.subr.mxu0 %v10388_v2 }
0x18ff   : > { %9817 = vmatmul.mubr.f32.vlgmr.msra.gmra.mxu1 %v5471_v7 }
0x1900   : > { %9825 = vmatpush3.msra.mxu1 %v5626_v11  ;;  %9826 = vmatprep.mubr.msk.f32.mxu1 %vm10389_vm0, %v10388_v2  ;;  %v5159_v11 = vsel %vm4449_vm10, %v5158_v6, %v5152_v8  ;;  %v5292_v6 = vld [vmem:[%s12651_s12 + $0x8] sm:$0xff] }
0x1901   : > { %9834 = vmatprep.subr.mxu1 %v10388_v2  ;;  %v5161_v40 = vsel %vm4451_vm11, %v5160_v9, %v5159_v11  ;;  %v5320_v9 = vld [vmem:[%s12652_s2 + $0x68] sm:$0xff]  ;;  %v5319_v11 = vld [vmem:[%s12652_s2 + $0x60] sm:$0xff] }
0x1902   : > { %v5163_v22 = vsel %vm4760_vm12, %v5161_v40, 0.0  ;;  %v5316_v40 = vld [vmem:[%s12652_s2 + $0x48] sm:$0xff] }
0x19b7   : > { %v5701_v32 = vpop.f32.mrf.mxu1 }
0x19b8   : > { %v5845_v56 = vmul.f32 0.088388346, %v5701_v32 }
0x19b9   : > { %v9808_v26 = vpop.f32.mrf.mxu1 }
0x19ba   : > { %v5848_v59 = vsel %vm10864_vm5, %v5845_v56, -1e+09 }
0x19bb   : > { %v5771_v34 = vpop.f32.mrf.mxu0  ;;  %v5851_v36 = vsel %vm1447_vm1, %v5848_v59, -inf }
0x19bc   : > { %v5846_v39 = vmul.f32 0.088388346, %v5771_v34  ;;  %5852 = vmax.xlane.f32.xlu1 %v5851_v36 }
0x19bd   : > { %v9813_v62 = vpop.f32.mrf.mxu0 }
0x19be   : > { %v5849_v1 = vsel %vm10873_vm6, %v5846_v39, -1e+09 }
0x19bf   : > { %v5841_v0 = vpop.f32.mrf.mxu1  ;;  %v5854_v43 = vsel %vm1447_vm1, %v5849_v1, -inf }
0x19c0   : > { %v5847_v47 = vmul.f32 0.088388346, %v5841_v0  ;;  %5855 = vmax.xlane.f32.xlu1 %v5854_v43 }
0x19c1   : > { %v9818_v48 = vpop.f32.mrf.mxu1 }
0x19c2   : > { %v5850_v58 = vsel %vm10881_vm7, %v5847_v47, -1e+09 }
0x19c3   : > { %v5857_v51 = vsel %vm1447_vm1, %v5850_v58, -inf }
0x19c4   : > { %5858 = vmax.xlane.f32.xlu1 %v5857_v51 }
0x1a45   : > { %v5853_v44 = vpop.xlane.xlu1 %5852 }
0x1a46   : > { %v5860_v49 = vsub.f32 %v5848_v59, %v5853_v44 }
0x1a48   : > { %v5863_v35 = vmul.f32 1.442695, %v5860_v49  ;;  %v5306_v49 = vld [vmem:[%s12651_s12 + $0x78] sm:$0xff] }
0x1a49   : > { %v5856_v38 = vpop.xlane.xlu1 %5855 }
0x1a4a   : > { %10226 = vpow2.f32 %v5863_v35  ;;  %v5861_v57 = vsub.f32 %v5849_v1, %v5856_v38  ;;  %v5304_v35 = vld [vmem:[%s12651_s12 + $0x68] sm:$0xff]  ;;  %v5303_v38 = vld [vmem:[%s12651_s12 + $0x60] sm:$0xff] }
0x1a4c   : > { %v5865_v46 = vmul.f32 1.442695, %v5861_v57  ;;  %v5301_v57 = vld [vmem:[%s12651_s12 + $0x50] sm:$0xff] }
0x1a4d   : > { %v5859_v28 = vpop.xlane.xlu1 %5858 }
0x1a4e   : > { %10228 = vpow2.f32 %v5865_v46  ;;  %v5862_v60 = vsub.f32 %v5850_v58, %v5859_v28  ;;  %v5300_v46 = vld [vmem:[%s12651_s12 + $0x48] sm:$0xff]  ;;  %v5299_v28 = vld [vmem:[%s12651_s12 + $0x40] sm:$0xff] }
0x1a50   : > { %v5867_v29 = vmul.f32 1.442695, %v5862_v60  ;;  %v5297_v60 = vld [vmem:[%s12651_s12 + $0x30] sm:$0xff] }
0x1a52   : > { %10230 = vpow2.f32 %v5867_v29  ;;  %v5296_v29 = vld [vmem:[%s12651_s12 + $0x28] sm:$0xff] }
0x1a57   : > { %v10227_v7 = vpop.eup %10226 }
0x1a58   : > { %v5869_v14 = vsel %vm1447_vm1, %v10227_v7, 0.0 }
0x1a59   : > { %5870 = vadd.xlane.f32.xlu1 %v5869_v14  ;;  %v5321_v14 = vld [vmem:[%s12652_s2 + $0x70] sm:$0xff] }
0x1a5b   : > { %v10229_v13 = vpop.eup %10228 }
0x1a5c   : > { %v5872_v19 = vsel %vm1447_vm1, %v10229_v13, 0.0 }
0x1a5d   : > { %5873 = vadd.xlane.f32.xlu0 %v5872_v19  ;;  %v5317_v19 = vld [vmem:[%s12652_s2 + $0x50] sm:$0xff] }
0x1a5f   : > { %v10231_v20 = vpop.eup %10230 }
0x1a60   : > { %v5875_v61 = vsel %vm1447_vm1, %v10231_v20, 0.0 }
0x1a61   : > { %5876 = vadd.xlane.f32.xlu1 %v5875_v61  ;;  %5164 = vadd.xlane.f32.xlu0 %v5163_v22  ;;  %v5314_v61 = vld [vmem:[%s12652_s2 + $0x38] sm:$0xff]  ;;  %v5313_v22 = vld [vmem:[%s12652_s2 + $0x30] sm:$0xff] }
0x1a77   : > { %5222 = vperm.xlu0 %10165, %v1445_v45   ;;  %v5312_v45 = vld [vmem:[%s12652_s2 + $0x28] sm:$0xff] }
0x1ae2   : > { %v5871_v23 = vpop.xlane.xlu1 %5870 }
0x1ae3   : > { %10232 = vrcp.f32 %v5871_v23  ;;  %v5311_v23 = vld [vmem:[%s12652_s2 + $0x20] sm:$0xff] }
0x1ae6   : > { %v5874_v24 = vpop.xlane.xlu0 %5873 }
0x1ae7   : > { %10234 = vrcp.f32 %v5874_v24  ;;  %v5310_v24 = vld [vmem:[%s12652_s2 + $0x18] sm:$0xff] }
0x1aea   : > { %v5877_v27 = vpop.xlane.xlu1 %5876  ;;  %v5165_v10 = vpop.xlane.xlu0 %5164 }
0x1aeb   : > { %10236 = vrcp.f32 %v5877_v27  ;;  %v5166_v53 = vmul.f32 0.0078125, %v5165_v10  ;;  %v5309_v27 = vld [vmem:[%s12652_s2 + $0x10] sm:$0xff]  ;;  %v5308_v10 = vld [vmem:[%s12652_s2 + $0x8] sm:$0xff] }
0x1aed   : > { %v5168_v30 = vrot.slane %v5166_v53, 1  ;;  %v5169_v31 = vrot.slane %v5166_v53, 2  ;;  %v11887_v32 = vsub.f32 %v5152_v8, %v5166_v53  ;;  %v5322_v8 = vld [vmem:[%s12652_s2 + $0x78] sm:$0xff]  ;;  %v5307_v53 = vld [vmem:[%s12652_s2] sm:$0xff] }
0x1aef   : > { %v11889_v56 = vsub.f32 %v5153_v5, %v5168_v30  ;;  %v11891_v26 = vsub.f32 %v5154_v17, %v5169_v31  ;;  %v5176_v62 = vmul.f32 %v11887_v32, %v11887_v32  ;;  %v5294_v5 = vld [vmem:[%s12651_s12 + $0x18] sm:$0xff]  ;;  %v5293_v17 = vld [vmem:[%s12651_s12 + $0x10] sm:$0xff]  ;;  %v5324_v30 = vld [vmem:[%s12652_s2 + $0x88] sm:$0xff] }
0x1af0   : > { %v10233_v59 = vpop.eup %10232 }
0x1af1   : > { %v5884_v34 = vmul.f32 %v10233_v59, %v10227_v7  ;;  %v5177_v36 = vmul.f32 %v11889_v56, %v11889_v56  ;;  %v5178_v39 = vmul.f32 %v11891_v26, %v11891_v26  ;;  %v5291_v7 = vld [vmem:[%s12651_s12] sm:$0xff] }
0x1af3   : > { %9822 = vmatmul.mubr.msk.f32.vlgmr.msra.gmra.mxu0 %vm1447_vm1, %v5884_v34  ;;  %v5182_v1 = vrot.slane %v5177_v36, 7  ;;  %v5184_v0 = vrot.slane %v5178_v39, 6  ;;  %v8310_v39 = vld [vmem:[%s12653_s6] ss:$0 sm:$0xff]  ;;  %s10392_s6 = smov 16  }
0x1af4   : > { %v10235_v43 = vpop.eup %10234  ;;  %9830 = vmatpush3.msra.mxu0 %v11852_v16  ;;  %9831 = vmatprep.mubr.msk.f32.mxu0 %vm10389_vm0, %v10388_v2 }
0x1af5   : > { %v5885_v47 = vmul.f32 %v10235_v43, %v10229_v13  ;;  %v5183_v48 = vsel %vm4449_vm10, %v5182_v1, %v5176_v62  ;;  %6242 = vmatprep.subr.mxu0 %v10388_v2  ;;  %v5318_v13 = vld [vmem:[%s12652_s2 + $0x58] sm:$0xff]  ;;  %v5323_v43 = vld [vmem:[%s12652_s2 + $0x80] sm:$0xff] }
0x1af6   : > { %v5185_v58 = vsel %vm4451_vm11, %v5184_v0, %v5183_v48 }
0x1af7   : > { %9827 = vmatmul.mubr.msk.f32.vlgmr.msra.gmra.mxu1 %vm1447_vm1, %v5885_v47  ;;  %v5187_v51 = vsel %vm4760_vm12, %v5185_v58, 0.0  ;;  %v5223_v47 = vpop.permute.xlu0 %5222 }
0x1af8   : > { %v10237_v44 = vpop.eup %10236  ;;  %5188 = vadd.xlane.f32.xlu1 %v5187_v51  ;;  %9866 = vmatprep.mubr.msk.f32.mxu1 %vm10389_vm0, %v10388_v2 }
0x1af9   : > { %v5886_v16 = vmul.f32 %v10237_v44, %v10231_v20  ;;  %9835 = vmatpush3.msra.mxu1 %v5306_v49  ;;  %v5315_v20 = vld [vmem:[%s12652_s2 + $0x40] sm:$0xff] }
0x1afa   : > { %9836 = vmatprep.subr.mxu1 %v10388_v2  ;;  %v8311_v44 = vld [vmem:[%s12654_s3] ss:$0 sm:$0xff]  ;;  %s12655_s3 = sld [smem:[#allocation38_spill]] }
0x1afb   : > { %9832 = vmatmul.mubr.msk.f32.vlgmr.msra.gmra.mxu0 %vm1447_vm1, %v5886_v16  ;;  %9837 = vmatpush3.msra.mxu1 %v5305_v54  ;;  %v5224_v54 = vrot.slane %v5223_v47, 1 }
0x1afc   : > { %9838 = vmatprep.subr.mxu1 %v10388_v2  ;;  %6243 = vmatpush1.msra.mxu0 %v5322_v8 }
0x1afd   : > { %9839 = vmatpush3.msra.mxu1 %v5304_v35  ;;  %6244 = vmatprep.subr.mxu0 %v10388_v2  ;;  %v5225_v35 = vrot.slane %v5223_v47, 2 }
0x1afe   : > { %9840 = vmatprep.subr.mxu1 %v10388_v2  ;;  %6245 = vmatpush1.msra.mxu0 %v5321_v14  ;;  %v10280_v14 = vld [vmem:[%s10953_s16] sm:$0x7]  ;;  %s12656_s16 = sld [smem:[#allocation40_spill]] }
0x1aff   : > { %9841 = vmatpush3.msra.mxu1 %v5303_v38  ;;  %6246 = vmatprep.subr.mxu0 %v10388_v2 }
0x1b00   : > { %9842 = vmatprep.subr.mxu1 %v10388_v2  ;;  %6247 = vmatpush1.msra.mxu0 %v5320_v9 }
0x1b01   : > { %9843 = vmatpush3.msra.mxu1 %v5302_v42  ;;  %6248 = vmatprep.subr.mxu0 %v10388_v2 }
0x1b02   : > { %9844 = vmatprep.subr.mxu1 %v10388_v2  ;;  %6249 = vmatpush1.msra.mxu0 %v5319_v11 }
0x1b03   : > { %9845 = vmatpush3.msra.mxu1 %v5301_v57  ;;  %6250 = vmatprep.subr.mxu0 %v10388_v2 }
0x1b04   : > { %9846 = vmatprep.subr.mxu1 %v10388_v2  ;;  %6251 = vmatpush1.msra.mxu0 %v5318_v13 }
0x1b05   : > { %9847 = vmatpush3.msra.mxu1 %v5300_v46  ;;  %6252 = vmatprep.subr.mxu0 %v10388_v2 }
0x1b06   : > { %9848 = vmatprep.subr.mxu1 %v10388_v2  ;;  %6253 = vmatpush1.msra.mxu0 %v5317_v19 }
0x1b07   : > { %9849 = vmatpush3.msra.mxu1 %v5299_v28  ;;  %6254 = vmatprep.subr.mxu0 %v10388_v2 }
0x1b08   : > { %9850 = vmatprep.subr.mxu1 %v10388_v2  ;;  %6255 = vmatpush1.msra.mxu0 %v5316_v40 }
0x1b09   : > { %9851 = vmatpush3.msra.mxu1 %v5298_v12  ;;  %6256 = vmatprep.subr.mxu0 %v10388_v2 }
0x1b0a   : > { %9852 = vmatprep.subr.mxu1 %v10388_v2  ;;  %6257 = vmatpush1.msra.mxu0 %v5315_v20 }
0x1b0b   : > { %9853 = vmatpush3.msra.mxu1 %v5297_v60  ;;  %6258 = vmatprep.subr.mxu0 %v10388_v2 }
0x1b0c   : > { %9854 = vmatprep.subr.mxu1 %v10388_v2  ;;  %6259 = vmatpush1.msra.mxu0 %v5314_v61 }
0x1b0d   : > { %9855 = vmatpush3.msra.mxu1 %v5296_v29  ;;  %6260 = vmatprep.subr.mxu0 %v10388_v2 }
0x1b0e   : > { %9856 = vmatprep.subr.mxu1 %v10388_v2  ;;  %6261 = vmatpush1.msra.mxu0 %v5313_v22 }
0x1b0f   : > { %9857 = vmatpush3.msra.mxu1 %v5295_v4  ;;  %6262 = vmatprep.subr.mxu0 %v10388_v2 }
0x1b10   : > { %9858 = vmatprep.subr.mxu1 %v10388_v2  ;;  %6263 = vmatpush1.msra.mxu0 %v5312_v45 }
0x1b11   : > { %9859 = vmatpush3.msra.mxu1 %v5294_v5  ;;  %6264 = vmatprep.subr.mxu0 %v10388_v2 }
0x1b12   : > { %9860 = vmatprep.subr.mxu1 %v10388_v2  ;;  %6265 = vmatpush1.msra.mxu0 %v5311_v23 }
0x1b13   : > { %9861 = vmatpush3.msra.mxu1 %v5293_v17  ;;  %6266 = vmatprep.subr.mxu0 %v10388_v2 }
0x1b14   : > { %9862 = vmatprep.subr.mxu1 %v10388_v2  ;;  %6267 = vmatpush1.msra.mxu0 %v5310_v24  ;;  %v5358_v24 = vld [vmem:[%s12655_s3 + $0xf8] sm:$0xff] }
0x1b15   : > { %9863 = vmatpush3.msra.mxu1 %v5292_v6  ;;  %6268 = vmatprep.subr.mxu0 %v10388_v2 }
0x1b16   : > { %9864 = vmatprep.subr.mxu1 %v10388_v2  ;;  %6269 = vmatpush1.msra.mxu0 %v5309_v27  ;;  %v5357_v27 = vld [vmem:[%s12655_s3 + $0xf0] sm:$0xff] }
0x1b17   : > { %9865 = vmatpush3.msra.mxu1 %v5291_v7  ;;  %6270 = vmatprep.subr.mxu0 %v10388_v2 }
0x1b18   : > { %6271 = vmatpush1.msra.mxu0 %v5308_v10  ;;  %v5356_v10 = vld [vmem:[%s12655_s3 + $0xe8] sm:$0xff]  ;;  %6365 = vmatprep.subr.mxu1 %v5358_v24  ;;  %v5388_v24 = vld [vmem:[%s12656_s16 + $0xe0] sm:$0xff] }
0x1b19   : > { %6272 = vmatprep.subr.mxu0 %v10388_v2 }
0x1b1a   : > { %6273 = vmatpush1.msra.mxu0 %v5307_v53  ;;  %v5355_v53 = vld [vmem:[%s12655_s3 + $0xe0] sm:$0xff] }
0x1b1b   : > { %6302 = vmatprep.subr.mxu0 %v10388_v2 }
0x1b1c   : > { %6303 = vmatpush2.msra.mxu0 %v5324_v30  ;;  %v5353_v30 = vld [vmem:[%s12655_s3 + $0xd0] sm:$0xff] }
0x1b1d   : > { %6304 = vmatprep.subr.mxu0 %v10388_v2 }
0x1b1e   : > { %6305 = vmatpush2.msra.mxu0 %v5323_v43 }
0x1b81   : > { %v5189_v31 = vpop.xlane.xlu1 %5188 }
0x1b82   : > { %v5190_v59 = vmul.f32 0.0078125, %v5189_v31 }
0x1b84   : > { %v5191_v34 = vadd.f32 1e-05, %v5190_v59 }
0x1b86   : > { %10238 = vrsqrt.f32 %v5191_v34 }
0x1b93   : > { %v10239_v36 = vpop.eup %10238 }
0x1b94   : > { %v5194_v62 = vrot.slane %v10239_v36, 1  ;;  %v5195_v1 = vrot.slane %v10239_v36, 2  ;;  %v5199_v0 = vmul.f32 %v10239_v36, %v11887_v32 }
0x1b96   : > { %v5200_v48 = vmul.f32 %v5194_v62, %v11889_v56  ;;  %v5201_v58 = vmul.f32 %v5195_v1, %v11891_v26  ;;  %v5208_v51 = vmul.f32 %v8310_v39, %v5199_v0 }
0x1b98   : > { %v5209_v16 = vmul.f32 %v8310_v39, %v5200_v48  ;;  %v5210_v49 = vmul.f32 %v8310_v39, %v5201_v58  ;;  %v5217_v38 = vadd.f32 %v8311_v44, %v5208_v51  ;;  %v5352_v51 = vld [vmem:[%s12655_s3 + $0xc8] sm:$0xff] }
0x1b9a   : > { %v5218_v42 = vadd.f32 %v8311_v44, %v5209_v16  ;;  %v5219_v57 = vadd.f32 %v8311_v44, %v5210_v49  ;;  %v5229_v12 = vmul.f32 %v5223_v47, %v5217_v38  ;;  %v5351_v44 = vld [vmem:[%s12655_s3 + $0xc0] sm:$0xff]  ;;  %v5350_v16 = vld [vmem:[%s12655_s3 + $0xb8] sm:$0xff]  ;;  %v5349_v49 = vld [vmem:[%s12655_s3 + $0xb0] sm:$0xff] }
0x1b9b   : > { %v5346_v38 = vld [vmem:[%s12655_s3 + $0x98] sm:$0xff] }
0x1b9c   : > { %v5230_v46 = vmul.f32 %v5224_v54, %v5218_v42  ;;  %v5231_v28 = vmul.f32 %v5225_v35, %v5219_v57  ;;  %v5348_v54 = vld [vmem:[%s12655_s3 + $0xa8] sm:$0xff]  ;;  %v5347_v35 = vld [vmem:[%s12655_s3 + $0xa0] sm:$0xff]  ;;  %v5345_v42 = vld [vmem:[%s12655_s3 + $0x90] sm:$0xff] }
0x1b9d   : > { %v5344_v57 = vld [vmem:[%s12655_s3 + $0x88] sm:$0xff] }
0x1b9e   : > { %v5235_v32 = vrot.slane %v5230_v46, 7  ;;  %v5237_v60 = vrot.slane %v5231_v28, 6  ;;  %v5343_v46 = vld [vmem:[%s12655_s3 + $0x80] sm:$0xff]  ;;  %v5342_v28 = vld [vmem:[%s12655_s3 + $0x78] sm:$0xff] }
0x1ba0   : > { %v5236_v29 = vsel %vm4449_vm10, %v5235_v32, %v5229_v12  ;;  %v5341_v12 = vld [vmem:[%s12655_s3 + $0x70] sm:$0xff]  ;;  %v5340_v32 = vld [vmem:[%s12655_s3 + $0x68] sm:$0xff] }
0x1ba1   : > { %v5238_v56 = vsel %vm4451_vm11, %v5237_v60, %v5236_v29  ;;  %v5339_v60 = vld [vmem:[%s12655_s3 + $0x60] sm:$0xff]  ;;  %v5338_v29 = vld [vmem:[%s12655_s3 + $0x58] sm:$0xff] }
0x1ba2   : > { %5239 = vrot.lane.b32.xlu1 %v5238_v56, %s10392_s6  ;;  %v5337_v56 = vld [vmem:[%s12655_s3 + $0x50] sm:$0xff]  ;;  %s12657_s6 = sld [smem:[#allocation36_spill]] }
0x1bb3   : > { %v5956_v26 = vpop.f32.mrf.mxu0 }
0x1bb4   : > { %9867 = vmatmul.mubr.f32.vlgmr.msra.gmra.mxu1 %v5956_v26  ;;  %v5336_v26 = vld [vmem:[%s12655_s3 + $0x48] sm:$0xff] }
0x1bb5   : > { %v9823_v4 = vpop.f32.mrf.mxu0  ;;  %9869 = vmatprep.mubr.msk.f32.mxu1 %vm10389_vm0, %v10388_v2  ;;  %6366 = vmatpush1.msra.mxu1 %v5357_v27  ;;  %v5372_v27 = vld [vmem:[%s12656_s16 + $0x60] sm:$0xff] }
0x1bb6   : > { %6367 = vmatprep.subr.mxu1 %v5356_v10  ;;  %v5335_v4 = vld [vmem:[%s12655_s3 + $0x40] sm:$0xff]  ;;  %v5387_v10 = vld [vmem:[%s12656_s16 + $0xd8] sm:$0xff] }
0x1bb7   : > { %v6029_v5 = vpop.f32.mrf.mxu1  ;;  %6368 = vmatpush1.msra.mxu1 %v5355_v53  ;;  %v5371_v53 = vld [vmem:[%s12656_s16 + $0x58] sm:$0xff] }
0x1bb8   : > { %9870 = vmatmul.mubr.f32.gmra.mxu1 %v6029_v5  ;;  %v5334_v5 = vld [vmem:[%s12655_s3 + $0x38] sm:$0xff] }
0x1bb9   : > { %v9828_v17 = vpop.f32.mrf.mxu1  ;;  %9872 = vmatprep.mubr.msk.f32.mxu1 %vm10389_vm0, %v10388_v2 }
0x1bba   : > { %v5333_v17 = vld [vmem:[%s12655_s3 + $0x30] sm:$0xff] }
0x1bbb   : > { %v6102_v6 = vpop.f32.mrf.mxu0 }
0x1bbc   : > { %9873 = vmatmul.mubr.f32.gmra.mxu1 %v6102_v6  ;;  %v5332_v6 = vld [vmem:[%s12655_s3 + $0x28] sm:$0xff] }
0x1bbd   : > { %v9833_v7 = vpop.f32.mrf.mxu0  ;;  %6429 = vmatprep.mubr.f32.mxu1 %v10388_v2 }
0x1bbe   : > { %v5331_v7 = vld [vmem:[%s12655_s3 + $0x20] sm:$0xff] }
0x1c14   : > { %v11989_v8 = vpop.permute.xlu1 %5239 }
0x1c15   : > { %8317 = vmatprep.mubr.msk.f32.mxu0 %vm2540_vm8, %v11989_v8  ;;  %v11996_v9 = vsel %vm2540_vm8, %v10280_v14, %v11989_v8  ;;  %v5330_v14 = vld [vmem:[%s12655_s3 + $0x18] sm:$0xff] }
0x1c16   : > { %6307 = vmatmul.mubr.f32.vlgmr.msra.gmra.mxu0 %v11996_v9 }
0x1c74   : > { %v6172_v11 = vpop.f32.mrf.mxu1 }
0x1c75   : > { %v6186_v13 = vadd.f32 %v6172_v11, %v11508_v50  ;;  %v5354_v50 = vld [vmem:[%s12655_s3 + $0xd8] sm:$0xff]  ;;  %v5329_v11 = vld [vmem:[%s12655_s3 + $0x10] sm:$0xff] }
0x1c76   : > { %v9868_v19 = vpop.f32.mrf.mxu1  ;;  %6369 = vmatprep.subr.mxu1 %v5354_v50  ;;  %v5386_v50 = vld [vmem:[%s12656_s16 + $0xd0] sm:$0xff] }
0x1c77   : > { %6189 = vadd.xlane.f32.xlu1 %v6186_v13  ;;  %6370 = vmatpush1.msra.mxu1 %v5353_v30  ;;  %v5327_v19 = vld [vmem:[%s12655_s3] sm:$0xff]  ;;  %v5370_v30 = vld [vmem:[%s12656_s16 + $0x50] sm:$0xff] }
0x1c78   : > { %v6177_v40 = vpop.f32.mrf.mxu1  ;;  %6371 = vmatprep.subr.mxu1 %v5352_v51  ;;  %v5380_v51 = vld [vmem:[%s12656_s16 + $0xa0] sm:$0xff] }
0x1c79   : > { %v6187_v20 = vadd.f32 %v6177_v40, %v11516_v37  ;;  %6372 = vmatpush1.msra.mxu1 %v5351_v44  ;;  %v5391_v40 = vld [vmem:[%s12656_s16 + $0xf8] sm:$0xff]  ;;  %v5364_v44 = vld [vmem:[%s12656_s16 + $0x20] sm:$0xff] }
0x1c7a   : > { %v9871_v61 = vpop.f32.mrf.mxu1  ;;  %6373 = vmatprep.subr.mxu1 %v5350_v16  ;;  %8948 = vmatprep.subr.mxu0 %v5391_v40 }
0x1c7b   : > { %6191 = vadd.xlane.f32.xlu0 %v6187_v20  ;;  %6374 = vmatpush1.msra.mxu1 %v5349_v49  ;;  %v5390_v61 = vld [vmem:[%s12656_s16 + $0xf0] sm:$0xff] }
0x1c7c   : > { %v6182_v22 = vpop.f32.mrf.mxu1  ;;  %6375 = vmatprep.subr.mxu1 %v5348_v54 }
0x1c7d   : > { %v6188_v45 = vadd.f32 %v6182_v22, %v11523_v3  ;;  %6376 = vmatpush1.msra.mxu1 %v5347_v35  ;;  %v5374_v22 = vld [vmem:[%s12656_s16 + $0x70] sm:$0xff] }
0x1c7e   : > { %v9874_v23 = vpop.f32.mrf.mxu1  ;;  %6377 = vmatprep.subr.mxu1 %v5346_v38 }
0x1c7f   : > { %6193 = vadd.xlane.f32.xlu0 %v6188_v45  ;;  %6378 = vmatpush1.msra.mxu1 %v5345_v42  ;;  %v5373_v23 = vld [vmem:[%s12656_s16 + $0x68] sm:$0xff] }
0x1c80   : > { %6379 = vmatprep.subr.mxu1 %v5344_v57 }
0x1c81   : > { %6380 = vmatpush1.msra.mxu1 %v5343_v46 }
0x1c82   : > { %6381 = vmatprep.subr.mxu1 %v5342_v28 }
0x1c83   : > { %6382 = vmatpush1.msra.mxu1 %v5341_v12 }
0x1c84   : > { %6383 = vmatprep.subr.mxu1 %v5340_v32 }
0x1c85   : > { %6384 = vmatpush1.msra.mxu1 %v5339_v60  ;;  %v8315_v60 = vld [vmem:[%s12657_s6] ss:$0 sm:$0xff] }
0x1c86   : > { %6385 = vmatprep.subr.mxu1 %v5338_v29 }
0x1c87   : > { %6386 = vmatpush1.msra.mxu1 %v5337_v56 }
0x1c88   : > { %6387 = vmatprep.subr.mxu1 %v5336_v26 }
0x1c89   : > { %6388 = vmatpush1.msra.mxu1 %v5335_v4  ;;  %v8316_v4 = vld [vmem:[%s12658_s13] ss:$0 sm:$0xff] }
0x1c8a   : > { %6389 = vmatprep.subr.mxu1 %v5334_v5 }
0x1c8b   : > { %6390 = vmatpush1.msra.mxu1 %v5333_v17 }
0x1c8c   : > { %6391 = vmatprep.subr.mxu1 %v5332_v6 }
0x1c8d   : > { %6392 = vmatpush1.msra.mxu1 %v5331_v7 }
0x1c8e   : > { %6393 = vmatprep.subr.mxu1 %v5330_v14 }
0x1c8f   : > { %6394 = vmatpush1.msra.mxu1 %v5329_v11 }
0x1cd6   : > { %v12008_v37 = vpop.f32.mrf.mxu0 }
0x1cd7   : > { %v6319_v12 = vrot.slane %v12008_v37, %v11034_v15 }
0x1cd8   : > { %v6310_v31 = vpop.f32.mrf.mxu0 }
0x1cd9   : > { %v5385_v31 = vld [vmem:[%s12656_s16 + $0xc8] sm:$0xff]  ;;  %v6320_v29 = vcombine.high %v6319_v12, %v6319_v12  ;;  %v6327_v56 = vrot.slane %v6319_v12, %v11034_v15 }
0x1cdb   : > { %v6334_v6 = vrot.slane %v6320_v29, %v11034_v15  ;;  %v6339_v7 = vrot.slane %v6327_v56, %v10857_v18  ;;  %v6335_v40 = vcombine.high %v6327_v56, %v6327_v56  ;;  %v8318_v29 = vld [vmem:[%s10614_s25] ss:$0 sm:$0xff] }
0x1d00   : > { %v6190_v59 = vpop.xlane.xlu1 %6189 }
0x1d01   : > { %v6195_v3 = vmul.f32 0.0078125, %v6190_v59  ;;  %v5369_v59 = vld [vmem:[%s12656_s16 + $0x48] sm:$0xff] }
0x1d03   : > { %v12010_v34 = vsub.f32 %v6186_v13, %v6195_v3  ;;  %v5328_v13 = vld [vmem:[%s12655_s3 + $0x8] sm:$0xff]  ;;  %v5384_v3 = vld [vmem:[%s12656_s16 + $0xc0] sm:$0xff] }
0x1d04   : > { %v6192_v36 = vpop.xlane.xlu0 %6191  ;;  %6395 = vmatprep.subr.mxu1 %v5328_v13 }
0x1d05   : > { %v6196_v39 = vmul.f32 0.0078125, %v6192_v36  ;;  %v6201_v62 = vmul.f32 %v12010_v34, %v12010_v34  ;;  %6396 = vmatpush1.msra.mxu1 %v5327_v19  ;;  %v5368_v36 = vld [vmem:[%s12656_s16 + $0x40] sm:$0xff] }
0x1d06   : > { %9875 = vmatprep.subr.mxu1 %v10388_v2 }
0x1d07   : > { %v12014_v1 = vsub.f32 %v6187_v20, %v6196_v39  ;;  %6204 = vadd.xlane.f32.xlu1 %v6201_v62  ;;  %v5375_v20 = vld [vmem:[%s12656_s16 + $0x78] sm:$0xff] }
0x1d08   : > { %v6194_v0 = vpop.xlane.xlu0 %6193  ;;  %8949 = vmatpush3.msra.mxu0 %v5375_v20  ;;  %v5383_v39 = vld [vmem:[%s12656_s16 + $0xb8] sm:$0xff]  ;;  %v6343_v20 = vrot.slane %v6334_v6, %v10857_v18 }
0x1d09   : > { %v6197_v43 = vmul.f32 0.0078125, %v6194_v0  ;;  %v6202_v47 = vmul.f32 %v12014_v1, %v12014_v1  ;;  %8950 = vmatprep.subr.mxu0 %v5390_v61  ;;  %v5367_v62 = vld [vmem:[%s12656_s16 + $0x38] sm:$0xff]  ;;  %v5382_v0 = vld [vmem:[%s12656_s16 + $0xb0] sm:$0xff] }
0x1d0a   : > { %8951 = vmatpush3.msra.mxu0 %v5374_v22 }
0x1d0b   : > { %v12018_v48 = vsub.f32 %v6188_v45, %v6197_v43  ;;  %6206 = vadd.xlane.f32.xlu0 %v6202_v47  ;;  %v5389_v45 = vld [vmem:[%s12656_s16 + $0xe8] sm:$0xff]  ;;  %v5366_v43 = vld [vmem:[%s12656_s16 + $0x30] sm:$0xff] }
0x1d0c   : > { %8952 = vmatprep.subr.mxu0 %v5389_v45  ;;  %v5381_v47 = vld [vmem:[%s12656_s16 + $0xa8] sm:$0xff] }
0x1d0d   : > { %v6203_v58 = vmul.f32 %v12018_v48, %v12018_v48  ;;  %8953 = vmatpush3.msra.mxu0 %v5373_v23  ;;  %v6347_v23 = vrot.slane %v6335_v40, %v10857_v18 }
0x1d0e   : > { %8954 = vmatprep.subr.mxu0 %v5388_v24 }
0x1d0f   : > { %6208 = vadd.xlane.f32.xlu1 %v6203_v58  ;;  %8955 = vmatpush3.msra.mxu0 %v5372_v27  ;;  %v5365_v58 = vld [vmem:[%s12656_s16 + $0x28] sm:$0xff]  ;;  %v5363_v27 = vld [vmem:[%s12656_s16 + $0x18] sm:$0xff] }
0x1d10   : > { %8956 = vmatprep.subr.mxu0 %v5387_v10  ;;  %v5378_v10 = vld [vmem:[%s12656_s16 + $0x90] sm:$0xff] }
0x1d11   : > { %8957 = vmatpush3.msra.mxu0 %v5371_v53  ;;  %v5362_v53 = vld [vmem:[%s12656_s16 + $0x10] sm:$0xff] }
0x1d12   : > { %8958 = vmatprep.subr.mxu0 %v5386_v50  ;;  %v5377_v50 = vld [vmem:[%s12656_s16 + $0x88] sm:$0xff] }
0x1d13   : > { %8959 = vmatpush3.msra.mxu0 %v5370_v30  ;;  %v5361_v30 = vld [vmem:[%s12656_s16 + $0x8] sm:$0xff] }
0x1d14   : > { %8960 = vmatprep.subr.mxu0 %v5385_v31  ;;  %v5376_v31 = vld [vmem:[%s12656_s16 + $0x80] sm:$0xff] }
0x1d15   : > { %8961 = vmatpush3.msra.mxu0 %v5369_v59  ;;  %v5360_v59 = vld [vmem:[%s12656_s16] sm:$0xff] }
0x1d16   : > { %8962 = vmatprep.subr.mxu0 %v5384_v3  ;;  %v5359_v3 = vld [vmem:[%s12659_s14] sm:$0x3] }
0x1d17   : > { %8963 = vmatpush3.msra.mxu0 %v5368_v36  ;;  %v6358_v36 = vrot.slane %v5359_v3, %v10857_v18 }
0x1d18   : > { %8964 = vmatprep.subr.mxu0 %v5383_v39  ;;  %v6362_v39 = vrot.slane %v5359_v3, %v11072_v55 }
0x1d19   : > { %8965 = vmatpush3.msra.mxu0 %v5367_v62 }
0x1d1a   : > { %8966 = vmatprep.subr.mxu0 %v5382_v0 }
0x1d1b   : > { %8967 = vmatpush3.msra.mxu0 %v5366_v43 }
0x1d1c   : > { %8968 = vmatprep.subr.mxu0 %v5381_v47 }
0x1d1d   : > { %8969 = vmatpush3.msra.mxu0 %v5365_v58 }
0x1d1e   : > { %8970 = vmatprep.subr.mxu0 %v5380_v51 }
0x1d1f   : > { %8971 = vmatpush3.msra.mxu0 %v5364_v44 }
0x1d90   : > { %v6205_v16 = vpop.xlane.xlu1 %6204 }
0x1d91   : > { %v6210_v49 = vmul.f32 0.0078125, %v6205_v16 }
0x1d93   : > { %v6213_v54 = vadd.f32 1e-05, %v6210_v49 }
0x1d94   : > { %v6207_v35 = vpop.xlane.xlu0 %6206 }
0x1d95   : > { %10240 = vrsqrt.f32 %v6213_v54  ;;  %v6211_v38 = vmul.f32 0.0078125, %v6207_v35 }
0x1d97   : > { %v6214_v42 = vadd.f32 1e-05, %v6211_v38 }
0x1d98   : > { %v6209_v57 = vpop.xlane.xlu1 %6208 }
0x1d99   : > { %10242 = vrsqrt.f32 %v6214_v42  ;;  %v6212_v46 = vmul.f32 0.0078125, %v6209_v57 }
0x1d9b   : > { %v6215_v28 = vadd.f32 1e-05, %v6212_v46 }
0x1d9d   : > { %10244 = vrsqrt.f32 %v6215_v28 }
0x1da2   : > { %v10241_v32 = vpop.eup %10240 }
0x1da3   : > { %v6219_v26 = vmul.f32 %v10241_v32, %v12010_v34 }
0x1da5   : > { %v6228_v5 = vmul.f32 %v8315_v60, %v6219_v26 }
0x1da6   : > { %v10243_v17 = vpop.eup %10242 }
0x1da7   : > { %v6237_v14 = vadd.f32 %v8316_v4, %v6228_v5  ;;  %v6220_v11 = vmul.f32 %v10243_v17, %v12014_v1 }
0x1da9   : > { %v12082_v13 = vadd.f32 %v6339_v7, %v6237_v14  ;;  %v6229_v37 = vmul.f32 %v8315_v60, %v6220_v11 }
0x1daa   : > { %v10245_v19 = vpop.eup %10244 }
0x1dab   : > { %6430 = vmatmul.mubr.f32.vlgmr.msra.gmra.mxu1 %v12082_v13  ;;  %v6238_v34 = vadd.f32 %v8316_v4, %v6229_v37  ;;  %v6221_v61 = vmul.f32 %v10245_v19, %v12018_v48  ;;  %v5379_v48 = vld [vmem:[%s12656_s16 + $0x98] sm:$0xff] }
0x1dac   : > { %6435 = vmatprep.mubr.f32.mxu1 %v10388_v2  ;;  %8972 = vmatprep.subr.mxu0 %v5379_v48  ;;  %v8350_v48 = vld [vmem:[%s12647_s9 + $0xe8] sm:$0xff] }
0x1dad   : > { %v12088_v22 = vadd.f32 %v6343_v20, %v6238_v34  ;;  %v6230_v1 = vmul.f32 %v8315_v60, %v6221_v61  ;;  %8973 = vmatpush3.msra.mxu0 %v5363_v27  ;;  %v8336_v61 = vld [vmem:[%s12644_s8 + $0xf8] sm:$0xff] }
0x1dae   : > { %8974 = vmatprep.subr.mxu0 %v5378_v10  ;;  %9876 = vmatpush3.msra.mxu1 %v8336_v61 }
0x1daf   : > { %6436 = vmatmul.mubr.f32.gmra.mxu1 %v12088_v22  ;;  %v6239_v45 = vadd.f32 %v8316_v4, %v6230_v1  ;;  %8975 = vmatpush3.msra.mxu0 %v5362_v53  ;;  %v8352_v1 = vld [vmem:[%s12647_s9 + $0xf8] sm:$0xff] }
0x1db0   : > { %6441 = vmatprep.mubr.f32.mxu1 %v10388_v2  ;;  %8976 = vmatprep.subr.mxu0 %v5377_v50 }
0x1db1   : > { %v12093_v24 = vadd.f32 %v6347_v23, %v6239_v45  ;;  %8977 = vmatpush3.msra.mxu0 %v5361_v30  ;;  %v8351_v45 = vld [vmem:[%s12647_s9 + $0xf0] sm:$0xff]  ;;  %9877 = vmatprep.subr.mxu1 %v10388_v2  ;;  %v8334_v23 = vld [vmem:[%s12644_s8 + $0xe8] sm:$0xff] }
0x1db2   : > { %8978 = vmatprep.subr.mxu0 %v5376_v31 }
0x1db3   : > { %6442 = vmatmul.mubr.f32.gmra.mxu1 %v12093_v24  ;;  %8979 = vmatpush3.msra.mxu0 %v5360_v59 }
0x1db4   : > { %9907 = vmatprep.mubr.msk.f32.mxu1 %vm10389_vm0, %v10388_v2  ;;  %9916 = vmatprep.subr.mxu0 %v10388_v2 }
0x1e6b   : > { %v6431_v62 = vpop.f32.mrf.mxu1 }
0x1e6c   : > { %v6432_v0 = vadd.f32 %v6431_v62, %v6358_v36 }
0x1e6d   : > { %v6433_v43 = vpop.f32.mrf.mxu1 }
0x1e6e   : > { %v6434_v47 = vadd.f32 %v6433_v43, %v6362_v39  ;;  %v6448_v44 = vmax.f32 %v6432_v0, 0.0  ;;  %v8332_v43 = vld [vmem:[%s12644_s8 + $0xd8] sm:$0xff] }
0x1e6f   : > { %v6437_v58 = vpop.f32.mrf.mxu1 }
0x1e70   : > { %v6449_v51 = vmax.f32 %v6434_v47, 0.0  ;;  %v6438_v16 = vadd.f32 %v6437_v58, %v6358_v36  ;;  %v8348_v47 = vld [vmem:[%s12647_s9 + $0xd8] sm:$0xff]  ;;  %v8331_v58 = vld [vmem:[%s12644_s8 + $0xd0] sm:$0xff] }
0x1e71   : > { %v6439_v49 = vpop.f32.mrf.mxu1 }
0x1e72   : > { %v6440_v54 = vadd.f32 %v6439_v49, %v6362_v39  ;;  %6524 = vmatprep.mubr.f32.mxu0 %v6449_v51  ;;  %v6450_v42 = vmax.f32 %v6438_v16, 0.0  ;;  %v8347_v51 = vld [vmem:[%s12647_s9 + $0xd0] sm:$0xff]  ;;  %v8346_v16 = vld [vmem:[%s12647_s9 + $0xc8] sm:$0xff]  ;;  %v8329_v49 = vld [vmem:[%s12644_s8 + $0xc0] sm:$0xff] }
0x1e73   : > { %v6443_v35 = vpop.f32.mrf.mxu1  ;;  %6525 = vmatmul.mubr.f32.vlgmr.msra.gmra.mxu0 %v6448_v44  ;;  %v8330_v44 = vld [vmem:[%s12644_s8 + $0xc8] sm:$0xff] }
0x1e74   : > { %v6451_v38 = vmax.f32 %v6440_v54, 0.0  ;;  %v6444_v57 = vadd.f32 %v6443_v35, %v6358_v36  ;;  %9917 = vmatpush3.msra.mxu0 %v8352_v1  ;;  %v8345_v54 = vld [vmem:[%s12647_s9 + $0xc0] sm:$0xff]  ;;  %v8328_v35 = vld [vmem:[%s12644_s8 + $0xb8] sm:$0xff] }
0x1e75   : > { %v6445_v46 = vpop.f32.mrf.mxu1  ;;  %9918 = vmatprep.subr.mxu0 %v10388_v2 }
0x1e76   : > { %v6446_v28 = vadd.f32 %v6445_v46, %v6362_v39  ;;  %6529 = vmatprep.mubr.f32.mxu0 %v6451_v38  ;;  %v6452_v32 = vmax.f32 %v6444_v57, 0.0  ;;  %9919 = vmatpush3.msra.mxu0 %v8351_v45  ;;  %v8344_v38 = vld [vmem:[%s12647_s9 + $0xb8] sm:$0xff]  ;;  %v8343_v57 = vld [vmem:[%s12647_s9 + $0xb0] sm:$0xff]  ;;  %v8326_v46 = vld [vmem:[%s12644_s8 + $0xa8] sm:$0xff] }
0x1e77   : > { %6530 = vmatmul.mubr.f32.gmra.mxu0 %v6450_v42  ;;  %9920 = vmatprep.subr.mxu0 %v10388_v2  ;;  %v8327_v42 = vld [vmem:[%s12644_s8 + $0xb0] sm:$0xff] }
0x1e78   : > { %v6453_v12 = vmax.f32 %v6446_v28, 0.0  ;;  %9921 = vmatpush3.msra.mxu0 %v8350_v48  ;;  %v8342_v28 = vld [vmem:[%s12647_s9 + $0xa8] sm:$0xff] }
0x1e79   : > { %9922 = vmatprep.subr.mxu0 %v10388_v2 }
0x1e7a   : > { %6534 = vmatprep.mubr.f32.mxu0 %v6453_v12  ;;  %v8325_v12 = vld [vmem:[%s12644_s8 + $0xa0] sm:$0xff] }
0x1e7b   : > { %6535 = vmatmul.mubr.f32.gmra.mxu0 %v6452_v32  ;;  %v8341_v32 = vld [vmem:[%s12647_s9 + $0xa0] sm:$0xff] }
0x1e7c   : > { %9948 = vmatprep.mubr.msk.f32.mxu0 %vm10389_vm0, %v10388_v2 }
0x1f33   : > { %v8980_v60 = vpop.f32.mrf.mxu0 }
0x1f35   : > { %v8981_v56 = vpop.f32.mrf.mxu0 }
0x1f36   : > { %v8982_v26 = vadd.f32 %v8981_v56, %v8980_v60  ;;  %v8324_v60 = vld [vmem:[%s12644_s8 + $0x98] sm:$0xff]  ;;  %v8323_v56 = vld [vmem:[%s12644_s8 + $0x90] sm:$0xff] }
0x1f37   : > { %v8983_v4 = vpop.f32.mrf.mxu0 }
0x1f38   : > { %v6527_v5 = vadd.f32 %v8982_v26, %v8318_v29  ;;  %v8339_v26 = vld [vmem:[%s12647_s9 + $0x90] sm:$0xff] }
0x1f39   : > { %v8984_v17 = vpop.f32.mrf.mxu0 }
0x1f3a   : > { %v8985_v6 = vadd.f32 %v8984_v17, %v8983_v4  ;;  %v6540_v7 = vadd.f32 %v6527_v5, %v12082_v13  ;;  %v8335_v13 = vld [vmem:[%s12644_s8 + $0xf0] sm:$0xff]  ;;  %v8322_v4 = vld [vmem:[%s12644_s8 + $0x88] sm:$0xff]  ;;  %v8321_v17 = vld [vmem:[%s12644_s8 + $0x80] sm:$0xff] }
0x1f3b   : > { %v8986_v14 = vpop.f32.mrf.mxu0  ;;  %9878 = vmatpush3.msra.mxu1 %v8335_v13  ;;  %v8338_v5 = vld [vmem:[%s12647_s9 + $0x88] sm:$0xff]  ;;  %v8319_v13 = vld [vmem:[%s10619_s21] ss:$0 sm:$0xff] }
0x1f3c   : > { %v6532_v11 = vadd.f32 %v8985_v6, %v8318_v29  ;;  %6543 = vadd.xlane.f32.xlu0 %v6540_v7  ;;  %9879 = vmatprep.subr.mxu1 %v10388_v2  ;;  %v8337_v6 = vld [vmem:[%s12647_s9 + $0x80] sm:$0xff] }
0x1f3d   : > { %v8987_v37 = vpop.f32.mrf.mxu0  ;;  %9880 = vmatpush3.msra.mxu1 %v8334_v23  ;;  %v8320_v23 = vld [vmem:[%s10624_s17] ss:$0 sm:$0xff] }
0x1f3e   : > { %v8988_v19 = vadd.f32 %v8987_v37, %v8986_v14  ;;  %v6541_v40 = vadd.f32 %v6532_v11, %v12088_v22  ;;  %v8333_v22 = vld [vmem:[%s12644_s8 + $0xe0] sm:$0xff]  ;;  %9881 = vmatprep.subr.mxu1 %v10388_v2 }
0x1f3f   : > { %9882 = vmatpush3.msra.mxu1 %v8333_v22 }
0x1f40   : > { %v6537_v34 = vadd.f32 %v8988_v19, %v8318_v29  ;;  %6545 = vadd.xlane.f32.xlu1 %v6541_v40  ;;  %9883 = vmatprep.subr.mxu1 %v10388_v2  ;;  %v8340_v29 = vld [vmem:[%s12647_s9 + $0x98] sm:$0xff] }
0x1f41   : > { %9884 = vmatpush3.msra.mxu1 %v8332_v43  ;;  %v8363_v43 = vld [vmem:[%s12645_s5 + $0xd0] sm:$0xff] }
0x1f42   : > { %v6542_v20 = vadd.f32 %v6537_v34, %v12093_v24  ;;  %v8349_v24 = vld [vmem:[%s12647_s9 + $0xe0] sm:$0xff]  ;;  %9885 = vmatprep.subr.mxu1 %v10388_v2 }
0x1f43   : > { %9923 = vmatpush3.msra.mxu0 %v8349_v24  ;;  %9886 = vmatpush3.msra.mxu1 %v8331_v58  ;;  %v8361_v58 = vld [vmem:[%s12645_s5 + $0xc0] sm:$0xff] }
0x1f44   : > { %6547 = vadd.xlane.f32.xlu0 %v6542_v20  ;;  %9924 = vmatprep.subr.mxu0 %v10388_v2 }
0x1f45   : > { %9925 = vmatpush3.msra.mxu0 %v8348_v47  ;;  %9887 = vmatprep.subr.mxu1 %v10388_v2  ;;  %v8362_v47 = vld [vmem:[%s12645_s5 + $0xc8] sm:$0xff] }
0x1f46   : > { %9926 = vmatprep.subr.mxu0 %v10388_v2  ;;  %9888 = vmatpush3.msra.mxu1 %v8330_v44  ;;  %v8359_v44 = vld [vmem:[%s12645_s5 + $0xb0] sm:$0xff] }
0x1f47   : > { %9927 = vmatpush3.msra.mxu0 %v8347_v51  ;;  %9889 = vmatprep.subr.mxu1 %v10388_v2  ;;  %v8360_v51 = vld [vmem:[%s12645_s5 + $0xb8] sm:$0xff] }
0x1f48   : > { %9928 = vmatprep.subr.mxu0 %v10388_v2  ;;  %9890 = vmatpush3.msra.mxu1 %v8329_v49  ;;  %v8357_v49 = vld [vmem:[%s12645_s5 + $0xa0] sm:$0xff] }
0x1f49   : > { %9929 = vmatpush3.msra.mxu0 %v8346_v16  ;;  %9891 = vmatprep.subr.mxu1 %v10388_v2  ;;  %v8358_v16 = vld [vmem:[%s12645_s5 + $0xa8] sm:$0xff] }
0x1f4a   : > { %9930 = vmatprep.subr.mxu0 %v10388_v2  ;;  %9892 = vmatpush3.msra.mxu1 %v8328_v35  ;;  %v8355_v35 = vld [vmem:[%s12645_s5 + $0x90] sm:$0xff] }
0x1f4b   : > { %9931 = vmatpush3.msra.mxu0 %v8345_v54  ;;  %9893 = vmatprep.subr.mxu1 %v10388_v2  ;;  %v8356_v54 = vld [vmem:[%s12645_s5 + $0x98] sm:$0xff] }
0x1f4c   : > { %9932 = vmatprep.subr.mxu0 %v10388_v2  ;;  %9894 = vmatpush3.msra.mxu1 %v8327_v42  ;;  %v8353_v42 = vld [vmem:[%s12645_s5 + $0x80] sm:$0xff] }
0x1f4d   : > { %9933 = vmatpush3.msra.mxu0 %v8344_v38  ;;  %9895 = vmatprep.subr.mxu1 %v10388_v2  ;;  %v8354_v38 = vld [vmem:[%s12645_s5 + $0x88] sm:$0xff] }
0x1f4e   : > { %9934 = vmatprep.subr.mxu0 %v10388_v2  ;;  %9896 = vmatpush3.msra.mxu1 %v8326_v46 }
0x1f4f   : > { %9935 = vmatpush3.msra.mxu0 %v8343_v57  ;;  %9897 = vmatprep.subr.mxu1 %v10388_v2 }
0x1f50   : > { %9936 = vmatprep.subr.mxu0 %v10388_v2  ;;  %9898 = vmatpush3.msra.mxu1 %v8325_v12 }
0x1f51   : > { %9937 = vmatpush3.msra.mxu0 %v8342_v28  ;;  %9899 = vmatprep.subr.mxu1 %v10388_v2 }
0x1f52   : > { %9938 = vmatprep.subr.mxu0 %v10388_v2  ;;  %9900 = vmatpush3.msra.mxu1 %v8324_v60 }
0x1f53   : > { %9939 = vmatpush3.msra.mxu0 %v8341_v32  ;;  %9901 = vmatprep.subr.mxu1 %v10388_v2 }
0x1f54   : > { %9940 = vmatprep.subr.mxu0 %v10388_v2  ;;  %9902 = vmatpush3.msra.mxu1 %v8323_v56 }
0x1f55   : > { %9941 = vmatpush3.msra.mxu0 %v8340_v29  ;;  %9903 = vmatprep.subr.mxu1 %v10388_v2 }
0x1f56   : > { %9942 = vmatprep.subr.mxu0 %v10388_v2  ;;  %9904 = vmatpush3.msra.mxu1 %v8322_v4 }
0x1f57   : > { %9943 = vmatpush3.msra.mxu0 %v8339_v26  ;;  %9905 = vmatprep.subr.mxu1 %v10388_v2 }
0x1f58   : > { %9944 = vmatprep.subr.mxu0 %v10388_v2  ;;  %9906 = vmatpush3.msra.mxu1 %v8321_v17 }
0x1f59   : > { %9945 = vmatpush3.msra.mxu0 %v8338_v5  ;;  %9957 = vmatprep.subr.mxu1 %v10388_v2 }
0x1f5a   : > { %9946 = vmatprep.subr.mxu0 %v10388_v2 }
0x1f5b   : > { %9947 = vmatpush3.msra.mxu0 %v8337_v6 }
0x1f5c   : > { %9998 = vmatprep.subr.mxu0 %v10388_v2 }
0x1fc5   : > { %v6544_v27 = vpop.xlane.xlu0 %6543 }
0x1fc6   : > { %v6549_v10 = vmul.f32 0.0078125, %v6544_v27  ;;  %v8368_v27 = vld [vmem:[%s12645_s5 + $0xf8] sm:$0xff] }
0x1fc8   : > { %v12132_v53 = vsub.f32 %v6540_v7, %v6549_v10 }
0x1fc9   : > { %v6546_v50 = vpop.xlane.xlu1 %6545 }
0x1fca   : > { %v6550_v30 = vmul.f32 0.0078125, %v6546_v50  ;;  %v6555_v31 = vmul.f32 %v12132_v53, %v12132_v53  ;;  %v8367_v50 = vld [vmem:[%s12645_s5 + $0xf0] sm:$0xff] }
0x1fcc   : > { %v12136_v59 = vsub.f32 %v6541_v40, %v6550_v30  ;;  %6558 = vadd.xlane.f32.xlu1 %v6555_v31 }
0x1fcd   : > { %v6548_v3 = vpop.xlane.xlu0 %6547 }
0x1fce   : > { %v6551_v36 = vmul.f32 0.0078125, %v6548_v3  ;;  %v6556_v39 = vmul.f32 %v12136_v59, %v12136_v59 }
0x1fd0   : > { %v12140_v62 = vsub.f32 %v6542_v20, %v6551_v36  ;;  %6560 = vadd.xlane.f32.xlu0 %v6556_v39  ;;  %v8365_v36 = vld [vmem:[%s12645_s5 + $0xe0] sm:$0xff] }
0x1fd2   : > { %v6557_v0 = vmul.f32 %v12140_v62, %v12140_v62 }
0x1fd4   : > { %6562 = vadd.xlane.f32.xlu1 %v6557_v0 }
0x2055   : > { %v6559_v7 = vpop.xlane.xlu1 %6558 }
0x2056   : > { %v6564_v14 = vmul.f32 0.0078125, %v6559_v7 }
0x2058   : > { %v6567_v11 = vadd.f32 1e-05, %v6564_v14 }
0x2059   : > { %v6561_v37 = vpop.xlane.xlu0 %6560 }
0x205a   : > { %10246 = vrsqrt.f32 %v6567_v11  ;;  %v6565_v19 = vmul.f32 0.0078125, %v6561_v37 }
0x205c   : > { %v6568_v40 = vadd.f32 1e-05, %v6565_v19 }
0x205d   : > { %v6563_v34 = vpop.xlane.xlu1 %6562 }
0x205e   : > { %10248 = vrsqrt.f32 %v6568_v40  ;;  %v6566_v20 = vmul.f32 0.0078125, %v6563_v34 }
0x2060   : > { %v6569_v61 = vadd.f32 1e-05, %v6566_v20 }
0x2062   : > { %10250 = vrsqrt.f32 %v6569_v61 }
0x2067   : > { %v10247_v1 = vpop.eup %10246 }
0x2068   : > { %v6573_v45 = vmul.f32 %v10247_v1, %v12132_v53 }
0x206a   : > { %v6582_v48 = vmul.f32 %v8319_v13, %v6573_v45 }
0x206b   : > { %v10249_v22 = vpop.eup %10248 }
0x206c   : > { %v12195_v24 = vadd.f32 %v8320_v23, %v6582_v48  ;;  %v6574_v10 = vmul.f32 %v10249_v22, %v12136_v59  ;;  %v8366_v59 = vld [vmem:[%s12645_s5 + $0xe8] sm:$0xff] }
0x206e   : > { %9908 = vmatmul.mubr.f32.vlgmr.msra.gmra.mxu1 %v12195_v24  ;;  %9949 = vmatmul.mubr.f32.vlgmr.msra.gmra.mxu0 %v12195_v24  ;;  %v6583_v30 = vmul.f32 %v8319_v13, %v6574_v10 }
0x206f   : > { %v10251_v31 = vpop.eup %10250  ;;  %9958 = vmatpush3.msra.mxu1 %v8368_v27  ;;  %9910 = vmatprep.mubr.msk.f32.mxu1 %vm10389_vm0, %v10388_v2 }
0x2070   : > { %9959 = vmatprep.subr.mxu1 %v10388_v2  ;;  %9951 = vmatprep.mubr.msk.f32.mxu0 %vm10389_vm0, %v10388_v2  ;;  %v12207_v53 = vadd.f32 %v8320_v23, %v6583_v30  ;;  %v6575_v3 = vmul.f32 %v10251_v31, %v12140_v62  ;;  %v8364_v62 = vld [vmem:[%s12645_s5 + $0xd8] sm:$0xff] }
0x2071   : > { %9960 = vmatpush3.msra.mxu1 %v8367_v50 }
0x2072   : > { %9961 = vmatprep.subr.mxu1 %v10388_v2  ;;  %9911 = vmatmul.mubr.f32.gmra.mxu1 %v12207_v53  ;;  %v6584_v39 = vmul.f32 %v8319_v13, %v6575_v3 }
0x2073   : > { %9952 = vmatmul.mubr.f32.gmra.mxu0 %v12207_v53  ;;  %9962 = vmatpush3.msra.mxu1 %v8366_v59 }
0x2074   : > { %9963 = vmatprep.subr.mxu1 %v10388_v2  ;;  %9913 = vmatprep.mubr.msk.f32.mxu1 %vm10389_vm0, %v10388_v2  ;;  %v12218_v0 = vadd.f32 %v8320_v23, %v6584_v39 }
0x2075   : > { %9964 = vmatpush3.msra.mxu1 %v8365_v36  ;;  %9954 = vmatprep.mubr.msk.f32.mxu0 %vm10389_vm0, %v10388_v2 }
0x2076   : > { %9965 = vmatprep.subr.mxu1 %v10388_v2  ;;  %9914 = vmatmul.mubr.f32.gmra.mxu1 %v12218_v0 }
0x2077   : > { %9955 = vmatmul.mubr.f32.gmra.mxu0 %v12218_v0  ;;  %9966 = vmatpush3.msra.mxu1 %v8364_v62 }
0x2078   : > { %9967 = vmatprep.subr.mxu1 %v10388_v2  ;;  %9989 = vmatprep.mubr.msk.f32.mxu1 %vm10389_vm0, %v10388_v2 }
0x2079   : > { %9968 = vmatpush3.msra.mxu1 %v8363_v43  ;;  %10000 = vmatprep.mubr.msk.f32.mxu0 %vm10389_vm0, %v10388_v2 }
0x207a   : > { %9969 = vmatprep.subr.mxu1 %v10388_v2 }
0x207b   : > { %9970 = vmatpush3.msra.mxu1 %v8362_v47 }
0x207c   : > { %9971 = vmatprep.subr.mxu1 %v10388_v2 }
0x207d   : > { %9972 = vmatpush3.msra.mxu1 %v8361_v58 }
0x207e   : > { %9973 = vmatprep.subr.mxu1 %v10388_v2 }
0x207f   : > { %9974 = vmatpush3.msra.mxu1 %v8360_v51 }
0x2080   : > { %9975 = vmatprep.subr.mxu1 %v10388_v2 }
0x2081   : > { %9976 = vmatpush3.msra.mxu1 %v8359_v44 }
0x2082   : > { %9977 = vmatprep.subr.mxu1 %v10388_v2 }
0x2083   : > { %9978 = vmatpush3.msra.mxu1 %v8358_v16 }
0x2084   : > { %9979 = vmatprep.subr.mxu1 %v10388_v2 }
0x2085   : > { %9980 = vmatpush3.msra.mxu1 %v8357_v49 }
0x2086   : > { %9981 = vmatprep.subr.mxu1 %v10388_v2 }
0x2087   : > { %9982 = vmatpush3.msra.mxu1 %v8356_v54  ;;  %v8384_v54 = vld [vmem:[%s12651_s12 + $0xf8] sm:$0xff] }
0x2088   : > { %9983 = vmatprep.subr.mxu1 %v10388_v2 }
0x2089   : > { %9984 = vmatpush3.msra.mxu1 %v8355_v35  ;;  %v8383_v35 = vld [vmem:[%s12651_s12 + $0xf0] sm:$0xff] }
0x208a   : > { %9985 = vmatprep.subr.mxu1 %v10388_v2 }
0x208b   : > { %9986 = vmatpush3.msra.mxu1 %v8354_v38  ;;  %v8382_v38 = vld [vmem:[%s12651_s12 + $0xe8] sm:$0xff] }
0x208c   : > { %9987 = vmatprep.subr.mxu1 %v10388_v2 }
0x208d   : > { %9988 = vmatpush3.msra.mxu1 %v8353_v42  ;;  %v8381_v42 = vld [vmem:[%s12651_s12 + $0xe0] sm:$0xff] }
0x208e   : > { %9990 = vmatmul.mubr.f32.vlgmr.msra.gmra.mxu1 %v12195_v24  ;;  %10028 = vmatprep.subr.mxu1 %v10388_v2 }
0x208f   : > { %9992 = vmatprep.mubr.msk.f32.mxu1 %vm10389_vm0, %v10388_v2  ;;  %10029 = vmatpush3.msra.mxu1 %v8384_v54 }
0x2090   : > { %10030 = vmatprep.subr.mxu1 %v10388_v2 }
0x2091   : > { %10031 = vmatpush3.msra.mxu1 %v8383_v35 }
0x2092   : > { %9993 = vmatmul.mubr.f32.gmra.mxu1 %v12207_v53  ;;  %10032 = vmatprep.subr.mxu1 %v10388_v2 }
0x2093   : > { %9995 = vmatprep.mubr.msk.f32.mxu1 %vm10389_vm0, %v10388_v2  ;;  %10033 = vmatpush3.msra.mxu1 %v8382_v38 }
0x2094   : > { %10034 = vmatprep.subr.mxu1 %v10388_v2 }
0x2095   : > { %10035 = vmatpush3.msra.mxu1 %v8381_v42 }
0x2096   : > { %9996 = vmatmul.mubr.f32.gmra.mxu1 %v12218_v0  ;;  %10036 = vmatprep.subr.mxu1 %v10388_v2 }
0x2097   : > { %10060 = vmatprep.mubr.msk.f32.mxu1 %vm10389_vm0, %v10388_v2 }
0x212e   : > { %v6825_v57 = vpop.f32.mrf.mxu1  ;;  %v6905_v46 = vpop.f32.mrf.mxu0 }
0x212f   : > { %9999 = vmatpush3.xpose.msra.mxu0 %v6905_v46  ;;  %v8379_v46 = vld [vmem:[%s12651_s12 + $0xd0] sm:$0xff] }
0x2130   : > { %v9909_v28 = vpop.f32.mrf.mxu1  ;;  %v9950_v12 = vpop.f32.mrf.mxu0  ;;  %10003 = vmatprep.subr.mxu0 %v10388_v2 }
0x2131   : > { %v8378_v28 = vld [vmem:[%s12651_s12 + $0xc8] sm:$0xff]  ;;  %v8377_v12 = vld [vmem:[%s12651_s12 + $0xc0] sm:$0xff] }
0x2132   : > { %v6830_v32 = vpop.f32.mrf.mxu1  ;;  %10001 = vmatmul.mubr.f32.vlgmr.msra.gmra.mxu0 %v6825_v57  ;;  %v8380_v57 = vld [vmem:[%s12651_s12 + $0xd8] sm:$0xff] }
0x2133   : > { %v6910_v60 = vpop.f32.mrf.mxu0  ;;  %10005 = vmatprep.mubr.msk.f32.mxu0 %vm10389_vm0, %v10388_v2  ;;  %10037 = vmatpush3.msra.mxu1 %v8380_v57 }
0x2134   : > { %10004 = vmatpush3.xpose.msra.mxu0 %v6910_v60  ;;  %v9912_v29 = vpop.f32.mrf.mxu1  ;;  %10038 = vmatprep.subr.mxu1 %v10388_v2  ;;  %v8375_v60 = vld [vmem:[%s12651_s12 + $0xb0] sm:$0xff] }
0x2135   : > { %v9953_v56 = vpop.f32.mrf.mxu0  ;;  %10008 = vmatprep.subr.mxu0 %v10388_v2  ;;  %10039 = vmatpush3.msra.mxu1 %v8379_v46  ;;  %v8374_v29 = vld [vmem:[%s12651_s12 + $0xa8] sm:$0xff] }
0x2136   : > { %v6835_v26 = vpop.f32.mrf.mxu1  ;;  %10040 = vmatprep.subr.mxu1 %v10388_v2  ;;  %v8373_v56 = vld [vmem:[%s12651_s12 + $0xa0] sm:$0xff] }
0x2137   : > { %v6915_v4 = vpop.f32.mrf.mxu0  ;;  %10006 = vmatmul.mubr.f32.vlgmr.msra.gmra.mxu0 %v6830_v32  ;;  %10041 = vmatpush3.msra.mxu1 %v8378_v28  ;;  %v8376_v32 = vld [vmem:[%s12651_s12 + $0xb8] sm:$0xff] }
0x2138   : > { %10009 = vmatpush3.xpose.msra.mxu0 %v6915_v4  ;;  %v9915_v5 = vpop.f32.mrf.mxu1  ;;  %10010 = vmatprep.mubr.msk.f32.mxu0 %vm10389_vm0, %v10388_v2  ;;  %v8371_v4 = vld [vmem:[%s12651_s12 + $0x90] sm:$0xff]  ;;  %v8436_v28 = vld [vmem:[%s12655_s3 + $0x1f8] sm:$0xff] }
0x2139   : > { %v9956_v17 = vpop.f32.mrf.mxu0  ;;  %10013 = vmatprep.subr.mxu0 %v10388_v2  ;;  %10042 = vmatprep.subr.mxu1 %v10388_v2  ;;  %v8370_v5 = vld [vmem:[%s12651_s12 + $0x88] sm:$0xff] }
0x213a   : > { %10043 = vmatpush3.msra.mxu1 %v8377_v12  ;;  %v8435_v12 = vld [vmem:[%s12655_s3 + $0x1f0] sm:$0xff] }
0x213b   : > { %10011 = vmatmul.mubr.f32.vlgmr.msra.gmra.mxu0 %v6835_v26  ;;  %10044 = vmatprep.subr.mxu1 %v10388_v2  ;;  %v8372_v26 = vld [vmem:[%s12651_s12 + $0x98] sm:$0xff] }
0x213c   : > { %10015 = vmatprep.mubr.msk.f32.mxu0 %vm10389_vm0, %v10388_v2  ;;  %10045 = vmatpush3.msra.mxu1 %v8376_v32  ;;  %v8434_v32 = vld [vmem:[%s12655_s3 + $0x1e8] sm:$0xff] }
0x213d   : > { %10046 = vmatprep.subr.mxu1 %v10388_v2 }
0x213e   : > { %10047 = vmatpush3.msra.mxu1 %v8375_v60  ;;  %v8433_v60 = vld [vmem:[%s12655_s3 + $0x1e0] sm:$0xff] }
0x213f   : > { %10048 = vmatprep.subr.mxu1 %v10388_v2 }
0x2140   : > { %10049 = vmatpush3.msra.mxu1 %v8374_v29  ;;  %v8431_v29 = vld [vmem:[%s12655_s3 + $0x1d0] sm:$0xff] }
0x2141   : > { %10050 = vmatprep.subr.mxu1 %v10388_v2 }
0x2142   : > { %10051 = vmatpush3.msra.mxu1 %v8373_v56 }
0x2143   : > { %10052 = vmatprep.subr.mxu1 %v10388_v2 }
0x2144   : > { %10053 = vmatpush3.msra.mxu1 %v8372_v26 }
0x2145   : > { %10054 = vmatprep.subr.mxu1 %v10388_v2 }
0x2146   : > { %10055 = vmatpush3.msra.mxu1 %v8371_v4 }
0x2147   : > { %10056 = vmatprep.subr.mxu1 %v10388_v2 }
0x2148   : > { %10057 = vmatpush3.msra.mxu1 %v8370_v5 }
0x2149   : > { %10058 = vmatprep.subr.mxu1 %v10388_v2 }
0x214e   : > { %v6985_v6 = vpop.f32.mrf.mxu1 }
0x214f   : > { %10014 = vmatpush3.msra.mxu0 %v6985_v6 }
0x2150   : > { %v9991_v7 = vpop.f32.mrf.mxu1  ;;  %10018 = vmatprep.subr.mxu0 %v10388_v2 }
0x2152   : > { %v12272_v14 = vpop.f32.mrf.mxu1 }
0x2154   : > { %v9994_v11 = vpop.f32.mrf.mxu1 }
0x2156   : > { %v12274_v37 = vpop.f32.mrf.mxu1 }
0x2158   : > { %v9997_v19 = vpop.f32.mrf.mxu1 }
0x21f2   : > { %v7065_v40 = vpop.f32.mrf.mxu0 }
0x21f3   : > { %v7209_v34 = vmul.f32 0.088388346, %v7065_v40 }
0x21f4   : > { %v10002_v20 = vpop.f32.mrf.mxu0 }
0x21f5   : > { %v7212_v61 = vsel %vm10864_vm5, %v7209_v34, -1e+09 }
0x21f6   : > { %v7215_v1 = vsel %vm1447_vm1, %v7212_v61, -inf }
0x21f7   : > { %v7135_v13 = vpop.f32.mrf.mxu0  ;;  %7216 = vmax.xlane.f32.xlu0 %v7215_v1  ;;  %v8399_v1 = vld [vmem:[%s12652_s2 + $0x100] sm:$0xff] }
0x21f8   : > { %v7210_v45 = vmul.f32 0.088388346, %v7135_v13  ;;  %v8397_v13 = vld [vmem:[%s12652_s2 + $0xf0] sm:$0xff] }
0x21f9   : > { %v10007_v23 = vpop.f32.mrf.mxu0 }
0x21fa   : > { %v7213_v48 = vsel %vm10873_vm6, %v7210_v45, -1e+09  ;;  %v8396_v45 = vld [vmem:[%s12652_s2 + $0xe8] sm:$0xff]  ;;  %v8395_v23 = vld [vmem:[%s12652_s2 + $0xe0] sm:$0xff] }
0x21fb   : > { %v7205_v22 = vpop.f32.mrf.mxu0  ;;  %v7218_v27 = vsel %vm1447_vm1, %v7213_v48, -inf }
0x21fc   : > { %v7211_v10 = vmul.f32 0.088388346, %v7205_v22  ;;  %7219 = vmax.xlane.f32.xlu1 %v7218_v27  ;;  %v8392_v22 = vld [vmem:[%s12652_s2 + $0xc8] sm:$0xff]  ;;  %v8391_v27 = vld [vmem:[%s12652_s2 + $0xc0] sm:$0xff] }
0x21fd   : > { %v10012_v50 = vpop.f32.mrf.mxu0 }
0x21fe   : > { %v7214_v30 = vsel %vm10881_vm7, %v7211_v10, -1e+09  ;;  %v8390_v10 = vld [vmem:[%s12652_s2 + $0xb8] sm:$0xff]  ;;  %v8389_v50 = vld [vmem:[%s12652_s2 + $0xb0] sm:$0xff] }
0x21ff   : > { %v7221_v25 = vsel %vm1447_vm1, %v7214_v30, -inf }
0x2200   : > { %7222 = vmax.xlane.f32.xlu0 %v7221_v25  ;;  %v8387_v25 = vld [vmem:[%s12652_s2 + $0xa0] sm:$0xff] }
0x2280   : > { %v7217_v31 = vpop.xlane.xlu0 %7216 }
0x2281   : > { %v7224_v59 = vsub.f32 %v7212_v61, %v7217_v31  ;;  %v8400_v61 = vld [vmem:[%s12652_s2 + $0x108] sm:$0xff]  ;;  %v8386_v31 = vld [vmem:[%s12652_s2 + $0x98] sm:$0xff] }
0x2283   : > { %v7227_v3 = vmul.f32 1.442695, %v7224_v59  ;;  %v8385_v59 = vld [vmem:[%s12652_s2 + $0x90] sm:$0xff] }
0x2285   : > { %10252 = vpow2.f32 %v7227_v3  ;;  %v7220_v36 = vpop.xlane.xlu1 %7219  ;;  %v8402_v3 = vld [vmem:[%s12652_s2 + $0x118] sm:$0xff] }
0x2286   : > { %v7225_v39 = vsub.f32 %v7213_v48, %v7220_v36  ;;  %v8393_v48 = vld [vmem:[%s12652_s2 + $0xd0] sm:$0xff] }
0x2287   : > { %v8401_v36 = vld [vmem:[%s12652_s2 + $0x110] sm:$0xff] }
0x2288   : > { %v7229_v33 = vmul.f32 1.442695, %v7225_v39  ;;  %v8369_v39 = vld [vmem:[%s12651_s12 + $0x80] sm:$0xff] }
0x2289   : > { %v7223_v62 = vpop.xlane.xlu0 %7222  ;;  %10059 = vmatpush3.msra.mxu1 %v8369_v39  ;;  %v8409_v39 = vld [vmem:[%s12655_s3 + $0x120] sm:$0xff] }
0x228a   : > { %10254 = vpow2.f32 %v7229_v33  ;;  %v7226_v43 = vsub.f32 %v7214_v30, %v7223_v62  ;;  %v8388_v30 = vld [vmem:[%s12652_s2 + $0xa8] sm:$0xff]  ;;  %7727 = vmatprep.subr.mxu1 %v8436_v28 }
0x228b   : > { %v8463_v28 = vld [vmem:[%s12656_s16 + $0x1c8] sm:$0xff] }
0x228c   : > { %v7231_v47 = vmul.f32 1.442695, %v7226_v43 }
0x228e   : > { %10256 = vpow2.f32 %v7231_v47 }
0x2292   : > { %v10253_v41 = vpop.eup %10252 }
0x2293   : > { %v7233_v58 = vsel %vm1447_vm1, %v10253_v41, 0.0 }
0x2294   : > { %7234 = vadd.xlane.f32.xlu1 %v7233_v58 }
0x2297   : > { %v12286_v51 = vpop.eup %10254 }
0x2298   : > { %v7236_v44 = vsel %vm1447_vm1, %v12286_v51, 0.0 }
0x2299   : > { %7237 = vadd.xlane.f32.xlu0 %v7236_v44 }
0x229b   : > { %v12290_v16 = vpop.eup %10256 }
0x229c   : > { %v7239_v49 = vsel %vm1447_vm1, %v12290_v16, 0.0 }
0x229d   : > { %7240 = vadd.xlane.f32.xlu1 %v7239_v49 }
0x231d   : > { %v7235_v17 = vpop.xlane.xlu1 %7234 }
0x231e   : > { %10258 = vrcp.f32 %v7235_v17 }
0x2322   : > { %v7238_v6 = vpop.xlane.xlu0 %7237 }
0x2323   : > { %10260 = vrcp.f32 %v7238_v6 }
0x2326   : > { %v7241_v7 = vpop.xlane.xlu1 %7240 }
0x2327   : > { %10262 = vrcp.f32 %v7241_v7 }
0x232b   : > { %v10259_v11 = vpop.eup %10258 }
0x232c   : > { %v7248_v19 = vmul.f32 %v10259_v11, %v10253_v41 }
0x232e   : > { %10016 = vmatmul.mubr.msk.f32.vlgmr.msra.gmra.mxu0 %vm1447_vm1, %v7248_v19 }
0x232f   : > { %10019 = vmatpush3.msra.mxu0 %v12272_v14  ;;  %10020 = vmatprep.mubr.msk.f32.mxu0 %vm10389_vm0, %v10388_v2 }
0x2330   : > { %v10261_v40 = vpop.eup %10260  ;;  %10023 = vmatprep.subr.mxu0 %v10388_v2 }
0x2331   : > { %v7249_v34 = vmul.f32 %v10261_v40, %v12286_v51 }
0x2333   : > { %10021 = vmatmul.mubr.msk.f32.vlgmr.msra.gmra.mxu0 %vm1447_vm1, %v7249_v34  ;;  %v8430_v34 = vld [vmem:[%s12655_s3 + $0x1c8] sm:$0xff] }
0x2334   : > { %v10263_v20 = vpop.eup %10262  ;;  %10024 = vmatpush3.msra.mxu0 %v12274_v37  ;;  %10025 = vmatprep.mubr.msk.f32.mxu0 %vm10389_vm0, %v10388_v2  ;;  %v8398_v37 = vld [vmem:[%s12652_s2 + $0xf8] sm:$0xff] }
0x2335   : > { %7604 = vmatprep.subr.mxu0 %v10388_v2  ;;  %v7250_v14 = vmul.f32 %v10263_v20, %v12290_v16  ;;  %v8429_v20 = vld [vmem:[%s12655_s3 + $0x1c0] sm:$0xff] }
0x2337   : > { %10026 = vmatmul.mubr.msk.f32.vlgmr.msra.gmra.mxu0 %vm1447_vm1, %v7250_v14  ;;  %v8428_v14 = vld [vmem:[%s12655_s3 + $0x1b8] sm:$0xff] }
0x2338   : > { %7605 = vmatpush1.msra.mxu0 %v8400_v61  ;;  %8478 = vmatprep.mubr.msk.f32.mxu0 %vm2540_vm8, %v11989_v8  ;;  %v8394_v8 = vld [vmem:[%s12652_s2 + $0xd8] sm:$0xff]  ;;  %v8427_v61 = vld [vmem:[%s12655_s3 + $0x1b0] sm:$0xff]  ;;  %s1406_s2 = sand.u32 1, %s10333_s10  }
0x2339   : > { %7606 = vmatprep.subr.mxu0 %v10388_v2 }
0x233a   : > { %7607 = vmatpush1.msra.mxu0 %v8399_v1  ;;  %v8426_v1 = vld [vmem:[%s12655_s3 + $0x1a8] sm:$0xff] }
0x233b   : > { %7608 = vmatprep.subr.mxu0 %v10388_v2 }
0x233c   : > { %7609 = vmatpush1.msra.mxu0 %v8398_v37  ;;  %v8425_v37 = vld [vmem:[%s12655_s3 + $0x1a0] sm:$0xff] }
0x233d   : > { %7610 = vmatprep.subr.mxu0 %v10388_v2 }
0x233e   : > { %7611 = vmatpush1.msra.mxu0 %v8397_v13  ;;  %v8424_v13 = vld [vmem:[%s12655_s3 + $0x198] sm:$0xff] }
0x233f   : > { %7612 = vmatprep.subr.mxu0 %v10388_v2 }
0x2340   : > { %7613 = vmatpush1.msra.mxu0 %v8396_v45  ;;  %v8423_v45 = vld [vmem:[%s12655_s3 + $0x190] sm:$0xff] }
0x2341   : > { %7614 = vmatprep.subr.mxu0 %v10388_v2 }
0x2342   : > { %7615 = vmatpush1.msra.mxu0 %v8395_v23  ;;  %v8422_v23 = vld [vmem:[%s12655_s3 + $0x188] sm:$0xff] }
0x2343   : > { %7616 = vmatprep.subr.mxu0 %v10388_v2 }
0x2344   : > { %7617 = vmatpush1.msra.mxu0 %v8394_v8  ;;  %v8421_v8 = vld [vmem:[%s12655_s3 + $0x180] sm:$0xff] }
0x2345   : > { %7618 = vmatprep.subr.mxu0 %v10388_v2 }
0x2346   : > { %7619 = vmatpush1.msra.mxu0 %v8393_v48  ;;  %v8420_v48 = vld [vmem:[%s12655_s3 + $0x178] sm:$0xff] }
0x2347   : > { %7620 = vmatprep.subr.mxu0 %v10388_v2 }
0x2348   : > { %7621 = vmatpush1.msra.mxu0 %v8392_v22  ;;  %v8419_v22 = vld [vmem:[%s12655_s3 + $0x170] sm:$0xff] }
0x2349   : > { %7622 = vmatprep.subr.mxu0 %v10388_v2 }
0x234a   : > { %7623 = vmatpush1.msra.mxu0 %v8391_v27  ;;  %v8418_v27 = vld [vmem:[%s12655_s3 + $0x168] sm:$0xff] }
0x234b   : > { %7624 = vmatprep.subr.mxu0 %v10388_v2 }
0x234c   : > { %7625 = vmatpush1.msra.mxu0 %v8390_v10  ;;  %v8417_v10 = vld [vmem:[%s12655_s3 + $0x160] sm:$0xff] }
0x234d   : > { %7626 = vmatprep.subr.mxu0 %v10388_v2 }
0x234e   : > { %7627 = vmatpush1.msra.mxu0 %v8389_v50  ;;  %v8416_v50 = vld [vmem:[%s12655_s3 + $0x158] sm:$0xff] }
0x234f   : > { %7628 = vmatprep.subr.mxu0 %v10388_v2 }
0x2350   : > { %7629 = vmatpush1.msra.mxu0 %v8388_v30  ;;  %v8415_v30 = vld [vmem:[%s12655_s3 + $0x150] sm:$0xff] }
0x2351   : > { %7630 = vmatprep.subr.mxu0 %v10388_v2 }
0x2352   : > { %7631 = vmatpush1.msra.mxu0 %v8387_v25  ;;  %v8414_v25 = vld [vmem:[%s12655_s3 + $0x148] sm:$0xff] }
0x2353   : > { %7632 = vmatprep.subr.mxu0 %v10388_v2 }
0x2354   : > { %7633 = vmatpush1.msra.mxu0 %v8386_v31  ;;  %v8413_v31 = vld [vmem:[%s12655_s3 + $0x140] sm:$0xff] }
0x2355   : > { %7634 = vmatprep.subr.mxu0 %v10388_v2 }
0x2356   : > { %7635 = vmatpush1.msra.mxu0 %v8385_v59  ;;  %v8412_v59 = vld [vmem:[%s12655_s3 + $0x138] sm:$0xff] }
0x2357   : > { %7664 = vmatprep.subr.mxu0 %v10388_v2 }
0x2358   : > { %7665 = vmatpush2.msra.mxu0 %v8402_v3  ;;  %v8411_v3 = vld [vmem:[%s12655_s3 + $0x130] sm:$0xff] }
0x2359   : > { %7666 = vmatprep.subr.mxu0 %v10388_v2 }
0x235a   : > { %7667 = vmatpush2.msra.mxu0 %v8401_v36  ;;  %v8410_v36 = vld [vmem:[%s12655_s3 + $0x128] sm:$0xff] }
0x235b   : > { %7669 = vmatmul.mubr.f32.vlgmr.msra.gmra.mxu0 %v11996_v9 }
0x23ee   : > { %v7320_v33 = vpop.f32.mrf.mxu0 }
0x23ef   : > { %10061 = vmatmul.mubr.f32.vlgmr.msra.gmra.mxu1 %v7320_v33  ;;  %v8408_v33 = vld [vmem:[%s12655_s3 + $0x118] sm:$0xff] }
0x23f0   : > { %v10017_v62 = vpop.f32.mrf.mxu0  ;;  %10063 = vmatprep.mubr.msk.f32.mxu1 %vm10389_vm0, %v10388_v2  ;;  %7728 = vmatpush1.msra.mxu1 %v8435_v12  ;;  %v8447_v12 = vld [vmem:[%s12656_s16 + $0x148] sm:$0xff] }
0x23f1   : > { %7729 = vmatprep.subr.mxu1 %v8434_v32  ;;  %v8407_v62 = vld [vmem:[%s12655_s3 + $0x110] sm:$0xff]  ;;  %v8462_v32 = vld [vmem:[%s12656_s16 + $0x1c0] sm:$0xff] }
0x23f2   : > { %7730 = vmatpush1.msra.mxu1 %v8433_v60  ;;  %v8446_v60 = vld [vmem:[%s12656_s16 + $0x140] sm:$0xff] }
0x23f3   : > { %v7393_v43 = vpop.f32.mrf.mxu0 }
0x23f4   : > { %10064 = vmatmul.mubr.f32.gmra.mxu1 %v7393_v43  ;;  %v8406_v43 = vld [vmem:[%s12655_s3 + $0x108] sm:$0xff] }
0x23f5   : > { %v10022_v47 = vpop.f32.mrf.mxu0  ;;  %10066 = vmatprep.mubr.msk.f32.mxu1 %vm10389_vm0, %v10388_v2 }
0x23f6   : > { %v8405_v47 = vld [vmem:[%s12655_s3 + $0x100] sm:$0xff] }
0x23f7   : > { %v7466_v41 = vpop.f32.mrf.mxu0 }
0x23f8   : > { %10067 = vmatmul.mubr.f32.gmra.mxu1 %v7466_v41  ;;  %v8469_v41 = vld [vmem:[%s12656_s16 + $0x1f8] sm:$0xff] }
0x23f9   : > { %v10027_v58 = vpop.f32.mrf.mxu0  ;;  %7791 = vmatprep.mubr.f32.mxu1 %v10388_v2  ;;  %9077 = vmatprep.subr.mxu0 %v8469_v41 }
0x23fa   : > { %v8453_v58 = vld [vmem:[%s12656_s16 + $0x178] sm:$0xff] }
0x23fb   : > { %9078 = vmatpush3.msra.mxu0 %v8453_v58  ;;  %v8457_v58 = vld [vmem:[%s12656_s16 + $0x198] sm:$0xff] }
0x241b   : > { %v12381_v9 = vpop.f32.mrf.mxu0 }
0x241d   : > { %v7672_v51 = vpop.f32.mrf.mxu0 }
0x241e   : > { %v8468_v51 = vld [vmem:[%s12656_s16 + $0x1f0] sm:$0xff] }
0x241f   : > { %9079 = vmatprep.subr.mxu0 %v8468_v51  ;;  %v8456_v51 = vld [vmem:[%s12656_s16 + $0x190] sm:$0xff] }
0x24af   : > { %v7536_v44 = vpop.f32.mrf.mxu1 }
0x24b0   : > { %v7550_v16 = vadd.f32 %v7536_v44, %v12195_v24  ;;  %v8432_v24 = vld [vmem:[%s12655_s3 + $0x1d8] sm:$0xff]  ;;  %v8452_v44 = vld [vmem:[%s12656_s16 + $0x170] sm:$0xff]  ;;  %s10069_s3 = smul.u32 24, %s1406_s2 }
0x24b1   : > { %v10062_v49 = vpop.f32.mrf.mxu1  ;;  %7731 = vmatprep.subr.mxu1 %v8432_v24  ;;  %9080 = vmatpush3.msra.mxu0 %v8452_v44  ;;  %v8461_v24 = vld [vmem:[%s12656_s16 + $0x1b8] sm:$0xff]  ;;  %v8440_v44 = vld [vmem:[%s12656_s16 + $0x110] sm:$0xff] }
0x24b2   : > { %7553 = vadd.xlane.f32.xlu0 %v7550_v16  ;;  %7732 = vmatpush1.msra.mxu1 %v8431_v29  ;;  %v8451_v49 = vld [vmem:[%s12656_s16 + $0x168] sm:$0xff]  ;;  %v8445_v29 = vld [vmem:[%s12656_s16 + $0x138] sm:$0xff]  ;;  %s1408_s5 = scalar_lea.vmem [#allocation2], %s10069_s3  ;;  %s12500_s3 = scalar_lea.sflag [#allocation3], %s1406_s2 }
0x24b3   : > { %7733 = vmatprep.subr.mxu1 %v8430_v34  ;;  %s7976_s8 = sshll.u32 %s1408_s5, 4  ;;  %s12497_s8 = int_to_ptr.vmem [resolvable:$true] %s7976_s8 }
0x24b4   : > { %v7541_v54 = vpop.f32.mrf.mxu1  ;;  %7734 = vmatpush1.msra.mxu1 %v8429_v20  ;;  %s10281_s12 = scalar_lea.vmem %s12497_s8, 384 }
0x24b5   : > { %v7551_v35 = vadd.f32 %v7541_v54, %v12207_v53  ;;  %7735 = vmatprep.subr.mxu1 %v8428_v14  ;;  %v8466_v54 = vld [vmem:[%s12656_s16 + $0x1e0] sm:$0xff]  ;;  %p10282_p11 = scmp.ne.s32.totalorder %s12497_s8, %s10281_s12 }
0x24b6   : > { %v10065_v38 = vpop.f32.mrf.mxu1  ;;  %7736 = vmatpush1.msra.mxu1 %v8427_v61 }
0x24b7   : > { %7555 = vadd.xlane.f32.xlu1 %v7551_v35  ;;  %7737 = vmatprep.subr.mxu1 %v8426_v1  ;;  %v8465_v38 = vld [vmem:[%s12656_s16 + $0x1d8] sm:$0xff]  ;;  %p10283_p12 = pnand %p10282_p11, %p10669_p5 }
0x24b8   : > { %v7546_v42 = vpop.f32.mrf.mxu1  ;;  %7738 = vmatpush1.msra.mxu1 %v8425_v37 }
0x24b9   : > { %v7552_v57 = vadd.f32 %v7546_v42, %v12218_v0  ;;  %7739 = vmatprep.subr.mxu1 %v8424_v13  ;;  %v8449_v42 = vld [vmem:[%s12656_s16 + $0x158] sm:$0xff]  ;;  %v7681_v13 = vrot.slane %v12381_v9, %v11034_v15  ;;  %p10284_p13 = pneg %p10283_p12 }
0x24ba   : > { %v10068_v46 = vpop.f32.mrf.mxu1  ;;  %7740 = vmatpush1.msra.mxu1 %v8423_v45 }
0x24bb   : > { %7557 = vadd.xlane.f32.xlu0 %v7552_v57  ;;  %7741 = vmatprep.subr.mxu1 %v8422_v23  ;;  %v8448_v46 = vld [vmem:[%s12656_s16 + $0x150] sm:$0xff]  ;;  %v8476_v23 = vld [vmem:[%s12657_s6 + $0x1] ss:$0 sm:$0xff]  ;;  %s10072_s6 = smul.u32 384, %s10652_s0  ;;  %s10393_s0 = smov [#allocation2]  }
0x24bc   : > { %7742 = vmatpush1.msra.mxu1 %v8421_v8  ;;  %v7689_v8 = vrot.slane %v7681_v13, %v11034_v15 }
0x24bd   : > { %7743 = vmatprep.subr.mxu1 %v8420_v48  ;;  %s12495_s9 = scalar_lea.hbm %s10629_s4, %s10072_s6 }
0x24be   : > { %7744 = vmatpush1.msra.mxu1 %v8419_v22  ;;  %v7682_v22 = vcombine.high %v7681_v13, %v7681_v13 }
0x24bf   : > { %7745 = vmatprep.subr.mxu1 %v8418_v27  ;;  %v8477_v27 = vld [vmem:[%s12658_s13 + $0x1] ss:$0 sm:$0xff]  ;;  %s10285_s13 = sshll.u32 %s10393_s0, 4  ;;  %s10286_s13 = int_to_ptr.vmem [resolvable:$false] %s10285_s13 }
0x24c0   : > { %7746 = vmatpush1.msra.mxu1 %v8417_v10  ;;  %s10287_s6 = scalar_lea.vmem %s10286_s13, 768  ;;  %p10288_p0 = scmp.lt.s32.totalorder %s12497_s8, %s10286_s13 }
0x24c1   : > { %7747 = vmatprep.subr.mxu1 %v8416_v50  ;;  %p10289_p1 = scmp.lt.s32.totalorder %s10287_s6, %s10281_s12 }
0x24c2   : > { %7748 = vmatpush1.msra.mxu1 %v8415_v30  ;;  %v7701_v30 = vrot.slane %v7689_v8, %v10857_v18 }
0x24c3   : > { %7749 = vmatprep.subr.mxu1 %v8414_v25  ;;  %p10290_p2 = por %p10289_p1, %p10288_p0 }
0x24c4   : > { %7750 = vmatpush1.msra.mxu1 %v8413_v31  ;;  %v7696_v31 = vrot.slane %v7682_v22, %v11034_v15 }
0x24c5   : > { %7751 = vmatprep.subr.mxu1 %v8412_v59  ;;  %p10291_p3 = pnand %p10290_p2, %p10284_p13 }
0x24c6   : > { %7752 = vmatpush1.msra.mxu1 %v8411_v3 }
0x24c7   : > { %7753 = vmatprep.subr.mxu1 %v8410_v36 }
0x24c8   : > { %7754 = vmatpush1.msra.mxu1 %v8409_v39 }
0x24c9   : > { %7755 = vmatprep.subr.mxu1 %v8408_v33  ;;  %v7705_v33 = vrot.slane %v7696_v31, %v10857_v18 }
0x24ca   : > { %7756 = vmatpush1.msra.mxu1 %v8407_v62 }
0x24cb   : > { %7757 = vmatprep.subr.mxu1 %v8406_v43 }
0x24cc   : > { %7758 = vmatpush1.msra.mxu1 %v8405_v47 }
0x253b   : > { %v7554_v53 = vpop.xlane.xlu0 %7553 }
0x253c   : > { %v7559_v56 = vmul.f32 0.0078125, %v7554_v53  ;;  %v8460_v53 = vld [vmem:[%s12656_s16 + $0x1b0] sm:$0xff] }
0x253e   : > { %v12392_v26 = vsub.f32 %v7550_v16, %v7559_v56  ;;  %v8467_v16 = vld [vmem:[%s12656_s16 + $0x1e8] sm:$0xff]  ;;  %v8444_v56 = vld [vmem:[%s12656_s16 + $0x130] sm:$0xff] }
0x253f   : > { %9081 = vmatprep.subr.mxu0 %v8467_v16  ;;  %v8455_v16 = vld [vmem:[%s12656_s16 + $0x188] sm:$0xff] }
0x2540   : > { %v7556_v0 = vpop.xlane.xlu1 %7555  ;;  %v7565_v4 = vmul.f32 %v12392_v26, %v12392_v26  ;;  %9082 = vmatpush3.msra.mxu0 %v8451_v49  ;;  %v8439_v49 = vld [vmem:[%s12656_s16 + $0x108] sm:$0xff] }
0x2541   : > { %v7560_v5 = vmul.f32 0.0078125, %v7556_v0  ;;  %9083 = vmatprep.subr.mxu0 %v8466_v54  ;;  %v8459_v0 = vld [vmem:[%s12656_s16 + $0x1a8] sm:$0xff]  ;;  %v8454_v54 = vld [vmem:[%s12656_s16 + $0x180] sm:$0xff] }
0x2542   : > { %7568 = vadd.xlane.f32.xlu1 %v7565_v4  ;;  %v8443_v4 = vld [vmem:[%s12656_s16 + $0x128] sm:$0xff] }
0x2543   : > { %v12396_v17 = vsub.f32 %v7551_v35, %v7560_v5  ;;  %v8450_v35 = vld [vmem:[%s12656_s16 + $0x160] sm:$0xff] }
0x2544   : > { %v7558_v6 = vpop.xlane.xlu0 %7557  ;;  %9084 = vmatpush3.msra.mxu0 %v8450_v35  ;;  %v8458_v5 = vld [vmem:[%s12656_s16 + $0x1a0] sm:$0xff] }
0x2545   : > { %v7561_v7 = vmul.f32 0.0078125, %v7558_v6  ;;  %v7566_v11 = vmul.f32 %v12396_v17, %v12396_v17  ;;  %9085 = vmatprep.subr.mxu0 %v8465_v38  ;;  %v8442_v6 = vld [vmem:[%s12656_s16 + $0x120] sm:$0xff] }
0x2546   : > { %9086 = vmatpush3.msra.mxu0 %v8449_v42  ;;  %v8438_v35 = vld [vmem:[%s12656_s16 + $0x100] sm:$0xff] }
0x2547   : > { %v12400_v19 = vsub.f32 %v7552_v57, %v7561_v7  ;;  %7570 = vadd.xlane.f32.xlu0 %v7566_v11  ;;  %v8464_v57 = vld [vmem:[%s12656_s16 + $0x1d0] sm:$0xff] }
0x2548   : > { %9087 = vmatprep.subr.mxu0 %v8464_v57 }
0x2549   : > { %v7567_v40 = vmul.f32 %v12400_v19, %v12400_v19  ;;  %9088 = vmatpush3.msra.mxu0 %v8448_v46 }
0x254a   : > { %9089 = vmatprep.subr.mxu0 %v8463_v28 }
0x254b   : > { %7572 = vadd.xlane.f32.xlu1 %v7567_v40  ;;  %9090 = vmatpush3.msra.mxu0 %v8447_v12 }
0x254c   : > { %9091 = vmatprep.subr.mxu0 %v8462_v32 }
0x254d   : > { %9092 = vmatpush3.msra.mxu0 %v8446_v60 }
0x254e   : > { %9093 = vmatprep.subr.mxu0 %v8461_v24 }
0x254f   : > { %9094 = vmatpush3.msra.mxu0 %v8445_v29 }
0x2550   : > { %9095 = vmatprep.subr.mxu0 %v8460_v53 }
0x2551   : > { %9096 = vmatpush3.msra.mxu0 %v8444_v56 }
0x2552   : > { %9097 = vmatprep.subr.mxu0 %v8459_v0 }
0x2553   : > { %9098 = vmatpush3.msra.mxu0 %v8443_v4 }
0x2554   : > { %9099 = vmatprep.subr.mxu0 %v8458_v5 }
0x2555   : > { %9100 = vmatpush3.msra.mxu0 %v8442_v6 }
0x2556   : > { %9101 = vmatprep.subr.mxu0 %v8457_v58 }
0x25cb   : > { %v7569_v7 = vpop.xlane.xlu1 %7568 }
0x25cc   : > { %v7574_v11 = vmul.f32 0.0078125, %v7569_v7 }
0x25ce   : > { %v7577_v40 = vadd.f32 1e-05, %v7574_v11 }
0x25d0   : > { %10264 = vrsqrt.f32 %v7577_v40  ;;  %v7571_v34 = vpop.xlane.xlu0 %7570 }
0x25d1   : > { %v7575_v20 = vmul.f32 0.0078125, %v7571_v34  ;;  %v8479_v34 = vld [vmem:[%s10614_s25 + $0x1] ss:$0 sm:$0xff] }
0x25d3   : > { %v7578_v14 = vadd.f32 1e-05, %v7575_v20 }
0x25d4   : > { %v7573_v61 = vpop.xlane.xlu1 %7572 }
0x25d5   : > { %10266 = vrsqrt.f32 %v7578_v14  ;;  %v7576_v1 = vmul.f32 0.0078125, %v7573_v61 }
0x25d7   : > { %v7579_v37 = vadd.f32 1e-05, %v7576_v1 }
0x25d9   : > { %10268 = vrsqrt.f32 %v7579_v37 }
0x25dd   : > { %v10265_v45 = vpop.eup %10264 }
0x25de   : > { %v7583_v48 = vmul.f32 %v10265_v45, %v12392_v26  ;;  %v7697_v26 = vcombine.high %v7689_v8, %v7689_v8 }
0x25e0   : > { %v7592_v10 = vmul.f32 %v8476_v23, %v7583_v48  ;;  %v7709_v47 = vrot.slane %v7697_v26, %v10857_v18 }
0x25e2   : > { %v10267_v50 = vpop.eup %10266  ;;  %v7601_v25 = vadd.f32 %v8477_v27, %v7592_v10 }
0x25e3   : > { %v7584_v59 = vmul.f32 %v10267_v50, %v12396_v17 }
0x25e4   : > { %v12463_v3 = vadd.f32 %v7701_v30, %v7601_v25 }
0x25e5   : > { %v7593_v9 = vmul.f32 %v8476_v23, %v7584_v59 }
0x25e6   : > { %v10269_v36 = vpop.eup %10268  ;;  %7792 = vmatmul.mubr.f32.vlgmr.msra.gmra.mxu1 %v12463_v3 }
0x25e7   : > { %7797 = vmatprep.mubr.f32.mxu1 %v10388_v2  ;;  %v7602_v39 = vadd.f32 %v8477_v27, %v7593_v9  ;;  %v7585_v15 = vmul.f32 %v10269_v36, %v12400_v19  ;;  %v8441_v19 = vld [vmem:[%s12656_s16 + $0x118] sm:$0xff] }
0x25e8   : > { %9102 = vmatpush3.msra.mxu0 %v8441_v19 }
0x25e9   : > { %v12469_v62 = vadd.f32 %v7705_v33, %v7602_v39  ;;  %v7594_v17 = vmul.f32 %v8476_v23, %v7585_v15  ;;  %9103 = vmatprep.subr.mxu0 %v8456_v51 }
0x25ea   : > { %9104 = vmatpush3.msra.mxu0 %v8440_v44 }
0x25eb   : > { %7798 = vmatmul.mubr.f32.gmra.mxu1 %v12469_v62  ;;  %v7603_v43 = vadd.f32 %v8477_v27, %v7594_v17  ;;  %9105 = vmatprep.subr.mxu0 %v8455_v16 }
0x25ec   : > { %7803 = vmatprep.mubr.f32.mxu1 %v10388_v2  ;;  %9106 = vmatpush3.msra.mxu0 %v8439_v49  ;;  %v8437_v2 = vld [vmem:[%s12659_s14 + $0x2] sm:$0x3] }
0x25ed   : > { %v7715_v41 = vadd.f32 %v7709_v47, %v7603_v43  ;;  %9107 = vmatprep.subr.mxu0 %v8454_v54  ;;  %v7720_v38 = vrot.slane %v8437_v2, %v10857_v18  ;;  %v7724_v42 = vrot.slane %v8437_v2, %v11072_v55  ;;  %v8480_v54 = vld [vmem:[%s10619_s21 + $0x1] ss:$0 sm:$0xff] }
0x25ee   : > { %9108 = vmatpush3.msra.mxu0 %v8438_v35  ;;  %v8481_v2 = vld [vmem:[%s10624_s17 + $0x1] ss:$0 sm:$0xff] }
0x25ef   : > { %7804 = vmatmul.mubr.f32.gmra.mxu1 %v7715_v41 }
0x26a6   : > { %v7793_v57 = vpop.f32.mrf.mxu1 }
0x26a7   : > { %v7794_v46 = vadd.f32 %v7793_v57, %v7720_v38 }
0x26a8   : > { %v7795_v28 = vpop.f32.mrf.mxu1 }
0x26a9   : > { %v7796_v12 = vadd.f32 %v7795_v28, %v7724_v42  ;;  %v7810_v24 = vmax.f32 %v7794_v46, 0.0 }
0x26ab   : > { %v7811_v32 = vmax.f32 %v7796_v12, 0.0  ;;  %v7799_v60 = vpop.f32.mrf.mxu1 }
0x26ac   : > { %v7800_v29 = vadd.f32 %v7799_v60, %v7720_v38 }
0x26ad   : > { %v7801_v53 = vpop.f32.mrf.mxu1  ;;  %7886 = vmatprep.mubr.f32.mxu0 %v7811_v32 }
0x26ae   : > { %v7802_v56 = vadd.f32 %v7801_v53, %v7724_v42  ;;  %7887 = vmatmul.mubr.f32.vlgmr.msra.gmra.mxu0 %v7810_v24  ;;  %v7812_v5 = vmax.f32 %v7800_v29, 0.0 }
0x26af   : > { %v7805_v0 = vpop.f32.mrf.mxu1 }
0x26b0   : > { %v7813_v4 = vmax.f32 %v7802_v56, 0.0  ;;  %v7806_v6 = vadd.f32 %v7805_v0, %v7720_v38 }
0x26b1   : > { %v7807_v18 = vpop.f32.mrf.mxu1 }
0x26b2   : > { %v7808_v7 = vadd.f32 %v7807_v18, %v7724_v42  ;;  %7891 = vmatprep.mubr.f32.mxu0 %v7813_v4  ;;  %v7814_v11 = vmax.f32 %v7806_v6, 0.0 }
0x26b3   : > { %7892 = vmatmul.mubr.f32.gmra.mxu0 %v7812_v5 }
0x26b4   : > { %v7815_v55 = vmax.f32 %v7808_v7, 0.0 }
0x26b6   : > { %7896 = vmatprep.mubr.f32.mxu0 %v7815_v55 }
0x26b7   : > { %7897 = vmatmul.mubr.f32.gmra.mxu0 %v7814_v11 }
0x276e   : > { %v9109_v40 = vpop.f32.mrf.mxu0 }
0x2770   : > { %v9110_v20 = vpop.f32.mrf.mxu0 }
0x2771   : > { %v9111_v14 = vadd.f32 %v9110_v20, %v9109_v40 }
0x2773   : > { %v7889_v61 = vadd.f32 %v9111_v14, %v8479_v34  ;;  %v9112_v1 = vpop.f32.mrf.mxu0 }
0x2775   : > { %v9113_v37 = vpop.f32.mrf.mxu0  ;;  %v7902_v13 = vadd.f32 %v7889_v61, %v12463_v3 }
0x2776   : > { %v9114_v45 = vadd.f32 %v9113_v37, %v9112_v1 }
0x2777   : > { %v9115_v23 = vpop.f32.mrf.mxu0  ;;  %7905 = vadd.xlane.f32.xlu0 %v7902_v13 }
0x2778   : > { %v7894_v8 = vadd.f32 %v9114_v45, %v8479_v34 }
0x2779   : > { %v9116_v48 = vpop.f32.mrf.mxu0 }
0x277a   : > { %v9117_v22 = vadd.f32 %v9116_v48, %v9115_v23  ;;  %v7903_v27 = vadd.f32 %v7894_v8, %v12469_v62 }
0x277c   : > { %v7899_v10 = vadd.f32 %v9117_v22, %v8479_v34  ;;  %7907 = vadd.xlane.f32.xlu1 %v7903_v27 }
0x277e   : > { %v7904_v50 = vadd.f32 %v7899_v10, %v7715_v41 }
0x2780   : > { %7909 = vadd.xlane.f32.xlu0 %v7904_v50 }
0x2800   : > { %v7906_v30 = vpop.xlane.xlu0 %7905 }
0x2801   : > { %v7911_v25 = vmul.f32 0.0078125, %v7906_v30 }
0x2803   : > { %v7914_v31 = vsub.f32 %v7902_v13, %v7911_v25 }
0x2805   : > { %v7908_v59 = vpop.xlane.xlu1 %7907  ;;  %v7917_v9 = vmul.f32 %v7914_v31, %v7914_v31 }
0x2806   : > { %v7912_v36 = vmul.f32 0.0078125, %v7908_v59 }
0x2807   : > { %7920 = vadd.xlane.f32.xlu1 %v7917_v9 }
0x2808   : > { %v7915_v3 = vsub.f32 %v7903_v27, %v7912_v36 }
0x2809   : > { %v7910_v26 = vpop.xlane.xlu0 %7909 }
0x280a   : > { %v7913_v39 = vmul.f32 0.0078125, %v7910_v26  ;;  %v7918_v33 = vmul.f32 %v7915_v3, %v7915_v3 }
0x280c   : > { %v7916_v15 = vsub.f32 %v7904_v50, %v7913_v39  ;;  %7922 = vadd.xlane.f32.xlu0 %v7918_v33 }
0x280e   : > { %v7919_v17 = vmul.f32 %v7916_v15, %v7916_v15 }
0x2810   : > { %7924 = vadd.xlane.f32.xlu1 %v7919_v17 }
0x2890   : > { %v7921_v62 = vpop.xlane.xlu1 %7920 }
0x2891   : > { %v7926_v43 = vmul.f32 0.0078125, %v7921_v62 }
0x2893   : > { %v7929_v47 = vadd.f32 1e-05, %v7926_v43 }
0x2895   : > { %10270 = vrsqrt.f32 %v7929_v47  ;;  %v7923_v41 = vpop.xlane.xlu0 %7922 }
0x2896   : > { %v7927_v58 = vmul.f32 0.0078125, %v7923_v41 }
0x2898   : > { %v7930_v19 = vadd.f32 1e-05, %v7927_v58 }
0x2899   : > { %v7925_v51 = vpop.xlane.xlu1 %7924 }
0x289a   : > { %10272 = vrsqrt.f32 %v7930_v19  ;;  %v7928_v44 = vmul.f32 0.0078125, %v7925_v51 }
0x289c   : > { %v7931_v16 = vadd.f32 1e-05, %v7928_v44 }
0x289e   : > { %10274 = vrsqrt.f32 %v7931_v16 }
0x28a2   : > { %v10271_v49 = vpop.eup %10270 }
0x28a3   : > { %v7935_v35 = vmul.f32 %v10271_v49, %v7914_v31 }
0x28a5   : > { %v7944_v38 = vmul.f32 %v8480_v54, %v7935_v35 }
0x28a7   : > { %v10273_v42 = vpop.eup %10272  ;;  %v7953_v57 = vadd.f32 %v8481_v2, %v7944_v38 }
0x28a8   : > { %v7936_v46 = vmul.f32 %v10273_v42, %v7915_v3 }
0x28a9   : > { %v7956_v28 = vmul.f32 %v7953_v57, %v11501_v21 }
0x28aa   : > { %v7945_v12 = vmul.f32 %v8480_v54, %v7936_v46 }
0x28ab   : > { %v10275_v32 = vpop.eup %10274  ;;  %7959 = vst [vmem:[%s1408_s5] sm:$0xff] %v7956_v28 }
0x28ac   : > { %v7954_v60 = vadd.f32 %v8481_v2, %v7945_v12  ;;  %v7937_v24 = vmul.f32 %v10275_v32, %v7916_v15 }
0x28ae   : > { %v7946_v29 = vmul.f32 %v8480_v54, %v7937_v24  ;;  %v7957_v53 = vmul.f32 %v7954_v60, %v11510_v52 }
0x28b0   : > { %v7955_v56 = vadd.f32 %v8481_v2, %v7946_v29  ;;  %7960 = vst [vmem:[%s1408_s5 + $0x8] sm:$0xff] %v7957_v53 }
0x28b2   : > { %v7958_v21 = vmul.f32 %v7955_v56, %v11519_v63 }
0x28b4   : > { %7961 = vst [vmem:[%s1408_s5 + $0x10] sm:$0xff] %v7958_v21 }
0x28b5   : > { %10294 = shalt.err (!%p10291_p3)
}
0x28b6   : > { %s10295_s5 = scalar_lea.hbm %s12495_s9, 384  ;;  %s10299_s2 = scalar_lea.hbm %s10629_s4, 768 }
0x28b7   : > { %p10296_p4 = scmp.ne.s32.totalorder %s12495_s9, %s10295_s5  ;;  %p10300_p9 = scmp.lt.s32.totalorder %s12495_s9, %s10629_s4 }
0x28b8   : > { %p10301_p10 = scmp.lt.s32.totalorder %s10299_s2, %s10295_s5 }
0x28b9   : > { %p10297_p7 = pnand %p10296_p4, %p10669_p5 }
0x28ba   : > { %p10302_p11 = por %p10301_p10, %p10300_p9 }
0x28bb   : > { %p10298_p8 = pneg %p10297_p7 }
0x28bd   : > { %p10303_p12 = pnand %p10302_p11, %p10298_p8 }
0x28bf   : > { %10306 = shalt.err (!%p10303_p12)
}
0x28c0   : > { %s10394_s13 = smov 128   ;;  %s10395_s12 = smov 8  }
0x28c1   : > { %10073 = dma.vmem_to_hbm [thread:$0]  (%p10669_p5), %s12497_s8, 384, %s12495_s9, %s12500_s3, %s10394_s13, %s10394_s13, %s10395_s12  }
0x28c2 PF: > { %p10079_p13 = scmp.ge.s32.totalorder %s10341_s15, 2  ;;  %s7991_s0 = sand.u32 1, %s10329_s7  }
0x28c3   : > { %s7992_s6 = scalar_lea.sflag [#allocation3], %s7991_s0 }
0x28c4   : > { %p10076_p0 = pnand %p10079_p13, %p10673_p6 }
0x28c6   : > { %p10077_p1 = pneg %p10076_p0 }
0x28c8   : > { %10324 = dma.done.wait (%p10077_p1), %s7992_s6, 384  }
0x28c9   : > { %10326 = vsyncadd (%p10077_p1), %s7992_s6, 4294966912  ;;  %p101_p2 = scmp.ge.s32.totalorder %s10656_s18, 4   ;;  %s12660_s7 = smov %s10333_s10 }
0x28ca   : > { %s12661_s10 = smov %s10337_s11  ;;  %s12662_s11 = smov %s10667_s26 }
0x28cb   : > { %s12663_s15 = smov %s10656_s18  ;;  %103 = sbr.rel (!%p101_p2) target bundleno = 86 (0x56), region = 321 }
0x28d0   :  { %7997 = vsyncpa [#allocation3], 1 }
0x28d1   :  { %7999 = vsyncpa [#allocation3 + $0x1], 1 }

</bundles_post_ra>
